<compile_context>
chip_gen: v7x
topology: tpu7x:2x2x1
jax: 0.10.0
libtpu: 0.0.40
codegen_flags: <defaults>
</compile_context>

<pallas_src>
import functools

import numpy as np
import jax
import jax.numpy as jnp
from jax.experimental import pallas as pl
from jax.experimental.pallas import tpu as pltpu

LEAKY_SLOPE = 0.02
BN_EPS = 1e-5
TM_TARGET = 512  # M-tile rows: ~2 MB bf16 x-tile at K=2048, well under scoped VMEM


def _rup(x, m):
    return ((x + m - 1) // m) * m


def _tile_m(m):
    """Choose M tile (multiple of 8) and padded M."""
    mp8 = _rup(m, 8)
    tm = min(TM_TARGET, mp8)
    return tm, _rup(mp8, tm)


# --------------------------------------------------------------------------
# Pallas kernels
# --------------------------------------------------------------------------
def _matmul_stats_kernel(x_ref, w_ref, b_ref, y_ref, s_ref, sq_ref):
    """y = x @ w + b (bf16 MXU, f32 acc); accumulate per-column sum/sumsq."""
    acc = jnp.dot(x_ref[...], w_ref[...],
                  preferred_element_type=jnp.float32) + b_ref[...]
    y_ref[...] = acc.astype(y_ref.dtype)

    part_s = jnp.sum(acc, axis=0, keepdims=True)
    part_sq = jnp.sum(acc * acc, axis=0, keepdims=True)

    @pl.when(pl.program_id(0) == 0)
    def _():
        s_ref[...] = jnp.zeros_like(s_ref)
        sq_ref[...] = jnp.zeros_like(sq_ref)

    s_ref[...] += part_s
    sq_ref[...] += part_sq


def _matmul_sigmoid_kernel(x_ref, w_ref, b_ref, y_ref):
    """y = sigmoid(x @ w + b) — final conv head (no BN), numerically stable."""
    acc = jnp.dot(x_ref[...], w_ref[...],
                  preferred_element_type=jnp.float32) + b_ref[...]
    z = jnp.exp(-jnp.abs(acc))
    y_ref[...] = jnp.where(acc >= 0.0, 1.0 / (1.0 + z), z / (1.0 + z))


def _bn_act_kernel(y_ref, scale_ref, shift_ref, o_ref):
    """o = leaky_relu(y * scale + shift)  (f32 math, bf16 in/out)."""
    y = y_ref[...].astype(jnp.float32) * scale_ref[...] + shift_ref[...]
    o_ref[...] = jnp.where(y >= 0.0, y, LEAKY_SLOPE * y).astype(o_ref.dtype)


def _bn_act_res_kernel(y_ref, scale_ref, shift_ref, res_ref, o_ref):
    """o = leaky_relu(y * scale + shift + res)."""
    y = (y_ref[...].astype(jnp.float32) * scale_ref[...] + shift_ref[...]
         + res_ref[...].astype(jnp.float32))
    o_ref[...] = jnp.where(y >= 0.0, y, LEAKY_SLOPE * y).astype(o_ref.dtype)


# --------------------------------------------------------------------------
# Pallas wrappers
# --------------------------------------------------------------------------
def pallas_matmul_stats(x, w, b):
    """x:(M,K) bf16, w:(K,N) bf16, b:(1,N) f32.

    Returns (y_pad:(Mp,N) bf16, mean:(N,), var:(N,)).
    Stats are over the M real rows (padded rows corrected analytically).
    """
    m, k = x.shape
    n = w.shape[1]
    tm, mp = _tile_m(m)
    if mp != m:
        x = jnp.pad(x, ((0, mp - m), (0, 0)))
    x = x.astype(jnp.bfloat16)

    y, s, sq = pl.pallas_call(
        _matmul_stats_kernel,
        out_shape=(
            jax.ShapeDtypeStruct((mp, n), jnp.bfloat16),
            jax.ShapeDtypeStruct((1, n), jnp.float32),
            jax.ShapeDtypeStruct((1, n), jnp.float32),
        ),
        grid=(mp // tm,),
        in_specs=[
            pl.BlockSpec((tm, k), lambda i: (i, 0)),
            pl.BlockSpec((k, n), lambda i: (0, 0)),
            pl.BlockSpec((1, n), lambda i: (0, 0)),
        ],
        out_specs=(
            pl.BlockSpec((tm, n), lambda i: (i, 0)),
            pl.BlockSpec((1, n), lambda i: (0, 0)),
            pl.BlockSpec((1, n), lambda i: (0, 0)),
        ),
        compiler_params=pltpu.CompilerParams(
            dimension_semantics=("arbitrary",)),
    )(x, w, b)

    # padded rows contribute exactly `b` per column: correct analytically.
    pad_rows = mp - m
    bvec = b[0].astype(jnp.float32)
    s_valid = s[0] - pad_rows * bvec
    sq_valid = sq[0] - pad_rows * bvec * bvec
    mean = s_valid / m
    var = jnp.maximum(sq_valid / m - mean * mean, 0.0)
    return y, mean, var


def pallas_matmul_sigmoid(x, w, b):
    """Final conv head: sigmoid fused into the matmul epilogue."""
    m, k = x.shape
    n = w.shape[1]
    tm, mp = _tile_m(m)
    if mp != m:
        x = jnp.pad(x, ((0, mp - m), (0, 0)))
    x = x.astype(jnp.bfloat16)

    y = pl.pallas_call(
        _matmul_sigmoid_kernel,
        out_shape=jax.ShapeDtypeStruct((mp, n), jnp.float32),
        grid=(mp // tm,),
        in_specs=[
            pl.BlockSpec((tm, k), lambda i: (i, 0)),
            pl.BlockSpec((k, n), lambda i: (0, 0)),
            pl.BlockSpec((1, n), lambda i: (0, 0)),
        ],
        out_specs=pl.BlockSpec((tm, n), lambda i: (i, 0)),
        compiler_params=pltpu.CompilerParams(
            dimension_semantics=("parallel",)),
    )(x, w, b)
    return y[:m]


def pallas_bn_act(y, scale, shift, res=None, m_valid=None):
    """y:(R,N) bf16; scale/shift:(N,) f32; res:(R,N) bf16 or None.

    Applies leaky_relu(y*scale + shift [+ res]); returns bf16 (m_valid, N).
    """
    r, n = y.shape
    tm, rp = _tile_m(r)
    if rp != r:
        y = jnp.pad(y, ((0, rp - r), (0, 0)))
    scale2 = scale.reshape(1, n).astype(jnp.float32)
    shift2 = shift.reshape(1, n).astype(jnp.float32)
    params = pltpu.CompilerParams(dimension_semantics=("parallel",))

    if res is None:
        out = pl.pallas_call(
            _bn_act_kernel,
            out_shape=jax.ShapeDtypeStruct((rp, n), jnp.bfloat16),
            grid=(rp // tm,),
            in_specs=[
                pl.BlockSpec((tm, n), lambda i: (i, 0)),
                pl.BlockSpec((1, n), lambda i: (0, 0)),
                pl.BlockSpec((1, n), lambda i: (0, 0)),
            ],
            out_specs=pl.BlockSpec((tm, n), lambda i: (i, 0)),
            compiler_params=params,
        )(y, scale2, shift2)
    else:
        if res.shape[0] < rp:
            res = jnp.pad(res, ((0, rp - res.shape[0]), (0, 0)))
        elif res.shape[0] > rp:
            res = res[:rp]
        res = res.astype(jnp.bfloat16)
        out = pl.pallas_call(
            _bn_act_res_kernel,
            out_shape=jax.ShapeDtypeStruct((rp, n), jnp.bfloat16),
            grid=(rp // tm,),
            in_specs=[
                pl.BlockSpec((tm, n), lambda i: (i, 0)),
                pl.BlockSpec((1, n), lambda i: (0, 0)),
                pl.BlockSpec((1, n), lambda i: (0, 0)),
                pl.BlockSpec((tm, n), lambda i: (i, 0)),
            ],
            out_specs=pl.BlockSpec((tm, n), lambda i: (i, 0)),
            compiler_params=params,
        )(y, scale2, shift2, res)

    if m_valid is not None and m_valid != rp:
        out = out[:m_valid]
    return out


# --------------------------------------------------------------------------
# Conv glue (im2col) + layers
# --------------------------------------------------------------------------
def _im2col(x, kh, kw, stride, pad):
    """x: NHWC (bf16) -> patches (N*Ho*Wo, kh*kw*C), column order (kh, kw, C)."""
    n, h, w, c = x.shape
    xp = jnp.pad(x, ((0, 0), (pad, pad), (pad, pad), (0, 0)))
    ho = (h + 2 * pad - kh) // stride + 1
    wo = (w + 2 * pad - kw) // stride + 1
    cols = []
    for i in range(kh):
        for j in range(kw):
            cols.append(
                xp[:, i:i + stride * (ho - 1) + 1:stride,
                      j:j + stride * (wo - 1) + 1:stride, :])
    patches = jnp.stack(cols, axis=3)              # (N, Ho, Wo, kh*kw, C)
    return patches.reshape(n * ho * wo, kh * kw * c), (n, ho, wo)


def _bn_scale_shift(bn, mean, var):
    scale = bn["gamma"] / jnp.sqrt(var + BN_EPS)
    shift = bn["beta"] - mean * scale
    return scale, shift


def conv_bn_lrelu(x, cp, bn, kh, kw, stride, pad):
    patches, (n, ho, wo) = _im2col(x, kh, kw, stride, pad)
    y_pad, mean, var = pallas_matmul_stats(patches, cp["wmat"], cp["b"])
    scale, shift = _bn_scale_shift(bn, mean, var)
    out = pallas_bn_act(y_pad, scale, shift, res=None, m_valid=n * ho * wo)
    return out.reshape(n, ho, wo, -1)


def resblock(x, p):
    """relu2(bn2(conv2(relu1(bn1(conv1(x))))) + scale(x)); skip fused into conv1."""
    cout = p["b_cat"].shape[1] // 2
    patches, (n, ho, wo) = _im2col(x, 3, 3, 1, 1)
    m = n * ho * wo

    # one matmul produces [conv1(x) | scale(x)] along N
    y_pad, mean, var = pallas_matmul_stats(patches, p["wmat_cat"], p["b_cat"])
    f_pre = y_pad[:, :cout]
    skip = y_pad[:, cout:]

    s1, sh1 = _bn_scale_shift(p["bn1"], mean[:cout], var[:cout])
    f = pallas_bn_act(f_pre, s1, sh1, res=None, m_valid=m).reshape(n, ho, wo, cout)

    patches2, _ = _im2col(f, 3, 3, 1, 1)
    y2_pad, m2, v2 = pallas_matmul_stats(patches2, p["wmat2"], p["b2"])
    s2, sh2 = _bn_scale_shift(p["bn2"], m2, v2)
    out = pallas_bn_act(y2_pad, s2, sh2, res=skip, m_valid=m)
    return out.reshape(n, ho, wo, cout)


def discriminator_forward(prep, completed, label, imsize):
    b = completed.shape[0]
    # label up-projection: (B,1) x (1,imsize^2) -> broadcast multiply-add (no MXU)
    lin_w = prep["linear"]["w"]                      # (imsize^2, 1)
    lin_b = prep["linear"]["b"]                      # (imsize^2,)
    up = label * lin_w[:, 0][None, :] + lin_b[None, :]
    up = up.reshape(b, 1, imsize, imsize)            # NCHW

    x = jnp.concatenate([completed, up], axis=1)      # (B,2,H,W) NCHW
    x = jnp.transpose(x, (0, 2, 3, 1)).astype(jnp.bfloat16)   # NHWC bf16

    x = conv_bn_lrelu(x, prep["conv1"], prep["bn1"], 4, 4, 2, 1)
    x = resblock(x, prep["res1"])
    x = conv_bn_lrelu(x, prep["conv2"], prep["bn2"], 4, 4, 2, 1)
    x = resblock(x, prep["res2"])
    x = conv_bn_lrelu(x, prep["conv3"], prep["bn3"], 4, 4, 2, 1)
    x = resblock(x, prep["res3"])

    patches, _ = _im2col(x, 4, 4, 2, 1)
    probs = pallas_matmul_sigmoid(patches, prep["final"]["wmat"], prep["final"]["b"])
    return probs.reshape(-1, 1)


# --------------------------------------------------------------------------
# Parameter setup: raw (PyTorch-layout) params + one-time prepared matrices
# --------------------------------------------------------------------------
def _spectral_normalize(w, key, n_iter=1):
    cout = w.shape[0]
    wm = w.reshape(cout, -1)
    u = jax.random.normal(key, (cout,), jnp.float32)
    u = u / (jnp.linalg.norm(u) + 1e-12)
    v = None
    for _ in range(n_iter):
        v = wm.T @ u
        v = v / (jnp.linalg.norm(v) + 1e-12)
        u = wm @ v
        u = u / (jnp.linalg.norm(u) + 1e-12)
    sigma = jnp.dot(u, wm @ v)
    return w / sigma


def _conv_params(key, cin, cout, k, spectral=True):
    k1, k2, k3 = jax.random.split(key, 3)
    w = jax.random.normal(k1, (cout, cin, k, k), jnp.float32) / np.sqrt(cin * k * k)
    b = 0.01 * jax.random.normal(k2, (cout,), jnp.float32)
    if spectral:
        w = _spectral_normalize(w, k3)
    return {"w": w, "b": b}


def _bn_params(key, c):
    k1, k2 = jax.random.split(key)
    return {"gamma": 1.0 + 0.1 * jax.random.normal(k1, (c,), jnp.float32),
            "beta": 0.1 * jax.random.normal(k2, (c,), jnp.float32)}


def _resblock_params(key, cin, cout):
    ks = jax.random.split(key, 5)
    return {
        "scale": _conv_params(ks[0], cin, cout, 1),
        "conv1": _conv_params(ks[1], cin, cout, 3),
        "bn1": _bn_params(ks[2], cout),
        "conv2": _conv_params(ks[3], cout, cout, 3),
        "bn2": _bn_params(ks[4], cout),
    }


def init_params(key, imsize):
    F = 32
    ks = jax.random.split(key, 12)
    lin_w = jax.random.normal(ks[0], (imsize * imsize, 1), jnp.float32)
    lin_b = 0.01 * jax.random.normal(ks[1], (imsize * imsize,), jnp.float32)
    return {
        "linear": {"w": lin_w, "b": lin_b},
        "conv1": _conv_params(ks[2], 2, F, 4),
        "bn1": _bn_params(ks[3], F),
        "res1": _resblock_params(ks[4], F, F),
        "conv2": _conv_params(ks[5], F, 2 * F, 4),
        "bn2": _bn_params(ks[6], 2 * F),
        "res2": _resblock_params(ks[7], 2 * F, 2 * F),
        "conv3": _conv_params(ks[8], 2 * F, 4 * F, 4),
        "bn3": _bn_params(ks[9], 4 * F),
        "res3": _resblock_params(ks[10], 4 * F, 4 * F),
        "final": _conv_params(ks[11], 4 * F, 1, 4),
    }


def _prep_conv(p):
    w, b = p["w"], p["b"]                       # (Cout, Cin, kh, kw) PyTorch layout
    cout, cin, kh, kw = w.shape
    wmat = jnp.transpose(w, (2, 3, 1, 0)).reshape(kh * kw * cin, cout)
    return {"wmat": wmat.astype(jnp.bfloat16),
            "b": b.reshape(1, cout).astype(jnp.float32)}


def _prep_bn(p):
    return {"gamma": p["gamma"].astype(jnp.float32),
            "beta": p["beta"].astype(jnp.float32)}


def _prep_resblock(p):
    c1w, c1b = p["conv1"]["w"], p["conv1"]["b"]
    scw, scb = p["scale"]["w"], p["scale"]["b"]
    cout, cin, kh, kw = c1w.shape               # 3x3
    w1 = jnp.transpose(c1w, (2, 3, 1, 0)).reshape(kh * kw * cin, cout)
    wsc = jnp.transpose(scw, (2, 3, 1, 0)).reshape(cin, cout)     # 1x1 conv
    center = (kh // 2) * kw + (kw // 2)         # center tap of the 3x3 window
    wskip = jnp.zeros((kh * kw * cin, cout), jnp.float32)
    wskip = wskip.at[center * cin:(center + 1) * cin, :].set(wsc)
    wcat = jnp.concatenate([w1, wskip], axis=1)                   # (9*cin, 2*cout)
    bcat = jnp.concatenate([c1b, scb]).reshape(1, 2 * cout)
    c2 = _prep_conv(p["conv2"])
    return {
        "wmat_cat": wcat.astype(jnp.bfloat16),
        "b_cat": bcat.astype(jnp.float32),
        "wmat2": c2["wmat"], "b2": c2["b"],
        "bn1": _prep_bn(p["bn1"]), "bn2": _prep_bn(p["bn2"]),
    }


def prepare_params(raw):
    return {
        "linear": {"w": raw["linear"]["w"].astype(jnp.float32),
                   "b": raw["linear"]["b"].astype(jnp.float32)},
        "conv1": _prep_conv(raw["conv1"]), "bn1": _prep_bn(raw["bn1"]),
        "res1": _prep_resblock(raw["res1"]),
        "conv2": _prep_conv(raw["conv2"]), "bn2": _prep_bn(raw["bn2"]),
        "res2": _prep_resblock(raw["res2"]),
        "conv3": _prep_conv(raw["conv3"]), "bn3": _prep_bn(raw["bn3"]),
        "res3": _prep_resblock(raw["res3"]),
        "final": _prep_conv(raw["final"]),
    }


if __name__ == "__main__":
    imsize = 16   # small imsize consistent with the module (default is 28)
    batch = 2
    key = jax.random.PRNGKey(0)
    pkey, dkey1, dkey2 = jax.random.split(key, 3)

    raw = init_params(pkey, imsize)
    prep = prepare_params(raw)

    completed = jax.random.normal(dkey1, (batch, 1, imsize, imsize), jnp.float32)
    label = jax.random.normal(dkey2, (batch, 1), jnp.float32)

    fwd = jax.jit(discriminator_forward, static_argnames=("imsize",))
    out = fwd(prep, completed, label, imsize=imsize)
    out = jax.block_until_ready(out)

    assert out.shape == (batch, 1)
    assert bool(jnp.all(jnp.isfinite(out)))
    assert bool(jnp.all((out >= 0.0) & (out <= 1.0)))
    print("KERNEL_OK")
</pallas_src>

<mosaic_0001>
module attributes {stable_mosaic.version = 11 : i64} {
  func.func @_matmul_stats_kernel(%arg0: i32, %arg1: memref<128x32xbf16, #tpu.memory_space<vmem>>, %arg2: memref<32x32xbf16, #tpu.memory_space<vmem>>, %arg3: memref<1x32xf32, #tpu.memory_space<vmem>>, %arg4: memref<128x32xbf16, #tpu.memory_space<vmem>>, %arg5: memref<1x32xf32, #tpu.memory_space<vmem>>, %arg6: memref<1x32xf32, #tpu.memory_space<vmem>>) attributes {dimension_semantics = [#tpu.dimension_semantics<arbitrary>], iteration_bounds = array<i64: 1>, scalar_prefetch = 0 : i64, scratch_operands = 0 : i64, tpu.core_type = #tpu.core_type<tc>, window_params = [{transform_indices = @transform_0, window_bounds = array<i64: 128, 32>}, {pipeline_mode = #tpu.pipeline_mode<synchronous>, transform_indices = @transform_1, window_bounds = array<i64: 32, 32>}, {pipeline_mode = #tpu.pipeline_mode<synchronous>, transform_indices = @transform_2, window_bounds = array<i64: 1, 32>}, {transform_indices = @transform_3, window_bounds = array<i64: 128, 32>}, {pipeline_mode = #tpu.pipeline_mode<synchronous>, transform_indices = @transform_4, window_bounds = array<i64: 1, 32>}, {pipeline_mode = #tpu.pipeline_mode<synchronous>, transform_indices = @transform_5, window_bounds = array<i64: 1, 32>}]} {
    %c0 = arith.constant 0 : index
    %c0_0 = arith.constant 0 : index
    %0 = vector.load %arg1[%c0, %c0_0] : memref<128x32xbf16, #tpu.memory_space<vmem>>, vector<128x32xbf16>
    %c0_1 = arith.constant 0 : index
    %c0_2 = arith.constant 0 : index
    %1 = vector.load %arg2[%c0_1, %c0_2] : memref<32x32xbf16, #tpu.memory_space<vmem>>, vector<32x32xbf16>
    %cst = arith.constant dense<0.000000e+00> : vector<128x32xf32>
    %2 = tpu.matmul %0, %1, %cst {dimension_numbers = #tpu.dot_dimension_numbers<[1], [0], [0], [1], [0, 0, 1, 1], [], []>} : vector<128x32xbf16>, vector<32x32xbf16>, vector<128x32xf32> -> vector<128x32xf32>
    %c0_3 = arith.constant 0 : index
    %c0_4 = arith.constant 0 : index
    %3 = vector.load %arg3[%c0_3, %c0_4] : memref<1x32xf32, #tpu.memory_space<vmem>>, vector<1x32xf32>
    %4 = vector.broadcast %3 : vector<1x32xf32> to vector<128x32xf32>
    %5 = arith.addf %2, %4 : vector<128x32xf32>
    %6 = arith.truncf %5 : vector<128x32xf32> to vector<128x32xbf16>
    %c0_5 = arith.constant 0 : index
    %c0_6 = arith.constant 0 : index
    %7 = vector.load %arg4[%c0_5, %c0_6] : memref<128x32xbf16, #tpu.memory_space<vmem>>, vector<128x32xbf16>
    tpu.vector_store %arg4[%c0_5, %c0_6], %6 {strides = array<i32>} : memref<128x32xbf16, #tpu.memory_space<vmem>>, vector<128x32xbf16>,
    %cst_7 = arith.constant dense<0.000000e+00> : vector<32xf32>
    %8 = vector.multi_reduction <add>, %5, %cst_7 [0] : vector<128x32xf32> to vector<32xf32>
    %9 = vector.shape_cast %8 : vector<32xf32> to vector<1x32xf32>
    %10 = arith.mulf %5, %5 : vector<128x32xf32>
    %cst_8 = arith.constant dense<0.000000e+00> : vector<32xf32>
    %11 = vector.multi_reduction <add>, %10, %cst_8 [0] : vector<128x32xf32> to vector<32xf32>
    %12 = vector.shape_cast %11 : vector<32xf32> to vector<1x32xf32>
    %c0_i32 = arith.constant 0 : i32
    %13 = arith.cmpi eq, %arg0, %c0_i32 : i32
    %14 = arith.extui %13 : i1 to i32
    %c0_i32_9 = arith.constant 0 : i32
    %15 = arith.cmpi ne, %14, %c0_i32_9 : i32
    scf.if %15 {
      %cst_18 = arith.constant 0.000000e+00 : f32
      %22 = vector.broadcast %cst_18 : f32 to vector<1x32xf32>
      %c0_19 = arith.constant 0 : index
      %c0_20 = arith.constant 0 : index
      %23 = vector.load %arg5[%c0_19, %c0_20] : memref<1x32xf32, #tpu.memory_space<vmem>>, vector<1x32xf32>
      tpu.vector_store %arg5[%c0_19, %c0_20], %22 {strides = array<i32>} : memref<1x32xf32, #tpu.memory_space<vmem>>, vector<1x32xf32>,
      %cst_21 = arith.constant 0.000000e+00 : f32
      %24 = vector.broadcast %cst_21 : f32 to vector<1x32xf32>
      %c0_22 = arith.constant 0 : index
      %c0_23 = arith.constant 0 : index
      %25 = vector.load %arg6[%c0_22, %c0_23] : memref<1x32xf32, #tpu.memory_space<vmem>>, vector<1x32xf32>
      tpu.vector_store %arg6[%c0_22, %c0_23], %24 {strides = array<i32>} : memref<1x32xf32, #tpu.memory_space<vmem>>, vector<1x32xf32>,
    } else {
    }
    %c0_10 = arith.constant 0 : index
    %c0_11 = arith.constant 0 : index
    %16 = vector.load %arg5[%c0_10, %c0_11] : memref<1x32xf32, #tpu.memory_space<vmem>>, vector<1x32xf32>
    %17 = arith.addf %16, %9 : vector<1x32xf32>
    %c0_12 = arith.constant 0 : index
    %c0_13 = arith.constant 0 : index
    %18 = vector.load %arg5[%c0_12, %c0_13] : memref<1x32xf32, #tpu.memory_space<vmem>>, vector<1x32xf32>
    tpu.vector_store %arg5[%c0_12, %c0_13], %17 {strides = array<i32>} : memref<1x32xf32, #tpu.memory_space<vmem>>, vector<1x32xf32>,
    %c0_14 = arith.constant 0 : index
    %c0_15 = arith.constant 0 : index
    %19 = vector.load %arg6[%c0_14, %c0_15] : memref<1x32xf32, #tpu.memory_space<vmem>>, vector<1x32xf32>
    %20 = arith.addf %19, %12 : vector<1x32xf32>
    %c0_16 = arith.constant 0 : index
    %c0_17 = arith.constant 0 : index
    %21 = vector.load %arg6[%c0_16, %c0_17] : memref<1x32xf32, #tpu.memory_space<vmem>>, vector<1x32xf32>
    tpu.vector_store %arg6[%c0_16, %c0_17], %20 {strides = array<i32>} : memref<1x32xf32, #tpu.memory_space<vmem>>, vector<1x32xf32>,
    return
  }
  func.func @transform_0(%arg0: i32) -> (i32, i32) {
    %c0_i32 = arith.constant 0 : i32
    %c0_i32_0 = arith.constant 0 : i32
    return %arg0, %c0_i32 : i32, i32
  }
  func.func @transform_1(%arg0: i32) -> (i32, i32) {
    %c0_i32 = arith.constant 0 : i32
    %c0_i32_0 = arith.constant 0 : i32
    %c0_i32_1 = arith.constant 0 : i32
    return %c0_i32, %c0_i32_0 : i32, i32
  }
  func.func @transform_2(%arg0: i32) -> (i32, i32) {
    %c0_i32 = arith.constant 0 : i32
    %c0_i32_0 = arith.constant 0 : i32
    %c0_i32_1 = arith.constant 0 : i32
    return %c0_i32, %c0_i32_0 : i32, i32
  }
  func.func @transform_3(%arg0: i32) -> (i32, i32) {
    %c0_i32 = arith.constant 0 : i32
    %c0_i32_0 = arith.constant 0 : i32
    return %arg0, %c0_i32 : i32, i32
  }
  func.func @transform_4(%arg0: i32) -> (i32, i32) {
    %c0_i32 = arith.constant 0 : i32
    %c0_i32_0 = arith.constant 0 : i32
    %c0_i32_1 = arith.constant 0 : i32
    return %c0_i32, %c0_i32_0 : i32, i32
  }
  func.func @transform_5(%arg0: i32) -> (i32, i32) {
    %c0_i32 = arith.constant 0 : i32
    %c0_i32_0 = arith.constant 0 : i32
    %c0_i32_1 = arith.constant 0 : i32
    return %c0_i32, %c0_i32_0 : i32, i32
  }
}

module attributes {stable_mosaic.version = 11 : i64} {
  func.func @_bn_act_kernel(%arg0: i32, %arg1: memref<128x32xbf16, #tpu.memory_space<vmem>>, %arg2: memref<1x32xf32, #tpu.memory_space<vmem>>, %arg3: memref<1x32xf32, #tpu.memory_space<vmem>>, %arg4: memref<128x32xbf16, #tpu.memory_space<vmem>>) attributes {dimension_semantics = [#tpu.dimension_semantics<parallel>], iteration_bounds = array<i64: 1>, scalar_prefetch = 0 : i64, scratch_operands = 0 : i64, tpu.core_type = #tpu.core_type<tc>, window_params = [{transform_indices = @transform_0, window_bounds = array<i64: 128, 32>}, {pipeline_mode = #tpu.pipeline_mode<synchronous>, transform_indices = @transform_1, window_bounds = array<i64: 1, 32>}, {pipeline_mode = #tpu.pipeline_mode<synchronous>, transform_indices = @transform_2, window_bounds = array<i64: 1, 32>}, {transform_indices = @transform_3, window_bounds = array<i64: 128, 32>}]} {
    %c0 = arith.constant 0 : index
    %c0_0 = arith.constant 0 : index
    %0 = vector.load %arg1[%c0, %c0_0] : memref<128x32xbf16, #tpu.memory_space<vmem>>, vector<128x32xbf16>
    %1 = arith.extf %0 : vector<128x32xbf16> to vector<128x32xf32>
    %c0_1 = arith.constant 0 : index
    %c0_2 = arith.constant 0 : index
    %2 = vector.load %arg2[%c0_1, %c0_2] : memref<1x32xf32, #tpu.memory_space<vmem>>, vector<1x32xf32>
    %3 = vector.broadcast %2 : vector<1x32xf32> to vector<128x32xf32>
    %4 = arith.mulf %1, %3 : vector<128x32xf32>
    %c0_3 = arith.constant 0 : index
    %c0_4 = arith.constant 0 : index
    %5 = vector.load %arg3[%c0_3, %c0_4] : memref<1x32xf32, #tpu.memory_space<vmem>>, vector<1x32xf32>
    %6 = vector.broadcast %5 : vector<1x32xf32> to vector<128x32xf32>
    %7 = arith.addf %4, %6 : vector<128x32xf32>
    %cst = arith.constant 0.000000e+00 : f32
    %8 = vector.broadcast %cst : f32 to vector<128x32xf32>
    %9 = arith.cmpf oge, %7, %8 : vector<128x32xf32>
    %cst_5 = arith.constant 2.000000e-02 : f32
    %10 = vector.broadcast %cst_5 : f32 to vector<128x32xf32>
    %11 = arith.mulf %10, %7 : vector<128x32xf32>
    %12 = arith.select %9, %7, %11 : vector<128x32xi1>, vector<128x32xf32>
    %13 = arith.truncf %12 : vector<128x32xf32> to vector<128x32xbf16>
    %c0_6 = arith.constant 0 : index
    %c0_7 = arith.constant 0 : index
    %14 = vector.load %arg4[%c0_6, %c0_7] : memref<128x32xbf16, #tpu.memory_space<vmem>>, vector<128x32xbf16>
    tpu.vector_store %arg4[%c0_6, %c0_7], %13 {strides = array<i32>} : memref<128x32xbf16, #tpu.memory_space<vmem>>, vector<128x32xbf16>,
    return
  }
  func.func @transform_0(%arg0: i32) -> (i32, i32) {
    %c0_i32 = arith.constant 0 : i32
    %c0_i32_0 = arith.constant 0 : i32
    return %arg0, %c0_i32 : i32, i32
  }
  func.func @transform_1(%arg0: i32) -> (i32, i32) {
    %c0_i32 = arith.constant 0 : i32
    %c0_i32_0 = arith.constant 0 : i32
    %c0_i32_1 = arith.constant 0 : i32
    return %c0_i32, %c0_i32_0 : i32, i32
  }
  func.func @transform_2(%arg0: i32) -> (i32, i32) {
    %c0_i32 = arith.constant 0 : i32
    %c0_i32_0 = arith.constant 0 : i32
    %c0_i32_1 = arith.constant 0 : i32
    return %c0_i32, %c0_i32_0 : i32, i32
  }
  func.func @transform_3(%arg0: i32) -> (i32, i32) {
    %c0_i32 = arith.constant 0 : i32
    %c0_i32_0 = arith.constant 0 : i32
    return %arg0, %c0_i32 : i32, i32
  }
}

module attributes {stable_mosaic.version = 11 : i64} {
  func.func @_matmul_stats_kernel(%arg0: i32, %arg1: memref<128x288xbf16, #tpu.memory_space<vmem>>, %arg2: memref<288x64xbf16, #tpu.memory_space<vmem>>, %arg3: memref<1x64xf32, #tpu.memory_space<vmem>>, %arg4: memref<128x64xbf16, #tpu.memory_space<vmem>>, %arg5: memref<1x64xf32, #tpu.memory_space<vmem>>, %arg6: memref<1x64xf32, #tpu.memory_space<vmem>>) attributes {dimension_semantics = [#tpu.dimension_semantics<arbitrary>], iteration_bounds = array<i64: 1>, scalar_prefetch = 0 : i64, scratch_operands = 0 : i64, tpu.core_type = #tpu.core_type<tc>, window_params = [{transform_indices = @transform_0, window_bounds = array<i64: 128, 288>}, {pipeline_mode = #tpu.pipeline_mode<synchronous>, transform_indices = @transform_1, window_bounds = array<i64: 288, 64>}, {pipeline_mode = #tpu.pipeline_mode<synchronous>, transform_indices = @transform_2, window_bounds = array<i64: 1, 64>}, {transform_indices = @transform_3, window_bounds = array<i64: 128, 64>}, {pipeline_mode = #tpu.pipeline_mode<synchronous>, transform_indices = @transform_4, window_bounds = array<i64: 1, 64>}, {pipeline_mode = #tpu.pipeline_mode<synchronous>, transform_indices = @transform_5, window_bounds = array<i64: 1, 64>}]} {
    %c0 = arith.constant 0 : index
    %c0_0 = arith.constant 0 : index
    %0 = vector.load %arg1[%c0, %c0_0] : memref<128x288xbf16, #tpu.memory_space<vmem>>, vector<128x288xbf16>
    %c0_1 = arith.constant 0 : index
    %c0_2 = arith.constant 0 : index
    %1 = vector.load %arg2[%c0_1, %c0_2] : memref<288x64xbf16, #tpu.memory_space<vmem>>, vector<288x64xbf16>
    %cst = arith.constant dense<0.000000e+00> : vector<128x64xf32>
    %2 = tpu.matmul %0, %1, %cst {dimension_numbers = #tpu.dot_dimension_numbers<[1], [0], [0], [1], [0, 0, 1, 1], [], []>} : vector<128x288xbf16>, vector<288x64xbf16>, vector<128x64xf32> -> vector<128x64xf32>
    %c0_3 = arith.constant 0 : index
    %c0_4 = arith.constant 0 : index
    %3 = vector.load %arg3[%c0_3, %c0_4] : memref<1x64xf32, #tpu.memory_space<vmem>>, vector<1x64xf32>
    %4 = vector.broadcast %3 : vector<1x64xf32> to vector<128x64xf32>
    %5 = arith.addf %2, %4 : vector<128x64xf32>
    %6 = arith.truncf %5 : vector<128x64xf32> to vector<128x64xbf16>
    %c0_5 = arith.constant 0 : index
    %c0_6 = arith.constant 0 : index
    %7 = vector.load %arg4[%c0_5, %c0_6] : memref<128x64xbf16, #tpu.memory_space<vmem>>, vector<128x64xbf16>
    tpu.vector_store %arg4[%c0_5, %c0_6], %6 {strides = array<i32>} : memref<128x64xbf16, #tpu.memory_space<vmem>>, vector<128x64xbf16>,
    %cst_7 = arith.constant dense<0.000000e+00> : vector<64xf32>
    %8 = vector.multi_reduction <add>, %5, %cst_7 [0] : vector<128x64xf32> to vector<64xf32>
    %9 = vector.shape_cast %8 : vector<64xf32> to vector<1x64xf32>
    %10 = arith.mulf %5, %5 : vector<128x64xf32>
    %cst_8 = arith.constant dense<0.000000e+00> : vector<64xf32>
    %11 = vector.multi_reduction <add>, %10, %cst_8 [0] : vector<128x64xf32> to vector<64xf32>
    %12 = vector.shape_cast %11 : vector<64xf32> to vector<1x64xf32>
    %c0_i32 = arith.constant 0 : i32
    %13 = arith.cmpi eq, %arg0, %c0_i32 : i32
    %14 = arith.extui %13 : i1 to i32
    %c0_i32_9 = arith.constant 0 : i32
    %15 = arith.cmpi ne, %14, %c0_i32_9 : i32
    scf.if %15 {
      %cst_18 = arith.constant 0.000000e+00 : f32
      %22 = vector.broadcast %cst_18 : f32 to vector<1x64xf32>
      %c0_19 = arith.constant 0 : index
      %c0_20 = arith.constant 0 : index
      %23 = vector.load %arg5[%c0_19, %c0_20] : memref<1x64xf32, #tpu.memory_space<vmem>>, vector<1x64xf32>
      tpu.vector_store %arg5[%c0_19, %c0_20], %22 {strides = array<i32>} : memref<1x64xf32, #tpu.memory_space<vmem>>, vector<1x64xf32>,
      %cst_21 = arith.constant 0.000000e+00 : f32
      %24 = vector.broadcast %cst_21 : f32 to vector<1x64xf32>
      %c0_22 = arith.constant 0 : index
      %c0_23 = arith.constant 0 : index
      %25 = vector.load %arg6[%c0_22, %c0_23] : memref<1x64xf32, #tpu.memory_space<vmem>>, vector<1x64xf32>
      tpu.vector_store %arg6[%c0_22, %c0_23], %24 {strides = array<i32>} : memref<1x64xf32, #tpu.memory_space<vmem>>, vector<1x64xf32>,
    } else {
    }
    %c0_10 = arith.constant 0 : index
    %c0_11 = arith.constant 0 : index
    %16 = vector.load %arg5[%c0_10, %c0_11] : memref<1x64xf32, #tpu.memory_space<vmem>>, vector<1x64xf32>
    %17 = arith.addf %16, %9 : vector<1x64xf32>
    %c0_12 = arith.constant 0 : index
    %c0_13 = arith.constant 0 : index
    %18 = vector.load %arg5[%c0_12, %c0_13] : memref<1x64xf32, #tpu.memory_space<vmem>>, vector<1x64xf32>
    tpu.vector_store %arg5[%c0_12, %c0_13], %17 {strides = array<i32>} : memref<1x64xf32, #tpu.memory_space<vmem>>, vector<1x64xf32>,
    %c0_14 = arith.constant 0 : index
    %c0_15 = arith.constant 0 : index
    %19 = vector.load %arg6[%c0_14, %c0_15] : memref<1x64xf32, #tpu.memory_space<vmem>>, vector<1x64xf32>
    %20 = arith.addf %19, %12 : vector<1x64xf32>
    %c0_16 = arith.constant 0 : index
    %c0_17 = arith.constant 0 : index
    %21 = vector.load %arg6[%c0_16, %c0_17] : memref<1x64xf32, #tpu.memory_space<vmem>>, vector<1x64xf32>
    tpu.vector_store %arg6[%c0_16, %c0_17], %20 {strides = array<i32>} : memref<1x64xf32, #tpu.memory_space<vmem>>, vector<1x64xf32>,
    return
  }
  func.func @transform_0(%arg0: i32) -> (i32, i32) {
    %c0_i32 = arith.constant 0 : i32
    %c0_i32_0 = arith.constant 0 : i32
    return %arg0, %c0_i32 : i32, i32
  }
  func.func @transform_1(%arg0: i32) -> (i32, i32) {
    %c0_i32 = arith.constant 0 : i32
    %c0_i32_0 = arith.constant 0 : i32
    %c0_i32_1 = arith.constant 0 : i32
    return %c0_i32, %c0_i32_0 : i32, i32
  }
  func.func @transform_2(%arg0: i32) -> (i32, i32) {
    %c0_i32 = arith.constant 0 : i32
    %c0_i32_0 = arith.constant 0 : i32
    %c0_i32_1 = arith.constant 0 : i32
    return %c0_i32, %c0_i32_0 : i32, i32
  }
  func.func @transform_3(%arg0: i32) -> (i32, i32) {
    %c0_i32 = arith.constant 0 : i32
    %c0_i32_0 = arith.constant 0 : i32
    return %arg0, %c0_i32 : i32, i32
  }
  func.func @transform_4(%arg0: i32) -> (i32, i32) {
    %c0_i32 = arith.constant 0 : i32
    %c0_i32_0 = arith.constant 0 : i32
    %c0_i32_1 = arith.constant 0 : i32
    return %c0_i32, %c0_i32_0 : i32, i32
  }
  func.func @transform_5(%arg0: i32) -> (i32, i32) {
    %c0_i32 = arith.constant 0 : i32
    %c0_i32_0 = arith.constant 0 : i32
    %c0_i32_1 = arith.constant 0 : i32
    return %c0_i32, %c0_i32_0 : i32, i32
  }
}

module attributes {stable_mosaic.version = 11 : i64} {
  func.func @_matmul_stats_kernel(%arg0: i32, %arg1: memref<128x288xbf16, #tpu.memory_space<vmem>>, %arg2: memref<288x32xbf16, #tpu.memory_space<vmem>>, %arg3: memref<1x32xf32, #tpu.memory_space<vmem>>, %arg4: memref<128x32xbf16, #tpu.memory_space<vmem>>, %arg5: memref<1x32xf32, #tpu.memory_space<vmem>>, %arg6: memref<1x32xf32, #tpu.memory_space<vmem>>) attributes {dimension_semantics = [#tpu.dimension_semantics<arbitrary>], iteration_bounds = array<i64: 1>, scalar_prefetch = 0 : i64, scratch_operands = 0 : i64, tpu.core_type = #tpu.core_type<tc>, window_params = [{transform_indices = @transform_0, window_bounds = array<i64: 128, 288>}, {pipeline_mode = #tpu.pipeline_mode<synchronous>, transform_indices = @transform_1, window_bounds = array<i64: 288, 32>}, {pipeline_mode = #tpu.pipeline_mode<synchronous>, transform_indices = @transform_2, window_bounds = array<i64: 1, 32>}, {transform_indices = @transform_3, window_bounds = array<i64: 128, 32>}, {pipeline_mode = #tpu.pipeline_mode<synchronous>, transform_indices = @transform_4, window_bounds = array<i64: 1, 32>}, {pipeline_mode = #tpu.pipeline_mode<synchronous>, transform_indices = @transform_5, window_bounds = array<i64: 1, 32>}]} {
    %c0 = arith.constant 0 : index
    %c0_0 = arith.constant 0 : index
    %0 = vector.load %arg1[%c0, %c0_0] : memref<128x288xbf16, #tpu.memory_space<vmem>>, vector<128x288xbf16>
    %c0_1 = arith.constant 0 : index
    %c0_2 = arith.constant 0 : index
    %1 = vector.load %arg2[%c0_1, %c0_2] : memref<288x32xbf16, #tpu.memory_space<vmem>>, vector<288x32xbf16>
    %cst = arith.constant dense<0.000000e+00> : vector<128x32xf32>
    %2 = tpu.matmul %0, %1, %cst {dimension_numbers = #tpu.dot_dimension_numbers<[1], [0], [0], [1], [0, 0, 1, 1], [], []>} : vector<128x288xbf16>, vector<288x32xbf16>, vector<128x32xf32> -> vector<128x32xf32>
    %c0_3 = arith.constant 0 : index
    %c0_4 = arith.constant 0 : index
    %3 = vector.load %arg3[%c0_3, %c0_4] : memref<1x32xf32, #tpu.memory_space<vmem>>, vector<1x32xf32>
    %4 = vector.broadcast %3 : vector<1x32xf32> to vector<128x32xf32>
    %5 = arith.addf %2, %4 : vector<128x32xf32>
    %6 = arith.truncf %5 : vector<128x32xf32> to vector<128x32xbf16>
    %c0_5 = arith.constant 0 : index
    %c0_6 = arith.constant 0 : index
    %7 = vector.load %arg4[%c0_5, %c0_6] : memref<128x32xbf16, #tpu.memory_space<vmem>>, vector<128x32xbf16>
    tpu.vector_store %arg4[%c0_5, %c0_6], %6 {strides = array<i32>} : memref<128x32xbf16, #tpu.memory_space<vmem>>, vector<128x32xbf16>,
    %cst_7 = arith.constant dense<0.000000e+00> : vector<32xf32>
    %8 = vector.multi_reduction <add>, %5, %cst_7 [0] : vector<128x32xf32> to vector<32xf32>
    %9 = vector.shape_cast %8 : vector<32xf32> to vector<1x32xf32>
    %10 = arith.mulf %5, %5 : vector<128x32xf32>
    %cst_8 = arith.constant dense<0.000000e+00> : vector<32xf32>
    %11 = vector.multi_reduction <add>, %10, %cst_8 [0] : vector<128x32xf32> to vector<32xf32>
    %12 = vector.shape_cast %11 : vector<32xf32> to vector<1x32xf32>
    %c0_i32 = arith.constant 0 : i32
    %13 = arith.cmpi eq, %arg0, %c0_i32 : i32
    %14 = arith.extui %13 : i1 to i32
    %c0_i32_9 = arith.constant 0 : i32
    %15 = arith.cmpi ne, %14, %c0_i32_9 : i32
    scf.if %15 {
      %cst_18 = arith.constant 0.000000e+00 : f32
      %22 = vector.broadcast %cst_18 : f32 to vector<1x32xf32>
      %c0_19 = arith.constant 0 : index
      %c0_20 = arith.constant 0 : index
      %23 = vector.load %arg5[%c0_19, %c0_20] : memref<1x32xf32, #tpu.memory_space<vmem>>, vector<1x32xf32>
      tpu.vector_store %arg5[%c0_19, %c0_20], %22 {strides = array<i32>} : memref<1x32xf32, #tpu.memory_space<vmem>>, vector<1x32xf32>,
      %cst_21 = arith.constant 0.000000e+00 : f32
      %24 = vector.broadcast %cst_21 : f32 to vector<1x32xf32>
      %c0_22 = arith.constant 0 : index
      %c0_23 = arith.constant 0 : index
      %25 = vector.load %arg6[%c0_22, %c0_23] : memref<1x32xf32, #tpu.memory_space<vmem>>, vector<1x32xf32>
      tpu.vector_store %arg6[%c0_22, %c0_23], %24 {strides = array<i32>} : memref<1x32xf32, #tpu.memory_space<vmem>>, vector<1x32xf32>,
    } else {
    }
    %c0_10 = arith.constant 0 : index
    %c0_11 = arith.constant 0 : index
    %16 = vector.load %arg5[%c0_10, %c0_11] : memref<1x32xf32, #tpu.memory_space<vmem>>, vector<1x32xf32>
    %17 = arith.addf %16, %9 : vector<1x32xf32>
    %c0_12 = arith.constant 0 : index
    %c0_13 = arith.constant 0 : index
    %18 = vector.load %arg5[%c0_12, %c0_13] : memref<1x32xf32, #tpu.memory_space<vmem>>, vector<1x32xf32>
    tpu.vector_store %arg5[%c0_12, %c0_13], %17 {strides = array<i32>} : memref<1x32xf32, #tpu.memory_space<vmem>>, vector<1x32xf32>,
    %c0_14 = arith.constant 0 : index
    %c0_15 = arith.constant 0 : index
    %19 = vector.load %arg6[%c0_14, %c0_15] : memref<1x32xf32, #tpu.memory_space<vmem>>, vector<1x32xf32>
    %20 = arith.addf %19, %12 : vector<1x32xf32>
    %c0_16 = arith.constant 0 : index
    %c0_17 = arith.constant 0 : index
    %21 = vector.load %arg6[%c0_16, %c0_17] : memref<1x32xf32, #tpu.memory_space<vmem>>, vector<1x32xf32>
    tpu.vector_store %arg6[%c0_16, %c0_17], %20 {strides = array<i32>} : memref<1x32xf32, #tpu.memory_space<vmem>>, vector<1x32xf32>,
    return
  }
  func.func @transform_0(%arg0: i32) -> (i32, i32) {
    %c0_i32 = arith.constant 0 : i32
    %c0_i32_0 = arith.constant 0 : i32
    return %arg0, %c0_i32 : i32, i32
  }
  func.func @transform_1(%arg0: i32) -> (i32, i32) {
    %c0_i32 = arith.constant 0 : i32
    %c0_i32_0 = arith.constant 0 : i32
    %c0_i32_1 = arith.constant 0 : i32
    return %c0_i32, %c0_i32_0 : i32, i32
  }
  func.func @transform_2(%arg0: i32) -> (i32, i32) {
    %c0_i32 = arith.constant 0 : i32
    %c0_i32_0 = arith.constant 0 : i32
    %c0_i32_1 = arith.constant 0 : i32
    return %c0_i32, %c0_i32_0 : i32, i32
  }
  func.func @transform_3(%arg0: i32) -> (i32, i32) {
    %c0_i32 = arith.constant 0 : i32
    %c0_i32_0 = arith.constant 0 : i32
    return %arg0, %c0_i32 : i32, i32
  }
  func.func @transform_4(%arg0: i32) -> (i32, i32) {
    %c0_i32 = arith.constant 0 : i32
    %c0_i32_0 = arith.constant 0 : i32
    %c0_i32_1 = arith.constant 0 : i32
    return %c0_i32, %c0_i32_0 : i32, i32
  }
  func.func @transform_5(%arg0: i32) -> (i32, i32) {
    %c0_i32 = arith.constant 0 : i32
    %c0_i32_0 = arith.constant 0 : i32
    %c0_i32_1 = arith.constant 0 : i32
    return %c0_i32, %c0_i32_0 : i32, i32
  }
}

module attributes {stable_mosaic.version = 11 : i64} {
  func.func @_bn_act_res_kernel(%arg0: i32, %arg1: memref<128x32xbf16, #tpu.memory_space<vmem>>, %arg2: memref<1x32xf32, #tpu.memory_space<vmem>>, %arg3: memref<1x32xf32, #tpu.memory_space<vmem>>, %arg4: memref<128x32xbf16, #tpu.memory_space<vmem>>, %arg5: memref<128x32xbf16, #tpu.memory_space<vmem>>) attributes {dimension_semantics = [#tpu.dimension_semantics<parallel>], iteration_bounds = array<i64: 1>, scalar_prefetch = 0 : i64, scratch_operands = 0 : i64, tpu.core_type = #tpu.core_type<tc>, window_params = [{transform_indices = @transform_0, window_bounds = array<i64: 128, 32>}, {pipeline_mode = #tpu.pipeline_mode<synchronous>, transform_indices = @transform_1, window_bounds = array<i64: 1, 32>}, {pipeline_mode = #tpu.pipeline_mode<synchronous>, transform_indices = @transform_2, window_bounds = array<i64: 1, 32>}, {transform_indices = @transform_3, window_bounds = array<i64: 128, 32>}, {transform_indices = @transform_4, window_bounds = array<i64: 128, 32>}]} {
    %c0 = arith.constant 0 : index
    %c0_0 = arith.constant 0 : index
    %0 = vector.load %arg1[%c0, %c0_0] : memref<128x32xbf16, #tpu.memory_space<vmem>>, vector<128x32xbf16>
    %1 = arith.extf %0 : vector<128x32xbf16> to vector<128x32xf32>
    %c0_1 = arith.constant 0 : index
    %c0_2 = arith.constant 0 : index
    %2 = vector.load %arg2[%c0_1, %c0_2] : memref<1x32xf32, #tpu.memory_space<vmem>>, vector<1x32xf32>
    %3 = vector.broadcast %2 : vector<1x32xf32> to vector<128x32xf32>
    %4 = arith.mulf %1, %3 : vector<128x32xf32>
    %c0_3 = arith.constant 0 : index
    %c0_4 = arith.constant 0 : index
    %5 = vector.load %arg3[%c0_3, %c0_4] : memref<1x32xf32, #tpu.memory_space<vmem>>, vector<1x32xf32>
    %6 = vector.broadcast %5 : vector<1x32xf32> to vector<128x32xf32>
    %7 = arith.addf %4, %6 : vector<128x32xf32>
    %c0_5 = arith.constant 0 : index
    %c0_6 = arith.constant 0 : index
    %8 = vector.load %arg4[%c0_5, %c0_6] : memref<128x32xbf16, #tpu.memory_space<vmem>>, vector<128x32xbf16>
    %9 = arith.extf %8 : vector<128x32xbf16> to vector<128x32xf32>
    %10 = arith.addf %7, %9 : vector<128x32xf32>
    %cst = arith.constant 0.000000e+00 : f32
    %11 = vector.broadcast %cst : f32 to vector<128x32xf32>
    %12 = arith.cmpf oge, %10, %11 : vector<128x32xf32>
    %cst_7 = arith.constant 2.000000e-02 : f32
    %13 = vector.broadcast %cst_7 : f32 to vector<128x32xf32>
    %14 = arith.mulf %13, %10 : vector<128x32xf32>
    %15 = arith.select %12, %10, %14 : vector<128x32xi1>, vector<128x32xf32>
    %16 = arith.truncf %15 : vector<128x32xf32> to vector<128x32xbf16>
    %c0_8 = arith.constant 0 : index
    %c0_9 = arith.constant 0 : index
    %17 = vector.load %arg5[%c0_8, %c0_9] : memref<128x32xbf16, #tpu.memory_space<vmem>>, vector<128x32xbf16>
    tpu.vector_store %arg5[%c0_8, %c0_9], %16 {strides = array<i32>} : memref<128x32xbf16, #tpu.memory_space<vmem>>, vector<128x32xbf16>,
    return
  }
  func.func @transform_0(%arg0: i32) -> (i32, i32) {
    %c0_i32 = arith.constant 0 : i32
    %c0_i32_0 = arith.constant 0 : i32
    return %arg0, %c0_i32 : i32, i32
  }
  func.func @transform_1(%arg0: i32) -> (i32, i32) {
    %c0_i32 = arith.constant 0 : i32
    %c0_i32_0 = arith.constant 0 : i32
    %c0_i32_1 = arith.constant 0 : i32
    return %c0_i32, %c0_i32_0 : i32, i32
  }
  func.func @transform_2(%arg0: i32) -> (i32, i32) {
    %c0_i32 = arith.constant 0 : i32
    %c0_i32_0 = arith.constant 0 : i32
    %c0_i32_1 = arith.constant 0 : i32
    return %c0_i32, %c0_i32_0 : i32, i32
  }
  func.func @transform_3(%arg0: i32) -> (i32, i32) {
    %c0_i32 = arith.constant 0 : i32
    %c0_i32_0 = arith.constant 0 : i32
    return %arg0, %c0_i32 : i32, i32
  }
  func.func @transform_4(%arg0: i32) -> (i32, i32) {
    %c0_i32 = arith.constant 0 : i32
    %c0_i32_0 = arith.constant 0 : i32
    return %arg0, %c0_i32 : i32, i32
  }
}

module attributes {stable_mosaic.version = 11 : i64} {
  func.func @_matmul_stats_kernel(%arg0: i32, %arg1: memref<32x512xbf16, #tpu.memory_space<vmem>>, %arg2: memref<512x64xbf16, #tpu.memory_space<vmem>>, %arg3: memref<1x64xf32, #tpu.memory_space<vmem>>, %arg4: memref<32x64xbf16, #tpu.memory_space<vmem>>, %arg5: memref<1x64xf32, #tpu.memory_space<vmem>>, %arg6: memref<1x64xf32, #tpu.memory_space<vmem>>) attributes {dimension_semantics = [#tpu.dimension_semantics<arbitrary>], iteration_bounds = array<i64: 1>, scalar_prefetch = 0 : i64, scratch_operands = 0 : i64, tpu.core_type = #tpu.core_type<tc>, window_params = [{transform_indices = @transform_0, window_bounds = array<i64: 32, 512>}, {pipeline_mode = #tpu.pipeline_mode<synchronous>, transform_indices = @transform_1, window_bounds = array<i64: 512, 64>}, {pipeline_mode = #tpu.pipeline_mode<synchronous>, transform_indices = @transform_2, window_bounds = array<i64: 1, 64>}, {transform_indices = @transform_3, window_bounds = array<i64: 32, 64>}, {pipeline_mode = #tpu.pipeline_mode<synchronous>, transform_indices = @transform_4, window_bounds = array<i64: 1, 64>}, {pipeline_mode = #tpu.pipeline_mode<synchronous>, transform_indices = @transform_5, window_bounds = array<i64: 1, 64>}]} {
    %c0 = arith.constant 0 : index
    %c0_0 = arith.constant 0 : index
    %0 = vector.load %arg1[%c0, %c0_0] : memref<32x512xbf16, #tpu.memory_space<vmem>>, vector<32x512xbf16>
    %c0_1 = arith.constant 0 : index
    %c0_2 = arith.constant 0 : index
    %1 = vector.load %arg2[%c0_1, %c0_2] : memref<512x64xbf16, #tpu.memory_space<vmem>>, vector<512x64xbf16>
    %cst = arith.constant dense<0.000000e+00> : vector<32x64xf32>
    %2 = tpu.matmul %0, %1, %cst {dimension_numbers = #tpu.dot_dimension_numbers<[1], [0], [0], [1], [0, 0, 1, 1], [], []>} : vector<32x512xbf16>, vector<512x64xbf16>, vector<32x64xf32> -> vector<32x64xf32>
    %c0_3 = arith.constant 0 : index
    %c0_4 = arith.constant 0 : index
    %3 = vector.load %arg3[%c0_3, %c0_4] : memref<1x64xf32, #tpu.memory_space<vmem>>, vector<1x64xf32>
    %4 = vector.broadcast %3 : vector<1x64xf32> to vector<32x64xf32>
    %5 = arith.addf %2, %4 : vector<32x64xf32>
    %6 = arith.truncf %5 : vector<32x64xf32> to vector<32x64xbf16>
    %c0_5 = arith.constant 0 : index
    %c0_6 = arith.constant 0 : index
    %7 = vector.load %arg4[%c0_5, %c0_6] : memref<32x64xbf16, #tpu.memory_space<vmem>>, vector<32x64xbf16>
    tpu.vector_store %arg4[%c0_5, %c0_6], %6 {strides = array<i32>} : memref<32x64xbf16, #tpu.memory_space<vmem>>, vector<32x64xbf16>,
    %cst_7 = arith.constant dense<0.000000e+00> : vector<64xf32>
    %8 = vector.multi_reduction <add>, %5, %cst_7 [0] : vector<32x64xf32> to vector<64xf32>
    %9 = vector.shape_cast %8 : vector<64xf32> to vector<1x64xf32>
    %10 = arith.mulf %5, %5 : vector<32x64xf32>
    %cst_8 = arith.constant dense<0.000000e+00> : vector<64xf32>
    %11 = vector.multi_reduction <add>, %10, %cst_8 [0] : vector<32x64xf32> to vector<64xf32>
    %12 = vector.shape_cast %11 : vector<64xf32> to vector<1x64xf32>
    %c0_i32 = arith.constant 0 : i32
    %13 = arith.cmpi eq, %arg0, %c0_i32 : i32
    %14 = arith.extui %13 : i1 to i32
    %c0_i32_9 = arith.constant 0 : i32
    %15 = arith.cmpi ne, %14, %c0_i32_9 : i32
    scf.if %15 {
      %cst_18 = arith.constant 0.000000e+00 : f32
      %22 = vector.broadcast %cst_18 : f32 to vector<1x64xf32>
      %c0_19 = arith.constant 0 : index
      %c0_20 = arith.constant 0 : index
      %23 = vector.load %arg5[%c0_19, %c0_20] : memref<1x64xf32, #tpu.memory_space<vmem>>, vector<1x64xf32>
      tpu.vector_store %arg5[%c0_19, %c0_20], %22 {strides = array<i32>} : memref<1x64xf32, #tpu.memory_space<vmem>>, vector<1x64xf32>,
      %cst_21 = arith.constant 0.000000e+00 : f32
      %24 = vector.broadcast %cst_21 : f32 to vector<1x64xf32>
      %c0_22 = arith.constant 0 : index
      %c0_23 = arith.constant 0 : index
      %25 = vector.load %arg6[%c0_22, %c0_23] : memref<1x64xf32, #tpu.memory_space<vmem>>, vector<1x64xf32>
      tpu.vector_store %arg6[%c0_22, %c0_23], %24 {strides = array<i32>} : memref<1x64xf32, #tpu.memory_space<vmem>>, vector<1x64xf32>,
    } else {
    }
    %c0_10 = arith.constant 0 : index
    %c0_11 = arith.constant 0 : index
    %16 = vector.load %arg5[%c0_10, %c0_11] : memref<1x64xf32, #tpu.memory_space<vmem>>, vector<1x64xf32>
    %17 = arith.addf %16, %9 : vector<1x64xf32>
    %c0_12 = arith.constant 0 : index
    %c0_13 = arith.constant 0 : index
    %18 = vector.load %arg5[%c0_12, %c0_13] : memref<1x64xf32, #tpu.memory_space<vmem>>, vector<1x64xf32>
    tpu.vector_store %arg5[%c0_12, %c0_13], %17 {strides = array<i32>} : memref<1x64xf32, #tpu.memory_space<vmem>>, vector<1x64xf32>,
    %c0_14 = arith.constant 0 : index
    %c0_15 = arith.constant 0 : index
    %19 = vector.load %arg6[%c0_14, %c0_15] : memref<1x64xf32, #tpu.memory_space<vmem>>, vector<1x64xf32>
    %20 = arith.addf %19, %12 : vector<1x64xf32>
    %c0_16 = arith.constant 0 : index
    %c0_17 = arith.constant 0 : index
    %21 = vector.load %arg6[%c0_16, %c0_17] : memref<1x64xf32, #tpu.memory_space<vmem>>, vector<1x64xf32>
    tpu.vector_store %arg6[%c0_16, %c0_17], %20 {strides = array<i32>} : memref<1x64xf32, #tpu.memory_space<vmem>>, vector<1x64xf32>,
    return
  }
  func.func @transform_0(%arg0: i32) -> (i32, i32) {
    %c0_i32 = arith.constant 0 : i32
    %c0_i32_0 = arith.constant 0 : i32
    return %arg0, %c0_i32 : i32, i32
  }
  func.func @transform_1(%arg0: i32) -> (i32, i32) {
    %c0_i32 = arith.constant 0 : i32
    %c0_i32_0 = arith.constant 0 : i32
    %c0_i32_1 = arith.constant 0 : i32
    return %c0_i32, %c0_i32_0 : i32, i32
  }
  func.func @transform_2(%arg0: i32) -> (i32, i32) {
    %c0_i32 = arith.constant 0 : i32
    %c0_i32_0 = arith.constant 0 : i32
    %c0_i32_1 = arith.constant 0 : i32
    return %c0_i32, %c0_i32_0 : i32, i32
  }
  func.func @transform_3(%arg0: i32) -> (i32, i32) {
    %c0_i32 = arith.constant 0 : i32
    %c0_i32_0 = arith.constant 0 : i32
    return %arg0, %c0_i32 : i32, i32
  }
  func.func @transform_4(%arg0: i32) -> (i32, i32) {
    %c0_i32 = arith.constant 0 : i32
    %c0_i32_0 = arith.constant 0 : i32
    %c0_i32_1 = arith.constant 0 : i32
    return %c0_i32, %c0_i32_0 : i32, i32
  }
  func.func @transform_5(%arg0: i32) -> (i32, i32) {
    %c0_i32 = arith.constant 0 : i32
    %c0_i32_0 = arith.constant 0 : i32
    %c0_i32_1 = arith.constant 0 : i32
    return %c0_i32, %c0_i32_0 : i32, i32
  }
}

module attributes {stable_mosaic.version = 11 : i64} {
  func.func @_bn_act_kernel(%arg0: i32, %arg1: memref<32x64xbf16, #tpu.memory_space<vmem>>, %arg2: memref<1x64xf32, #tpu.memory_space<vmem>>, %arg3: memref<1x64xf32, #tpu.memory_space<vmem>>, %arg4: memref<32x64xbf16, #tpu.memory_space<vmem>>) attributes {dimension_semantics = [#tpu.dimension_semantics<parallel>], iteration_bounds = array<i64: 1>, scalar_prefetch = 0 : i64, scratch_operands = 0 : i64, tpu.core_type = #tpu.core_type<tc>, window_params = [{transform_indices = @transform_0, window_bounds = array<i64: 32, 64>}, {pipeline_mode = #tpu.pipeline_mode<synchronous>, transform_indices = @transform_1, window_bounds = array<i64: 1, 64>}, {pipeline_mode = #tpu.pipeline_mode<synchronous>, transform_indices = @transform_2, window_bounds = array<i64: 1, 64>}, {transform_indices = @transform_3, window_bounds = array<i64: 32, 64>}]} {
    %c0 = arith.constant 0 : index
    %c0_0 = arith.constant 0 : index
    %0 = vector.load %arg1[%c0, %c0_0] : memref<32x64xbf16, #tpu.memory_space<vmem>>, vector<32x64xbf16>
    %1 = arith.extf %0 : vector<32x64xbf16> to vector<32x64xf32>
    %c0_1 = arith.constant 0 : index
    %c0_2 = arith.constant 0 : index
    %2 = vector.load %arg2[%c0_1, %c0_2] : memref<1x64xf32, #tpu.memory_space<vmem>>, vector<1x64xf32>
    %3 = vector.broadcast %2 : vector<1x64xf32> to vector<32x64xf32>
    %4 = arith.mulf %1, %3 : vector<32x64xf32>
    %c0_3 = arith.constant 0 : index
    %c0_4 = arith.constant 0 : index
    %5 = vector.load %arg3[%c0_3, %c0_4] : memref<1x64xf32, #tpu.memory_space<vmem>>, vector<1x64xf32>
    %6 = vector.broadcast %5 : vector<1x64xf32> to vector<32x64xf32>
    %7 = arith.addf %4, %6 : vector<32x64xf32>
    %cst = arith.constant 0.000000e+00 : f32
    %8 = vector.broadcast %cst : f32 to vector<32x64xf32>
    %9 = arith.cmpf oge, %7, %8 : vector<32x64xf32>
    %cst_5 = arith.constant 2.000000e-02 : f32
    %10 = vector.broadcast %cst_5 : f32 to vector<32x64xf32>
    %11 = arith.mulf %10, %7 : vector<32x64xf32>
    %12 = arith.select %9, %7, %11 : vector<32x64xi1>, vector<32x64xf32>
    %13 = arith.truncf %12 : vector<32x64xf32> to vector<32x64xbf16>
    %c0_6 = arith.constant 0 : index
    %c0_7 = arith.constant 0 : index
    %14 = vector.load %arg4[%c0_6, %c0_7] : memref<32x64xbf16, #tpu.memory_space<vmem>>, vector<32x64xbf16>
    tpu.vector_store %arg4[%c0_6, %c0_7], %13 {strides = array<i32>} : memref<32x64xbf16, #tpu.memory_space<vmem>>, vector<32x64xbf16>,
    return
  }
  func.func @transform_0(%arg0: i32) -> (i32, i32) {
    %c0_i32 = arith.constant 0 : i32
    %c0_i32_0 = arith.constant 0 : i32
    return %arg0, %c0_i32 : i32, i32
  }
  func.func @transform_1(%arg0: i32) -> (i32, i32) {
    %c0_i32 = arith.constant 0 : i32
    %c0_i32_0 = arith.constant 0 : i32
    %c0_i32_1 = arith.constant 0 : i32
    return %c0_i32, %c0_i32_0 : i32, i32
  }
  func.func @transform_2(%arg0: i32) -> (i32, i32) {
    %c0_i32 = arith.constant 0 : i32
    %c0_i32_0 = arith.constant 0 : i32
    %c0_i32_1 = arith.constant 0 : i32
    return %c0_i32, %c0_i32_0 : i32, i32
  }
  func.func @transform_3(%arg0: i32) -> (i32, i32) {
    %c0_i32 = arith.constant 0 : i32
    %c0_i32_0 = arith.constant 0 : i32
    return %arg0, %c0_i32 : i32, i32
  }
}

module attributes {stable_mosaic.version = 11 : i64} {
  func.func @_matmul_stats_kernel(%arg0: i32, %arg1: memref<32x576xbf16, #tpu.memory_space<vmem>>, %arg2: memref<576x128xbf16, #tpu.memory_space<vmem>>, %arg3: memref<1x128xf32, #tpu.memory_space<vmem>>, %arg4: memref<32x128xbf16, #tpu.memory_space<vmem>>, %arg5: memref<1x128xf32, #tpu.memory_space<vmem>>, %arg6: memref<1x128xf32, #tpu.memory_space<vmem>>) attributes {dimension_semantics = [#tpu.dimension_semantics<arbitrary>], iteration_bounds = array<i64: 1>, scalar_prefetch = 0 : i64, scratch_operands = 0 : i64, tpu.core_type = #tpu.core_type<tc>, window_params = [{transform_indices = @transform_0, window_bounds = array<i64: 32, 576>}, {pipeline_mode = #tpu.pipeline_mode<synchronous>, transform_indices = @transform_1, window_bounds = array<i64: 576, 128>}, {pipeline_mode = #tpu.pipeline_mode<synchronous>, transform_indices = @transform_2, window_bounds = array<i64: 1, 128>}, {transform_indices = @transform_3, window_bounds = array<i64: 32, 128>}, {pipeline_mode = #tpu.pipeline_mode<synchronous>, transform_indices = @transform_4, window_bounds = array<i64: 1, 128>}, {pipeline_mode = #tpu.pipeline_mode<synchronous>, transform_indices = @transform_5, window_bounds = array<i64: 1, 128>}]} {
    %c0 = arith.constant 0 : index
    %c0_0 = arith.constant 0 : index
    %0 = vector.load %arg1[%c0, %c0_0] : memref<32x576xbf16, #tpu.memory_space<vmem>>, vector<32x576xbf16>
    %c0_1 = arith.constant 0 : index
    %c0_2 = arith.constant 0 : index
    %1 = vector.load %arg2[%c0_1, %c0_2] : memref<576x128xbf16, #tpu.memory_space<vmem>>, vector<576x128xbf16>
    %cst = arith.constant dense<0.000000e+00> : vector<32x128xf32>
    %2 = tpu.matmul %0, %1, %cst {dimension_numbers = #tpu.dot_dimension_numbers<[1], [0], [0], [1], [0, 0, 1, 1], [], []>} : vector<32x576xbf16>, vector<576x128xbf16>, vector<32x128xf32> -> vector<32x128xf32>
    %c0_3 = arith.constant 0 : index
    %c0_4 = arith.constant 0 : index
    %3 = vector.load %arg3[%c0_3, %c0_4] : memref<1x128xf32, #tpu.memory_space<vmem>>, vector<1x128xf32>
    %4 = vector.broadcast %3 : vector<1x128xf32> to vector<32x128xf32>
    %5 = arith.addf %2, %4 : vector<32x128xf32>
    %6 = arith.truncf %5 : vector<32x128xf32> to vector<32x128xbf16>
    %c0_5 = arith.constant 0 : index
    %c0_6 = arith.constant 0 : index
    %7 = vector.load %arg4[%c0_5, %c0_6] : memref<32x128xbf16, #tpu.memory_space<vmem>>, vector<32x128xbf16>
    tpu.vector_store %arg4[%c0_5, %c0_6], %6 {strides = array<i32>} : memref<32x128xbf16, #tpu.memory_space<vmem>>, vector<32x128xbf16>,
    %cst_7 = arith.constant dense<0.000000e+00> : vector<128xf32>
    %8 = vector.multi_reduction <add>, %5, %cst_7 [0] : vector<32x128xf32> to vector<128xf32>
    %9 = vector.shape_cast %8 : vector<128xf32> to vector<1x128xf32>
    %10 = arith.mulf %5, %5 : vector<32x128xf32>
    %cst_8 = arith.constant dense<0.000000e+00> : vector<128xf32>
    %11 = vector.multi_reduction <add>, %10, %cst_8 [0] : vector<32x128xf32> to vector<128xf32>
    %12 = vector.shape_cast %11 : vector<128xf32> to vector<1x128xf32>
    %c0_i32 = arith.constant 0 : i32
    %13 = arith.cmpi eq, %arg0, %c0_i32 : i32
    %14 = arith.extui %13 : i1 to i32
    %c0_i32_9 = arith.constant 0 : i32
    %15 = arith.cmpi ne, %14, %c0_i32_9 : i32
    scf.if %15 {
      %cst_18 = arith.constant 0.000000e+00 : f32
      %22 = vector.broadcast %cst_18 : f32 to vector<1x128xf32>
      %c0_19 = arith.constant 0 : index
      %c0_20 = arith.constant 0 : index
      %23 = vector.load %arg5[%c0_19, %c0_20] : memref<1x128xf32, #tpu.memory_space<vmem>>, vector<1x128xf32>
      tpu.vector_store %arg5[%c0_19, %c0_20], %22 {strides = array<i32>} : memref<1x128xf32, #tpu.memory_space<vmem>>, vector<1x128xf32>,
      %cst_21 = arith.constant 0.000000e+00 : f32
      %24 = vector.broadcast %cst_21 : f32 to vector<1x128xf32>
      %c0_22 = arith.constant 0 : index
      %c0_23 = arith.constant 0 : index
      %25 = vector.load %arg6[%c0_22, %c0_23] : memref<1x128xf32, #tpu.memory_space<vmem>>, vector<1x128xf32>
      tpu.vector_store %arg6[%c0_22, %c0_23], %24 {strides = array<i32>} : memref<1x128xf32, #tpu.memory_space<vmem>>, vector<1x128xf32>,
    } else {
    }
    %c0_10 = arith.constant 0 : index
    %c0_11 = arith.constant 0 : index
    %16 = vector.load %arg5[%c0_10, %c0_11] : memref<1x128xf32, #tpu.memory_space<vmem>>, vector<1x128xf32>
    %17 = arith.addf %16, %9 : vector<1x128xf32>
    %c0_12 = arith.constant 0 : index
    %c0_13 = arith.constant 0 : index
    %18 = vector.load %arg5[%c0_12, %c0_13] : memref<1x128xf32, #tpu.memory_space<vmem>>, vector<1x128xf32>
    tpu.vector_store %arg5[%c0_12, %c0_13], %17 {strides = array<i32>} : memref<1x128xf32, #tpu.memory_space<vmem>>, vector<1x128xf32>,
    %c0_14 = arith.constant 0 : index
    %c0_15 = arith.constant 0 : index
    %19 = vector.load %arg6[%c0_14, %c0_15] : memref<1x128xf32, #tpu.memory_space<vmem>>, vector<1x128xf32>
    %20 = arith.addf %19, %12 : vector<1x128xf32>
    %c0_16 = arith.constant 0 : index
    %c0_17 = arith.constant 0 : index
    %21 = vector.load %arg6[%c0_16, %c0_17] : memref<1x128xf32, #tpu.memory_space<vmem>>, vector<1x128xf32>
    tpu.vector_store %arg6[%c0_16, %c0_17], %20 {strides = array<i32>} : memref<1x128xf32, #tpu.memory_space<vmem>>, vector<1x128xf32>,
    return
  }
  func.func @transform_0(%arg0: i32) -> (i32, i32) {
    %c0_i32 = arith.constant 0 : i32
    %c0_i32_0 = arith.constant 0 : i32
    return %arg0, %c0_i32 : i32, i32
  }
  func.func @transform_1(%arg0: i32) -> (i32, i32) {
    %c0_i32 = arith.constant 0 : i32
    %c0_i32_0 = arith.constant 0 : i32
    %c0_i32_1 = arith.constant 0 : i32
    return %c0_i32, %c0_i32_0 : i32, i32
  }
  func.func @transform_2(%arg0: i32) -> (i32, i32) {
    %c0_i32 = arith.constant 0 : i32
    %c0_i32_0 = arith.constant 0 : i32
    %c0_i32_1 = arith.constant 0 : i32
    return %c0_i32, %c0_i32_0 : i32, i32
  }
  func.func @transform_3(%arg0: i32) -> (i32, i32) {
    %c0_i32 = arith.constant 0 : i32
    %c0_i32_0 = arith.constant 0 : i32
    return %arg0, %c0_i32 : i32, i32
  }
  func.func @transform_4(%arg0: i32) -> (i32, i32) {
    %c0_i32 = arith.constant 0 : i32
    %c0_i32_0 = arith.constant 0 : i32
    %c0_i32_1 = arith.constant 0 : i32
    return %c0_i32, %c0_i32_0 : i32, i32
  }
  func.func @transform_5(%arg0: i32) -> (i32, i32) {
    %c0_i32 = arith.constant 0 : i32
    %c0_i32_0 = arith.constant 0 : i32
    %c0_i32_1 = arith.constant 0 : i32
    return %c0_i32, %c0_i32_0 : i32, i32
  }
}

module attributes {stable_mosaic.version = 11 : i64} {
  func.func @_matmul_stats_kernel(%arg0: i32, %arg1: memref<32x576xbf16, #tpu.memory_space<vmem>>, %arg2: memref<576x64xbf16, #tpu.memory_space<vmem>>, %arg3: memref<1x64xf32, #tpu.memory_space<vmem>>, %arg4: memref<32x64xbf16, #tpu.memory_space<vmem>>, %arg5: memref<1x64xf32, #tpu.memory_space<vmem>>, %arg6: memref<1x64xf32, #tpu.memory_space<vmem>>) attributes {dimension_semantics = [#tpu.dimension_semantics<arbitrary>], iteration_bounds = array<i64: 1>, scalar_prefetch = 0 : i64, scratch_operands = 0 : i64, tpu.core_type = #tpu.core_type<tc>, window_params = [{transform_indices = @transform_0, window_bounds = array<i64: 32, 576>}, {pipeline_mode = #tpu.pipeline_mode<synchronous>, transform_indices = @transform_1, window_bounds = array<i64: 576, 64>}, {pipeline_mode = #tpu.pipeline_mode<synchronous>, transform_indices = @transform_2, window_bounds = array<i64: 1, 64>}, {transform_indices = @transform_3, window_bounds = array<i64: 32, 64>}, {pipeline_mode = #tpu.pipeline_mode<synchronous>, transform_indices = @transform_4, window_bounds = array<i64: 1, 64>}, {pipeline_mode = #tpu.pipeline_mode<synchronous>, transform_indices = @transform_5, window_bounds = array<i64: 1, 64>}]} {
    %c0 = arith.constant 0 : index
    %c0_0 = arith.constant 0 : index
    %0 = vector.load %arg1[%c0, %c0_0] : memref<32x576xbf16, #tpu.memory_space<vmem>>, vector<32x576xbf16>
    %c0_1 = arith.constant 0 : index
    %c0_2 = arith.constant 0 : index
    %1 = vector.load %arg2[%c0_1, %c0_2] : memref<576x64xbf16, #tpu.memory_space<vmem>>, vector<576x64xbf16>
    %cst = arith.constant dense<0.000000e+00> : vector<32x64xf32>
    %2 = tpu.matmul %0, %1, %cst {dimension_numbers = #tpu.dot_dimension_numbers<[1], [0], [0], [1], [0, 0, 1, 1], [], []>} : vector<32x576xbf16>, vector<576x64xbf16>, vector<32x64xf32> -> vector<32x64xf32>
    %c0_3 = arith.constant 0 : index
    %c0_4 = arith.constant 0 : index
    %3 = vector.load %arg3[%c0_3, %c0_4] : memref<1x64xf32, #tpu.memory_space<vmem>>, vector<1x64xf32>
    %4 = vector.broadcast %3 : vector<1x64xf32> to vector<32x64xf32>
    %5 = arith.addf %2, %4 : vector<32x64xf32>
    %6 = arith.truncf %5 : vector<32x64xf32> to vector<32x64xbf16>
    %c0_5 = arith.constant 0 : index
    %c0_6 = arith.constant 0 : index
    %7 = vector.load %arg4[%c0_5, %c0_6] : memref<32x64xbf16, #tpu.memory_space<vmem>>, vector<32x64xbf16>
    tpu.vector_store %arg4[%c0_5, %c0_6], %6 {strides = array<i32>} : memref<32x64xbf16, #tpu.memory_space<vmem>>, vector<32x64xbf16>,
    %cst_7 = arith.constant dense<0.000000e+00> : vector<64xf32>
    %8 = vector.multi_reduction <add>, %5, %cst_7 [0] : vector<32x64xf32> to vector<64xf32>
    %9 = vector.shape_cast %8 : vector<64xf32> to vector<1x64xf32>
    %10 = arith.mulf %5, %5 : vector<32x64xf32>
    %cst_8 = arith.constant dense<0.000000e+00> : vector<64xf32>
    %11 = vector.multi_reduction <add>, %10, %cst_8 [0] : vector<32x64xf32> to vector<64xf32>
    %12 = vector.shape_cast %11 : vector<64xf32> to vector<1x64xf32>
    %c0_i32 = arith.constant 0 : i32
    %13 = arith.cmpi eq, %arg0, %c0_i32 : i32
    %14 = arith.extui %13 : i1 to i32
    %c0_i32_9 = arith.constant 0 : i32
    %15 = arith.cmpi ne, %14, %c0_i32_9 : i32
    scf.if %15 {
      %cst_18 = arith.constant 0.000000e+00 : f32
      %22 = vector.broadcast %cst_18 : f32 to vector<1x64xf32>
      %c0_19 = arith.constant 0 : index
      %c0_20 = arith.constant 0 : index
      %23 = vector.load %arg5[%c0_19, %c0_20] : memref<1x64xf32, #tpu.memory_space<vmem>>, vector<1x64xf32>
      tpu.vector_store %arg5[%c0_19, %c0_20], %22 {strides = array<i32>} : memref<1x64xf32, #tpu.memory_space<vmem>>, vector<1x64xf32>,
      %cst_21 = arith.constant 0.000000e+00 : f32
      %24 = vector.broadcast %cst_21 : f32 to vector<1x64xf32>
      %c0_22 = arith.constant 0 : index
      %c0_23 = arith.constant 0 : index
      %25 = vector.load %arg6[%c0_22, %c0_23] : memref<1x64xf32, #tpu.memory_space<vmem>>, vector<1x64xf32>
      tpu.vector_store %arg6[%c0_22, %c0_23], %24 {strides = array<i32>} : memref<1x64xf32, #tpu.memory_space<vmem>>, vector<1x64xf32>,
    } else {
    }
    %c0_10 = arith.constant 0 : index
    %c0_11 = arith.constant 0 : index
    %16 = vector.load %arg5[%c0_10, %c0_11] : memref<1x64xf32, #tpu.memory_space<vmem>>, vector<1x64xf32>
    %17 = arith.addf %16, %9 : vector<1x64xf32>
    %c0_12 = arith.constant 0 : index
    %c0_13 = arith.constant 0 : index
    %18 = vector.load %arg5[%c0_12, %c0_13] : memref<1x64xf32, #tpu.memory_space<vmem>>, vector<1x64xf32>
    tpu.vector_store %arg5[%c0_12, %c0_13], %17 {strides = array<i32>} : memref<1x64xf32, #tpu.memory_space<vmem>>, vector<1x64xf32>,
    %c0_14 = arith.constant 0 : index
    %c0_15 = arith.constant 0 : index
    %19 = vector.load %arg6[%c0_14, %c0_15] : memref<1x64xf32, #tpu.memory_space<vmem>>, vector<1x64xf32>
    %20 = arith.addf %19, %12 : vector<1x64xf32>
    %c0_16 = arith.constant 0 : index
    %c0_17 = arith.constant 0 : index
    %21 = vector.load %arg6[%c0_16, %c0_17] : memref<1x64xf32, #tpu.memory_space<vmem>>, vector<1x64xf32>
    tpu.vector_store %arg6[%c0_16, %c0_17], %20 {strides = array<i32>} : memref<1x64xf32, #tpu.memory_space<vmem>>, vector<1x64xf32>,
    return
  }
  func.func @transform_0(%arg0: i32) -> (i32, i32) {
    %c0_i32 = arith.constant 0 : i32
    %c0_i32_0 = arith.constant 0 : i32
    return %arg0, %c0_i32 : i32, i32
  }
  func.func @transform_1(%arg0: i32) -> (i32, i32) {
    %c0_i32 = arith.constant 0 : i32
    %c0_i32_0 = arith.constant 0 : i32
    %c0_i32_1 = arith.constant 0 : i32
    return %c0_i32, %c0_i32_0 : i32, i32
  }
  func.func @transform_2(%arg0: i32) -> (i32, i32) {
    %c0_i32 = arith.constant 0 : i32
    %c0_i32_0 = arith.constant 0 : i32
    %c0_i32_1 = arith.constant 0 : i32
    return %c0_i32, %c0_i32_0 : i32, i32
  }
  func.func @transform_3(%arg0: i32) -> (i32, i32) {
    %c0_i32 = arith.constant 0 : i32
    %c0_i32_0 = arith.constant 0 : i32
    return %arg0, %c0_i32 : i32, i32
  }
  func.func @transform_4(%arg0: i32) -> (i32, i32) {
    %c0_i32 = arith.constant 0 : i32
    %c0_i32_0 = arith.constant 0 : i32
    %c0_i32_1 = arith.constant 0 : i32
    return %c0_i32, %c0_i32_0 : i32, i32
  }
  func.func @transform_5(%arg0: i32) -> (i32, i32) {
    %c0_i32 = arith.constant 0 : i32
    %c0_i32_0 = arith.constant 0 : i32
    %c0_i32_1 = arith.constant 0 : i32
    return %c0_i32, %c0_i32_0 : i32, i32
  }
}

module attributes {stable_mosaic.version = 11 : i64} {
  func.func @_bn_act_res_kernel(%arg0: i32, %arg1: memref<32x64xbf16, #tpu.memory_space<vmem>>, %arg2: memref<1x64xf32, #tpu.memory_space<vmem>>, %arg3: memref<1x64xf32, #tpu.memory_space<vmem>>, %arg4: memref<32x64xbf16, #tpu.memory_space<vmem>>, %arg5: memref<32x64xbf16, #tpu.memory_space<vmem>>) attributes {dimension_semantics = [#tpu.dimension_semantics<parallel>], iteration_bounds = array<i64: 1>, scalar_prefetch = 0 : i64, scratch_operands = 0 : i64, tpu.core_type = #tpu.core_type<tc>, window_params = [{transform_indices = @transform_0, window_bounds = array<i64: 32, 64>}, {pipeline_mode = #tpu.pipeline_mode<synchronous>, transform_indices = @transform_1, window_bounds = array<i64: 1, 64>}, {pipeline_mode = #tpu.pipeline_mode<synchronous>, transform_indices = @transform_2, window_bounds = array<i64: 1, 64>}, {transform_indices = @transform_3, window_bounds = array<i64: 32, 64>}, {transform_indices = @transform_4, window_bounds = array<i64: 32, 64>}]} {
    %c0 = arith.constant 0 : index
    %c0_0 = arith.constant 0 : index
    %0 = vector.load %arg1[%c0, %c0_0] : memref<32x64xbf16, #tpu.memory_space<vmem>>, vector<32x64xbf16>
    %1 = arith.extf %0 : vector<32x64xbf16> to vector<32x64xf32>
    %c0_1 = arith.constant 0 : index
    %c0_2 = arith.constant 0 : index
    %2 = vector.load %arg2[%c0_1, %c0_2] : memref<1x64xf32, #tpu.memory_space<vmem>>, vector<1x64xf32>
    %3 = vector.broadcast %2 : vector<1x64xf32> to vector<32x64xf32>
    %4 = arith.mulf %1, %3 : vector<32x64xf32>
    %c0_3 = arith.constant 0 : index
    %c0_4 = arith.constant 0 : index
    %5 = vector.load %arg3[%c0_3, %c0_4] : memref<1x64xf32, #tpu.memory_space<vmem>>, vector<1x64xf32>
    %6 = vector.broadcast %5 : vector<1x64xf32> to vector<32x64xf32>
    %7 = arith.addf %4, %6 : vector<32x64xf32>
    %c0_5 = arith.constant 0 : index
    %c0_6 = arith.constant 0 : index
    %8 = vector.load %arg4[%c0_5, %c0_6] : memref<32x64xbf16, #tpu.memory_space<vmem>>, vector<32x64xbf16>
    %9 = arith.extf %8 : vector<32x64xbf16> to vector<32x64xf32>
    %10 = arith.addf %7, %9 : vector<32x64xf32>
    %cst = arith.constant 0.000000e+00 : f32
    %11 = vector.broadcast %cst : f32 to vector<32x64xf32>
    %12 = arith.cmpf oge, %10, %11 : vector<32x64xf32>
    %cst_7 = arith.constant 2.000000e-02 : f32
    %13 = vector.broadcast %cst_7 : f32 to vector<32x64xf32>
    %14 = arith.mulf %13, %10 : vector<32x64xf32>
    %15 = arith.select %12, %10, %14 : vector<32x64xi1>, vector<32x64xf32>
    %16 = arith.truncf %15 : vector<32x64xf32> to vector<32x64xbf16>
    %c0_8 = arith.constant 0 : index
    %c0_9 = arith.constant 0 : index
    %17 = vector.load %arg5[%c0_8, %c0_9] : memref<32x64xbf16, #tpu.memory_space<vmem>>, vector<32x64xbf16>
    tpu.vector_store %arg5[%c0_8, %c0_9], %16 {strides = array<i32>} : memref<32x64xbf16, #tpu.memory_space<vmem>>, vector<32x64xbf16>,
    return
  }
  func.func @transform_0(%arg0: i32) -> (i32, i32) {
    %c0_i32 = arith.constant 0 : i32
    %c0_i32_0 = arith.constant 0 : i32
    return %arg0, %c0_i32 : i32, i32
  }
  func.func @transform_1(%arg0: i32) -> (i32, i32) {
    %c0_i32 = arith.constant 0 : i32
    %c0_i32_0 = arith.constant 0 : i32
    %c0_i32_1 = arith.constant 0 : i32
    return %c0_i32, %c0_i32_0 : i32, i32
  }
  func.func @transform_2(%arg0: i32) -> (i32, i32) {
    %c0_i32 = arith.constant 0 : i32
    %c0_i32_0 = arith.constant 0 : i32
    %c0_i32_1 = arith.constant 0 : i32
    return %c0_i32, %c0_i32_0 : i32, i32
  }
  func.func @transform_3(%arg0: i32) -> (i32, i32) {
    %c0_i32 = arith.constant 0 : i32
    %c0_i32_0 = arith.constant 0 : i32
    return %arg0, %c0_i32 : i32, i32
  }
  func.func @transform_4(%arg0: i32) -> (i32, i32) {
    %c0_i32 = arith.constant 0 : i32
    %c0_i32_0 = arith.constant 0 : i32
    return %arg0, %c0_i32 : i32, i32
  }
}

module attributes {stable_mosaic.version = 11 : i64} {
  func.func @_matmul_stats_kernel(%arg0: i32, %arg1: memref<8x1024xbf16, #tpu.memory_space<vmem>>, %arg2: memref<1024x128xbf16, #tpu.memory_space<vmem>>, %arg3: memref<1x128xf32, #tpu.memory_space<vmem>>, %arg4: memref<8x128xbf16, #tpu.memory_space<vmem>>, %arg5: memref<1x128xf32, #tpu.memory_space<vmem>>, %arg6: memref<1x128xf32, #tpu.memory_space<vmem>>) attributes {dimension_semantics = [#tpu.dimension_semantics<arbitrary>], iteration_bounds = array<i64: 1>, scalar_prefetch = 0 : i64, scratch_operands = 0 : i64, tpu.core_type = #tpu.core_type<tc>, window_params = [{transform_indices = @transform_0, window_bounds = array<i64: 8, 1024>}, {pipeline_mode = #tpu.pipeline_mode<synchronous>, transform_indices = @transform_1, window_bounds = array<i64: 1024, 128>}, {pipeline_mode = #tpu.pipeline_mode<synchronous>, transform_indices = @transform_2, window_bounds = array<i64: 1, 128>}, {transform_indices = @transform_3, window_bounds = array<i64: 8, 128>}, {pipeline_mode = #tpu.pipeline_mode<synchronous>, transform_indices = @transform_4, window_bounds = array<i64: 1, 128>}, {pipeline_mode = #tpu.pipeline_mode<synchronous>, transform_indices = @transform_5, window_bounds = array<i64: 1, 128>}]} {
    %c0 = arith.constant 0 : index
    %c0_0 = arith.constant 0 : index
    %0 = vector.load %arg1[%c0, %c0_0] : memref<8x1024xbf16, #tpu.memory_space<vmem>>, vector<8x1024xbf16>
    %c0_1 = arith.constant 0 : index
    %c0_2 = arith.constant 0 : index
    %1 = vector.load %arg2[%c0_1, %c0_2] : memref<1024x128xbf16, #tpu.memory_space<vmem>>, vector<1024x128xbf16>
    %cst = arith.constant dense<0.000000e+00> : vector<8x128xf32>
    %2 = tpu.matmul %0, %1, %cst {dimension_numbers = #tpu.dot_dimension_numbers<[1], [0], [0], [1], [0, 0, 1, 1], [], []>} : vector<8x1024xbf16>, vector<1024x128xbf16>, vector<8x128xf32> -> vector<8x128xf32>
    %c0_3 = arith.constant 0 : index
    %c0_4 = arith.constant 0 : index
    %3 = vector.load %arg3[%c0_3, %c0_4] : memref<1x128xf32, #tpu.memory_space<vmem>>, vector<1x128xf32>
    %4 = vector.broadcast %3 : vector<1x128xf32> to vector<8x128xf32>
    %5 = arith.addf %2, %4 : vector<8x128xf32>
    %6 = arith.truncf %5 : vector<8x128xf32> to vector<8x128xbf16>
    %c0_5 = arith.constant 0 : index
    %c0_6 = arith.constant 0 : index
    %7 = vector.load %arg4[%c0_5, %c0_6] : memref<8x128xbf16, #tpu.memory_space<vmem>>, vector<8x128xbf16>
    tpu.vector_store %arg4[%c0_5, %c0_6], %6 {strides = array<i32>} : memref<8x128xbf16, #tpu.memory_space<vmem>>, vector<8x128xbf16>,
    %cst_7 = arith.constant dense<0.000000e+00> : vector<128xf32>
    %8 = vector.multi_reduction <add>, %5, %cst_7 [0] : vector<8x128xf32> to vector<128xf32>
    %9 = vector.shape_cast %8 : vector<128xf32> to vector<1x128xf32>
    %10 = arith.mulf %5, %5 : vector<8x128xf32>
    %cst_8 = arith.constant dense<0.000000e+00> : vector<128xf32>
    %11 = vector.multi_reduction <add>, %10, %cst_8 [0] : vector<8x128xf32> to vector<128xf32>
    %12 = vector.shape_cast %11 : vector<128xf32> to vector<1x128xf32>
    %c0_i32 = arith.constant 0 : i32
    %13 = arith.cmpi eq, %arg0, %c0_i32 : i32
    %14 = arith.extui %13 : i1 to i32
    %c0_i32_9 = arith.constant 0 : i32
    %15 = arith.cmpi ne, %14, %c0_i32_9 : i32
    scf.if %15 {
      %cst_18 = arith.constant 0.000000e+00 : f32
      %22 = vector.broadcast %cst_18 : f32 to vector<1x128xf32>
      %c0_19 = arith.constant 0 : index
      %c0_20 = arith.constant 0 : index
      %23 = vector.load %arg5[%c0_19, %c0_20] : memref<1x128xf32, #tpu.memory_space<vmem>>, vector<1x128xf32>
      tpu.vector_store %arg5[%c0_19, %c0_20], %22 {strides = array<i32>} : memref<1x128xf32, #tpu.memory_space<vmem>>, vector<1x128xf32>,
      %cst_21 = arith.constant 0.000000e+00 : f32
      %24 = vector.broadcast %cst_21 : f32 to vector<1x128xf32>
      %c0_22 = arith.constant 0 : index
      %c0_23 = arith.constant 0 : index
      %25 = vector.load %arg6[%c0_22, %c0_23] : memref<1x128xf32, #tpu.memory_space<vmem>>, vector<1x128xf32>
      tpu.vector_store %arg6[%c0_22, %c0_23], %24 {strides = array<i32>} : memref<1x128xf32, #tpu.memory_space<vmem>>, vector<1x128xf32>,
    } else {
    }
    %c0_10 = arith.constant 0 : index
    %c0_11 = arith.constant 0 : index
    %16 = vector.load %arg5[%c0_10, %c0_11] : memref<1x128xf32, #tpu.memory_space<vmem>>, vector<1x128xf32>
    %17 = arith.addf %16, %9 : vector<1x128xf32>
    %c0_12 = arith.constant 0 : index
    %c0_13 = arith.constant 0 : index
    %18 = vector.load %arg5[%c0_12, %c0_13] : memref<1x128xf32, #tpu.memory_space<vmem>>, vector<1x128xf32>
    tpu.vector_store %arg5[%c0_12, %c0_13], %17 {strides = array<i32>} : memref<1x128xf32, #tpu.memory_space<vmem>>, vector<1x128xf32>,
    %c0_14 = arith.constant 0 : index
    %c0_15 = arith.constant 0 : index
    %19 = vector.load %arg6[%c0_14, %c0_15] : memref<1x128xf32, #tpu.memory_space<vmem>>, vector<1x128xf32>
    %20 = arith.addf %19, %12 : vector<1x128xf32>
    %c0_16 = arith.constant 0 : index
    %c0_17 = arith.constant 0 : index
    %21 = vector.load %arg6[%c0_16, %c0_17] : memref<1x128xf32, #tpu.memory_space<vmem>>, vector<1x128xf32>
    tpu.vector_store %arg6[%c0_16, %c0_17], %20 {strides = array<i32>} : memref<1x128xf32, #tpu.memory_space<vmem>>, vector<1x128xf32>,
    return
  }
  func.func @transform_0(%arg0: i32) -> (i32, i32) {
    %c0_i32 = arith.constant 0 : i32
    %c0_i32_0 = arith.constant 0 : i32
    return %arg0, %c0_i32 : i32, i32
  }
  func.func @transform_1(%arg0: i32) -> (i32, i32) {
    %c0_i32 = arith.constant 0 : i32
    %c0_i32_0 = arith.constant 0 : i32
    %c0_i32_1 = arith.constant 0 : i32
    return %c0_i32, %c0_i32_0 : i32, i32
  }
  func.func @transform_2(%arg0: i32) -> (i32, i32) {
    %c0_i32 = arith.constant 0 : i32
    %c0_i32_0 = arith.constant 0 : i32
    %c0_i32_1 = arith.constant 0 : i32
    return %c0_i32, %c0_i32_0 : i32, i32
  }
  func.func @transform_3(%arg0: i32) -> (i32, i32) {
    %c0_i32 = arith.constant 0 : i32
    %c0_i32_0 = arith.constant 0 : i32
    return %arg0, %c0_i32 : i32, i32
  }
  func.func @transform_4(%arg0: i32) -> (i32, i32) {
    %c0_i32 = arith.constant 0 : i32
    %c0_i32_0 = arith.constant 0 : i32
    %c0_i32_1 = arith.constant 0 : i32
    return %c0_i32, %c0_i32_0 : i32, i32
  }
  func.func @transform_5(%arg0: i32) -> (i32, i32) {
    %c0_i32 = arith.constant 0 : i32
    %c0_i32_0 = arith.constant 0 : i32
    %c0_i32_1 = arith.constant 0 : i32
    return %c0_i32, %c0_i32_0 : i32, i32
  }
}

module attributes {stable_mosaic.version = 11 : i64} {
  func.func @_bn_act_kernel(%arg0: i32, %arg1: memref<8x128xbf16, #tpu.memory_space<vmem>>, %arg2: memref<1x128xf32, #tpu.memory_space<vmem>>, %arg3: memref<1x128xf32, #tpu.memory_space<vmem>>, %arg4: memref<8x128xbf16, #tpu.memory_space<vmem>>) attributes {dimension_semantics = [#tpu.dimension_semantics<parallel>], iteration_bounds = array<i64: 1>, scalar_prefetch = 0 : i64, scratch_operands = 0 : i64, tpu.core_type = #tpu.core_type<tc>, window_params = [{transform_indices = @transform_0, window_bounds = array<i64: 8, 128>}, {pipeline_mode = #tpu.pipeline_mode<synchronous>, transform_indices = @transform_1, window_bounds = array<i64: 1, 128>}, {pipeline_mode = #tpu.pipeline_mode<synchronous>, transform_indices = @transform_2, window_bounds = array<i64: 1, 128>}, {transform_indices = @transform_3, window_bounds = array<i64: 8, 128>}]} {
    %c0 = arith.constant 0 : index
    %c0_0 = arith.constant 0 : index
    %0 = vector.load %arg1[%c0, %c0_0] : memref<8x128xbf16, #tpu.memory_space<vmem>>, vector<8x128xbf16>
    %1 = arith.extf %0 : vector<8x128xbf16> to vector<8x128xf32>
    %c0_1 = arith.constant 0 : index
    %c0_2 = arith.constant 0 : index
    %2 = vector.load %arg2[%c0_1, %c0_2] : memref<1x128xf32, #tpu.memory_space<vmem>>, vector<1x128xf32>
    %3 = vector.broadcast %2 : vector<1x128xf32> to vector<8x128xf32>
    %4 = arith.mulf %1, %3 : vector<8x128xf32>
    %c0_3 = arith.constant 0 : index
    %c0_4 = arith.constant 0 : index
    %5 = vector.load %arg3[%c0_3, %c0_4] : memref<1x128xf32, #tpu.memory_space<vmem>>, vector<1x128xf32>
    %6 = vector.broadcast %5 : vector<1x128xf32> to vector<8x128xf32>
    %7 = arith.addf %4, %6 : vector<8x128xf32>
    %cst = arith.constant 0.000000e+00 : f32
    %8 = vector.broadcast %cst : f32 to vector<8x128xf32>
    %9 = arith.cmpf oge, %7, %8 : vector<8x128xf32>
    %cst_5 = arith.constant 2.000000e-02 : f32
    %10 = vector.broadcast %cst_5 : f32 to vector<8x128xf32>
    %11 = arith.mulf %10, %7 : vector<8x128xf32>
    %12 = arith.select %9, %7, %11 : vector<8x128xi1>, vector<8x128xf32>
    %13 = arith.truncf %12 : vector<8x128xf32> to vector<8x128xbf16>
    %c0_6 = arith.constant 0 : index
    %c0_7 = arith.constant 0 : index
    %14 = vector.load %arg4[%c0_6, %c0_7] : memref<8x128xbf16, #tpu.memory_space<vmem>>, vector<8x128xbf16>
    tpu.vector_store %arg4[%c0_6, %c0_7], %13 {strides = array<i32>} : memref<8x128xbf16, #tpu.memory_space<vmem>>, vector<8x128xbf16>,
    return
  }
  func.func @transform_0(%arg0: i32) -> (i32, i32) {
    %c0_i32 = arith.constant 0 : i32
    %c0_i32_0 = arith.constant 0 : i32
    return %arg0, %c0_i32 : i32, i32
  }
  func.func @transform_1(%arg0: i32) -> (i32, i32) {
    %c0_i32 = arith.constant 0 : i32
    %c0_i32_0 = arith.constant 0 : i32
    %c0_i32_1 = arith.constant 0 : i32
    return %c0_i32, %c0_i32_0 : i32, i32
  }
  func.func @transform_2(%arg0: i32) -> (i32, i32) {
    %c0_i32 = arith.constant 0 : i32
    %c0_i32_0 = arith.constant 0 : i32
    %c0_i32_1 = arith.constant 0 : i32
    return %c0_i32, %c0_i32_0 : i32, i32
  }
  func.func @transform_3(%arg0: i32) -> (i32, i32) {
    %c0_i32 = arith.constant 0 : i32
    %c0_i32_0 = arith.constant 0 : i32
    return %arg0, %c0_i32 : i32, i32
  }
}

module attributes {stable_mosaic.version = 11 : i64} {
  func.func @_matmul_stats_kernel(%arg0: i32, %arg1: memref<8x1152xbf16, #tpu.memory_space<vmem>>, %arg2: memref<1152x256xbf16, #tpu.memory_space<vmem>>, %arg3: memref<1x256xf32, #tpu.memory_space<vmem>>, %arg4: memref<8x256xbf16, #tpu.memory_space<vmem>>, %arg5: memref<1x256xf32, #tpu.memory_space<vmem>>, %arg6: memref<1x256xf32, #tpu.memory_space<vmem>>) attributes {dimension_semantics = [#tpu.dimension_semantics<arbitrary>], iteration_bounds = array<i64: 1>, scalar_prefetch = 0 : i64, scratch_operands = 0 : i64, tpu.core_type = #tpu.core_type<tc>, window_params = [{transform_indices = @transform_0, window_bounds = array<i64: 8, 1152>}, {pipeline_mode = #tpu.pipeline_mode<synchronous>, transform_indices = @transform_1, window_bounds = array<i64: 1152, 256>}, {pipeline_mode = #tpu.pipeline_mode<synchronous>, transform_indices = @transform_2, window_bounds = array<i64: 1, 256>}, {transform_indices = @transform_3, window_bounds = array<i64: 8, 256>}, {pipeline_mode = #tpu.pipeline_mode<synchronous>, transform_indices = @transform_4, window_bounds = array<i64: 1, 256>}, {pipeline_mode = #tpu.pipeline_mode<synchronous>, transform_indices = @transform_5, window_bounds = array<i64: 1, 256>}]} {
    %c0 = arith.constant 0 : index
    %c0_0 = arith.constant 0 : index
    %0 = vector.load %arg1[%c0, %c0_0] : memref<8x1152xbf16, #tpu.memory_space<vmem>>, vector<8x1152xbf16>
    %c0_1 = arith.constant 0 : index
    %c0_2 = arith.constant 0 : index
    %1 = vector.load %arg2[%c0_1, %c0_2] : memref<1152x256xbf16, #tpu.memory_space<vmem>>, vector<1152x256xbf16>
    %cst = arith.constant dense<0.000000e+00> : vector<8x256xf32>
    %2 = tpu.matmul %0, %1, %cst {dimension_numbers = #tpu.dot_dimension_numbers<[1], [0], [0], [1], [0, 0, 1, 1], [], []>} : vector<8x1152xbf16>, vector<1152x256xbf16>, vector<8x256xf32> -> vector<8x256xf32>
    %c0_3 = arith.constant 0 : index
    %c0_4 = arith.constant 0 : index
    %3 = vector.load %arg3[%c0_3, %c0_4] : memref<1x256xf32, #tpu.memory_space<vmem>>, vector<1x256xf32>
    %4 = vector.broadcast %3 : vector<1x256xf32> to vector<8x256xf32>
    %5 = arith.addf %2, %4 : vector<8x256xf32>
    %6 = arith.truncf %5 : vector<8x256xf32> to vector<8x256xbf16>
    %c0_5 = arith.constant 0 : index
    %c0_6 = arith.constant 0 : index
    %7 = vector.load %arg4[%c0_5, %c0_6] : memref<8x256xbf16, #tpu.memory_space<vmem>>, vector<8x256xbf16>
    tpu.vector_store %arg4[%c0_5, %c0_6], %6 {strides = array<i32>} : memref<8x256xbf16, #tpu.memory_space<vmem>>, vector<8x256xbf16>,
    %cst_7 = arith.constant dense<0.000000e+00> : vector<256xf32>
    %8 = vector.multi_reduction <add>, %5, %cst_7 [0] : vector<8x256xf32> to vector<256xf32>
    %9 = vector.shape_cast %8 : vector<256xf32> to vector<1x256xf32>
    %10 = arith.mulf %5, %5 : vector<8x256xf32>
    %cst_8 = arith.constant dense<0.000000e+00> : vector<256xf32>
    %11 = vector.multi_reduction <add>, %10, %cst_8 [0] : vector<8x256xf32> to vector<256xf32>
    %12 = vector.shape_cast %11 : vector<256xf32> to vector<1x256xf32>
    %c0_i32 = arith.constant 0 : i32
    %13 = arith.cmpi eq, %arg0, %c0_i32 : i32
    %14 = arith.extui %13 : i1 to i32
    %c0_i32_9 = arith.constant 0 : i32
    %15 = arith.cmpi ne, %14, %c0_i32_9 : i32
    scf.if %15 {
      %cst_18 = arith.constant 0.000000e+00 : f32
      %22 = vector.broadcast %cst_18 : f32 to vector<1x256xf32>
      %c0_19 = arith.constant 0 : index
      %c0_20 = arith.constant 0 : index
      %23 = vector.load %arg5[%c0_19, %c0_20] : memref<1x256xf32, #tpu.memory_space<vmem>>, vector<1x256xf32>
      tpu.vector_store %arg5[%c0_19, %c0_20], %22 {strides = array<i32>} : memref<1x256xf32, #tpu.memory_space<vmem>>, vector<1x256xf32>,
      %cst_21 = arith.constant 0.000000e+00 : f32
      %24 = vector.broadcast %cst_21 : f32 to vector<1x256xf32>
      %c0_22 = arith.constant 0 : index
      %c0_23 = arith.constant 0 : index
      %25 = vector.load %arg6[%c0_22, %c0_23] : memref<1x256xf32, #tpu.memory_space<vmem>>, vector<1x256xf32>
      tpu.vector_store %arg6[%c0_22, %c0_23], %24 {strides = array<i32>} : memref<1x256xf32, #tpu.memory_space<vmem>>, vector<1x256xf32>,
    } else {
    }
    %c0_10 = arith.constant 0 : index
    %c0_11 = arith.constant 0 : index
    %16 = vector.load %arg5[%c0_10, %c0_11] : memref<1x256xf32, #tpu.memory_space<vmem>>, vector<1x256xf32>
    %17 = arith.addf %16, %9 : vector<1x256xf32>
    %c0_12 = arith.constant 0 : index
    %c0_13 = arith.constant 0 : index
    %18 = vector.load %arg5[%c0_12, %c0_13] : memref<1x256xf32, #tpu.memory_space<vmem>>, vector<1x256xf32>
    tpu.vector_store %arg5[%c0_12, %c0_13], %17 {strides = array<i32>} : memref<1x256xf32, #tpu.memory_space<vmem>>, vector<1x256xf32>,
    %c0_14 = arith.constant 0 : index
    %c0_15 = arith.constant 0 : index
    %19 = vector.load %arg6[%c0_14, %c0_15] : memref<1x256xf32, #tpu.memory_space<vmem>>, vector<1x256xf32>
    %20 = arith.addf %19, %12 : vector<1x256xf32>
    %c0_16 = arith.constant 0 : index
    %c0_17 = arith.constant 0 : index
    %21 = vector.load %arg6[%c0_16, %c0_17] : memref<1x256xf32, #tpu.memory_space<vmem>>, vector<1x256xf32>
    tpu.vector_store %arg6[%c0_16, %c0_17], %20 {strides = array<i32>} : memref<1x256xf32, #tpu.memory_space<vmem>>, vector<1x256xf32>,
    return
  }
  func.func @transform_0(%arg0: i32) -> (i32, i32) {
    %c0_i32 = arith.constant 0 : i32
    %c0_i32_0 = arith.constant 0 : i32
    return %arg0, %c0_i32 : i32, i32
  }
  func.func @transform_1(%arg0: i32) -> (i32, i32) {
    %c0_i32 = arith.constant 0 : i32
    %c0_i32_0 = arith.constant 0 : i32
    %c0_i32_1 = arith.constant 0 : i32
    return %c0_i32, %c0_i32_0 : i32, i32
  }
  func.func @transform_2(%arg0: i32) -> (i32, i32) {
    %c0_i32 = arith.constant 0 : i32
    %c0_i32_0 = arith.constant 0 : i32
    %c0_i32_1 = arith.constant 0 : i32
    return %c0_i32, %c0_i32_0 : i32, i32
  }
  func.func @transform_3(%arg0: i32) -> (i32, i32) {
    %c0_i32 = arith.constant 0 : i32
    %c0_i32_0 = arith.constant 0 : i32
    return %arg0, %c0_i32 : i32, i32
  }
  func.func @transform_4(%arg0: i32) -> (i32, i32) {
    %c0_i32 = arith.constant 0 : i32
    %c0_i32_0 = arith.constant 0 : i32
    %c0_i32_1 = arith.constant 0 : i32
    return %c0_i32, %c0_i32_0 : i32, i32
  }
  func.func @transform_5(%arg0: i32) -> (i32, i32) {
    %c0_i32 = arith.constant 0 : i32
    %c0_i32_0 = arith.constant 0 : i32
    %c0_i32_1 = arith.constant 0 : i32
    return %c0_i32, %c0_i32_0 : i32, i32
  }
}

module attributes {stable_mosaic.version = 11 : i64} {
  func.func @_matmul_stats_kernel(%arg0: i32, %arg1: memref<8x1152xbf16, #tpu.memory_space<vmem>>, %arg2: memref<1152x128xbf16, #tpu.memory_space<vmem>>, %arg3: memref<1x128xf32, #tpu.memory_space<vmem>>, %arg4: memref<8x128xbf16, #tpu.memory_space<vmem>>, %arg5: memref<1x128xf32, #tpu.memory_space<vmem>>, %arg6: memref<1x128xf32, #tpu.memory_space<vmem>>) attributes {dimension_semantics = [#tpu.dimension_semantics<arbitrary>], iteration_bounds = array<i64: 1>, scalar_prefetch = 0 : i64, scratch_operands = 0 : i64, tpu.core_type = #tpu.core_type<tc>, window_params = [{transform_indices = @transform_0, window_bounds = array<i64: 8, 1152>}, {pipeline_mode = #tpu.pipeline_mode<synchronous>, transform_indices = @transform_1, window_bounds = array<i64: 1152, 128>}, {pipeline_mode = #tpu.pipeline_mode<synchronous>, transform_indices = @transform_2, window_bounds = array<i64: 1, 128>}, {transform_indices = @transform_3, window_bounds = array<i64: 8, 128>}, {pipeline_mode = #tpu.pipeline_mode<synchronous>, transform_indices = @transform_4, window_bounds = array<i64: 1, 128>}, {pipeline_mode = #tpu.pipeline_mode<synchronous>, transform_indices = @transform_5, window_bounds = array<i64: 1, 128>}]} {
    %c0 = arith.constant 0 : index
    %c0_0 = arith.constant 0 : index
    %0 = vector.load %arg1[%c0, %c0_0] : memref<8x1152xbf16, #tpu.memory_space<vmem>>, vector<8x1152xbf16>
    %c0_1 = arith.constant 0 : index
    %c0_2 = arith.constant 0 : index
    %1 = vector.load %arg2[%c0_1, %c0_2] : memref<1152x128xbf16, #tpu.memory_space<vmem>>, vector<1152x128xbf16>
    %cst = arith.constant dense<0.000000e+00> : vector<8x128xf32>
    %2 = tpu.matmul %0, %1, %cst {dimension_numbers = #tpu.dot_dimension_numbers<[1], [0], [0], [1], [0, 0, 1, 1], [], []>} : vector<8x1152xbf16>, vector<1152x128xbf16>, vector<8x128xf32> -> vector<8x128xf32>
    %c0_3 = arith.constant 0 : index
    %c0_4 = arith.constant 0 : index
    %3 = vector.load %arg3[%c0_3, %c0_4] : memref<1x128xf32, #tpu.memory_space<vmem>>, vector<1x128xf32>
    %4 = vector.broadcast %3 : vector<1x128xf32> to vector<8x128xf32>
    %5 = arith.addf %2, %4 : vector<8x128xf32>
    %6 = arith.truncf %5 : vector<8x128xf32> to vector<8x128xbf16>
    %c0_5 = arith.constant 0 : index
    %c0_6 = arith.constant 0 : index
    %7 = vector.load %arg4[%c0_5, %c0_6] : memref<8x128xbf16, #tpu.memory_space<vmem>>, vector<8x128xbf16>
    tpu.vector_store %arg4[%c0_5, %c0_6], %6 {strides = array<i32>} : memref<8x128xbf16, #tpu.memory_space<vmem>>, vector<8x128xbf16>,
    %cst_7 = arith.constant dense<0.000000e+00> : vector<128xf32>
    %8 = vector.multi_reduction <add>, %5, %cst_7 [0] : vector<8x128xf32> to vector<128xf32>
    %9 = vector.shape_cast %8 : vector<128xf32> to vector<1x128xf32>
    %10 = arith.mulf %5, %5 : vector<8x128xf32>
    %cst_8 = arith.constant dense<0.000000e+00> : vector<128xf32>
    %11 = vector.multi_reduction <add>, %10, %cst_8 [0] : vector<8x128xf32> to vector<128xf32>
    %12 = vector.shape_cast %11 : vector<128xf32> to vector<1x128xf32>
    %c0_i32 = arith.constant 0 : i32
    %13 = arith.cmpi eq, %arg0, %c0_i32 : i32
    %14 = arith.extui %13 : i1 to i32
    %c0_i32_9 = arith.constant 0 : i32
    %15 = arith.cmpi ne, %14, %c0_i32_9 : i32
    scf.if %15 {
      %cst_18 = arith.constant 0.000000e+00 : f32
      %22 = vector.broadcast %cst_18 : f32 to vector<1x128xf32>
      %c0_19 = arith.constant 0 : index
      %c0_20 = arith.constant 0 : index
      %23 = vector.load %arg5[%c0_19, %c0_20] : memref<1x128xf32, #tpu.memory_space<vmem>>, vector<1x128xf32>
      tpu.vector_store %arg5[%c0_19, %c0_20], %22 {strides = array<i32>} : memref<1x128xf32, #tpu.memory_space<vmem>>, vector<1x128xf32>,
      %cst_21 = arith.constant 0.000000e+00 : f32
      %24 = vector.broadcast %cst_21 : f32 to vector<1x128xf32>
      %c0_22 = arith.constant 0 : index
      %c0_23 = arith.constant 0 : index
      %25 = vector.load %arg6[%c0_22, %c0_23] : memref<1x128xf32, #tpu.memory_space<vmem>>, vector<1x128xf32>
      tpu.vector_store %arg6[%c0_22, %c0_23], %24 {strides = array<i32>} : memref<1x128xf32, #tpu.memory_space<vmem>>, vector<1x128xf32>,
    } else {
    }
    %c0_10 = arith.constant 0 : index
    %c0_11 = arith.constant 0 : index
    %16 = vector.load %arg5[%c0_10, %c0_11] : memref<1x128xf32, #tpu.memory_space<vmem>>, vector<1x128xf32>
    %17 = arith.addf %16, %9 : vector<1x128xf32>
    %c0_12 = arith.constant 0 : index
    %c0_13 = arith.constant 0 : index
    %18 = vector.load %arg5[%c0_12, %c0_13] : memref<1x128xf32, #tpu.memory_space<vmem>>, vector<1x128xf32>
    tpu.vector_store %arg5[%c0_12, %c0_13], %17 {strides = array<i32>} : memref<1x128xf32, #tpu.memory_space<vmem>>, vector<1x128xf32>,
    %c0_14 = arith.constant 0 : index
    %c0_15 = arith.constant 0 : index
    %19 = vector.load %arg6[%c0_14, %c0_15] : memref<1x128xf32, #tpu.memory_space<vmem>>, vector<1x128xf32>
    %20 = arith.addf %19, %12 : vector<1x128xf32>
    %c0_16 = arith.constant 0 : index
    %c0_17 = arith.constant 0 : index
    %21 = vector.load %arg6[%c0_16, %c0_17] : memref<1x128xf32, #tpu.memory_space<vmem>>, vector<1x128xf32>
    tpu.vector_store %arg6[%c0_16, %c0_17], %20 {strides = array<i32>} : memref<1x128xf32, #tpu.memory_space<vmem>>, vector<1x128xf32>,
    return
  }
  func.func @transform_0(%arg0: i32) -> (i32, i32) {
    %c0_i32 = arith.constant 0 : i32
    %c0_i32_0 = arith.constant 0 : i32
    return %arg0, %c0_i32 : i32, i32
  }
  func.func @transform_1(%arg0: i32) -> (i32, i32) {
    %c0_i32 = arith.constant 0 : i32
    %c0_i32_0 = arith.constant 0 : i32
    %c0_i32_1 = arith.constant 0 : i32
    return %c0_i32, %c0_i32_0 : i32, i32
  }
  func.func @transform_2(%arg0: i32) -> (i32, i32) {
    %c0_i32 = arith.constant 0 : i32
    %c0_i32_0 = arith.constant 0 : i32
    %c0_i32_1 = arith.constant 0 : i32
    return %c0_i32, %c0_i32_0 : i32, i32
  }
  func.func @transform_3(%arg0: i32) -> (i32, i32) {
    %c0_i32 = arith.constant 0 : i32
    %c0_i32_0 = arith.constant 0 : i32
    return %arg0, %c0_i32 : i32, i32
  }
  func.func @transform_4(%arg0: i32) -> (i32, i32) {
    %c0_i32 = arith.constant 0 : i32
    %c0_i32_0 = arith.constant 0 : i32
    %c0_i32_1 = arith.constant 0 : i32
    return %c0_i32, %c0_i32_0 : i32, i32
  }
  func.func @transform_5(%arg0: i32) -> (i32, i32) {
    %c0_i32 = arith.constant 0 : i32
    %c0_i32_0 = arith.constant 0 : i32
    %c0_i32_1 = arith.constant 0 : i32
    return %c0_i32, %c0_i32_0 : i32, i32
  }
}

module attributes {stable_mosaic.version = 11 : i64} {
  func.func @_bn_act_res_kernel(%arg0: i32, %arg1: memref<8x128xbf16, #tpu.memory_space<vmem>>, %arg2: memref<1x128xf32, #tpu.memory_space<vmem>>, %arg3: memref<1x128xf32, #tpu.memory_space<vmem>>, %arg4: memref<8x128xbf16, #tpu.memory_space<vmem>>, %arg5: memref<8x128xbf16, #tpu.memory_space<vmem>>) attributes {dimension_semantics = [#tpu.dimension_semantics<parallel>], iteration_bounds = array<i64: 1>, scalar_prefetch = 0 : i64, scratch_operands = 0 : i64, tpu.core_type = #tpu.core_type<tc>, window_params = [{transform_indices = @transform_0, window_bounds = array<i64: 8, 128>}, {pipeline_mode = #tpu.pipeline_mode<synchronous>, transform_indices = @transform_1, window_bounds = array<i64: 1, 128>}, {pipeline_mode = #tpu.pipeline_mode<synchronous>, transform_indices = @transform_2, window_bounds = array<i64: 1, 128>}, {transform_indices = @transform_3, window_bounds = array<i64: 8, 128>}, {transform_indices = @transform_4, window_bounds = array<i64: 8, 128>}]} {
    %c0 = arith.constant 0 : index
    %c0_0 = arith.constant 0 : index
    %0 = vector.load %arg1[%c0, %c0_0] : memref<8x128xbf16, #tpu.memory_space<vmem>>, vector<8x128xbf16>
    %1 = arith.extf %0 : vector<8x128xbf16> to vector<8x128xf32>
    %c0_1 = arith.constant 0 : index
    %c0_2 = arith.constant 0 : index
    %2 = vector.load %arg2[%c0_1, %c0_2] : memref<1x128xf32, #tpu.memory_space<vmem>>, vector<1x128xf32>
    %3 = vector.broadcast %2 : vector<1x128xf32> to vector<8x128xf32>
    %4 = arith.mulf %1, %3 : vector<8x128xf32>
    %c0_3 = arith.constant 0 : index
    %c0_4 = arith.constant 0 : index
    %5 = vector.load %arg3[%c0_3, %c0_4] : memref<1x128xf32, #tpu.memory_space<vmem>>, vector<1x128xf32>
    %6 = vector.broadcast %5 : vector<1x128xf32> to vector<8x128xf32>
    %7 = arith.addf %4, %6 : vector<8x128xf32>
    %c0_5 = arith.constant 0 : index
    %c0_6 = arith.constant 0 : index
    %8 = vector.load %arg4[%c0_5, %c0_6] : memref<8x128xbf16, #tpu.memory_space<vmem>>, vector<8x128xbf16>
    %9 = arith.extf %8 : vector<8x128xbf16> to vector<8x128xf32>
    %10 = arith.addf %7, %9 : vector<8x128xf32>
    %cst = arith.constant 0.000000e+00 : f32
    %11 = vector.broadcast %cst : f32 to vector<8x128xf32>
    %12 = arith.cmpf oge, %10, %11 : vector<8x128xf32>
    %cst_7 = arith.constant 2.000000e-02 : f32
    %13 = vector.broadcast %cst_7 : f32 to vector<8x128xf32>
    %14 = arith.mulf %13, %10 : vector<8x128xf32>
    %15 = arith.select %12, %10, %14 : vector<8x128xi1>, vector<8x128xf32>
    %16 = arith.truncf %15 : vector<8x128xf32> to vector<8x128xbf16>
    %c0_8 = arith.constant 0 : index
    %c0_9 = arith.constant 0 : index
    %17 = vector.load %arg5[%c0_8, %c0_9] : memref<8x128xbf16, #tpu.memory_space<vmem>>, vector<8x128xbf16>
    tpu.vector_store %arg5[%c0_8, %c0_9], %16 {strides = array<i32>} : memref<8x128xbf16, #tpu.memory_space<vmem>>, vector<8x128xbf16>,
    return
  }
  func.func @transform_0(%arg0: i32) -> (i32, i32) {
    %c0_i32 = arith.constant 0 : i32
    %c0_i32_0 = arith.constant 0 : i32
    return %arg0, %c0_i32 : i32, i32
  }
  func.func @transform_1(%arg0: i32) -> (i32, i32) {
    %c0_i32 = arith.constant 0 : i32
    %c0_i32_0 = arith.constant 0 : i32
    %c0_i32_1 = arith.constant 0 : i32
    return %c0_i32, %c0_i32_0 : i32, i32
  }
  func.func @transform_2(%arg0: i32) -> (i32, i32) {
    %c0_i32 = arith.constant 0 : i32
    %c0_i32_0 = arith.constant 0 : i32
    %c0_i32_1 = arith.constant 0 : i32
    return %c0_i32, %c0_i32_0 : i32, i32
  }
  func.func @transform_3(%arg0: i32) -> (i32, i32) {
    %c0_i32 = arith.constant 0 : i32
    %c0_i32_0 = arith.constant 0 : i32
    return %arg0, %c0_i32 : i32, i32
  }
  func.func @transform_4(%arg0: i32) -> (i32, i32) {
    %c0_i32 = arith.constant 0 : i32
    %c0_i32_0 = arith.constant 0 : i32
    return %arg0, %c0_i32 : i32, i32
  }
}

module attributes {stable_mosaic.version = 11 : i64} {
  func.func @_matmul_sigmoid_kernel(%arg0: i32, %arg1: memref<8x2048xbf16, #tpu.memory_space<vmem>>, %arg2: memref<2048x1xbf16, #tpu.memory_space<vmem>>, %arg3: memref<1x1xf32, #tpu.memory_space<vmem>>, %arg4: memref<8x1xf32, #tpu.memory_space<vmem>>) attributes {dimension_semantics = [#tpu.dimension_semantics<parallel>], iteration_bounds = array<i64: 1>, scalar_prefetch = 0 : i64, scratch_operands = 0 : i64, tpu.core_type = #tpu.core_type<tc>, window_params = [{transform_indices = @transform_0, window_bounds = array<i64: 8, 2048>}, {pipeline_mode = #tpu.pipeline_mode<synchronous>, transform_indices = @transform_1, window_bounds = array<i64: 2048, 1>}, {pipeline_mode = #tpu.pipeline_mode<synchronous>, transform_indices = @transform_2, window_bounds = array<i64: 1, 1>}, {transform_indices = @transform_3, window_bounds = array<i64: 8, 1>}]} {
    %c0 = arith.constant 0 : index
    %c0_0 = arith.constant 0 : index
    %0 = vector.load %arg1[%c0, %c0_0] : memref<8x2048xbf16, #tpu.memory_space<vmem>>, vector<8x2048xbf16>
    %c0_1 = arith.constant 0 : index
    %c0_2 = arith.constant 0 : index
    %1 = vector.load %arg2[%c0_1, %c0_2] : memref<2048x1xbf16, #tpu.memory_space<vmem>>, vector<2048x1xbf16>
    %cst = arith.constant dense<0.000000e+00> : vector<8x1xf32>
    %2 = tpu.matmul %0, %1, %cst {dimension_numbers = #tpu.dot_dimension_numbers<[1], [0], [0], [1], [0, 0, 1, 1], [], []>} : vector<8x2048xbf16>, vector<2048x1xbf16>, vector<8x1xf32> -> vector<8x1xf32>
    %c0_3 = arith.constant 0 : index
    %c0_4 = arith.constant 0 : index
    %3 = vector.load %arg3[%c0_3, %c0_4] : memref<1x1xf32, #tpu.memory_space<vmem>>, vector<1x1xf32>
    %4 = vector.broadcast %3 : vector<1x1xf32> to vector<8x1xf32>
    %5 = arith.addf %2, %4 : vector<8x1xf32>
    %6 = math.absf %5 : vector<8x1xf32>
    %cst_5 = arith.constant 0.000000e+00 : f32
    %7 = vector.broadcast %cst_5 : f32 to vector<8x1xf32>
    %8 = arith.subf %7, %6 : vector<8x1xf32>
    %9 = math.exp %8 : vector<8x1xf32>
    %cst_6 = arith.constant 0.000000e+00 : f32
    %10 = vector.broadcast %cst_6 : f32 to vector<8x1xf32>
    %11 = arith.cmpf oge, %5, %10 : vector<8x1xf32>
    %cst_7 = arith.constant 1.000000e+00 : f32
    %12 = vector.broadcast %cst_7 : f32 to vector<8x1xf32>
    %13 = arith.addf %12, %9 : vector<8x1xf32>
    %cst_8 = arith.constant 1.000000e+00 : f32
    %14 = vector.broadcast %cst_8 : f32 to vector<8x1xf32>
    %15 = arith.divf %14, %13 : vector<8x1xf32>
    %cst_9 = arith.constant 1.000000e+00 : f32
    %16 = vector.broadcast %cst_9 : f32 to vector<8x1xf32>
    %17 = arith.addf %16, %9 : vector<8x1xf32>
    %18 = arith.divf %9, %17 : vector<8x1xf32>
    %19 = arith.select %11, %15, %18 : vector<8x1xi1>, vector<8x1xf32>
    %c0_10 = arith.constant 0 : index
    %c0_11 = arith.constant 0 : index
    %20 = vector.load %arg4[%c0_10, %c0_11] : memref<8x1xf32, #tpu.memory_space<vmem>>, vector<8x1xf32>
    tpu.vector_store %arg4[%c0_10, %c0_11], %19 {strides = array<i32>} : memref<8x1xf32, #tpu.memory_space<vmem>>, vector<8x1xf32>,
    return
  }
  func.func @transform_0(%arg0: i32) -> (i32, i32) {
    %c0_i32 = arith.constant 0 : i32
    %c0_i32_0 = arith.constant 0 : i32
    return %arg0, %c0_i32 : i32, i32
  }
  func.func @transform_1(%arg0: i32) -> (i32, i32) {
    %c0_i32 = arith.constant 0 : i32
    %c0_i32_0 = arith.constant 0 : i32
    %c0_i32_1 = arith.constant 0 : i32
    return %c0_i32, %c0_i32_0 : i32, i32
  }
  func.func @transform_2(%arg0: i32) -> (i32, i32) {
    %c0_i32 = arith.constant 0 : i32
    %c0_i32_0 = arith.constant 0 : i32
    %c0_i32_1 = arith.constant 0 : i32
    return %c0_i32, %c0_i32_0 : i32, i32
  }
  func.func @transform_3(%arg0: i32) -> (i32, i32) {
    %c0_i32 = arith.constant 0 : i32
    %c0_i32_0 = arith.constant 0 : i32
    return %arg0, %c0_i32 : i32, i32
  }
}

</mosaic_0001>

<bundles_post_ra>
// kernel: discriminator_forward.20
= control target key start
LH: loop header
LB: loop body
LE: loop exit
PB: predicated region body
PF: predicated region fallthrough
CT: control target
= control target key end

     0   :  { %vm204_vm0 = vcmask 257024   ;;  %s448_s0 = inlined_call_operand.vmem [shape: bf16[128,32], index: 0, kind: input, shape index: {}]   ;;  %s449_s1 = inlined_call_operand.vmem [shape: f32[1,32], index: 1, kind: input, shape index: {}]   ;;  %s450_s2 = inlined_call_operand.vmem [shape: f32[1,32], index: 2, kind: input, shape index: {}]   ;;  %s451_s3 = inlined_call_operand.vmem [shape: bf16[128,32], index: 3, kind: output, shape index: {}]  }
   0x1   :  { %v260_v0 = vld [vmem:[%s448_s0] sm:$0xff]   ;;  %v291_v4 = vld [vmem:[%s448_s0 + $0x8] sm:$0xff]   ;;  %v292_v5 = vld [vmem:[%s448_s0 + $0x10] sm:$0xff]  }
   0x2   :  { %v324_v1 = vld [vmem:[%s449_s1] ss:$0 sm:$0xff]  ;;  %v261_v2 = vunpack.c.l.bf16 %v260_v0  ;;  %v262_v3 = vunpack.c.h.bf16 %v260_v0  ;;  %v293_v6 = vld [vmem:[%s448_s0 + $0x18] sm:$0xff]   ;;  %v265_v8 = vunpack.c.l.bf16 %v291_v4  ;;  %v266_v9 = vunpack.c.h.bf16 %v291_v4  ;;  %v295_v40 = vld [vmem:[%s448_s0 + $0x28] sm:$0xff]  }
   0x3   :  { %v338_v7 = vld [vmem:[%s450_s2] ss:$0 sm:$0xff]  ;;  %v269_v10 = vunpack.c.l.bf16 %v292_v5  ;;  %v270_v11 = vunpack.c.h.bf16 %v292_v5  ;;  %v273_v14 = vunpack.c.l.bf16 %v293_v6  ;;  %v274_v15 = vunpack.c.h.bf16 %v293_v6  ;;  %v296_v52 = vld [vmem:[%s448_s0 + $0x30] sm:$0xff]  }
   0x4   :  { %v53_v12 = vmul.f32 %v261_v2, %v324_v1  ;;  %v54_v13 = vmul.f32 %v262_v3, %v324_v1  ;;  %v55_v16 = vmul.f32 %v265_v8, %v324_v1  ;;  %v56_v17 = vmul.f32 %v266_v9, %v324_v1  ;;  %v294_v39 = vld [vmem:[%s448_s0 + $0x20] sm:$0xff]  }
   0x5   :  { %v57_v18 = vmul.f32 %v269_v10, %v324_v1  ;;  %v58_v19 = vmul.f32 %v270_v11, %v324_v1  ;;  %v59_v22 = vmul.f32 %v273_v14, %v324_v1  ;;  %v60_v23 = vmul.f32 %v274_v15, %v324_v1 }
   0x6   :  { %v76_v20 = vadd.f32 %v338_v7, %v53_v12  ;;  %v77_v21 = vadd.f32 %v338_v7, %v54_v13  ;;  %v78_v24 = vadd.f32 %v338_v7, %v55_v16  ;;  %v79_v25 = vadd.f32 %v338_v7, %v56_v17  ;;  %v297_v17 = vld [vmem:[%s448_s0 + $0x38] sm:$0xff]  }
   0x7   :  { %v80_v26 = vadd.f32 %v338_v7, %v57_v18  ;;  %v81_v27 = vadd.f32 %v338_v7, %v58_v19  ;;  %v82_v46 = vadd.f32 %v338_v7, %v59_v22  ;;  %v83_v47 = vadd.f32 %v338_v7, %v60_v23 }
   0x8   :  { %vm92_vm1 = vcmp.ge.f32.partialorder %v76_v20, 0.0  ;;  %v108_v28 = vmul.f32 0.02, %v76_v20  ;;  %vm93_vm2 = vcmp.ge.f32.partialorder %v77_v21, 0.0  ;;  %v109_v29 = vmul.f32 0.02, %v77_v21 }
   0x9   :  { %vm94_vm3 = vcmp.ge.f32.partialorder %v78_v24, 0.0  ;;  %v110_v30 = vmul.f32 0.02, %v78_v24  ;;  %vm95_vm4 = vcmp.ge.f32.partialorder %v79_v25, 0.0  ;;  %v111_v31 = vmul.f32 0.02, %v79_v25 }
   0xa   :  { %v124_v32 = vsel %vm92_vm1, %v76_v20, %v108_v28  ;;  %v125_v33 = vsel %vm93_vm2, %v77_v21, %v109_v29  ;;  %vm96_vm5 = vcmp.ge.f32.partialorder %v80_v26, 0.0  ;;  %v112_v34 = vmul.f32 0.02, %v80_v26 }
   0xb   :  { %v243_v35 = vpack.c.bf16 %v124_v32, %v124_v32  ;;  %v244_v36 = vpack.c.bf16 %v125_v33, %v125_v33  ;;  %v126_v37 = vsel %vm94_vm3, %v78_v24, %v110_v30  ;;  %v127_v38 = vsel %vm95_vm4, %v79_v25, %v111_v31 }
   0xc   :  { %v245_v41 = vpack.c.bf16 %v126_v37, %v126_v37  ;;  %v246_v42 = vpack.c.bf16 %v127_v38, %v127_v38  ;;  %v128_v43 = vsel %vm96_vm5, %v80_v26, %v112_v34  ;;  %vm97_vm6 = vcmp.ge.f32.partialorder %v81_v27, 0.0 }
   0xd   :  { %205 = vst.msk [vmem:[%s451_s3] sm:$0xf] %vm204_vm0, %v243_v35  ;;  %206 = vst.msk [vmem:[%s451_s3 + $0x4] sm:$0xf] %vm204_vm0, %v244_v36  ;;  %v247_v44 = vpack.c.bf16 %v128_v43, %v128_v43  ;;  %v113_v45 = vmul.f32 0.02, %v81_v27  ;;  %v277_v48 = vunpack.c.l.bf16 %v294_v39  ;;  %v278_v49 = vunpack.c.h.bf16 %v294_v39 }
   0xe   :  { %207 = vst.msk [vmem:[%s451_s3 + $0x8] sm:$0xf] %vm204_vm0, %v245_v41  ;;  %208 = vst.msk [vmem:[%s451_s3 + $0xc] sm:$0xf] %vm204_vm0, %v246_v42  ;;  %v281_v50 = vunpack.c.l.bf16 %v295_v40  ;;  %v282_v51 = vunpack.c.h.bf16 %v295_v40  ;;  %vm98_vm7 = vcmp.ge.f32.partialorder %v82_v46, 0.0  ;;  %vm99_vm8 = vcmp.ge.f32.partialorder %v83_v47, 0.0 }
   0xf   :  { %209 = vst.msk [vmem:[%s451_s3 + $0x10] sm:$0xf] %vm204_vm0, %v247_v44  ;;  %v129_v53 = vsel %vm97_vm6, %v81_v27, %v113_v45  ;;  %v114_v54 = vmul.f32 0.02, %v82_v46  ;;  %v115_v56 = vmul.f32 0.02, %v83_v47  ;;  %v61_v57 = vmul.f32 %v277_v48, %v324_v1 }
  0x10   :  { %v248_v55 = vpack.c.bf16 %v129_v53, %v129_v53  ;;  %v62_v58 = vmul.f32 %v278_v49, %v324_v1  ;;  %v63_v60 = vmul.f32 %v281_v50, %v324_v1  ;;  %v64_v61 = vmul.f32 %v282_v51, %v324_v1 }
  0x11   :  { %v130_v59 = vsel %vm98_vm7, %v82_v46, %v114_v54  ;;  %v285_v62 = vunpack.c.l.bf16 %v296_v52  ;;  %v131_v0 = vsel %vm99_vm8, %v83_v47, %v115_v56  ;;  %v84_v2 = vadd.f32 %v338_v7, %v61_v57 }
  0x12   :  { %210 = vst.msk [vmem:[%s451_s3 + $0x14] sm:$0xf] %vm204_vm0, %v248_v55  ;;  %v249_v63 = vpack.c.bf16 %v130_v59, %v130_v59  ;;  %v85_v3 = vadd.f32 %v338_v7, %v62_v58  ;;  %v250_v4 = vpack.c.bf16 %v131_v0, %v131_v0  ;;  %v86_v5 = vadd.f32 %v338_v7, %v63_v60 }
  0x13   :  { %v87_v6 = vadd.f32 %v338_v7, %v64_v61  ;;  %v65_v8 = vmul.f32 %v285_v62, %v324_v1  ;;  %vm100_vm9 = vcmp.ge.f32.partialorder %v84_v2, 0.0  ;;  %v116_v9 = vmul.f32 0.02, %v84_v2 }
  0x14   :  { %211 = vst.msk [vmem:[%s451_s3 + $0x18] sm:$0xf] %vm204_vm0, %v249_v63  ;;  %vm101_vm10 = vcmp.ge.f32.partialorder %v85_v3, 0.0  ;;  %v117_v10 = vmul.f32 0.02, %v85_v3  ;;  %vm102_vm11 = vcmp.ge.f32.partialorder %v86_v5, 0.0  ;;  %v286_v16 = vunpack.c.h.bf16 %v296_v52 }
  0x15   :  { %212 = vst.msk [vmem:[%s451_s3 + $0x1c] sm:$0xf] %vm204_vm0, %v250_v4  ;;  %v118_v11 = vmul.f32 0.02, %v86_v5  ;;  %vm103_vm12 = vcmp.ge.f32.partialorder %v87_v6, 0.0  ;;  %v132_v13 = vsel %vm100_vm9, %v84_v2, %v116_v9  ;;  %v88_v15 = vadd.f32 %v338_v7, %v65_v8 }
  0x16   :  { %v119_v12 = vmul.f32 0.02, %v87_v6  ;;  %v133_v14 = vsel %vm101_vm10, %v85_v3, %v117_v10  ;;  %v251_v18 = vpack.c.bf16 %v132_v13, %v132_v13  ;;  %v66_v25 = vmul.f32 %v286_v16, %v324_v1 }
  0x17   :  { %v252_v19 = vpack.c.bf16 %v133_v14, %v133_v14  ;;  %v134_v20 = vsel %vm102_vm11, %v86_v5, %v118_v11  ;;  %vm104_vm13 = vcmp.ge.f32.partialorder %v88_v15, 0.0  ;;  %v120_v24 = vmul.f32 0.02, %v88_v15 }
  0x18   :  { %v135_v21 = vsel %vm103_vm12, %v87_v6, %v119_v12  ;;  %v253_v22 = vpack.c.bf16 %v134_v20, %v134_v20  ;;  %213 = vst.msk [vmem:[%s451_s3 + $0x20] sm:$0xf] %vm204_vm0, %v251_v18  ;;  %v289_v26 = vunpack.c.l.bf16 %v297_v17  ;;  %v290_v27 = vunpack.c.h.bf16 %v297_v17 }
  0x19   :  { %v254_v23 = vpack.c.bf16 %v135_v21, %v135_v21  ;;  %214 = vst.msk [vmem:[%s451_s3 + $0x24] sm:$0xf] %vm204_vm0, %v252_v19  ;;  %v136_v28 = vsel %vm104_vm13, %v88_v15, %v120_v24  ;;  %v89_v30 = vadd.f32 %v338_v7, %v66_v25 }
  0x1a   :  { %215 = vst.msk [vmem:[%s451_s3 + $0x28] sm:$0xf] %vm204_vm0, %v253_v22  ;;  %v255_v29 = vpack.c.bf16 %v136_v28, %v136_v28  ;;  %v67_v31 = vmul.f32 %v289_v26, %v324_v1  ;;  %v68_v32 = vmul.f32 %v290_v27, %v324_v1 }
  0x1b   :  { %216 = vst.msk [vmem:[%s451_s3 + $0x2c] sm:$0xf] %vm204_vm0, %v254_v23  ;;  %vm105_vm14 = vcmp.ge.f32.partialorder %v89_v30, 0.0  ;;  %v121_v33 = vmul.f32 0.02, %v89_v30 }
  0x1c   :  { %217 = vst.msk [vmem:[%s451_s3 + $0x30] sm:$0xf] %vm204_vm0, %v255_v29  ;;  %v90_v34 = vadd.f32 %v338_v7, %v67_v31  ;;  %v91_v35 = vadd.f32 %v338_v7, %v68_v32 }
  0x1d   :  { %v137_v36 = vsel %vm105_vm14, %v89_v30, %v121_v33 }
  0x1e   :  { %vm106_vm15 = vcmp.ge.f32.partialorder %v90_v34, 0.0  ;;  %v122_v37 = vmul.f32 0.02, %v90_v34  ;;  %vm107_vm1 = vcmp.ge.f32.partialorder %v91_v35, 0.0  ;;  %v256_v38 = vpack.c.bf16 %v137_v36, %v137_v36 }
  0x1f   :  { %v123_v39 = vmul.f32 0.02, %v91_v35 }
  0x20   :  { %v138_v40 = vsel %vm106_vm15, %v90_v34, %v122_v37  ;;  %218 = vst.msk [vmem:[%s451_s3 + $0x34] sm:$0xf] %vm204_vm0, %v256_v38 }
  0x21   :  { %v257_v1 = vpack.c.bf16 %v138_v40, %v138_v40  ;;  %v139_v41 = vsel %vm107_vm1, %v91_v35, %v123_v39 }
  0x22   :  { %v258_v42 = vpack.c.bf16 %v139_v41, %v139_v41 }
  0x23   :  { %219 = vst.msk [vmem:[%s451_s3 + $0x38] sm:$0xf] %vm204_vm0, %v257_v1 }
  0x24   :  { %220 = vst.msk [vmem:[%s451_s3 + $0x3c] sm:$0xf] %vm204_vm0, %v258_v42 }

// kernel: discriminator_forward.19
= control target key start
LH: loop header
LB: loop body
LE: loop exit
PB: predicated region body
PF: predicated region fallthrough
CT: control target
= control target key end

     0   :  { %vm97_vm0 = vcmask 261120   ;;  %vm394_vm1 = vcmask 253952   ;;  %v512_v10 = vmov 0.0   ;;  %vm283_vm2 = vcmask 257024   ;;  %s741_s1 = inlined_call_operand.vmem [shape: bf16[32,32], index: 1, kind: input, shape index: {}]   ;;  %s742_s0 = inlined_call_operand.vmem [shape: bf16[128,32], index: 0, kind: input, shape index: {}]   ;;  %s743_s4 = inlined_call_operand.vmem [shape: f32[1,32], index: 4, kind: output, shape index: {1}]   ;;  %s744_s5 = inlined_call_operand.vmem [shape: f32[1,32], index: 5, kind: output, shape index: {2}]   ;;  %s745_s2 = inlined_call_operand.vmem [shape: f32[1,32], index: 2, kind: input, shape index: {}]   ;;  %s746_s3 = inlined_call_operand.vmem [shape: bf16[128,32], index: 3, kind: output, shape index: {0}]  }
   0x1   :  { %v502_v0 = vld [vmem:[%s741_s1] sm:$0xff]   ;;  %v503_v1 = vld [vmem:[%s741_s1 + $0x8] sm:$0xff]   ;;  %v506_v4 = vld [vmem:[%s742_s0 + $0x10] sm:$0xff]   ;;  %395 = vst.msk [vmem:[%s743_s4] sm:$0x1] %vm394_vm1, %v512_v10 }
   0x2   :  { %477 = vmatprep.subr.bf16.mxu0 %v502_v0  ;;  %v504_v2 = vld [vmem:[%s742_s0] sm:$0xff]   ;;  %497 = vmatprep.subr.bf16.mxu1 %v502_v0  ;;  %v505_v3 = vld [vmem:[%s742_s0 + $0x8] sm:$0xff]   ;;  %v510_v7 = vld [vmem:[%s742_s0 + $0x30] sm:$0xff]   ;;  %396 = vst.msk [vmem:[%s744_s5] sm:$0x1] %vm394_vm1, %v512_v10 }
   0x3   :  { %478 = vmatpush3.bf16.msra.mxu0 %v502_v0  ;;  %499 = vmatpush3.bf16.msra.mxu1 %v502_v0  ;;  %v508_v5 = vld [vmem:[%s742_s0 + $0x20] sm:$0xff]   ;;  %v509_v6 = vld [vmem:[%s742_s0 + $0x28] sm:$0xff]   ;;  %v507_v8 = vld [vmem:[%s742_s0 + $0x18] sm:$0xff]  }
   0x4   :  { %479 = vmatprep.subr.bf16.mxu0 %v503_v1  ;;  %481 = vmatprep.mubr.msk.bf16.mxu0 %vm97_vm0, %v504_v2  ;;  %v511_v9 = vld [vmem:[%s742_s0 + $0x38] sm:$0xff]   ;;  %v592_v11 = vld [vmem:[%s745_s2] ss:$0 sm:$0xff] }
   0x5   :  { %498 = vmatprep.subr.bf16.mxu1 %v503_v1  ;;  %489 = vmatprep.mubr.msk.bf16.mxu1 %vm97_vm0, %v508_v5 }
   0x7   :  { %480 = vmatpush3.bf16.msra.mxu0 %v503_v1  ;;  %500 = vmatpush3.bf16.msra.mxu1 %v503_v1 }
   0xa   :  { %482 = vmatmul.mubr.msk.bf16.vlgmr.msra.gmra.mrb[0].mxu0 %vm97_vm0, %v505_v3  ;;  %490 = vmatmul.mubr.msk.bf16.vlgmr.msra.gmra.mrb[0].mxu1 %vm97_vm0, %v509_v6 }
   0xb   :  { %485 = vmatprep.mubr.msk.bf16.mxu0 %vm97_vm0, %v506_v4  ;;  %493 = vmatprep.mubr.msk.bf16.mxu1 %vm97_vm0, %v510_v7 }
  0x12   :  { %486 = vmatmul.mubr.msk.bf16.gmra.mrb[4].mxu0 %vm97_vm0, %v507_v8  ;;  %494 = vmatmul.mubr.msk.bf16.gmra.mrb[4].mxu1 %vm97_vm0, %v511_v9 }
  0xdd   :  { %v483_v12 = vpop.f32.mrb[0].mxu0  ;;  %v491_v13 = vpop.f32.mrb[0].mxu1 }
  0xde   :  { %v165_v14 = vadd.f32 %v483_v12, %v592_v11  ;;  %v156_v15 = vpop.f32.mrb[1].mxu0  ;;  %v188_v16 = vpop.f32.mrb[1].mxu1  ;;  %v598_v23 = vadd.f32 %v491_v13, %v592_v11 }
  0xdf   :  { %v157_v17 = vadd.f32 %v592_v11, %v156_v15  ;;  %v484_v18 = vpop.f32.mrb[2].mxu0  ;;  %v492_v19 = vpop.f32.mrb[2].mxu1  ;;  %v602_v28 = vadd.f32 %v592_v11, %v188_v16 }
  0xe0   :  { %v453_v20 = vpack.c.bf16 %v165_v14, %v165_v14  ;;  %v168_v21 = vadd.f32 %v484_v18, %v592_v11  ;;  %v159_v22 = vpop.f32.mrb[3].mxu0  ;;  %v191_v24 = vpop.f32.mrb[3].mxu1  ;;  %v339_v29 = vmul.f32 %v165_v14, %v165_v14  ;;  %v461_v37 = vpack.c.bf16 %v598_v23, %v598_v23 }
  0xe1   :  { %v451_v25 = vpack.c.bf16 %v157_v17, %v157_v17  ;;  %v337_v26 = vmul.f32 %v157_v17, %v157_v17  ;;  %v160_v27 = vadd.f32 %v592_v11, %v159_v22  ;;  %v300_v31 = vsel %vm97_vm0, %v157_v17, 0.0 }
  0xe2   :  { %286 = vst.msk [vmem:[%s746_s3 + $0x8] sm:$0xf] %vm283_vm2, %v453_v20  ;;  %v454_v30 = vpack.c.bf16 %v168_v21, %v168_v21  ;;  %v340_v35 = vmul.f32 %v168_v21, %v168_v21  ;;  %v303_v38 = vsel %vm97_vm0, %v165_v14, 0.0  ;;  %v459_v42 = vpack.c.bf16 %v602_v28, %v602_v28  ;;  %294 = vst.msk [vmem:[%s746_s3 + $0x28] sm:$0xf] %vm283_vm2, %v461_v37 }
  0xe3   :  { %284 = vst.msk [vmem:[%s746_s3] sm:$0xf] %vm283_vm2, %v451_v25  ;;  %v452_v32 = vpack.c.bf16 %v160_v27, %v160_v27  ;;  %v301_v33 = vsel %vm97_vm0, %v160_v27, 0.0  ;;  %v338_v34 = vmul.f32 %v160_v27, %v160_v27  ;;  %v353_v39 = vsel %vm97_vm0, %v337_v26, 0.0 }
  0xe4   :  { %287 = vst.msk [vmem:[%s746_s3 + $0xc] sm:$0xf] %vm283_vm2, %v454_v30  ;;  %v302_v36 = vadd.f32 %v301_v33, %v300_v31  ;;  %v356_v49 = vsel %vm97_vm0, %v339_v29, 0.0  ;;  %292 = vst.msk [vmem:[%s746_s3 + $0x20] sm:$0xf] %vm283_vm2, %v459_v42  ;;  %v641_v52 = vadd.f32 %v492_v19, %v592_v11  ;;  %v305_v54 = vsel %vm97_vm0, %v168_v21, 0.0 }
  0xe5   :  { %285 = vst.msk [vmem:[%s746_s3 + $0x4] sm:$0xf] %vm283_vm2, %v452_v32  ;;  %v354_v40 = vsel %vm97_vm0, %v338_v34, 0.0  ;;  %v487_v41 = vpop.f32.mrb[4].mxu0  ;;  %v495_v43 = vpop.f32.mrb[4].mxu1  ;;  %v358_v55 = vsel %vm97_vm0, %v340_v35, 0.0  ;;  %v192_v3 = vadd.f32 %v592_v11, %v191_v24  ;;  %v345_v15 = vmul.f32 %v602_v28, %v602_v28 }
  0xe6   :  { %v304_v44 = vadd.f32 %v303_v38, %v302_v36  ;;  %v355_v45 = vadd.f32 %v354_v40, %v353_v39  ;;  %v181_v46 = vadd.f32 %v487_v41, %v592_v11  ;;  %v172_v47 = vpop.f32.mrb[5].mxu0  ;;  %v204_v48 = vpop.f32.mrb[5].mxu1  ;;  %v462_v6 = vpack.c.bf16 %v641_v52, %v641_v52 }
  0xe7   :  { %v173_v50 = vadd.f32 %v592_v11, %v172_v47  ;;  %v488_v51 = vpop.f32.mrb[6].mxu0  ;;  %v496_v53 = vpop.f32.mrb[6].mxu1  ;;  %v460_v16 = vpack.c.bf16 %v192_v3, %v192_v3  ;;  %v213_v20 = vadd.f32 %v495_v43, %v592_v11  ;;  %v205_v24 = vadd.f32 %v592_v11, %v204_v48 }
  0xe8   :  { %v357_v56 = vadd.f32 %v356_v49, %v355_v45  ;;  %v457_v57 = vpack.c.bf16 %v181_v46, %v181_v46  ;;  %v175_v58 = vpop.f32.mrb[7].mxu0  ;;  %v207_v59 = vpop.f32.mrb[7].mxu1  ;;  %v306_v61 = vadd.f32 %v305_v54, %v304_v44  ;;  %v184_v1 = vadd.f32 %v488_v51, %v592_v11  ;;  %295 = vst.msk [vmem:[%s746_s3 + $0x2c] sm:$0xf] %vm283_vm2, %v462_v6 }
  0xe9   :  { %v455_v60 = vpack.c.bf16 %v173_v50, %v173_v50  ;;  %v307_v62 = vsel %vm97_vm0, %v173_v50, 0.0  ;;  %v341_v63 = vmul.f32 %v173_v50, %v173_v50  ;;  %v176_v2 = vadd.f32 %v592_v11, %v175_v58  ;;  %293 = vst.msk [vmem:[%s746_s3 + $0x24] sm:$0xf] %vm283_vm2, %v460_v16 }
  0xea   :  { %290 = vst.msk [vmem:[%s746_s3 + $0x18] sm:$0xf] %vm283_vm2, %v457_v57  ;;  %v359_v0 = vadd.f32 %v358_v55, %v357_v56  ;;  %v308_v4 = vadd.f32 %v307_v62, %v306_v61  ;;  %v458_v8 = vpack.c.bf16 %v184_v1, %v184_v1  ;;  %v343_v9 = vmul.f32 %v181_v46, %v181_v46 }
  0xeb   :  { %288 = vst.msk [vmem:[%s746_s3 + $0x10] sm:$0xf] %vm283_vm2, %v455_v60  ;;  %v360_v5 = vsel %vm97_vm0, %v341_v63, 0.0  ;;  %v456_v10 = vpack.c.bf16 %v176_v2, %v176_v2  ;;  %v309_v12 = vsel %vm97_vm0, %v176_v2, 0.0  ;;  %v342_v13 = vmul.f32 %v176_v2, %v176_v2 }
  0xec   :  { %v361_v7 = vadd.f32 %v360_v5, %v359_v0  ;;  %291 = vst.msk [vmem:[%s746_s3 + $0x1c] sm:$0xf] %vm283_vm2, %v458_v8  ;;  %v310_v14 = vadd.f32 %v309_v12, %v308_v4  ;;  %v311_v17 = vsel %vm97_vm0, %v181_v46, 0.0  ;;  %v344_v18 = vmul.f32 %v184_v1, %v184_v1 }
  0xed   :  { %289 = vst.msk [vmem:[%s746_s3 + $0x14] sm:$0xf] %vm283_vm2, %v456_v10  ;;  %v362_v19 = vsel %vm97_vm0, %v342_v13, 0.0  ;;  %v364_v25 = vsel %vm97_vm0, %v343_v9, 0.0  ;;  %v313_v26 = vsel %vm97_vm0, %v184_v1, 0.0  ;;  %v315_v27 = vsel %vm97_vm0, %v602_v28, 0.0 }
  0xee   :  { %v312_v21 = vadd.f32 %v311_v17, %v310_v14  ;;  %v363_v22 = vadd.f32 %v362_v19, %v361_v7  ;;  %v465_v29 = vpack.c.bf16 %v213_v20, %v213_v20  ;;  %v368_v32 = vsel %vm97_vm0, %v345_v15, 0.0 }
  0xef   :  { %v463_v33 = vpack.c.bf16 %v205_v24, %v205_v24  ;;  %v366_v34 = vsel %vm97_vm0, %v344_v18, 0.0  ;;  %v346_v35 = vmul.f32 %v192_v3, %v192_v3  ;;  %v216_v36 = vadd.f32 %v496_v53, %v592_v11 }
  0xf0   :  { %v365_v30 = vadd.f32 %v364_v25, %v363_v22  ;;  %v314_v31 = vadd.f32 %v313_v26, %v312_v21  ;;  %298 = vst.msk [vmem:[%s746_s3 + $0x38] sm:$0xf] %vm283_vm2, %v465_v29  ;;  %v208_v37 = vadd.f32 %v592_v11, %v207_v59  ;;  %v347_v39 = vmul.f32 %v598_v23, %v598_v23 }
  0xf1   :  { %296 = vst.msk [vmem:[%s746_s3 + $0x30] sm:$0xf] %vm283_vm2, %v463_v33  ;;  %v317_v40 = vsel %vm97_vm0, %v192_v3, 0.0  ;;  %v466_v41 = vpack.c.bf16 %v216_v36, %v216_v36  ;;  %v319_v45 = vsel %vm97_vm0, %v598_v23, 0.0  ;;  %v348_v11 = vmul.f32 %v641_v52, %v641_v52 }
  0xf2   :  { %v316_v38 = vadd.f32 %v315_v27, %v314_v31  ;;  %v367_v28 = vadd.f32 %v366_v34, %v365_v30  ;;  %v464_v44 = vpack.c.bf16 %v208_v37, %v208_v37  ;;  %v370_v46 = vsel %vm97_vm0, %v346_v35, 0.0 }
  0xf3   :  { %v349_v47 = vmul.f32 %v205_v24, %v205_v24  ;;  %299 = vst.msk [vmem:[%s746_s3 + $0x3c] sm:$0xf] %vm283_vm2, %v466_v41  ;;  %v372_v23 = vsel %vm97_vm0, %v347_v39, 0.0  ;;  %v321_v50 = vsel %vm97_vm0, %v641_v52, 0.0  ;;  %v323_v51 = vsel %vm97_vm0, %v205_v24, 0.0 }
  0xf4   :  { %v369_v42 = vadd.f32 %v368_v32, %v367_v28  ;;  %v318_v43 = vadd.f32 %v317_v40, %v316_v38  ;;  %297 = vst.msk [vmem:[%s746_s3 + $0x34] sm:$0xf] %vm283_vm2, %v464_v44  ;;  %v374_v55 = vsel %vm97_vm0, %v348_v11, 0.0  ;;  %v350_v57 = vmul.f32 %v208_v37, %v208_v37  ;;  %v401_v24 = vld [vmem:[%s744_s5] sm:$0x1] }
  0xf5   :  { %v376_v56 = vsel %vm97_vm0, %v349_v47, 0.0  ;;  %v351_v60 = vmul.f32 %v213_v20, %v213_v20  ;;  %v325_v61 = vsel %vm97_vm0, %v208_v37, 0.0  ;;  %v327_v0 = vsel %vm97_vm0, %v213_v20, 0.0  ;;  %v397_v20 = vld [vmem:[%s743_s4] sm:$0x1] }
  0xf6   :  { %v320_v48 = vadd.f32 %v319_v45, %v318_v43  ;;  %v371_v49 = vadd.f32 %v370_v46, %v369_v42  ;;  %v352_v1 = vmul.f32 %v216_v36, %v216_v36  ;;  %v378_v52 = vsel %vm97_vm0, %v350_v57, 0.0 }
  0xf7   :  { %v380_v4 = vsel %vm97_vm0, %v351_v60, 0.0  ;;  %v329_v5 = vsel %vm97_vm0, %v216_v36, 0.0 }
  0xf8   :  { %v373_v53 = vadd.f32 %v372_v23, %v371_v49  ;;  %v322_v54 = vadd.f32 %v321_v50, %v320_v48  ;;  %v382_v8 = vsel %vm97_vm0, %v352_v1, 0.0 }
  0xfa   :  { %v324_v58 = vadd.f32 %v323_v51, %v322_v54  ;;  %v375_v59 = vadd.f32 %v374_v55, %v373_v53 }
  0xfc   :  { %v377_v62 = vadd.f32 %v376_v56, %v375_v59  ;;  %v326_v63 = vadd.f32 %v325_v61, %v324_v58 }
  0xfe   :  { %v328_v2 = vadd.f32 %v327_v0, %v326_v63  ;;  %v379_v3 = vadd.f32 %v378_v52, %v377_v62 }
 0x100   :  { %v330_v6 = vadd.f32 %v329_v5, %v328_v2  ;;  %v381_v7 = vadd.f32 %v380_v4, %v379_v3 }
 0x102   :  { %v331_v9 = vrot.slane %v330_v6, 4  ;;  %v383_v10 = vadd.f32 %v382_v8, %v381_v7 }
 0x104   :  { %v332_v12 = vadd.f32 %v331_v9, %v330_v6  ;;  %v384_v13 = vrot.slane %v383_v10, 4 }
 0x106   :  { %v333_v14 = vrot.slane %v332_v12, 2  ;;  %v385_v15 = vadd.f32 %v384_v13, %v383_v10 }
 0x108   :  { %v334_v16 = vadd.f32 %v333_v14, %v332_v12  ;;  %v386_v17 = vrot.slane %v385_v15, 2 }
 0x10a   :  { %v335_v18 = vrot.slane %v334_v16, 1  ;;  %v387_v19 = vadd.f32 %v386_v17, %v385_v15 }
 0x10c   :  { %v336_v21 = vadd.f32 %v335_v18, %v334_v16  ;;  %v388_v22 = vrot.slane %v387_v19, 1 }
 0x10e   :  { %v389_v25 = vadd.f32 %v388_v22, %v387_v19  ;;  %v398_v26 = vadd.f32 %v397_v20, %v336_v21 }
 0x110   :  { %400 = vst.msk [vmem:[%s743_s4] sm:$0x1] %vm394_vm1, %v398_v26  ;;  %v402_v27 = vadd.f32 %v401_v24, %v389_v25 }
 0x112   :  { %403 = vst.msk [vmem:[%s744_s5] sm:$0x1] %vm394_vm1, %v402_v27 }

// kernel: discriminator_forward.21
= control target key start
LH: loop header
LB: loop body
LE: loop exit
PB: predicated region body
PF: predicated region fallthrough
CT: control target
= control target key end

     0   :  { %vm321_vm0 = vcmask 261120   ;;  %vm716_vm1 = vcmask 516096   ;;  %v982_v42 = vmov 0.0   ;;  %vm604_vm2 = vcmask 519168   ;;  %s1304_s1 = inlined_call_operand.vmem [shape: bf16[288,64], index: 1, kind: input, shape index: {}]   ;;  %s1305_s0 = inlined_call_operand.vmem [shape: bf16[128,288], index: 0, kind: input, shape index: {}]   ;;  %s1306_s4 = inlined_call_operand.vmem [shape: f32[1,64], index: 4, kind: output, shape index: {1}]   ;;  %s1307_s5 = inlined_call_operand.vmem [shape: f32[1,64], index: 5, kind: output, shape index: {2}]   ;;  %s1308_s2 = inlined_call_operand.vmem [shape: f32[1,64], index: 2, kind: input, shape index: {}]   ;;  %s1309_s3 = inlined_call_operand.vmem [shape: bf16[128,64], index: 3, kind: output, shape index: {0}]  }
   0x1   :  { %v932_v0 = vld [vmem:[%s1304_s1 + $0x40] sm:$0xff]   ;;  %v934_v2 = vld [vmem:[%s1304_s1 + $0x48] sm:$0xff]   ;;  %v936_v4 = vld [vmem:[%s1304_s1 + $0x50] sm:$0xff]   ;;  %717 = vst.msk [vmem:[%s1306_s4] sm:$0x1] %vm716_vm1, %v982_v42  ;;  %vm621_vm3 = vcmask 523264  }
   0x2   :  { %v933_v1 = vld [vmem:[%s1304_s1] sm:$0xff]   ;;  %821 = vmatprep.subr.bf16.mxu0 %v932_v0  ;;  %915 = vmatprep.subr.bf16.mxu1 %v932_v0  ;;  %v935_v3 = vld [vmem:[%s1304_s1 + $0x8] sm:$0xff]   ;;  %v937_v5 = vld [vmem:[%s1304_s1 + $0x10] sm:$0xff]   ;;  %718 = vst.msk [vmem:[%s1307_s5] sm:$0x1] %vm716_vm1, %v982_v42 }
   0x3   :  { %822 = vmatpush3.bf16.msra.mxu0 %v933_v1  ;;  %923 = vmatpush3.bf16.msra.mxu1 %v933_v1  ;;  %v938_v6 = vld [vmem:[%s1304_s1 + $0x58] sm:$0xff]   ;;  %v940_v8 = vld [vmem:[%s1304_s1 + $0x60] sm:$0xff]   ;;  %v942_v10 = vld [vmem:[%s1304_s1 + $0x68] sm:$0xff]  }
   0x4   :  { %823 = vmatprep.subr.bf16.mxu0 %v934_v2  ;;  %916 = vmatprep.subr.bf16.mxu1 %v934_v2  ;;  %v939_v7 = vld [vmem:[%s1304_s1 + $0x18] sm:$0xff]   ;;  %v941_v9 = vld [vmem:[%s1304_s1 + $0x20] sm:$0xff]   ;;  %v943_v13 = vld [vmem:[%s1304_s1 + $0x28] sm:$0xff]  }
   0x5   :  { %v950_v11 = vld [vmem:[%s1305_s0 + $0x4] ss:$12 sps:$4 sm:$0xff]   ;;  %v953_v12 = vld [vmem:[%s1305_s0 + $0x94] ss:$12 sps:$4 sm:$0xff]   ;;  %v946_v16 = vld [vmem:[%s1304_s1 + $0x78] sm:$0xff]  }
   0x6   :  { %v944_v14 = vld [vmem:[%s1304_s1 + $0x70] sm:$0xff]   ;;  %378 = vmatprep.mubr.bf16.mxu0 %v950_v11  ;;  %426 = vmatprep.mubr.bf16.mxu1 %v953_v12  ;;  %v947_v17 = vld [vmem:[%s1304_s1 + $0x38] sm:$0xff]   ;;  %v948_v18 = vld [vmem:[%s1305_s0] ss:$12 sps:$4 sm:$0xff]  }
   0x7   :  { %824 = vmatpush3.bf16.msra.mxu0 %v935_v3  ;;  %924 = vmatpush3.bf16.msra.mxu1 %v935_v3  ;;  %v945_v15 = vld [vmem:[%s1304_s1 + $0x30] sm:$0xff]   ;;  %v958_v19 = vld [vmem:[%s1304_s1 + $0x80] sm:$0xff]   ;;  %v954_v21 = vld [vmem:[%s1305_s0 + $0x1c] ss:$12 sps:$4 sm:$0xff]  }
   0x8   :  { %825 = vmatprep.subr.bf16.mxu0 %v936_v4  ;;  %917 = vmatprep.subr.bf16.mxu1 %v936_v4  ;;  %v951_v20 = vld [vmem:[%s1305_s0 + $0x90] ss:$12 sps:$4 sm:$0xff]   ;;  %v956_v22 = vld [vmem:[%s1305_s0 + $0xac] ss:$12 sps:$4 sm:$0xff]   ;;  %v960_v25 = vld [vmem:[%s1305_s0 + $0xa8] ss:$12 sps:$4 sm:$0xff]  }
   0x9   :  { %v961_v23 = vld [vmem:[%s1304_s1 + $0x88] sm:$0xff]   ;;  %v959_v24 = vld [vmem:[%s1305_s0 + $0x18] ss:$12 sps:$4 sm:$0xff]   ;;  %v962_v26 = vld [vmem:[%s1305_s0 + $0x34] ss:$12 sps:$4 sm:$0xff]  }
   0xa   :  { %v964_v27 = vld [vmem:[%s1305_s0 + $0x8] ss:$12 sps:$4 sm:$0xff]   ;;  %v965_v28 = vld [vmem:[%s1305_s0 + $0x30] ss:$12 sps:$4 sm:$0xff]   ;;  %v966_v29 = vld [vmem:[%s1305_s0 + $0x20] ss:$12 sps:$4 sm:$0xff]  }
   0xb   :  { %826 = vmatpush3.bf16.msra.mxu0 %v937_v5  ;;  %925 = vmatpush3.bf16.msra.mxu1 %v937_v5  ;;  %v967_v30 = vld [vmem:[%s1305_s0 + $0x4c] ss:$12 sps:$4 sm:$0xff]   ;;  %v970_v32 = vld [vmem:[%s1305_s0 + $0x48] ss:$12 sps:$4 sm:$0xff]   ;;  %v971_v33 = vld [vmem:[%s1305_s0 + $0x50] ss:$12 sps:$4 sm:$0xff]  }
   0xc   :  { %827 = vmatprep.subr.bf16.mxu0 %v938_v6  ;;  %918 = vmatprep.subr.bf16.mxu1 %v938_v6  ;;  %v969_v31 = vld [vmem:[%s1305_s0 + $0x38] ss:$12 sps:$4 sm:$0xff]   ;;  %v974_v35 = vld [vmem:[%s1305_s0 + $0x68] ss:$12 sps:$4 sm:$0xff]   ;;  %v975_v36 = vld [vmem:[%s1305_s0 + $0x60] ss:$12 sps:$4 sm:$0xff]  }
   0xd   :  { %v972_v34 = vld [vmem:[%s1305_s0 + $0x64] ss:$12 sps:$4 sm:$0xff]   ;;  %v976_v37 = vld [vmem:[%s1305_s0 + $0x80] ss:$12 sps:$4 sm:$0xff]   ;;  %v977_v38 = vld [vmem:[%s1305_s0 + $0x7c] ss:$12 sps:$4 sm:$0xff]  }
   0xe   :  { %v979_v39 = vld [vmem:[%s1305_s0 + $0x98] ss:$12 sps:$4 sm:$0xff]   ;;  %v981_v41 = vld [vmem:[%s1305_s0 + $0xb0] ss:$12 sps:$4 sm:$0xff]   ;;  %v1166_v3 = vld [vmem:[%s1308_s2] ss:$0 sm:$0xff] }
   0xf   :  { %828 = vmatpush3.bf16.msra.mxu0 %v939_v7  ;;  %926 = vmatpush3.bf16.msra.mxu1 %v939_v7  ;;  %v980_v40 = vld [vmem:[%s1305_s0 + $0x78] ss:$12 sps:$4 sm:$0xff]  }
  0x10   :  { %829 = vmatprep.subr.bf16.mxu0 %v940_v8  ;;  %919 = vmatprep.subr.bf16.mxu1 %v940_v8 }
  0x13   :  { %830 = vmatpush3.bf16.msra.mxu0 %v941_v9  ;;  %927 = vmatpush3.bf16.msra.mxu1 %v941_v9 }
  0x14   :  { %831 = vmatprep.subr.bf16.mxu0 %v942_v10  ;;  %920 = vmatprep.subr.bf16.mxu1 %v942_v10 }
  0x17   :  { %832 = vmatpush3.bf16.msra.mxu0 %v943_v13  ;;  %928 = vmatpush3.bf16.msra.mxu1 %v943_v13 }
  0x18   :  { %833 = vmatprep.subr.bf16.mxu0 %v944_v14  ;;  %921 = vmatprep.subr.bf16.mxu1 %v944_v14 }
  0x1b   :  { %834 = vmatpush3.bf16.msra.mxu0 %v945_v15  ;;  %929 = vmatpush3.bf16.msra.mxu1 %v945_v15 }
  0x1c   :  { %835 = vmatprep.subr.bf16.mxu0 %v946_v16  ;;  %922 = vmatprep.subr.bf16.mxu1 %v946_v16 }
  0x1f   :  { %836 = vmatpush3.bf16.msra.mxu0 %v947_v17  ;;  %930 = vmatpush3.bf16.msra.mxu1 %v947_v17 }
  0x20   :  { %895 = vmatprep.subr.bf16.mxu1 %v958_v19 }
  0x22   :  { %379 = vmatmul.mubr.bf16.vlgmr.msra.gmra.mrb[0].mxu0 %v948_v18  ;;  %427 = vmatmul.mubr.bf16.vlgmr.msra.gmra.mrb[0].mxu1 %v951_v20 }
  0x23   :  { %386 = vmatprep.mubr.bf16.mxu0 %v954_v21  ;;  %434 = vmatprep.mubr.bf16.mxu1 %v956_v22 }
  0x24   :  { %896 = vmatpush3.bf16.msra.mxu1 %v958_v19 }
  0x25   :  { %897 = vmatprep.subr.bf16.mxu1 %v961_v23 }
  0x28   :  { %898 = vmatpush3.bf16.msra.mxu1 %v961_v23 }
  0x2a   :  { %387 = vmatmul.mubr.bf16.gmra.mrb[4].mxu0 %v959_v24  ;;  %435 = vmatmul.mubr.bf16.gmra.mrb[4].mxu1 %v960_v25 }
  0x2b   :  { %394 = vmatprep.mubr.bf16.mxu0 %v962_v26  ;;  %899 = vmatprep.mubr.msk.bf16.mxu1 %vm321_vm0, %v964_v27 }
  0x32   :  { %395 = vmatmul.mubr.bf16.gmra.mrb[8].mxu0 %v965_v28  ;;  %900 = vmatmul.mubr.msk.bf16.vlgmr.msra.gmra.mrb[8].mxu1 %vm321_vm0, %v966_v29 }
  0x33   :  { %402 = vmatprep.mubr.bf16.mxu0 %v967_v30  ;;  %903 = vmatprep.mubr.msk.bf16.mxu1 %vm321_vm0, %v969_v31 }
  0x3a   :  { %403 = vmatmul.mubr.bf16.gmra.mrb[12].mxu0 %v970_v32  ;;  %904 = vmatmul.mubr.msk.bf16.gmra.mrb[12].mxu1 %vm321_vm0, %v971_v33 }
  0x3b   :  { %410 = vmatprep.mubr.bf16.mxu0 %v972_v34  ;;  %907 = vmatprep.mubr.msk.bf16.mxu1 %vm321_vm0, %v974_v35 }
  0x42   :  { %411 = vmatmul.mubr.bf16.gmra.mrb[16].mxu0 %v975_v36  ;;  %908 = vmatmul.mubr.msk.bf16.gmra.mrb[16].mxu1 %vm321_vm0, %v976_v37 }
  0x43   :  { %418 = vmatprep.mubr.bf16.mxu0 %v977_v38  ;;  %911 = vmatprep.mubr.msk.bf16.mxu1 %vm321_vm0, %v979_v39 }
  0x4a   :  { %419 = vmatmul.mubr.bf16.gmra.mrb[20].mxu0 %v980_v40  ;;  %912 = vmatmul.mubr.msk.bf16.gmra.mrb[20].mxu1 %vm321_vm0, %v981_v41 }
  0xf5   :  { %v837_v43 = vpop.f32.mrb[0].mxu0  ;;  %v873_v44 = vpop.f32.mrb[0].mxu1 }
  0xf6   :  { %v838_v45 = vpop.f32.mrb[1].mxu0  ;;  %v874_v46 = vpop.f32.mrb[1].mxu1 }
  0xf7   :  { %v839_v47 = vadd.f32 %v838_v45, %v837_v43  ;;  %v840_v48 = vpop.f32.mrb[2].mxu0  ;;  %v1155_v49 = vadd.f32 %v874_v46, %v873_v44  ;;  %v876_v50 = vpop.f32.mrb[2].mxu1 }
  0xf8   :  { %v841_v51 = vpop.f32.mrb[3].mxu0  ;;  %v877_v52 = vpop.f32.mrb[3].mxu1 }
  0xf9   :  { %v842_v53 = vadd.f32 %v841_v51, %v840_v48  ;;  %v1157_v54 = vadd.f32 %v877_v52, %v876_v50  ;;  %v381_v7 = vadd.f32 %v839_v47, %v1166_v3 }
  0xfb   :  { %v384_v22 = vadd.f32 %v842_v53, %v1166_v3 }
  0xfd   :  { %v843_v55 = vpop.f32.mrb[4].mxu0  ;;  %v879_v56 = vpop.f32.mrb[4].mxu1 }
  0xfe   :  { %v844_v57 = vpop.f32.mrb[5].mxu0  ;;  %v880_v58 = vpop.f32.mrb[5].mxu1 }
  0xff   :  { %v845_v59 = vadd.f32 %v844_v57, %v843_v55  ;;  %v846_v60 = vpop.f32.mrb[6].mxu0  ;;  %v1159_v61 = vadd.f32 %v880_v58, %v879_v56  ;;  %v882_v62 = vpop.f32.mrb[6].mxu1 }
 0x100   :  { %v847_v63 = vpop.f32.mrb[7].mxu0  ;;  %v883_v0 = vpop.f32.mrb[7].mxu1 }
 0x101   :  { %v848_v1 = vadd.f32 %v847_v63, %v846_v60  ;;  %v1161_v2 = vadd.f32 %v883_v0, %v882_v62  ;;  %v389_v4 = vadd.f32 %v845_v59, %v1166_v3 }
 0x103   :  { %v392_v11 = vadd.f32 %v848_v1, %v1166_v3 }
 0x105   :  { %v849_v5 = vpop.f32.mrb[8].mxu0  ;;  %v901_v6 = vpop.f32.mrb[8].mxu1 }
 0x106   :  { %v486_v8 = vadd.f32 %v901_v6, %v389_v4  ;;  %v850_v9 = vpop.f32.mrb[9].mxu0  ;;  %v477_v10 = vpop.f32.mrb[9].mxu1 }
 0x107   :  { %v851_v12 = vadd.f32 %v850_v9, %v849_v5  ;;  %v478_v13 = vadd.f32 %v477_v10, %v381_v7  ;;  %v852_v14 = vpop.f32.mrb[10].mxu0  ;;  %v902_v15 = vpop.f32.mrb[10].mxu1 }
 0x108   :  { %v807_v16 = vpack.c.bf16 %v486_v8, %v486_v8  ;;  %v489_v17 = vadd.f32 %v902_v15, %v392_v11  ;;  %v853_v18 = vpop.f32.mrb[11].mxu0  ;;  %v480_v19 = vpop.f32.mrb[11].mxu1  ;;  %v661_v23 = vmul.f32 %v486_v8, %v486_v8  ;;  %v625_v34 = vsel %vm621_vm3, %v486_v8, 0.0 }
 0x109   :  { %v805_v20 = vpack.c.bf16 %v478_v13, %v478_v13  ;;  %v854_v21 = vadd.f32 %v853_v18, %v852_v14  ;;  %v659_v25 = vmul.f32 %v478_v13, %v478_v13  ;;  %v481_v26 = vadd.f32 %v480_v19, %v384_v22 }
 0x10a   :  { %607 = vst.msk [vmem:[%s1309_s3 + $0x8] sm:$0xf] %vm604_vm2, %v807_v16  ;;  %v808_v24 = vpack.c.bf16 %v489_v17, %v489_v17  ;;  %v622_v27 = vsel %vm621_vm3, %v478_v13, 0.0  ;;  %v397_v33 = vadd.f32 %v851_v12, %v1166_v3  ;;  %v678_v35 = vsel %vm621_vm3, %v661_v23, 0.0 }
 0x10b   :  { %605 = vst.msk [vmem:[%s1309_s3] sm:$0xf] %vm604_vm2, %v805_v20  ;;  %v806_v28 = vpack.c.bf16 %v481_v26, %v481_v26  ;;  %v623_v29 = vsel %vm621_vm3, %v481_v26, 0.0  ;;  %v660_v30 = vmul.f32 %v481_v26, %v481_v26  ;;  %v662_v36 = vmul.f32 %v489_v17, %v489_v17 }
 0x10c   :  { %608 = vst.msk [vmem:[%s1309_s3 + $0xc] sm:$0xf] %vm604_vm2, %v808_v24  ;;  %v624_v37 = vadd.f32 %v623_v29, %v622_v27  ;;  %v675_v40 = vsel %vm621_vm3, %v659_v25, 0.0  ;;  %v627_v46 = vsel %vm621_vm3, %v489_v17, 0.0  ;;  %v400_v51 = vadd.f32 %v854_v21, %v1166_v3 }
 0x10d   :  { %v855_v31 = vpop.f32.mrb[12].mxu0  ;;  %v905_v32 = vpop.f32.mrb[12].mxu1  ;;  %606 = vst.msk [vmem:[%s1309_s3 + $0x4] sm:$0xf] %vm604_vm2, %v806_v28  ;;  %v676_v41 = vsel %vm621_vm3, %v660_v30, 0.0  ;;  %v680_v63 = vsel %vm621_vm3, %v662_v36, 0.0 }
 0x10e   :  { %v856_v38 = vpop.f32.mrb[13].mxu0  ;;  %v493_v39 = vpop.f32.mrb[13].mxu1  ;;  %v626_v47 = vadd.f32 %v625_v34, %v624_v37  ;;  %v677_v48 = vadd.f32 %v676_v41, %v675_v40  ;;  %v429_v40 = vadd.f32 %v1155_v49, %v1166_v3 }
 0x10f   :  { %v857_v42 = vadd.f32 %v856_v38, %v855_v31  ;;  %v494_v43 = vadd.f32 %v493_v39, %v397_v33  ;;  %v858_v44 = vpop.f32.mrb[14].mxu0  ;;  %v906_v45 = vpop.f32.mrb[14].mxu1  ;;  %v437_v39 = vadd.f32 %v1159_v61, %v1166_v3 }
 0x110   :  { %v859_v50 = vpop.f32.mrb[15].mxu0  ;;  %v496_v52 = vpop.f32.mrb[15].mxu1  ;;  %v679_v58 = vadd.f32 %v678_v35, %v677_v48  ;;  %v628_v59 = vadd.f32 %v627_v46, %v626_v47 }
 0x111   :  { %v405_v53 = vadd.f32 %v857_v42, %v1166_v3  ;;  %v809_v55 = vpack.c.bf16 %v494_v43, %v494_v43  ;;  %v629_v56 = vsel %vm621_vm3, %v494_v43, 0.0  ;;  %v663_v57 = vmul.f32 %v494_v43, %v494_v43 }
 0x112   :  { %v860_v60 = vadd.f32 %v859_v50, %v858_v44  ;;  %v497_v62 = vadd.f32 %v496_v52, %v400_v51  ;;  %v630_v4 = vadd.f32 %v629_v56, %v628_v59  ;;  %v681_v5 = vadd.f32 %v680_v63, %v679_v58 }
 0x113   :  { %v502_v0 = vadd.f32 %v905_v32, %v405_v53  ;;  %609 = vst.msk [vmem:[%s1309_s3 + $0x10] sm:$0xf] %vm604_vm2, %v809_v55  ;;  %v682_v1 = vsel %vm621_vm3, %v663_v57, 0.0 }
 0x114   :  { %v408_v6 = vadd.f32 %v860_v60, %v1166_v3  ;;  %v810_v7 = vpack.c.bf16 %v497_v62, %v497_v62  ;;  %v631_v10 = vsel %vm621_vm3, %v497_v62, 0.0  ;;  %v683_v14 = vadd.f32 %v682_v1, %v681_v5 }
 0x115   :  { %v811_v8 = vpack.c.bf16 %v502_v0, %v502_v0  ;;  %v665_v9 = vmul.f32 %v502_v0, %v502_v0  ;;  %v633_v11 = vsel %vm621_vm3, %v502_v0, 0.0  ;;  %v861_v12 = vpop.f32.mrb[16].mxu0  ;;  %v1208_v13 = vpop.f32.mrb[16].mxu1  ;;  %v632_v16 = vadd.f32 %v631_v10, %v630_v4 }
 0x116   :  { %v505_v15 = vadd.f32 %v906_v45, %v408_v6  ;;  %610 = vst.msk [vmem:[%s1309_s3 + $0x14] sm:$0xf] %vm604_vm2, %v810_v7  ;;  %v664_v17 = vmul.f32 %v497_v62, %v497_v62  ;;  %v862_v18 = vpop.f32.mrb[17].mxu0  ;;  %v509_v19 = vpop.f32.mrb[17].mxu1  ;;  %v440_v4 = vadd.f32 %v1161_v2, %v1166_v3 }
 0x117   :  { %611 = vst.msk [vmem:[%s1309_s3 + $0x18] sm:$0xf] %vm604_vm2, %v811_v8  ;;  %v686_v20 = vsel %vm621_vm3, %v665_v9, 0.0  ;;  %v863_v21 = vadd.f32 %v862_v18, %v861_v12  ;;  %v864_v22 = vpop.f32.mrb[18].mxu0  ;;  %v1219_v23 = vpop.f32.mrb[18].mxu1  ;;  %v634_v26 = vadd.f32 %v633_v11, %v632_v16  ;;  %v432_v8 = vadd.f32 %v1157_v54, %v1166_v3 }
 0x118   :  { %v812_v24 = vpack.c.bf16 %v505_v15, %v505_v15  ;;  %v666_v25 = vmul.f32 %v505_v15, %v505_v15  ;;  %v684_v27 = vsel %vm621_vm3, %v664_v17, 0.0  ;;  %v865_v28 = vpop.f32.mrb[19].mxu0  ;;  %v512_v29 = vpop.f32.mrb[19].mxu1  ;;  %v635_v33 = vsel %vm621_vm3, %v505_v15, 0.0 }
 0x119   :  { %v685_v30 = vadd.f32 %v684_v27, %v683_v14  ;;  %v866_v31 = vadd.f32 %v865_v28, %v864_v22  ;;  %v413_v32 = vadd.f32 %v863_v21, %v1166_v3  ;;  %v636_v34 = vadd.f32 %v635_v33, %v634_v26 }
 0x11a   :  { %612 = vst.msk [vmem:[%s1309_s3 + $0x1c] sm:$0xf] %vm604_vm2, %v812_v24  ;;  %v688_v35 = vsel %vm621_vm3, %v666_v25, 0.0 }
 0x11b   :  { %v687_v36 = vadd.f32 %v686_v20, %v685_v30  ;;  %v510_v37 = vadd.f32 %v509_v19, %v413_v32  ;;  %v416_v38 = vadd.f32 %v866_v31, %v1166_v3 }
 0x11d   :  { %v813_v41 = vpack.c.bf16 %v510_v37, %v510_v37  ;;  %v637_v42 = vsel %vm621_vm3, %v510_v37, 0.0  ;;  %v667_v43 = vmul.f32 %v510_v37, %v510_v37  ;;  %v689_v44 = vadd.f32 %v688_v35, %v687_v36  ;;  %v867_v45 = vpop.f32.mrb[20].mxu0  ;;  %v913_v46 = vpop.f32.mrb[20].mxu1 }
 0x11e   :  { %v638_v47 = vadd.f32 %v637_v42, %v636_v34  ;;  %v513_v48 = vadd.f32 %v512_v29, %v416_v38  ;;  %v534_v50 = vadd.f32 %v913_v46, %v437_v39  ;;  %v868_v51 = vpop.f32.mrb[21].mxu0  ;;  %v525_v52 = vpop.f32.mrb[21].mxu1 }
 0x11f   :  { %613 = vst.msk [vmem:[%s1309_s3 + $0x20] sm:$0xf] %vm604_vm2, %v813_v41  ;;  %v690_v61 = vsel %vm621_vm3, %v667_v43, 0.0  ;;  %v869_v49 = vadd.f32 %v868_v51, %v867_v45  ;;  %v526_v53 = vadd.f32 %v525_v52, %v429_v40  ;;  %v870_v55 = vpop.f32.mrb[22].mxu0  ;;  %v914_v56 = vpop.f32.mrb[22].mxu1 }
 0x120   :  { %v691_v57 = vadd.f32 %v690_v61, %v689_v44  ;;  %v814_v58 = vpack.c.bf16 %v513_v48, %v513_v48  ;;  %v639_v59 = vsel %vm621_vm3, %v513_v48, 0.0  ;;  %v668_v60 = vmul.f32 %v513_v48, %v513_v48  ;;  %v871_v62 = vpop.f32.mrb[23].mxu0  ;;  %v528_v63 = vpop.f32.mrb[23].mxu1 }
 0x121   :  { %v640_v0 = vadd.f32 %v639_v59, %v638_v47  ;;  %v819_v1 = vpack.c.bf16 %v534_v50, %v534_v50  ;;  %v421_v6 = vadd.f32 %v869_v49, %v1166_v3  ;;  %v817_v7 = vpack.c.bf16 %v526_v53, %v526_v53  ;;  %v723_v59 = vld [vmem:[%s1307_s5] sm:$0x1] }
 0x122   :  { %614 = vst.msk [vmem:[%s1309_s3 + $0x24] sm:$0xf] %vm604_vm2, %v814_v58  ;;  %v692_v5 = vsel %vm621_vm3, %v668_v60, 0.0  ;;  %v537_v2 = vadd.f32 %v914_v56, %v440_v4  ;;  %v872_v11 = vadd.f32 %v871_v62, %v870_v55  ;;  %v529_v12 = vadd.f32 %v528_v63, %v432_v8  ;;  %v719_v56 = vld [vmem:[%s1306_s4] sm:$0x1] }
 0x123   :  { %v693_v9 = vadd.f32 %v692_v5, %v691_v57  ;;  %619 = vst.msk [vmem:[%s1309_s3 + $0x38] sm:$0xf] %vm604_vm2, %v819_v1  ;;  %v518_v10 = vadd.f32 %v1208_v13, %v421_v6  ;;  %617 = vst.msk [vmem:[%s1309_s3 + $0x30] sm:$0xf] %vm604_vm2, %v817_v7  ;;  %v645_v27 = vsel %vm621_vm3, %v526_v53, 0.0  ;;  %v673_v31 = vmul.f32 %v534_v50, %v534_v50 }
 0x124   :  { %v820_v14 = vpack.c.bf16 %v537_v2, %v537_v2  ;;  %v424_v17 = vadd.f32 %v872_v11, %v1166_v3  ;;  %v818_v13 = vpack.c.bf16 %v529_v12, %v529_v12  ;;  %v671_v3 = vmul.f32 %v526_v53, %v526_v53 }
 0x125   :  { %v815_v15 = vpack.c.bf16 %v518_v10, %v518_v10  ;;  %v641_v54 = vsel %vm621_vm3, %v518_v10, 0.0  ;;  %v669_v16 = vmul.f32 %v518_v10, %v518_v10  ;;  %v672_v28 = vmul.f32 %v529_v12, %v529_v12 }
 0x126   :  { %v642_v18 = vadd.f32 %v641_v54, %v640_v0  ;;  %620 = vst.msk [vmem:[%s1309_s3 + $0x3c] sm:$0xf] %vm604_vm2, %v820_v14  ;;  %v521_v20 = vadd.f32 %v1219_v23, %v424_v17  ;;  %618 = vst.msk [vmem:[%s1309_s3 + $0x34] sm:$0xf] %vm604_vm2, %v818_v13  ;;  %v698_v32 = vsel %vm621_vm3, %v671_v3, 0.0  ;;  %v647_v33 = vsel %vm621_vm3, %v529_v12, 0.0 }
 0x127   :  { %615 = vst.msk [vmem:[%s1309_s3 + $0x28] sm:$0xf] %vm604_vm2, %v815_v15  ;;  %v694_v19 = vsel %vm621_vm3, %v669_v16, 0.0  ;;  %v649_v36 = vsel %vm621_vm3, %v534_v50, 0.0  ;;  %v674_v37 = vmul.f32 %v537_v2, %v537_v2  ;;  %v700_v38 = vsel %vm621_vm3, %v672_v28, 0.0 }
 0x128   :  { %v695_v21 = vadd.f32 %v694_v19, %v693_v9  ;;  %v816_v22 = vpack.c.bf16 %v521_v20, %v521_v20  ;;  %v643_v24 = vsel %vm621_vm3, %v521_v20, 0.0  ;;  %v670_v25 = vmul.f32 %v521_v20, %v521_v20 }
 0x129   :  { %v644_v26 = vadd.f32 %v643_v24, %v642_v18  ;;  %v702_v41 = vsel %vm621_vm3, %v673_v31, 0.0  ;;  %v651_v42 = vsel %vm621_vm3, %v537_v2, 0.0  ;;  %v704_v45 = vsel %vm621_vm3, %v674_v37, 0.0 }
 0x12a   :  { %616 = vst.msk [vmem:[%s1309_s3 + $0x2c] sm:$0xf] %vm604_vm2, %v816_v22  ;;  %v696_v23 = vsel %vm621_vm3, %v670_v25, 0.0 }
 0x12b   :  { %v646_v29 = vadd.f32 %v645_v27, %v644_v26  ;;  %v697_v30 = vadd.f32 %v696_v23, %v695_v21 }
 0x12d   :  { %v648_v34 = vadd.f32 %v647_v33, %v646_v29  ;;  %v699_v35 = vadd.f32 %v698_v32, %v697_v30 }
 0x12f   :  { %v650_v39 = vadd.f32 %v649_v36, %v648_v34  ;;  %v701_v40 = vadd.f32 %v700_v38, %v699_v35 }
 0x131   :  { %v652_v43 = vadd.f32 %v651_v42, %v650_v39  ;;  %v703_v44 = vadd.f32 %v702_v41, %v701_v40 }
 0x133   :  { %v653_v46 = vrot.slane %v652_v43, 4  ;;  %v705_v47 = vadd.f32 %v704_v45, %v703_v44 }
 0x135   :  { %v654_v48 = vadd.f32 %v653_v46, %v652_v43  ;;  %v706_v51 = vrot.slane %v705_v47, 4 }
 0x137   :  { %v655_v52 = vrot.slane %v654_v48, 2  ;;  %v707_v61 = vadd.f32 %v706_v51, %v705_v47 }
 0x139   :  { %v656_v50 = vadd.f32 %v655_v52, %v654_v48  ;;  %v708_v49 = vrot.slane %v707_v61, 2 }
 0x13b   :  { %v657_v53 = vrot.slane %v656_v50, 1  ;;  %v709_v55 = vadd.f32 %v708_v49, %v707_v61 }
 0x13d   :  { %v658_v57 = vadd.f32 %v657_v53, %v656_v50  ;;  %v710_v58 = vrot.slane %v709_v55, 1 }
 0x13f   :  { %v711_v60 = vadd.f32 %v710_v58, %v709_v55  ;;  %v720_v62 = vadd.f32 %v719_v56, %v658_v57 }
 0x141   :  { %722 = vst.msk [vmem:[%s1306_s4] sm:$0x1] %vm716_vm1, %v720_v62  ;;  %v724_v63 = vadd.f32 %v723_v59, %v711_v60 }
 0x143   :  { %725 = vst.msk [vmem:[%s1307_s5] sm:$0x1] %vm716_vm1, %v724_v63 }

// kernel: discriminator_forward.23
= control target key start
LH: loop header
LB: loop body
LE: loop exit
PB: predicated region body
PF: predicated region fallthrough
CT: control target
= control target key end

     0   :  { %vm321_vm0 = vcmask 261120   ;;  %vm715_vm1 = vcmask 253952   ;;  %v981_v42 = vmov 0.0   ;;  %vm604_vm2 = vcmask 257024   ;;  %s1303_s1 = inlined_call_operand.vmem [shape: bf16[288,32], index: 1, kind: input, shape index: {}]   ;;  %s1304_s0 = inlined_call_operand.vmem [shape: bf16[128,288], index: 0, kind: input, shape index: {}]   ;;  %s1305_s4 = inlined_call_operand.vmem [shape: f32[1,32], index: 4, kind: output, shape index: {1}]   ;;  %s1306_s5 = inlined_call_operand.vmem [shape: f32[1,32], index: 5, kind: output, shape index: {2}]   ;;  %s1307_s2 = inlined_call_operand.vmem [shape: f32[1,32], index: 2, kind: input, shape index: {}]   ;;  %s1308_s3 = inlined_call_operand.vmem [shape: bf16[128,32], index: 3, kind: output, shape index: {0}]  }
   0x1   :  { %v931_v0 = vld [vmem:[%s1303_s1 + $0x40] sm:$0xff]   ;;  %v933_v2 = vld [vmem:[%s1303_s1 + $0x48] sm:$0xff]   ;;  %v935_v4 = vld [vmem:[%s1303_s1 + $0x50] sm:$0xff]   ;;  %716 = vst.msk [vmem:[%s1305_s4] sm:$0x1] %vm715_vm1, %v981_v42 }
   0x2   :  { %v932_v1 = vld [vmem:[%s1303_s1] sm:$0xff]   ;;  %820 = vmatprep.subr.bf16.mxu0 %v931_v0  ;;  %914 = vmatprep.subr.bf16.mxu1 %v931_v0  ;;  %v934_v3 = vld [vmem:[%s1303_s1 + $0x8] sm:$0xff]   ;;  %v936_v5 = vld [vmem:[%s1303_s1 + $0x10] sm:$0xff]   ;;  %717 = vst.msk [vmem:[%s1306_s5] sm:$0x1] %vm715_vm1, %v981_v42 }
   0x3   :  { %821 = vmatpush3.bf16.msra.mxu0 %v932_v1  ;;  %922 = vmatpush3.bf16.msra.mxu1 %v932_v1  ;;  %v937_v6 = vld [vmem:[%s1303_s1 + $0x58] sm:$0xff]   ;;  %v939_v8 = vld [vmem:[%s1303_s1 + $0x60] sm:$0xff]   ;;  %v941_v10 = vld [vmem:[%s1303_s1 + $0x68] sm:$0xff]  }
   0x4   :  { %822 = vmatprep.subr.bf16.mxu0 %v933_v2  ;;  %915 = vmatprep.subr.bf16.mxu1 %v933_v2  ;;  %v938_v7 = vld [vmem:[%s1303_s1 + $0x18] sm:$0xff]   ;;  %v940_v9 = vld [vmem:[%s1303_s1 + $0x20] sm:$0xff]   ;;  %v942_v13 = vld [vmem:[%s1303_s1 + $0x28] sm:$0xff]  }
   0x5   :  { %v949_v11 = vld [vmem:[%s1304_s0 + $0x4] ss:$12 sps:$4 sm:$0xff]   ;;  %v952_v12 = vld [vmem:[%s1304_s0 + $0x94] ss:$12 sps:$4 sm:$0xff]   ;;  %v945_v16 = vld [vmem:[%s1303_s1 + $0x78] sm:$0xff]  }
   0x6   :  { %v943_v14 = vld [vmem:[%s1303_s1 + $0x70] sm:$0xff]   ;;  %378 = vmatprep.mubr.bf16.mxu0 %v949_v11  ;;  %426 = vmatprep.mubr.bf16.mxu1 %v952_v12  ;;  %v946_v17 = vld [vmem:[%s1303_s1 + $0x38] sm:$0xff]   ;;  %v947_v18 = vld [vmem:[%s1304_s0] ss:$12 sps:$4 sm:$0xff]  }
   0x7   :  { %823 = vmatpush3.bf16.msra.mxu0 %v934_v3  ;;  %923 = vmatpush3.bf16.msra.mxu1 %v934_v3  ;;  %v944_v15 = vld [vmem:[%s1303_s1 + $0x30] sm:$0xff]   ;;  %v957_v19 = vld [vmem:[%s1303_s1 + $0x80] sm:$0xff]   ;;  %v953_v21 = vld [vmem:[%s1304_s0 + $0x1c] ss:$12 sps:$4 sm:$0xff]  }
   0x8   :  { %824 = vmatprep.subr.bf16.mxu0 %v935_v4  ;;  %916 = vmatprep.subr.bf16.mxu1 %v935_v4  ;;  %v950_v20 = vld [vmem:[%s1304_s0 + $0x90] ss:$12 sps:$4 sm:$0xff]   ;;  %v955_v22 = vld [vmem:[%s1304_s0 + $0xac] ss:$12 sps:$4 sm:$0xff]   ;;  %v959_v25 = vld [vmem:[%s1304_s0 + $0xa8] ss:$12 sps:$4 sm:$0xff]  }
   0x9   :  { %v960_v23 = vld [vmem:[%s1303_s1 + $0x88] sm:$0xff]   ;;  %v958_v24 = vld [vmem:[%s1304_s0 + $0x18] ss:$12 sps:$4 sm:$0xff]   ;;  %v961_v26 = vld [vmem:[%s1304_s0 + $0x34] ss:$12 sps:$4 sm:$0xff]  }
   0xa   :  { %v963_v27 = vld [vmem:[%s1304_s0 + $0x8] ss:$12 sps:$4 sm:$0xff]   ;;  %v964_v28 = vld [vmem:[%s1304_s0 + $0x30] ss:$12 sps:$4 sm:$0xff]   ;;  %v965_v29 = vld [vmem:[%s1304_s0 + $0x20] ss:$12 sps:$4 sm:$0xff]  }
   0xb   :  { %825 = vmatpush3.bf16.msra.mxu0 %v936_v5  ;;  %924 = vmatpush3.bf16.msra.mxu1 %v936_v5  ;;  %v966_v30 = vld [vmem:[%s1304_s0 + $0x4c] ss:$12 sps:$4 sm:$0xff]   ;;  %v969_v32 = vld [vmem:[%s1304_s0 + $0x48] ss:$12 sps:$4 sm:$0xff]   ;;  %v970_v33 = vld [vmem:[%s1304_s0 + $0x50] ss:$12 sps:$4 sm:$0xff]  }
   0xc   :  { %826 = vmatprep.subr.bf16.mxu0 %v937_v6  ;;  %917 = vmatprep.subr.bf16.mxu1 %v937_v6  ;;  %v968_v31 = vld [vmem:[%s1304_s0 + $0x38] ss:$12 sps:$4 sm:$0xff]   ;;  %v973_v35 = vld [vmem:[%s1304_s0 + $0x68] ss:$12 sps:$4 sm:$0xff]   ;;  %v974_v36 = vld [vmem:[%s1304_s0 + $0x60] ss:$12 sps:$4 sm:$0xff]  }
   0xd   :  { %v971_v34 = vld [vmem:[%s1304_s0 + $0x64] ss:$12 sps:$4 sm:$0xff]   ;;  %v975_v37 = vld [vmem:[%s1304_s0 + $0x80] ss:$12 sps:$4 sm:$0xff]   ;;  %v976_v38 = vld [vmem:[%s1304_s0 + $0x7c] ss:$12 sps:$4 sm:$0xff]  }
   0xe   :  { %v978_v39 = vld [vmem:[%s1304_s0 + $0x98] ss:$12 sps:$4 sm:$0xff]   ;;  %v980_v41 = vld [vmem:[%s1304_s0 + $0xb0] ss:$12 sps:$4 sm:$0xff]   ;;  %v1165_v3 = vld [vmem:[%s1307_s2] ss:$0 sm:$0xff] }
   0xf   :  { %827 = vmatpush3.bf16.msra.mxu0 %v938_v7  ;;  %925 = vmatpush3.bf16.msra.mxu1 %v938_v7  ;;  %v979_v40 = vld [vmem:[%s1304_s0 + $0x78] ss:$12 sps:$4 sm:$0xff]  }
  0x10   :  { %828 = vmatprep.subr.bf16.mxu0 %v939_v8  ;;  %918 = vmatprep.subr.bf16.mxu1 %v939_v8 }
  0x13   :  { %829 = vmatpush3.bf16.msra.mxu0 %v940_v9  ;;  %926 = vmatpush3.bf16.msra.mxu1 %v940_v9 }
  0x14   :  { %830 = vmatprep.subr.bf16.mxu0 %v941_v10  ;;  %919 = vmatprep.subr.bf16.mxu1 %v941_v10 }
  0x17   :  { %831 = vmatpush3.bf16.msra.mxu0 %v942_v13  ;;  %927 = vmatpush3.bf16.msra.mxu1 %v942_v13 }
  0x18   :  { %832 = vmatprep.subr.bf16.mxu0 %v943_v14  ;;  %920 = vmatprep.subr.bf16.mxu1 %v943_v14 }
  0x1b   :  { %833 = vmatpush3.bf16.msra.mxu0 %v944_v15  ;;  %928 = vmatpush3.bf16.msra.mxu1 %v944_v15 }
  0x1c   :  { %834 = vmatprep.subr.bf16.mxu0 %v945_v16  ;;  %921 = vmatprep.subr.bf16.mxu1 %v945_v16 }
  0x1f   :  { %835 = vmatpush3.bf16.msra.mxu0 %v946_v17  ;;  %929 = vmatpush3.bf16.msra.mxu1 %v946_v17 }
  0x20   :  { %894 = vmatprep.subr.bf16.mxu1 %v957_v19 }
  0x22   :  { %379 = vmatmul.mubr.bf16.vlgmr.msra.gmra.mrb[0].mxu0 %v947_v18  ;;  %427 = vmatmul.mubr.bf16.vlgmr.msra.gmra.mrb[0].mxu1 %v950_v20 }
  0x23   :  { %386 = vmatprep.mubr.bf16.mxu0 %v953_v21  ;;  %434 = vmatprep.mubr.bf16.mxu1 %v955_v22 }
  0x24   :  { %895 = vmatpush3.bf16.msra.mxu1 %v957_v19 }
  0x25   :  { %896 = vmatprep.subr.bf16.mxu1 %v960_v23 }
  0x28   :  { %897 = vmatpush3.bf16.msra.mxu1 %v960_v23 }
  0x2a   :  { %387 = vmatmul.mubr.bf16.gmra.mrb[4].mxu0 %v958_v24  ;;  %435 = vmatmul.mubr.bf16.gmra.mrb[4].mxu1 %v959_v25 }
  0x2b   :  { %394 = vmatprep.mubr.bf16.mxu0 %v961_v26  ;;  %898 = vmatprep.mubr.msk.bf16.mxu1 %vm321_vm0, %v963_v27 }
  0x32   :  { %395 = vmatmul.mubr.bf16.gmra.mrb[8].mxu0 %v964_v28  ;;  %899 = vmatmul.mubr.msk.bf16.vlgmr.msra.gmra.mrb[8].mxu1 %vm321_vm0, %v965_v29 }
  0x33   :  { %402 = vmatprep.mubr.bf16.mxu0 %v966_v30  ;;  %902 = vmatprep.mubr.msk.bf16.mxu1 %vm321_vm0, %v968_v31 }
  0x3a   :  { %403 = vmatmul.mubr.bf16.gmra.mrb[12].mxu0 %v969_v32  ;;  %903 = vmatmul.mubr.msk.bf16.gmra.mrb[12].mxu1 %vm321_vm0, %v970_v33 }
  0x3b   :  { %410 = vmatprep.mubr.bf16.mxu0 %v971_v34  ;;  %906 = vmatprep.mubr.msk.bf16.mxu1 %vm321_vm0, %v973_v35 }
  0x42   :  { %411 = vmatmul.mubr.bf16.gmra.mrb[16].mxu0 %v974_v36  ;;  %907 = vmatmul.mubr.msk.bf16.gmra.mrb[16].mxu1 %vm321_vm0, %v975_v37 }
  0x43   :  { %418 = vmatprep.mubr.bf16.mxu0 %v976_v38  ;;  %910 = vmatprep.mubr.msk.bf16.mxu1 %vm321_vm0, %v978_v39 }
  0x4a   :  { %419 = vmatmul.mubr.bf16.gmra.mrb[20].mxu0 %v979_v40  ;;  %911 = vmatmul.mubr.msk.bf16.gmra.mrb[20].mxu1 %vm321_vm0, %v980_v41 }
  0xf5   :  { %v836_v43 = vpop.f32.mrb[0].mxu0  ;;  %v872_v44 = vpop.f32.mrb[0].mxu1 }
  0xf6   :  { %v837_v45 = vpop.f32.mrb[1].mxu0  ;;  %v873_v46 = vpop.f32.mrb[1].mxu1 }
  0xf7   :  { %v838_v47 = vadd.f32 %v837_v45, %v836_v43  ;;  %v839_v48 = vpop.f32.mrb[2].mxu0  ;;  %v1154_v49 = vadd.f32 %v873_v46, %v872_v44  ;;  %v875_v50 = vpop.f32.mrb[2].mxu1 }
  0xf8   :  { %v840_v51 = vpop.f32.mrb[3].mxu0  ;;  %v876_v52 = vpop.f32.mrb[3].mxu1 }
  0xf9   :  { %v841_v53 = vadd.f32 %v840_v51, %v839_v48  ;;  %v1156_v54 = vadd.f32 %v876_v52, %v875_v50  ;;  %v381_v7 = vadd.f32 %v838_v47, %v1165_v3 }
  0xfb   :  { %v384_v22 = vadd.f32 %v841_v53, %v1165_v3 }
  0xfd   :  { %v842_v55 = vpop.f32.mrb[4].mxu0  ;;  %v878_v56 = vpop.f32.mrb[4].mxu1 }
  0xfe   :  { %v843_v57 = vpop.f32.mrb[5].mxu0  ;;  %v879_v58 = vpop.f32.mrb[5].mxu1 }
  0xff   :  { %v844_v59 = vadd.f32 %v843_v57, %v842_v55  ;;  %v845_v60 = vpop.f32.mrb[6].mxu0  ;;  %v1158_v61 = vadd.f32 %v879_v58, %v878_v56  ;;  %v881_v62 = vpop.f32.mrb[6].mxu1 }
 0x100   :  { %v846_v63 = vpop.f32.mrb[7].mxu0  ;;  %v882_v0 = vpop.f32.mrb[7].mxu1 }
 0x101   :  { %v847_v1 = vadd.f32 %v846_v63, %v845_v60  ;;  %v1160_v2 = vadd.f32 %v882_v0, %v881_v62  ;;  %v389_v4 = vadd.f32 %v844_v59, %v1165_v3 }
 0x103   :  { %v392_v11 = vadd.f32 %v847_v1, %v1165_v3 }
 0x105   :  { %v848_v5 = vpop.f32.mrb[8].mxu0  ;;  %v900_v6 = vpop.f32.mrb[8].mxu1 }
 0x106   :  { %v486_v8 = vadd.f32 %v900_v6, %v389_v4  ;;  %v849_v9 = vpop.f32.mrb[9].mxu0  ;;  %v477_v10 = vpop.f32.mrb[9].mxu1 }
 0x107   :  { %v850_v12 = vadd.f32 %v849_v9, %v848_v5  ;;  %v478_v13 = vadd.f32 %v477_v10, %v381_v7  ;;  %v851_v14 = vpop.f32.mrb[10].mxu0  ;;  %v901_v15 = vpop.f32.mrb[10].mxu1 }
 0x108   :  { %v806_v16 = vpack.c.bf16 %v486_v8, %v486_v8  ;;  %v489_v17 = vadd.f32 %v901_v15, %v392_v11  ;;  %v852_v18 = vpop.f32.mrb[11].mxu0  ;;  %v480_v19 = vpop.f32.mrb[11].mxu1  ;;  %v660_v23 = vmul.f32 %v486_v8, %v486_v8  ;;  %v624_v34 = vsel %vm321_vm0, %v486_v8, 0.0 }
 0x109   :  { %v804_v20 = vpack.c.bf16 %v478_v13, %v478_v13  ;;  %v853_v21 = vadd.f32 %v852_v18, %v851_v14  ;;  %v658_v25 = vmul.f32 %v478_v13, %v478_v13  ;;  %v481_v26 = vadd.f32 %v480_v19, %v384_v22 }
 0x10a   :  { %607 = vst.msk [vmem:[%s1308_s3 + $0x8] sm:$0xf] %vm604_vm2, %v806_v16  ;;  %v807_v24 = vpack.c.bf16 %v489_v17, %v489_v17  ;;  %v621_v27 = vsel %vm321_vm0, %v478_v13, 0.0  ;;  %v397_v33 = vadd.f32 %v850_v12, %v1165_v3  ;;  %v677_v35 = vsel %vm321_vm0, %v660_v23, 0.0 }
 0x10b   :  { %605 = vst.msk [vmem:[%s1308_s3] sm:$0xf] %vm604_vm2, %v804_v20  ;;  %v805_v28 = vpack.c.bf16 %v481_v26, %v481_v26  ;;  %v622_v29 = vsel %vm321_vm0, %v481_v26, 0.0  ;;  %v659_v30 = vmul.f32 %v481_v26, %v481_v26  ;;  %v661_v36 = vmul.f32 %v489_v17, %v489_v17 }
 0x10c   :  { %608 = vst.msk [vmem:[%s1308_s3 + $0xc] sm:$0xf] %vm604_vm2, %v807_v24  ;;  %v623_v37 = vadd.f32 %v622_v29, %v621_v27  ;;  %v674_v40 = vsel %vm321_vm0, %v658_v25, 0.0  ;;  %v626_v46 = vsel %vm321_vm0, %v489_v17, 0.0  ;;  %v400_v51 = vadd.f32 %v853_v21, %v1165_v3 }
 0x10d   :  { %v854_v31 = vpop.f32.mrb[12].mxu0  ;;  %v904_v32 = vpop.f32.mrb[12].mxu1  ;;  %606 = vst.msk [vmem:[%s1308_s3 + $0x4] sm:$0xf] %vm604_vm2, %v805_v28  ;;  %v675_v41 = vsel %vm321_vm0, %v659_v30, 0.0  ;;  %v679_v63 = vsel %vm321_vm0, %v661_v36, 0.0 }
 0x10e   :  { %v855_v38 = vpop.f32.mrb[13].mxu0  ;;  %v493_v39 = vpop.f32.mrb[13].mxu1  ;;  %v625_v47 = vadd.f32 %v624_v34, %v623_v37  ;;  %v676_v48 = vadd.f32 %v675_v41, %v674_v40  ;;  %v429_v40 = vadd.f32 %v1154_v49, %v1165_v3 }
 0x10f   :  { %v856_v42 = vadd.f32 %v855_v38, %v854_v31  ;;  %v494_v43 = vadd.f32 %v493_v39, %v397_v33  ;;  %v857_v44 = vpop.f32.mrb[14].mxu0  ;;  %v905_v45 = vpop.f32.mrb[14].mxu1  ;;  %v437_v39 = vadd.f32 %v1158_v61, %v1165_v3 }
 0x110   :  { %v858_v50 = vpop.f32.mrb[15].mxu0  ;;  %v496_v52 = vpop.f32.mrb[15].mxu1  ;;  %v678_v58 = vadd.f32 %v677_v35, %v676_v48  ;;  %v627_v59 = vadd.f32 %v626_v46, %v625_v47 }
 0x111   :  { %v405_v53 = vadd.f32 %v856_v42, %v1165_v3  ;;  %v808_v55 = vpack.c.bf16 %v494_v43, %v494_v43  ;;  %v628_v56 = vsel %vm321_vm0, %v494_v43, 0.0  ;;  %v662_v57 = vmul.f32 %v494_v43, %v494_v43 }
 0x112   :  { %v859_v60 = vadd.f32 %v858_v50, %v857_v44  ;;  %v497_v62 = vadd.f32 %v496_v52, %v400_v51  ;;  %v629_v4 = vadd.f32 %v628_v56, %v627_v59  ;;  %v680_v5 = vadd.f32 %v679_v63, %v678_v58 }
 0x113   :  { %v502_v0 = vadd.f32 %v904_v32, %v405_v53  ;;  %609 = vst.msk [vmem:[%s1308_s3 + $0x10] sm:$0xf] %vm604_vm2, %v808_v55  ;;  %v681_v1 = vsel %vm321_vm0, %v662_v57, 0.0 }
 0x114   :  { %v408_v6 = vadd.f32 %v859_v60, %v1165_v3  ;;  %v809_v7 = vpack.c.bf16 %v497_v62, %v497_v62  ;;  %v630_v10 = vsel %vm321_vm0, %v497_v62, 0.0  ;;  %v682_v14 = vadd.f32 %v681_v1, %v680_v5 }
 0x115   :  { %v810_v8 = vpack.c.bf16 %v502_v0, %v502_v0  ;;  %v664_v9 = vmul.f32 %v502_v0, %v502_v0  ;;  %v632_v11 = vsel %vm321_vm0, %v502_v0, 0.0  ;;  %v860_v12 = vpop.f32.mrb[16].mxu0  ;;  %v1207_v13 = vpop.f32.mrb[16].mxu1  ;;  %v631_v16 = vadd.f32 %v630_v10, %v629_v4 }
 0x116   :  { %v505_v15 = vadd.f32 %v905_v45, %v408_v6  ;;  %610 = vst.msk [vmem:[%s1308_s3 + $0x14] sm:$0xf] %vm604_vm2, %v809_v7  ;;  %v663_v17 = vmul.f32 %v497_v62, %v497_v62  ;;  %v861_v18 = vpop.f32.mrb[17].mxu0  ;;  %v509_v19 = vpop.f32.mrb[17].mxu1  ;;  %v440_v4 = vadd.f32 %v1160_v2, %v1165_v3 }
 0x117   :  { %611 = vst.msk [vmem:[%s1308_s3 + $0x18] sm:$0xf] %vm604_vm2, %v810_v8  ;;  %v685_v20 = vsel %vm321_vm0, %v664_v9, 0.0  ;;  %v862_v21 = vadd.f32 %v861_v18, %v860_v12  ;;  %v863_v22 = vpop.f32.mrb[18].mxu0  ;;  %v1218_v23 = vpop.f32.mrb[18].mxu1  ;;  %v633_v26 = vadd.f32 %v632_v11, %v631_v16  ;;  %v432_v8 = vadd.f32 %v1156_v54, %v1165_v3 }
 0x118   :  { %v811_v24 = vpack.c.bf16 %v505_v15, %v505_v15  ;;  %v665_v25 = vmul.f32 %v505_v15, %v505_v15  ;;  %v683_v27 = vsel %vm321_vm0, %v663_v17, 0.0  ;;  %v864_v28 = vpop.f32.mrb[19].mxu0  ;;  %v512_v29 = vpop.f32.mrb[19].mxu1  ;;  %v634_v33 = vsel %vm321_vm0, %v505_v15, 0.0 }
 0x119   :  { %v684_v30 = vadd.f32 %v683_v27, %v682_v14  ;;  %v865_v31 = vadd.f32 %v864_v28, %v863_v22  ;;  %v413_v32 = vadd.f32 %v862_v21, %v1165_v3  ;;  %v635_v34 = vadd.f32 %v634_v33, %v633_v26 }
 0x11a   :  { %612 = vst.msk [vmem:[%s1308_s3 + $0x1c] sm:$0xf] %vm604_vm2, %v811_v24  ;;  %v687_v35 = vsel %vm321_vm0, %v665_v25, 0.0 }
 0x11b   :  { %v686_v36 = vadd.f32 %v685_v20, %v684_v30  ;;  %v510_v37 = vadd.f32 %v509_v19, %v413_v32  ;;  %v416_v38 = vadd.f32 %v865_v31, %v1165_v3 }
 0x11d   :  { %v812_v41 = vpack.c.bf16 %v510_v37, %v510_v37  ;;  %v636_v42 = vsel %vm321_vm0, %v510_v37, 0.0  ;;  %v666_v43 = vmul.f32 %v510_v37, %v510_v37  ;;  %v688_v44 = vadd.f32 %v687_v35, %v686_v36  ;;  %v866_v45 = vpop.f32.mrb[20].mxu0  ;;  %v912_v46 = vpop.f32.mrb[20].mxu1 }
 0x11e   :  { %v637_v47 = vadd.f32 %v636_v42, %v635_v34  ;;  %v513_v48 = vadd.f32 %v512_v29, %v416_v38  ;;  %v534_v50 = vadd.f32 %v912_v46, %v437_v39  ;;  %v867_v51 = vpop.f32.mrb[21].mxu0  ;;  %v525_v52 = vpop.f32.mrb[21].mxu1 }
 0x11f   :  { %613 = vst.msk [vmem:[%s1308_s3 + $0x20] sm:$0xf] %vm604_vm2, %v812_v41  ;;  %v689_v61 = vsel %vm321_vm0, %v666_v43, 0.0  ;;  %v868_v49 = vadd.f32 %v867_v51, %v866_v45  ;;  %v526_v53 = vadd.f32 %v525_v52, %v429_v40  ;;  %v869_v55 = vpop.f32.mrb[22].mxu0  ;;  %v913_v56 = vpop.f32.mrb[22].mxu1 }
 0x120   :  { %v690_v57 = vadd.f32 %v689_v61, %v688_v44  ;;  %v813_v58 = vpack.c.bf16 %v513_v48, %v513_v48  ;;  %v638_v59 = vsel %vm321_vm0, %v513_v48, 0.0  ;;  %v667_v60 = vmul.f32 %v513_v48, %v513_v48  ;;  %v870_v62 = vpop.f32.mrb[23].mxu0  ;;  %v528_v63 = vpop.f32.mrb[23].mxu1 }
 0x121   :  { %v639_v0 = vadd.f32 %v638_v59, %v637_v47  ;;  %v818_v1 = vpack.c.bf16 %v534_v50, %v534_v50  ;;  %v421_v6 = vadd.f32 %v868_v49, %v1165_v3  ;;  %v816_v7 = vpack.c.bf16 %v526_v53, %v526_v53  ;;  %v722_v59 = vld [vmem:[%s1306_s5] sm:$0x1] }
 0x122   :  { %614 = vst.msk [vmem:[%s1308_s3 + $0x24] sm:$0xf] %vm604_vm2, %v813_v58  ;;  %v691_v5 = vsel %vm321_vm0, %v667_v60, 0.0  ;;  %v537_v2 = vadd.f32 %v913_v56, %v440_v4  ;;  %v871_v11 = vadd.f32 %v870_v62, %v869_v55  ;;  %v529_v12 = vadd.f32 %v528_v63, %v432_v8  ;;  %v718_v56 = vld [vmem:[%s1305_s4] sm:$0x1] }
 0x123   :  { %v692_v9 = vadd.f32 %v691_v5, %v690_v57  ;;  %619 = vst.msk [vmem:[%s1308_s3 + $0x38] sm:$0xf] %vm604_vm2, %v818_v1  ;;  %v518_v10 = vadd.f32 %v1207_v13, %v421_v6  ;;  %617 = vst.msk [vmem:[%s1308_s3 + $0x30] sm:$0xf] %vm604_vm2, %v816_v7  ;;  %v644_v27 = vsel %vm321_vm0, %v526_v53, 0.0  ;;  %v672_v31 = vmul.f32 %v534_v50, %v534_v50 }
 0x124   :  { %v819_v14 = vpack.c.bf16 %v537_v2, %v537_v2  ;;  %v424_v17 = vadd.f32 %v871_v11, %v1165_v3  ;;  %v817_v13 = vpack.c.bf16 %v529_v12, %v529_v12  ;;  %v670_v3 = vmul.f32 %v526_v53, %v526_v53 }
 0x125   :  { %v814_v15 = vpack.c.bf16 %v518_v10, %v518_v10  ;;  %v640_v54 = vsel %vm321_vm0, %v518_v10, 0.0  ;;  %v668_v16 = vmul.f32 %v518_v10, %v518_v10  ;;  %v671_v28 = vmul.f32 %v529_v12, %v529_v12 }
 0x126   :  { %v641_v18 = vadd.f32 %v640_v54, %v639_v0  ;;  %620 = vst.msk [vmem:[%s1308_s3 + $0x3c] sm:$0xf] %vm604_vm2, %v819_v14  ;;  %v521_v20 = vadd.f32 %v1218_v23, %v424_v17  ;;  %618 = vst.msk [vmem:[%s1308_s3 + $0x34] sm:$0xf] %vm604_vm2, %v817_v13  ;;  %v697_v32 = vsel %vm321_vm0, %v670_v3, 0.0  ;;  %v646_v33 = vsel %vm321_vm0, %v529_v12, 0.0 }
 0x127   :  { %615 = vst.msk [vmem:[%s1308_s3 + $0x28] sm:$0xf] %vm604_vm2, %v814_v15  ;;  %v693_v19 = vsel %vm321_vm0, %v668_v16, 0.0  ;;  %v648_v36 = vsel %vm321_vm0, %v534_v50, 0.0  ;;  %v673_v37 = vmul.f32 %v537_v2, %v537_v2  ;;  %v699_v38 = vsel %vm321_vm0, %v671_v28, 0.0 }
 0x128   :  { %v694_v21 = vadd.f32 %v693_v19, %v692_v9  ;;  %v815_v22 = vpack.c.bf16 %v521_v20, %v521_v20  ;;  %v642_v24 = vsel %vm321_vm0, %v521_v20, 0.0  ;;  %v669_v25 = vmul.f32 %v521_v20, %v521_v20 }
 0x129   :  { %v643_v26 = vadd.f32 %v642_v24, %v641_v18  ;;  %v701_v41 = vsel %vm321_vm0, %v672_v31, 0.0  ;;  %v650_v42 = vsel %vm321_vm0, %v537_v2, 0.0  ;;  %v703_v45 = vsel %vm321_vm0, %v673_v37, 0.0 }
 0x12a   :  { %616 = vst.msk [vmem:[%s1308_s3 + $0x2c] sm:$0xf] %vm604_vm2, %v815_v22  ;;  %v695_v23 = vsel %vm321_vm0, %v669_v25, 0.0 }
 0x12b   :  { %v645_v29 = vadd.f32 %v644_v27, %v643_v26  ;;  %v696_v30 = vadd.f32 %v695_v23, %v694_v21 }
 0x12d   :  { %v647_v34 = vadd.f32 %v646_v33, %v645_v29  ;;  %v698_v35 = vadd.f32 %v697_v32, %v696_v30 }
 0x12f   :  { %v649_v39 = vadd.f32 %v648_v36, %v647_v34  ;;  %v700_v40 = vadd.f32 %v699_v38, %v698_v35 }
 0x131   :  { %v651_v43 = vadd.f32 %v650_v42, %v649_v39  ;;  %v702_v44 = vadd.f32 %v701_v41, %v700_v40 }
 0x133   :  { %v652_v46 = vrot.slane %v651_v43, 4  ;;  %v704_v47 = vadd.f32 %v703_v45, %v702_v44 }
 0x135   :  { %v653_v48 = vadd.f32 %v652_v46, %v651_v43  ;;  %v705_v51 = vrot.slane %v704_v47, 4 }
 0x137   :  { %v654_v52 = vrot.slane %v653_v48, 2  ;;  %v706_v61 = vadd.f32 %v705_v51, %v704_v47 }
 0x139   :  { %v655_v50 = vadd.f32 %v654_v52, %v653_v48  ;;  %v707_v49 = vrot.slane %v706_v61, 2 }
 0x13b   :  { %v656_v53 = vrot.slane %v655_v50, 1  ;;  %v708_v55 = vadd.f32 %v707_v49, %v706_v61 }
 0x13d   :  { %v657_v57 = vadd.f32 %v656_v53, %v655_v50  ;;  %v709_v58 = vrot.slane %v708_v55, 1 }
 0x13f   :  { %v710_v60 = vadd.f32 %v709_v58, %v708_v55  ;;  %v719_v62 = vadd.f32 %v718_v56, %v657_v57 }
 0x141   :  { %721 = vst.msk [vmem:[%s1305_s4] sm:$0x1] %vm715_vm1, %v719_v62  ;;  %v723_v63 = vadd.f32 %v722_v59, %v710_v60 }
 0x143   :  { %724 = vst.msk [vmem:[%s1306_s5] sm:$0x1] %vm715_vm1, %v723_v63 }

// kernel: discriminator_forward.24
= control target key start
LH: loop header
LB: loop body
LE: loop exit
PB: predicated region body
PF: predicated region fallthrough
CT: control target
= control target key end

     0   :  { %vm255_vm0 = vcmask 257024   ;;  %s575_s0 = inlined_call_operand.vmem [shape: bf16[128,32], index: 0, kind: input, shape index: {}]   ;;  %s576_s1 = inlined_call_operand.vmem [shape: f32[1,32], index: 1, kind: input, shape index: {}]   ;;  %s577_s2 = inlined_call_operand.vmem [shape: f32[1,32], index: 2, kind: input, shape index: {}]   ;;  %s578_s3 = inlined_call_operand.vmem [shape: bf16[128,32], index: 3, kind: input, shape index: {}]   ;;  %s579_s4 = inlined_call_operand.vmem [shape: bf16[128,32], index: 4, kind: output, shape index: {}]  }
   0x1   :  { %v311_v0 = vld [vmem:[%s575_s0] sm:$0xff]   ;;  %v374_v5 = vld [vmem:[%s575_s0 + $0x8] sm:$0xff]   ;;  %v375_v12 = vld [vmem:[%s575_s0 + $0x10] sm:$0xff]  }
   0x2   :  { %v419_v1 = vld [vmem:[%s576_s1] ss:$0 sm:$0xff]  ;;  %v312_v2 = vunpack.c.l.bf16 %v311_v0  ;;  %v313_v4 = vunpack.c.h.bf16 %v311_v0  ;;  %v381_v6 = vld [vmem:[%s578_s3 + $0x8] sm:$0xff]   ;;  %v316_v10 = vunpack.c.l.bf16 %v374_v5  ;;  %v382_v13 = vld [vmem:[%s578_s3 + $0x10] sm:$0xff]   ;;  %v317_v16 = vunpack.c.h.bf16 %v374_v5 }
   0x3   :  { %v343_v3 = vld [vmem:[%s578_s3] sm:$0xff]   ;;  %v348_v11 = vunpack.c.l.bf16 %v381_v6  ;;  %v349_v17 = vunpack.c.h.bf16 %v381_v6  ;;  %v446_v18 = vld [vmem:[%s575_s0 + $0x18] sm:$0xff]   ;;  %v320_v20 = vunpack.c.l.bf16 %v375_v12  ;;  %v352_v21 = vunpack.c.l.bf16 %v382_v13  ;;  %v378_v0 = vld [vmem:[%s575_s0 + $0x28] sm:$0xff]  }
   0x4   :  { %v433_v7 = vld [vmem:[%s577_s2] ss:$0 sm:$0xff]  ;;  %v344_v8 = vunpack.c.l.bf16 %v343_v3  ;;  %v345_v9 = vunpack.c.h.bf16 %v343_v3  ;;  %v56_v14 = vmul.f32 %v312_v2, %v419_v1  ;;  %v57_v15 = vmul.f32 %v313_v4, %v419_v1  ;;  %v452_v23 = vld [vmem:[%s578_s3 + $0x18] sm:$0xff]   ;;  %v385_v5 = vld [vmem:[%s578_s3 + $0x28] sm:$0xff]  }
   0x5   :  { %v58_v19 = vmul.f32 %v316_v10, %v419_v1  ;;  %v321_v22 = vunpack.c.h.bf16 %v375_v12  ;;  %v59_v26 = vmul.f32 %v317_v16, %v419_v1  ;;  %v353_v27 = vunpack.c.h.bf16 %v382_v13  ;;  %v377_v52 = vld [vmem:[%s575_s0 + $0x20] sm:$0xff]  }
   0x6   :  { %v79_v24 = vadd.f32 %v433_v7, %v56_v14  ;;  %v80_v25 = vadd.f32 %v433_v7, %v57_v15  ;;  %v60_v29 = vmul.f32 %v320_v20, %v419_v1  ;;  %v324_v31 = vunpack.c.l.bf16 %v446_v18  ;;  %v384_v63 = vld [vmem:[%s578_s3 + $0x20] sm:$0xff]   ;;  %v379_v15 = vld [vmem:[%s575_s0 + $0x30] sm:$0xff]  }
   0x7   :  { %v81_v28 = vadd.f32 %v433_v7, %v58_v19  ;;  %v61_v30 = vmul.f32 %v321_v22, %v419_v1  ;;  %v82_v34 = vadd.f32 %v433_v7, %v59_v26  ;;  %v356_v35 = vunpack.c.l.bf16 %v452_v23 }
   0x8   :  { %v127_v32 = vadd.f32 %v344_v8, %v79_v24  ;;  %v128_v33 = vadd.f32 %v345_v9, %v80_v25  ;;  %v83_v37 = vadd.f32 %v433_v7, %v60_v29  ;;  %v62_v39 = vmul.f32 %v324_v31, %v419_v1  ;;  %v386_v31 = vld [vmem:[%s578_s3 + $0x30] sm:$0xff]  }
   0x9   :  { %v129_v36 = vadd.f32 %v348_v11, %v81_v28  ;;  %v84_v38 = vadd.f32 %v433_v7, %v61_v30  ;;  %v130_v43 = vadd.f32 %v349_v17, %v82_v34  ;;  %v325_v58 = vunpack.c.h.bf16 %v446_v18 }
   0xa   :  { %vm143_vm1 = vcmp.ge.f32.partialorder %v127_v32, 0.0  ;;  %v159_v40 = vmul.f32 0.02, %v127_v32  ;;  %vm144_vm2 = vcmp.ge.f32.partialorder %v128_v33, 0.0  ;;  %v160_v41 = vmul.f32 0.02, %v128_v33 }
   0xb   :  { %vm145_vm3 = vcmp.ge.f32.partialorder %v129_v36, 0.0  ;;  %v161_v42 = vmul.f32 0.02, %v129_v36  ;;  %v131_v44 = vadd.f32 %v352_v21, %v83_v37  ;;  %v132_v47 = vadd.f32 %v353_v27, %v84_v38 }
   0xc   :  { %v175_v45 = vsel %vm143_vm1, %v127_v32, %v159_v40  ;;  %v176_v46 = vsel %vm144_vm2, %v128_v33, %v160_v41  ;;  %v85_v48 = vadd.f32 %v433_v7, %v62_v39  ;;  %vm146_vm4 = vcmp.ge.f32.partialorder %v130_v43, 0.0 }
   0xd   :  { %v294_v49 = vpack.c.bf16 %v175_v45, %v175_v45  ;;  %v295_v50 = vpack.c.bf16 %v176_v46, %v176_v46  ;;  %v177_v51 = vsel %vm145_vm3, %v129_v36, %v161_v42  ;;  %v162_v54 = vmul.f32 0.02, %v130_v43  ;;  %v380_v42 = vld [vmem:[%s575_s0 + $0x38] sm:$0xff]  }
   0xe   :  { %v296_v53 = vpack.c.bf16 %v177_v51, %v177_v51  ;;  %vm147_vm5 = vcmp.ge.f32.partialorder %v131_v44, 0.0  ;;  %v163_v55 = vmul.f32 0.02, %v131_v44  ;;  %vm148_vm6 = vcmp.ge.f32.partialorder %v132_v47, 0.0 }
   0xf   :  { %256 = vst.msk [vmem:[%s579_s4] sm:$0xf] %vm255_vm0, %v294_v49  ;;  %257 = vst.msk [vmem:[%s579_s4 + $0x4] sm:$0xf] %vm255_vm0, %v295_v50  ;;  %v164_v56 = vmul.f32 0.02, %v132_v47  ;;  %v133_v57 = vadd.f32 %v356_v35, %v85_v48  ;;  %v178_v59 = vsel %vm146_vm4, %v130_v43, %v162_v54  ;;  %v357_v61 = vunpack.c.h.bf16 %v452_v23 }
  0x10   :  { %258 = vst.msk [vmem:[%s579_s4 + $0x8] sm:$0xf] %vm255_vm0, %v296_v53  ;;  %v179_v60 = vsel %vm147_vm5, %v131_v44, %v163_v55  ;;  %v328_v62 = vunpack.c.l.bf16 %v377_v52  ;;  %v297_v2 = vpack.c.bf16 %v178_v59, %v178_v59  ;;  %v63_v9 = vmul.f32 %v325_v58, %v419_v1  ;;  %v387_v53 = vld [vmem:[%s578_s3 + $0x38] sm:$0xff]  }
  0x11   :  { %v298_v3 = vpack.c.bf16 %v179_v60, %v179_v60  ;;  %v180_v4 = vsel %vm148_vm6, %v132_v47, %v164_v56  ;;  %vm149_vm7 = vcmp.ge.f32.partialorder %v133_v57, 0.0  ;;  %v165_v8 = vmul.f32 0.02, %v133_v57 }
  0x12   :  { %v299_v6 = vpack.c.bf16 %v180_v4, %v180_v4  ;;  %v64_v10 = vmul.f32 %v328_v62, %v419_v1  ;;  %259 = vst.msk [vmem:[%s579_s4 + $0xc] sm:$0xf] %vm255_vm0, %v297_v2  ;;  %v360_v11 = vunpack.c.l.bf16 %v384_v63  ;;  %v329_v12 = vunpack.c.h.bf16 %v377_v52 }
  0x13   :  { %260 = vst.msk [vmem:[%s579_s4 + $0x10] sm:$0xf] %vm255_vm0, %v298_v3  ;;  %v361_v13 = vunpack.c.h.bf16 %v384_v63  ;;  %v332_v14 = vunpack.c.l.bf16 %v378_v0  ;;  %v181_v16 = vsel %vm149_vm7, %v133_v57, %v165_v8  ;;  %v86_v17 = vadd.f32 %v433_v7, %v63_v9 }
  0x14   :  { %261 = vst.msk [vmem:[%s579_s4 + $0x14] sm:$0xf] %vm255_vm0, %v299_v6  ;;  %v87_v18 = vadd.f32 %v433_v7, %v64_v10  ;;  %v364_v19 = vunpack.c.l.bf16 %v385_v5  ;;  %v300_v20 = vpack.c.bf16 %v181_v16, %v181_v16  ;;  %v65_v21 = vmul.f32 %v329_v12, %v419_v1 }
  0x15   :  { %v66_v22 = vmul.f32 %v332_v14, %v419_v1  ;;  %v333_v23 = vunpack.c.h.bf16 %v378_v0  ;;  %v134_v24 = vadd.f32 %v357_v61, %v86_v17  ;;  %v336_v26 = vunpack.c.l.bf16 %v379_v15 }
  0x16   :  { %v135_v25 = vadd.f32 %v360_v11, %v87_v18  ;;  %262 = vst.msk [vmem:[%s579_s4 + $0x18] sm:$0xf] %vm255_vm0, %v300_v20  ;;  %v88_v27 = vadd.f32 %v433_v7, %v65_v21  ;;  %v365_v30 = vunpack.c.h.bf16 %v385_v5  ;;  %v368_v40 = vunpack.c.l.bf16 %v386_v31 }
  0x17   :  { %v89_v28 = vadd.f32 %v433_v7, %v66_v22  ;;  %v67_v29 = vmul.f32 %v333_v23, %v419_v1  ;;  %vm150_vm8 = vcmp.ge.f32.partialorder %v134_v24, 0.0  ;;  %v166_v32 = vmul.f32 0.02, %v134_v24 }
  0x18   :  { %vm151_vm9 = vcmp.ge.f32.partialorder %v135_v25, 0.0  ;;  %v167_v33 = vmul.f32 0.02, %v135_v25  ;;  %v136_v34 = vadd.f32 %v361_v13, %v88_v27  ;;  %v68_v37 = vmul.f32 %v336_v26, %v419_v1 }
  0x19   :  { %v137_v35 = vadd.f32 %v364_v19, %v89_v28  ;;  %v90_v36 = vadd.f32 %v433_v7, %v67_v29  ;;  %v182_v38 = vsel %vm150_vm8, %v134_v24, %v166_v32  ;;  %v337_v41 = vunpack.c.h.bf16 %v379_v15 }
  0x1a   :  { %v183_v39 = vsel %vm151_vm9, %v135_v25, %v167_v33  ;;  %v301_v43 = vpack.c.bf16 %v182_v38, %v182_v38  ;;  %vm152_vm10 = vcmp.ge.f32.partialorder %v136_v34, 0.0  ;;  %v168_v45 = vmul.f32 0.02, %v136_v34 }
  0x1b   :  { %v302_v44 = vpack.c.bf16 %v183_v39, %v183_v39  ;;  %vm153_vm11 = vcmp.ge.f32.partialorder %v137_v35, 0.0  ;;  %v169_v46 = vmul.f32 0.02, %v137_v35  ;;  %v138_v47 = vadd.f32 %v365_v30, %v90_v36 }
  0x1c   :  { %v91_v48 = vadd.f32 %v433_v7, %v68_v37  ;;  %263 = vst.msk [vmem:[%s579_s4 + $0x1c] sm:$0xf] %vm255_vm0, %v301_v43  ;;  %v184_v49 = vsel %vm152_vm10, %v136_v34, %v168_v45  ;;  %v69_v50 = vmul.f32 %v337_v41, %v419_v1  ;;  %v369_v51 = vunpack.c.h.bf16 %v386_v31 }
  0x1d   :  { %264 = vst.msk [vmem:[%s579_s4 + $0x20] sm:$0xf] %vm255_vm0, %v302_v44  ;;  %v340_v52 = vunpack.c.l.bf16 %v380_v42  ;;  %v303_v54 = vpack.c.bf16 %v184_v49, %v184_v49  ;;  %v185_v55 = vsel %vm153_vm11, %v137_v35, %v169_v46  ;;  %vm154_vm12 = vcmp.ge.f32.partialorder %v138_v47, 0.0 }
  0x1e   :  { %v170_v56 = vmul.f32 0.02, %v138_v47  ;;  %v304_v57 = vpack.c.bf16 %v185_v55, %v185_v55  ;;  %v139_v58 = vadd.f32 %v368_v40, %v91_v48  ;;  %v92_v59 = vadd.f32 %v433_v7, %v69_v50 }
  0x1f   :  { %v70_v60 = vmul.f32 %v340_v52, %v419_v1  ;;  %265 = vst.msk [vmem:[%s579_s4 + $0x24] sm:$0xf] %vm255_vm0, %v303_v54  ;;  %v372_v62 = vunpack.c.l.bf16 %v387_v53  ;;  %v341_v63 = vunpack.c.h.bf16 %v380_v42  ;;  %v373_v6 = vunpack.c.h.bf16 %v387_v53 }
  0x20   :  { %v186_v61 = vsel %vm154_vm12, %v138_v47, %v170_v56  ;;  %266 = vst.msk [vmem:[%s579_s4 + $0x28] sm:$0xf] %vm255_vm0, %v304_v57  ;;  %vm155_vm13 = vcmp.ge.f32.partialorder %v139_v58, 0.0  ;;  %v171_v2 = vmul.f32 0.02, %v139_v58  ;;  %v140_v3 = vadd.f32 %v369_v51, %v92_v59 }
  0x21   :  { %v305_v0 = vpack.c.bf16 %v186_v61, %v186_v61  ;;  %v93_v4 = vadd.f32 %v433_v7, %v70_v60  ;;  %v71_v5 = vmul.f32 %v341_v63, %v419_v1 }
  0x22   :  { %v187_v8 = vsel %vm155_vm13, %v139_v58, %v171_v2  ;;  %vm156_vm14 = vcmp.ge.f32.partialorder %v140_v3, 0.0  ;;  %v172_v9 = vmul.f32 0.02, %v140_v3 }
  0x23   :  { %267 = vst.msk [vmem:[%s579_s4 + $0x2c] sm:$0xf] %vm255_vm0, %v305_v0  ;;  %v306_v10 = vpack.c.bf16 %v187_v8, %v187_v8  ;;  %v141_v11 = vadd.f32 %v372_v62, %v93_v4  ;;  %v94_v12 = vadd.f32 %v433_v7, %v71_v5 }
  0x24   :  { %v188_v13 = vsel %vm156_vm14, %v140_v3, %v172_v9 }
  0x25   :  { %268 = vst.msk [vmem:[%s579_s4 + $0x30] sm:$0xf] %vm255_vm0, %v306_v10  ;;  %v307_v1 = vpack.c.bf16 %v188_v13, %v188_v13  ;;  %vm157_vm15 = vcmp.ge.f32.partialorder %v141_v11, 0.0  ;;  %v173_v14 = vmul.f32 0.02, %v141_v11  ;;  %v142_v15 = vadd.f32 %v373_v6, %v94_v12 }
  0x27   :  { %269 = vst.msk [vmem:[%s579_s4 + $0x34] sm:$0xf] %vm255_vm0, %v307_v1  ;;  %v189_v16 = vsel %vm157_vm15, %v141_v11, %v173_v14  ;;  %vm158_vm1 = vcmp.ge.f32.partialorder %v142_v15, 0.0  ;;  %v174_v17 = vmul.f32 0.02, %v142_v15 }
  0x28   :  { %v308_v18 = vpack.c.bf16 %v189_v16, %v189_v16 }
  0x29   :  { %v190_v7 = vsel %vm158_vm1, %v142_v15, %v174_v17 }
  0x2a   :  { %270 = vst.msk [vmem:[%s579_s4 + $0x38] sm:$0xf] %vm255_vm0, %v308_v18  ;;  %v309_v19 = vpack.c.bf16 %v190_v7, %v190_v7 }
  0x2c   :  { %271 = vst.msk [vmem:[%s579_s4 + $0x3c] sm:$0xf] %vm255_vm0, %v309_v19 }

// kernel: discriminator_forward.26
= control target key start
LH: loop header
LB: loop body
LE: loop exit
PB: predicated region body
PF: predicated region fallthrough
CT: control target
= control target key end

     0   :  { %vm72_vm4 = vcmask 519168   ;;  %s144_s0 = inlined_call_operand.vmem [shape: bf16[32,64], index: 0, kind: input, shape index: {}]   ;;  %s145_s1 = inlined_call_operand.vmem [shape: f32[1,64], index: 1, kind: input, shape index: {}]   ;;  %s146_s2 = inlined_call_operand.vmem [shape: f32[1,64], index: 2, kind: input, shape index: {}]   ;;  %s147_s3 = inlined_call_operand.vmem [shape: bf16[32,64], index: 3, kind: output, shape index: {}]  }
   0x1   :  { %v92_v0 = vld [vmem:[%s144_s0] sm:$0xff]   ;;  %v99_v4 = vld [vmem:[%s144_s0 + $0x8] sm:$0xff]  }
   0x2   :  { %v81_v1 = vld [vmem:[%s145_s1] ss:$0 sm:$0xff]  ;;  %v93_v2 = vunpack.c.l.bf16 %v92_v0  ;;  %v94_v3 = vunpack.c.h.bf16 %v92_v0  ;;  %v97_v6 = vunpack.c.l.bf16 %v99_v4  ;;  %v98_v7 = vunpack.c.h.bf16 %v99_v4 }
   0x3   :  { %v82_v5 = vld [vmem:[%s146_s2] ss:$0 sm:$0xff] }
   0x4   :  { %v29_v8 = vmul.f32 %v93_v2, %v81_v1  ;;  %v30_v9 = vmul.f32 %v94_v3, %v81_v1  ;;  %v31_v10 = vmul.f32 %v97_v6, %v81_v1  ;;  %v32_v11 = vmul.f32 %v98_v7, %v81_v1 }
   0x6   :  { %v40_v12 = vadd.f32 %v82_v5, %v29_v8  ;;  %v41_v13 = vadd.f32 %v82_v5, %v30_v9  ;;  %v42_v14 = vadd.f32 %v82_v5, %v31_v10  ;;  %v43_v15 = vadd.f32 %v82_v5, %v32_v11 }
   0x8   :  { %vm44_vm0 = vcmp.ge.f32.partialorder %v40_v12, 0.0  ;;  %v48_v16 = vmul.f32 0.02, %v40_v12  ;;  %vm45_vm1 = vcmp.ge.f32.partialorder %v41_v13, 0.0  ;;  %v49_v17 = vmul.f32 0.02, %v41_v13 }
   0x9   :  { %vm46_vm2 = vcmp.ge.f32.partialorder %v42_v14, 0.0  ;;  %v50_v18 = vmul.f32 0.02, %v42_v14  ;;  %vm47_vm3 = vcmp.ge.f32.partialorder %v43_v15, 0.0  ;;  %v51_v19 = vmul.f32 0.02, %v43_v15 }
   0xa   :  { %v52_v20 = vsel %vm44_vm0, %v40_v12, %v48_v16  ;;  %v53_v21 = vsel %vm45_vm1, %v41_v13, %v49_v17 }
   0xb   :  { %v87_v22 = vpack.c.bf16 %v52_v20, %v52_v20  ;;  %v88_v23 = vpack.c.bf16 %v53_v21, %v53_v21  ;;  %v54_v24 = vsel %vm46_vm2, %v42_v14, %v50_v18  ;;  %v55_v25 = vsel %vm47_vm3, %v43_v15, %v51_v19 }
   0xc   :  { %v89_v26 = vpack.c.bf16 %v54_v24, %v54_v24  ;;  %v90_v27 = vpack.c.bf16 %v55_v25, %v55_v25 }
   0xd   :  { %73 = vst.msk [vmem:[%s147_s3] sm:$0xf] %vm72_vm4, %v87_v22  ;;  %74 = vst.msk [vmem:[%s147_s3 + $0x4] sm:$0xf] %vm72_vm4, %v88_v23 }
   0xe   :  { %75 = vst.msk [vmem:[%s147_s3 + $0x8] sm:$0xf] %vm72_vm4, %v89_v26  ;;  %76 = vst.msk [vmem:[%s147_s3 + $0xc] sm:$0xf] %vm72_vm4, %v90_v27 }

// kernel: discriminator_forward.25
= control target key start
LH: loop header
LB: loop body
LE: loop exit
PB: predicated region body
PF: predicated region fallthrough
CT: control target
= control target key end

     0   :  { %vm483_vm0 = vcmask 516096   ;;  %v655_v40 = vmov 0.0   ;;  %vm443_vm1 = vcmask 519168   ;;  %vm448_vm2 = vcmask 523264   ;;  %s855_s1 = inlined_call_operand.vmem [shape: bf16[512,64], index: 1, kind: input, shape index: {}]   ;;  %s856_s0 = inlined_call_operand.vmem [shape: bf16[32,512], index: 0, kind: input, shape index: {}]   ;;  %s857_s4 = inlined_call_operand.vmem [shape: f32[1,64], index: 4, kind: output, shape index: {1}]   ;;  %s858_s5 = inlined_call_operand.vmem [shape: f32[1,64], index: 5, kind: output, shape index: {2}]   ;;  %s859_s2 = inlined_call_operand.vmem [shape: f32[1,64], index: 2, kind: input, shape index: {}]   ;;  %s860_s3 = inlined_call_operand.vmem [shape: bf16[32,64], index: 3, kind: output, shape index: {0}]  }
   0x1   :  { %v611_v0 = vld [vmem:[%s855_s1 + $0x40] sm:$0xff]   ;;  %v615_v4 = vld [vmem:[%s855_s1 + $0x48] sm:$0xff]   ;;  %v619_v8 = vld [vmem:[%s855_s1 + $0x50] sm:$0xff]   ;;  %484 = vst.msk [vmem:[%s857_s4] sm:$0x1] %vm483_vm0, %v655_v40 }
   0x2   :  { %v612_v1 = vld [vmem:[%s855_s1 + $0xc0] sm:$0xff]   ;;  %554 = vmatprep.subr.bf16.mxu0 %v611_v0  ;;  %v616_v5 = vld [vmem:[%s855_s1 + $0xc8] sm:$0xff]   ;;  %v620_v9 = vld [vmem:[%s855_s1 + $0xd0] sm:$0xff]   ;;  %485 = vst.msk [vmem:[%s858_s5] sm:$0x1] %vm483_vm0, %v655_v40 }
   0x3   :  { %v613_v2 = vld [vmem:[%s855_s1] sm:$0xff]   ;;  %582 = vmatprep.subr.bf16.mxu1 %v612_v1  ;;  %v617_v6 = vld [vmem:[%s855_s1 + $0x8] sm:$0xff]   ;;  %v621_v10 = vld [vmem:[%s855_s1 + $0x10] sm:$0xff]  }
   0x4   :  { %v614_v3 = vld [vmem:[%s855_s1 + $0x80] sm:$0xff]   ;;  %555 = vmatpush3.bf16.msra.mxu0 %v613_v2  ;;  %v618_v7 = vld [vmem:[%s855_s1 + $0x88] sm:$0xff]   ;;  %v622_v11 = vld [vmem:[%s855_s1 + $0x90] sm:$0xff]  }
   0x5   :  { %583 = vmatpush3.bf16.msra.mxu1 %v614_v3  ;;  %556 = vmatprep.subr.bf16.mxu0 %v615_v4  ;;  %v623_v12 = vld [vmem:[%s855_s1 + $0x58] sm:$0xff]   ;;  %v627_v16 = vld [vmem:[%s855_s1 + $0x60] sm:$0xff]   ;;  %v631_v20 = vld [vmem:[%s855_s1 + $0x68] sm:$0xff]  }
   0x6   :  { %584 = vmatprep.subr.bf16.mxu1 %v616_v5  ;;  %v624_v13 = vld [vmem:[%s855_s1 + $0xd8] sm:$0xff]   ;;  %v628_v17 = vld [vmem:[%s855_s1 + $0xe0] sm:$0xff]   ;;  %v632_v21 = vld [vmem:[%s855_s1 + $0xe8] sm:$0xff]  }
   0x7   :  { %v625_v14 = vld [vmem:[%s855_s1 + $0x18] sm:$0xff]   ;;  %v629_v18 = vld [vmem:[%s855_s1 + $0x20] sm:$0xff]   ;;  %v633_v22 = vld [vmem:[%s855_s1 + $0x28] sm:$0xff]  }
   0x8   :  { %557 = vmatpush3.bf16.msra.mxu0 %v617_v6  ;;  %v626_v15 = vld [vmem:[%s855_s1 + $0x98] sm:$0xff]   ;;  %v630_v19 = vld [vmem:[%s855_s1 + $0xa0] sm:$0xff]   ;;  %v634_v23 = vld [vmem:[%s855_s1 + $0xa8] sm:$0xff]  }
   0x9   :  { %585 = vmatpush3.bf16.msra.mxu1 %v618_v7  ;;  %558 = vmatprep.subr.bf16.mxu0 %v619_v8  ;;  %v635_v24 = vld [vmem:[%s855_s1 + $0x70] sm:$0xff]   ;;  %v639_v28 = vld [vmem:[%s855_s1 + $0x78] sm:$0xff]   ;;  %v505_v43 = vld [vmem:[%s859_s2] ss:$0 sm:$0xff] }
   0xa   :  { %586 = vmatprep.subr.bf16.mxu1 %v620_v9  ;;  %v636_v25 = vld [vmem:[%s855_s1 + $0xf0] sm:$0xff]   ;;  %v640_v29 = vld [vmem:[%s855_s1 + $0xf8] sm:$0xff]  }
   0xb   :  { %v637_v26 = vld [vmem:[%s855_s1 + $0x30] sm:$0xff]   ;;  %v641_v30 = vld [vmem:[%s855_s1 + $0x38] sm:$0xff]  }
   0xc   :  { %559 = vmatpush3.bf16.msra.mxu0 %v621_v10  ;;  %v638_v27 = vld [vmem:[%s855_s1 + $0xb0] sm:$0xff]   ;;  %v642_v31 = vld [vmem:[%s855_s1 + $0xb8] sm:$0xff]  }
   0xd   :  { %587 = vmatpush3.bf16.msra.mxu1 %v622_v11  ;;  %560 = vmatprep.subr.bf16.mxu0 %v623_v12  ;;  %v643_v32 = vld [vmem:[%s856_s0] ss:$16 sps:$4 sm:$0xff]   ;;  %v645_v33 = vld [vmem:[%s856_s0 + $0x4] ss:$16 sps:$4 sm:$0xff]   ;;  %v646_v34 = vld [vmem:[%s856_s0 + $0x8] ss:$16 sps:$4 sm:$0xff]  }
   0xe   :  { %588 = vmatprep.subr.bf16.mxu1 %v624_v13  ;;  %v648_v35 = vld [vmem:[%s856_s0 + $0xc] ss:$16 sps:$4 sm:$0xff]   ;;  %361 = vmatprep.mubr.bf16.mxu0 %v645_v33  ;;  %v649_v36 = vld [vmem:[%s856_s0 + $0x24] ss:$16 sps:$4 sm:$0xff]   ;;  %v653_v38 = vld [vmem:[%s856_s0 + $0x20] ss:$16 sps:$4 sm:$0xff]  }
   0xf   :  { %410 = vmatprep.mubr.bf16.mxu1 %v648_v35  ;;  %v651_v37 = vld [vmem:[%s856_s0 + $0x2c] ss:$16 sps:$4 sm:$0xff]   ;;  %v654_v39 = vld [vmem:[%s856_s0 + $0x28] ss:$16 sps:$4 sm:$0xff]  }
  0x10   :  { %561 = vmatpush3.bf16.msra.mxu0 %v625_v14 }
  0x11   :  { %589 = vmatpush3.bf16.msra.mxu1 %v626_v15  ;;  %562 = vmatprep.subr.bf16.mxu0 %v627_v16 }
  0x12   :  { %590 = vmatprep.subr.bf16.mxu1 %v628_v17 }
  0x14   :  { %563 = vmatpush3.bf16.msra.mxu0 %v629_v18 }
  0x15   :  { %591 = vmatpush3.bf16.msra.mxu1 %v630_v19  ;;  %564 = vmatprep.subr.bf16.mxu0 %v631_v20 }
  0x16   :  { %592 = vmatprep.subr.bf16.mxu1 %v632_v21 }
  0x18   :  { %565 = vmatpush3.bf16.msra.mxu0 %v633_v22 }
  0x19   :  { %593 = vmatpush3.bf16.msra.mxu1 %v634_v23  ;;  %566 = vmatprep.subr.bf16.mxu0 %v635_v24 }
  0x1a   :  { %594 = vmatprep.subr.bf16.mxu1 %v636_v25 }
  0x1c   :  { %567 = vmatpush3.bf16.msra.mxu0 %v637_v26 }
  0x1d   :  { %595 = vmatpush3.bf16.msra.mxu1 %v638_v27  ;;  %568 = vmatprep.subr.bf16.mxu0 %v639_v28 }
  0x1e   :  { %596 = vmatprep.subr.bf16.mxu1 %v640_v29 }
  0x20   :  { %569 = vmatpush3.bf16.msra.mxu0 %v641_v30 }
  0x21   :  { %597 = vmatpush3.bf16.msra.mxu1 %v642_v31 }
  0x23   :  { %362 = vmatmul.mubr.bf16.vlgmr.msra.gmra.mrb[0].mxu0 %v643_v32 }
  0x24   :  { %411 = vmatmul.mubr.bf16.vlgmr.msra.gmra.mrb[0].mxu1 %v646_v34  ;;  %369 = vmatprep.mubr.bf16.mxu0 %v649_v36 }
  0x25   :  { %418 = vmatprep.mubr.bf16.mxu1 %v651_v37 }
  0x2b   :  { %370 = vmatmul.mubr.bf16.gmra.mrb[4].mxu0 %v653_v38 }
  0x2c   :  { %419 = vmatmul.mubr.bf16.gmra.mrb[4].mxu1 %v654_v39 }
  0xf6   :  { %v570_v41 = vpop.f32.mrb[0].mxu0 }
  0xf7   :  { %v598_v42 = vpop.f32.mrb[0].mxu1  ;;  %v571_v44 = vpop.f32.mrb[1].mxu0 }
  0xf8   :  { %v572_v45 = vadd.f32 %v571_v44, %v570_v41  ;;  %v599_v46 = vpop.f32.mrb[1].mxu1  ;;  %v573_v47 = vpop.f32.mrb[2].mxu0  ;;  %v486_v41 = vld [vmem:[%s857_s4] sm:$0x1] }
  0xf9   :  { %v600_v48 = vadd.f32 %v599_v46, %v598_v42  ;;  %v601_v49 = vpop.f32.mrb[2].mxu1  ;;  %v574_v50 = vpop.f32.mrb[3].mxu0  ;;  %v490_v44 = vld [vmem:[%s858_s5] sm:$0x1] }
  0xfa   :  { %v364_v51 = vadd.f32 %v572_v45, %v505_v43  ;;  %v575_v52 = vadd.f32 %v574_v50, %v573_v47  ;;  %v602_v53 = vpop.f32.mrb[3].mxu1 }
  0xfb   :  { %v603_v54 = vadd.f32 %v602_v53, %v601_v49 }
  0xfc   :  { %v413_v55 = vadd.f32 %v600_v48, %v364_v51  ;;  %v367_v56 = vadd.f32 %v575_v52, %v505_v43 }
  0xfe   :  { %v550_v57 = vpack.c.bf16 %v413_v55, %v413_v55  ;;  %v462_v58 = vmul.f32 %v413_v55, %v413_v55  ;;  %v416_v59 = vadd.f32 %v603_v54, %v367_v56  ;;  %v576_v60 = vpop.f32.mrb[4].mxu0  ;;  %v449_v63 = vsel %vm448_vm2, %v413_v55, 0.0 }
  0xff   :  { %v604_v61 = vpop.f32.mrb[4].mxu1  ;;  %v577_v62 = vpop.f32.mrb[5].mxu0 }
 0x100   :  { %444 = vst.msk [vmem:[%s860_s3] sm:$0xf] %vm443_vm1, %v550_v57  ;;  %v551_v0 = vpack.c.bf16 %v416_v59, %v416_v59  ;;  %v450_v1 = vsel %vm448_vm2, %v416_v59, 0.0  ;;  %v463_v2 = vmul.f32 %v416_v59, %v416_v59  ;;  %v605_v3 = vpop.f32.mrb[5].mxu1  ;;  %v579_v4 = vpop.f32.mrb[6].mxu0  ;;  %v578_v6 = vadd.f32 %v577_v62, %v576_v60 }
 0x101   :  { %v451_v5 = vadd.f32 %v450_v1, %v449_v63  ;;  %v606_v7 = vadd.f32 %v605_v3, %v604_v61  ;;  %v607_v8 = vpop.f32.mrb[6].mxu1  ;;  %v580_v9 = vpop.f32.mrb[7].mxu0  ;;  %v466_v10 = vsel %vm448_vm2, %v462_v58, 0.0 }
 0x102   :  { %445 = vst.msk [vmem:[%s860_s3 + $0x4] sm:$0xf] %vm443_vm1, %v551_v0  ;;  %v467_v11 = vsel %vm448_vm2, %v463_v2, 0.0  ;;  %v581_v12 = vadd.f32 %v580_v9, %v579_v4  ;;  %v608_v13 = vpop.f32.mrb[7].mxu1  ;;  %v372_v15 = vadd.f32 %v578_v6, %v505_v43 }
 0x103   :  { %v468_v14 = vadd.f32 %v467_v11, %v466_v10  ;;  %v609_v16 = vadd.f32 %v608_v13, %v607_v8 }
 0x104   :  { %v375_v17 = vadd.f32 %v581_v12, %v505_v43  ;;  %v421_v18 = vadd.f32 %v606_v7, %v372_v15 }
 0x106   :  { %v424_v19 = vadd.f32 %v609_v16, %v375_v17  ;;  %v552_v20 = vpack.c.bf16 %v421_v18, %v421_v18  ;;  %v452_v21 = vsel %vm448_vm2, %v421_v18, 0.0  ;;  %v464_v22 = vmul.f32 %v421_v18, %v421_v18 }
 0x107   :  { %v453_v23 = vadd.f32 %v452_v21, %v451_v5 }
 0x108   :  { %v553_v24 = vpack.c.bf16 %v424_v19, %v424_v19  ;;  %v454_v25 = vsel %vm448_vm2, %v424_v19, 0.0  ;;  %v465_v26 = vmul.f32 %v424_v19, %v424_v19  ;;  %446 = vst.msk [vmem:[%s860_s3 + $0x8] sm:$0xf] %vm443_vm1, %v552_v20  ;;  %v469_v27 = vsel %vm448_vm2, %v464_v22, 0.0 }
 0x109   :  { %v470_v28 = vadd.f32 %v469_v27, %v468_v14  ;;  %v455_v29 = vadd.f32 %v454_v25, %v453_v23 }
 0x10a   :  { %447 = vst.msk [vmem:[%s860_s3 + $0xc] sm:$0xf] %vm443_vm1, %v553_v24  ;;  %v471_v30 = vsel %vm448_vm2, %v465_v26, 0.0 }
 0x10b   :  { %v456_v31 = vrot.slane %v455_v29, 4  ;;  %v472_v32 = vadd.f32 %v471_v30, %v470_v28 }
 0x10d   :  { %v457_v33 = vadd.f32 %v456_v31, %v455_v29  ;;  %v473_v34 = vrot.slane %v472_v32, 4 }
 0x10f   :  { %v458_v35 = vrot.slane %v457_v33, 2  ;;  %v474_v36 = vadd.f32 %v473_v34, %v472_v32 }
 0x111   :  { %v459_v37 = vadd.f32 %v458_v35, %v457_v33  ;;  %v475_v38 = vrot.slane %v474_v36, 2 }
 0x113   :  { %v460_v39 = vrot.slane %v459_v37, 1  ;;  %v476_v40 = vadd.f32 %v475_v38, %v474_v36 }
 0x115   :  { %v461_v42 = vadd.f32 %v460_v39, %v459_v37  ;;  %v477_v43 = vrot.slane %v476_v40, 1 }
 0x117   :  { %v478_v45 = vadd.f32 %v477_v43, %v476_v40  ;;  %v487_v46 = vadd.f32 %v486_v41, %v461_v42 }
 0x119   :  { %489 = vst.msk [vmem:[%s857_s4] sm:$0x1] %vm483_vm0, %v487_v46  ;;  %v491_v47 = vadd.f32 %v490_v44, %v478_v45 }
 0x11b   :  { %492 = vst.msk [vmem:[%s858_s5] sm:$0x1] %vm483_vm0, %v491_v47 }

// kernel: discriminator_forward.27
= control target key start
LH: loop header
LB: loop body
LE: loop exit
PB: predicated region body
PF: predicated region fallthrough
CT: control target
= control target key end

     0   :  { %vm375_vm0 = vcmask 523264   ;;  %v788_v46 = vmov 0.0   ;;  %s984_s1 = inlined_call_operand.vmem [shape: bf16[576,128], index: 1, kind: input, shape index: {}]   ;;  %s985_s0 = inlined_call_operand.vmem [shape: bf16[32,576], index: 0, kind: input, shape index: {}]   ;;  %s986_s4 = inlined_call_operand.vmem [shape: f32[1,128], index: 4, kind: output, shape index: {1}]   ;;  %s987_s5 = inlined_call_operand.vmem [shape: f32[1,128], index: 5, kind: output, shape index: {2}]   ;;  %s988_s2 = inlined_call_operand.vmem [shape: f32[1,128], index: 2, kind: input, shape index: {}]   ;;  %s989_s3 = inlined_call_operand.vmem [shape: bf16[32,128], index: 3, kind: output, shape index: {0}]  }
   0x1   :  { %v738_v0 = vld [vmem:[%s984_s1 + $0x40] sm:$0xff]   ;;  %v742_v4 = vld [vmem:[%s984_s1 + $0x48] sm:$0xff]   ;;  %v746_v8 = vld [vmem:[%s984_s1 + $0x50] sm:$0xff]   ;;  %575 = vst [vmem:[%s986_s4] sm:$0x1] %v788_v46 }
   0x2   :  { %v739_v1 = vld [vmem:[%s984_s1] sm:$0xff]   ;;  %663 = vmatprep.subr.bf16.mxu0 %v738_v0  ;;  %v743_v5 = vld [vmem:[%s984_s1 + $0x8] sm:$0xff]   ;;  %v747_v9 = vld [vmem:[%s984_s1 + $0x10] sm:$0xff]   ;;  %576 = vst [vmem:[%s987_s5] sm:$0x1] %v788_v46 }
   0x3   :  { %v740_v2 = vld [vmem:[%s984_s1 + $0xc0] sm:$0xff]   ;;  %664 = vmatpush3.bf16.msra.mxu0 %v739_v1  ;;  %v744_v6 = vld [vmem:[%s984_s1 + $0xc8] sm:$0xff]   ;;  %v748_v10 = vld [vmem:[%s984_s1 + $0xd0] sm:$0xff]  }
   0x4   :  { %v741_v3 = vld [vmem:[%s984_s1 + $0x80] sm:$0xff]   ;;  %691 = vmatprep.subr.bf16.mxu1 %v740_v2  ;;  %665 = vmatprep.subr.bf16.mxu0 %v742_v4  ;;  %v745_v7 = vld [vmem:[%s984_s1 + $0x88] sm:$0xff]   ;;  %v749_v11 = vld [vmem:[%s984_s1 + $0x90] sm:$0xff]  }
   0x5   :  { %692 = vmatpush3.bf16.msra.mxu1 %v741_v3  ;;  %v750_v12 = vld [vmem:[%s984_s1 + $0x58] sm:$0xff]   ;;  %v754_v16 = vld [vmem:[%s984_s1 + $0x60] sm:$0xff]   ;;  %v758_v20 = vld [vmem:[%s984_s1 + $0x68] sm:$0xff]  }
   0x6   :  { %693 = vmatprep.subr.bf16.mxu1 %v744_v6  ;;  %v751_v13 = vld [vmem:[%s984_s1 + $0x18] sm:$0xff]   ;;  %v755_v17 = vld [vmem:[%s984_s1 + $0x20] sm:$0xff]   ;;  %v759_v21 = vld [vmem:[%s984_s1 + $0x28] sm:$0xff]  }
   0x7   :  { %666 = vmatpush3.bf16.msra.mxu0 %v743_v5  ;;  %v752_v14 = vld [vmem:[%s984_s1 + $0xd8] sm:$0xff]   ;;  %v756_v18 = vld [vmem:[%s984_s1 + $0xe0] sm:$0xff]   ;;  %v760_v22 = vld [vmem:[%s984_s1 + $0xe8] sm:$0xff]  }
   0x8   :  { %667 = vmatprep.subr.bf16.mxu0 %v746_v8  ;;  %v753_v15 = vld [vmem:[%s984_s1 + $0x98] sm:$0xff]   ;;  %v757_v19 = vld [vmem:[%s984_s1 + $0xa0] sm:$0xff]   ;;  %v761_v23 = vld [vmem:[%s984_s1 + $0xa8] sm:$0xff]  }
   0x9   :  { %694 = vmatpush3.bf16.msra.mxu1 %v745_v7  ;;  %v762_v24 = vld [vmem:[%s984_s1 + $0x70] sm:$0xff]   ;;  %v766_v28 = vld [vmem:[%s984_s1 + $0x78] sm:$0xff]   ;;  %v773_v34 = vld [vmem:[%s984_s1 + $0x100] sm:$0xff]  }
   0xa   :  { %695 = vmatprep.subr.bf16.mxu1 %v748_v10  ;;  %v763_v25 = vld [vmem:[%s984_s1 + $0x30] sm:$0xff]   ;;  %v767_v29 = vld [vmem:[%s984_s1 + $0x38] sm:$0xff]   ;;  %v776_v36 = vld [vmem:[%s985_s0 + $0xc] ss:$20 sps:$4 sm:$0xff]  }
   0xb   :  { %668 = vmatpush3.bf16.msra.mxu0 %v747_v9  ;;  %v764_v26 = vld [vmem:[%s984_s1 + $0xf0] sm:$0xff]   ;;  %v768_v30 = vld [vmem:[%s984_s1 + $0xf8] sm:$0xff]   ;;  %v777_v37 = vld [vmem:[%s984_s1 + $0x108] sm:$0xff]   ;;  %463 = vmatprep.mubr.bf16.mxu1 %v776_v36 }
   0xc   :  { %669 = vmatprep.subr.bf16.mxu0 %v750_v12  ;;  %v765_v27 = vld [vmem:[%s984_s1 + $0xb0] sm:$0xff]   ;;  %v771_v32 = vld [vmem:[%s985_s0 + $0x4] ss:$20 sps:$4 sm:$0xff]   ;;  %v774_v35 = vld [vmem:[%s985_s0 + $0x8] ss:$20 sps:$4 sm:$0xff]  }
   0xd   :  { %696 = vmatpush3.bf16.msra.mxu1 %v749_v11  ;;  %v769_v31 = vld [vmem:[%s985_s0] ss:$20 sps:$4 sm:$0xff]   ;;  %v772_v33 = vld [vmem:[%s984_s1 + $0xb8] sm:$0xff]   ;;  %414 = vmatprep.mubr.bf16.mxu0 %v771_v32  ;;  %v784_v42 = vld [vmem:[%s985_s0 + $0x30] ss:$20 sps:$4 sm:$0xff]  }
   0xe   :  { %697 = vmatprep.subr.bf16.mxu1 %v752_v14  ;;  %v778_v38 = vld [vmem:[%s985_s0 + $0x2c] ss:$20 sps:$4 sm:$0xff]   ;;  %v780_v39 = vld [vmem:[%s985_s0 + $0x28] ss:$20 sps:$4 sm:$0xff]   ;;  %v781_v40 = vld [vmem:[%s984_s1 + $0x110] sm:$0xff]  }
   0xf   :  { %670 = vmatpush3.bf16.msra.mxu0 %v751_v13  ;;  %v782_v41 = vld [vmem:[%s985_s0 + $0x34] ss:$20 sps:$4 sm:$0xff]   ;;  %v785_v43 = vld [vmem:[%s984_s1 + $0x118] sm:$0xff]   ;;  %v786_v44 = vld [vmem:[%s985_s0 + $0x10] ss:$20 sps:$4 sm:$0xff]  }
  0x10   :  { %671 = vmatprep.subr.bf16.mxu0 %v754_v16  ;;  %v787_v45 = vld [vmem:[%s985_s0 + $0x38] ss:$20 sps:$4 sm:$0xff]   ;;  %v595_v48 = vld [vmem:[%s988_s2] ss:$0 sm:$0xff] }
  0x11   :  { %698 = vmatpush3.bf16.msra.mxu1 %v753_v15 }
  0x12   :  { %699 = vmatprep.subr.bf16.mxu1 %v756_v18 }
  0x13   :  { %672 = vmatpush3.bf16.msra.mxu0 %v755_v17 }
  0x14   :  { %673 = vmatprep.subr.bf16.mxu0 %v758_v20 }
  0x15   :  { %700 = vmatpush3.bf16.msra.mxu1 %v757_v19 }
  0x16   :  { %701 = vmatprep.subr.bf16.mxu1 %v760_v22 }
  0x17   :  { %674 = vmatpush3.bf16.msra.mxu0 %v759_v21 }
  0x18   :  { %675 = vmatprep.subr.bf16.mxu0 %v762_v24 }
  0x19   :  { %702 = vmatpush3.bf16.msra.mxu1 %v761_v23 }
  0x1a   :  { %703 = vmatprep.subr.bf16.mxu1 %v764_v26 }
  0x1b   :  { %676 = vmatpush3.bf16.msra.mxu0 %v763_v25 }
  0x1c   :  { %677 = vmatprep.subr.bf16.mxu0 %v766_v28 }
  0x1d   :  { %704 = vmatpush3.bf16.msra.mxu1 %v765_v27 }
  0x1e   :  { %705 = vmatprep.subr.bf16.mxu1 %v768_v30 }
  0x1f   :  { %678 = vmatpush3.bf16.msra.mxu0 %v767_v29 }
  0x20   :  { %725 = vmatprep.subr.bf16.mxu0 %v773_v34 }
  0x21   :  { %706 = vmatpush3.bf16.msra.mxu1 %v772_v33 }
  0x22   :  { %415 = vmatmul.mubr.bf16.vlgmr.msra.gmra.mrb[0].mxu0 %v769_v31 }
  0x23   :  { %726 = vmatpush3.bf16.msra.mxu0 %v773_v34  ;;  %422 = vmatprep.mubr.bf16.mxu0 %v778_v38 }
  0x24   :  { %464 = vmatmul.mubr.bf16.vlgmr.msra.gmra.mrb[0].mxu1 %v774_v35  ;;  %727 = vmatprep.subr.bf16.mxu0 %v777_v37 }
  0x25   :  { %471 = vmatprep.mubr.bf16.mxu1 %v782_v41 }
  0x27   :  { %728 = vmatpush3.bf16.msra.mxu0 %v777_v37 }
  0x28   :  { %729 = vmatprep.subr.bf16.mxu0 %v781_v40 }
  0x2a   :  { %423 = vmatmul.mubr.bf16.gmra.mrb[4].mxu0 %v780_v39 }
  0x2b   :  { %733 = vmatprep.mubr.msk.bf16.mxu0 %vm375_vm0, %v786_v44  ;;  %730 = vmatpush3.bf16.msra.mxu0 %v781_v40 }
  0x2c   :  { %472 = vmatmul.mubr.bf16.gmra.mrb[4].mxu1 %v784_v42  ;;  %731 = vmatprep.subr.bf16.mxu0 %v785_v43 }
  0x2f   :  { %732 = vmatpush3.bf16.msra.mxu0 %v785_v43 }
  0x32   :  { %734 = vmatmul.mubr.msk.bf16.vlgmr.msra.gmra.mrb[8].mxu0 %vm375_vm0, %v787_v45  ;;  %v577_v45 = vld [vmem:[%s986_s4] sm:$0x1] }
  0xf5   :  { %v679_v47 = vpop.f32.mrb[0].mxu0 }
  0xf6   :  { %v680_v49 = vpop.f32.mrb[1].mxu0 }
  0xf7   :  { %v681_v50 = vadd.f32 %v680_v49, %v679_v47  ;;  %v682_v51 = vpop.f32.mrb[2].mxu0  ;;  %v707_v52 = vpop.f32.mrb[0].mxu1 }
  0xf8   :  { %v683_v53 = vpop.f32.mrb[3].mxu0  ;;  %v708_v56 = vpop.f32.mrb[1].mxu1 }
  0xf9   :  { %v417_v54 = vadd.f32 %v681_v50, %v595_v48  ;;  %v684_v55 = vadd.f32 %v683_v53, %v682_v51  ;;  %v709_v57 = vadd.f32 %v708_v56, %v707_v52  ;;  %v710_v58 = vpop.f32.mrb[2].mxu1 }
  0xfa   :  { %v711_v60 = vpop.f32.mrb[3].mxu1 }
  0xfb   :  { %v420_v59 = vadd.f32 %v684_v55, %v595_v48  ;;  %v712_v61 = vadd.f32 %v711_v60, %v710_v58  ;;  %v466_v62 = vadd.f32 %v709_v57, %v417_v54 }
  0xfd   :  { %v685_v63 = vpop.f32.mrb[4].mxu0  ;;  %v469_v1 = vadd.f32 %v712_v61, %v420_v59 }
  0xfe   :  { %v686_v0 = vpop.f32.mrb[5].mxu0 }
  0xff   :  { %v687_v2 = vadd.f32 %v686_v0, %v685_v63  ;;  %v688_v3 = vpop.f32.mrb[6].mxu0  ;;  %v713_v4 = vpop.f32.mrb[4].mxu1 }
 0x100   :  { %v689_v5 = vpop.f32.mrb[7].mxu0  ;;  %v714_v8 = vpop.f32.mrb[5].mxu1 }
 0x101   :  { %v425_v6 = vadd.f32 %v687_v2, %v595_v48  ;;  %v690_v7 = vadd.f32 %v689_v5, %v688_v3  ;;  %v715_v9 = vadd.f32 %v714_v8, %v713_v4  ;;  %v716_v10 = vpop.f32.mrb[6].mxu1 }
 0x102   :  { %v717_v12 = vpop.f32.mrb[7].mxu1 }
 0x103   :  { %v428_v11 = vadd.f32 %v690_v7, %v595_v48  ;;  %v718_v13 = vadd.f32 %v717_v12, %v716_v10  ;;  %v474_v14 = vadd.f32 %v715_v9, %v425_v6  ;;  %v580_v48 = vld [vmem:[%s987_s5] sm:$0x1] }
 0x105   :  { %v735_v15 = vpop.f32.mrb[8].mxu0  ;;  %v477_v16 = vadd.f32 %v718_v13, %v428_v11 }
 0x106   :  { %v523_v17 = vadd.f32 %v735_v15, %v474_v14  ;;  %v514_v18 = vpop.f32.mrb[9].mxu0 }
 0x107   :  { %v515_v19 = vadd.f32 %v514_v18, %v466_v62  ;;  %v736_v20 = vpop.f32.mrb[10].mxu0 }
 0x108   :  { %v526_v21 = vadd.f32 %v736_v20, %v477_v16  ;;  %v517_v22 = vpop.f32.mrb[11].mxu0  ;;  %v560_v29 = vmul.f32 %v523_v17, %v523_v17 }
 0x109   :  { %v518_v23 = vadd.f32 %v517_v22, %v469_v1  ;;  %v558_v25 = vmul.f32 %v515_v19, %v515_v19 }
 0x10a   :  { %v660_v24 = vpack.c.bf16 %v526_v21, %v523_v17  ;;  %v561_v32 = vmul.f32 %v526_v21, %v526_v21 }
 0x10b   :  { %v655_v26 = vpack.c.bf16 %v518_v23, %v515_v19  ;;  %v549_v27 = vadd.f32 %v518_v23, %v515_v19  ;;  %v559_v28 = vmul.f32 %v518_v23, %v518_v23 }
 0x10c   :  { %662 = vst [vmem:[%s989_s3 + $0x8] sm:$0xff] %v660_v24  }
 0x10d   :  { %656 = vst [vmem:[%s989_s3] sm:$0xff] %v655_v26   ;;  %v550_v30 = vadd.f32 %v549_v27, %v523_v17  ;;  %v562_v31 = vadd.f32 %v559_v28, %v558_v25 }
 0x10f   :  { %v551_v33 = vadd.f32 %v550_v30, %v526_v21  ;;  %v563_v34 = vadd.f32 %v562_v31, %v560_v29 }
 0x111   :  { %v552_v35 = vrot.slane %v551_v33, 4  ;;  %v564_v36 = vadd.f32 %v563_v34, %v561_v32 }
 0x113   :  { %v553_v37 = vadd.f32 %v552_v35, %v551_v33  ;;  %v565_v38 = vrot.slane %v564_v36, 4 }
 0x115   :  { %v554_v39 = vrot.slane %v553_v37, 2  ;;  %v566_v40 = vadd.f32 %v565_v38, %v564_v36 }
 0x117   :  { %v555_v41 = vadd.f32 %v554_v39, %v553_v37  ;;  %v567_v42 = vrot.slane %v566_v40, 2 }
 0x119   :  { %v556_v43 = vrot.slane %v555_v41, 1  ;;  %v568_v44 = vadd.f32 %v567_v42, %v566_v40 }
 0x11b   :  { %v557_v46 = vadd.f32 %v556_v43, %v555_v41  ;;  %v569_v47 = vrot.slane %v568_v44, 1 }
 0x11d   :  { %v570_v49 = vadd.f32 %v569_v47, %v568_v44  ;;  %v578_v50 = vadd.f32 %v577_v45, %v557_v46 }
 0x11f   :  { %579 = vst [vmem:[%s986_s4] sm:$0x1] %v578_v50  ;;  %v581_v51 = vadd.f32 %v580_v48, %v570_v49 }
 0x121   :  { %582 = vst [vmem:[%s987_s5] sm:$0x1] %v581_v51 }

// kernel: discriminator_forward.30
= control target key start
LH: loop header
LB: loop body
LE: loop exit
PB: predicated region body
PF: predicated region fallthrough
CT: control target
= control target key end

     0   :  { %vm87_vm3 = vcmask 519168   ;;  %s179_s0 = inlined_call_operand.vmem [shape: bf16[32,64], index: 0, kind: input, shape index: {}]   ;;  %s180_s1 = inlined_call_operand.vmem [shape: f32[1,64], index: 1, kind: input, shape index: {}]   ;;  %s181_s2 = inlined_call_operand.vmem [shape: f32[1,64], index: 2, kind: input, shape index: {}]   ;;  %s182_s3 = inlined_call_operand.vmem [shape: bf16[32,64], index: 3, kind: input, shape index: {}]   ;;  %s183_s4 = inlined_call_operand.vmem [shape: bf16[32,64], index: 4, kind: output, shape index: {}]  }
   0x1   :  { %v107_v0 = vld [vmem:[%s179_s0] sm:$0xff]   ;;  %v122_v5 = vld [vmem:[%s179_s0 + $0x8] sm:$0xff]  }
   0x2   :  { %v96_v1 = vld [vmem:[%s180_s1] ss:$0 sm:$0xff]  ;;  %v108_v2 = vunpack.c.l.bf16 %v107_v0  ;;  %v109_v4 = vunpack.c.h.bf16 %v107_v0  ;;  %v123_v6 = vld [vmem:[%s182_s3 + $0x8] sm:$0xff]   ;;  %v112_v9 = vunpack.c.l.bf16 %v122_v5  ;;  %v113_v13 = vunpack.c.h.bf16 %v122_v5 }
   0x3   :  { %v115_v3 = vld [vmem:[%s182_s3] sm:$0xff]   ;;  %v120_v15 = vunpack.c.l.bf16 %v123_v6  ;;  %v121_v20 = vunpack.c.h.bf16 %v123_v6 }
   0x4   :  { %v97_v7 = vld [vmem:[%s181_s2] ss:$0 sm:$0xff]  ;;  %v116_v8 = vunpack.c.l.bf16 %v115_v3  ;;  %v32_v10 = vmul.f32 %v108_v2, %v96_v1  ;;  %v33_v11 = vmul.f32 %v109_v4, %v96_v1  ;;  %v117_v12 = vunpack.c.h.bf16 %v115_v3 }
   0x5   :  { %v34_v14 = vmul.f32 %v112_v9, %v96_v1  ;;  %v35_v18 = vmul.f32 %v113_v13, %v96_v1 }
   0x6   :  { %v43_v16 = vadd.f32 %v97_v7, %v32_v10  ;;  %v44_v17 = vadd.f32 %v97_v7, %v33_v11 }
   0x7   :  { %v45_v19 = vadd.f32 %v97_v7, %v34_v14  ;;  %v46_v23 = vadd.f32 %v97_v7, %v35_v18 }
   0x8   :  { %v55_v21 = vadd.f32 %v116_v8, %v43_v16  ;;  %v56_v22 = vadd.f32 %v117_v12, %v44_v17 }
   0x9   :  { %v57_v24 = vadd.f32 %v120_v15, %v45_v19  ;;  %v58_v28 = vadd.f32 %v121_v20, %v46_v23 }
   0xa   :  { %vm59_vm0 = vcmp.ge.f32.partialorder %v55_v21, 0.0  ;;  %v63_v25 = vmul.f32 0.02, %v55_v21  ;;  %vm60_vm1 = vcmp.ge.f32.partialorder %v56_v22, 0.0  ;;  %v64_v26 = vmul.f32 0.02, %v56_v22 }
   0xb   :  { %vm61_vm2 = vcmp.ge.f32.partialorder %v57_v24, 0.0  ;;  %v65_v27 = vmul.f32 0.02, %v57_v24  ;;  %vm62_vm4 = vcmp.ge.f32.partialorder %v58_v28, 0.0  ;;  %v66_v35 = vmul.f32 0.02, %v58_v28 }
   0xc   :  { %v67_v29 = vsel %vm59_vm0, %v55_v21, %v63_v25  ;;  %v68_v30 = vsel %vm60_vm1, %v56_v22, %v64_v26 }
   0xd   :  { %v102_v31 = vpack.c.bf16 %v67_v29, %v67_v29  ;;  %v103_v32 = vpack.c.bf16 %v68_v30, %v68_v30  ;;  %v69_v33 = vsel %vm61_vm2, %v57_v24, %v65_v27  ;;  %v70_v36 = vsel %vm62_vm4, %v58_v28, %v66_v35 }
   0xe   :  { %v104_v34 = vpack.c.bf16 %v69_v33, %v69_v33  ;;  %v105_v37 = vpack.c.bf16 %v70_v36, %v70_v36 }
   0xf   :  { %88 = vst.msk [vmem:[%s183_s4] sm:$0xf] %vm87_vm3, %v102_v31  ;;  %89 = vst.msk [vmem:[%s183_s4 + $0x4] sm:$0xf] %vm87_vm3, %v103_v32 }
  0x10   :  { %90 = vst.msk [vmem:[%s183_s4 + $0x8] sm:$0xf] %vm87_vm3, %v104_v34  ;;  %91 = vst.msk [vmem:[%s183_s4 + $0xc] sm:$0xf] %vm87_vm3, %v105_v37 }

// kernel: discriminator_forward.29
= control target key start
LH: loop header
LB: loop body
LE: loop exit
PB: predicated region body
PF: predicated region fallthrough
CT: control target
= control target key end

     0   :  { %vm375_vm0 = vcmask 523264   ;;  %vm584_vm1 = vcmask 516096   ;;  %v788_v46 = vmov 0.0   ;;  %vm545_vm2 = vcmask 519168   ;;  %s1008_s1 = inlined_call_operand.vmem [shape: bf16[576,64], index: 1, kind: input, shape index: {}]   ;;  %s1009_s0 = inlined_call_operand.vmem [shape: bf16[32,576], index: 0, kind: input, shape index: {}]   ;;  %s1010_s4 = inlined_call_operand.vmem [shape: f32[1,64], index: 4, kind: output, shape index: {1}]   ;;  %s1011_s5 = inlined_call_operand.vmem [shape: f32[1,64], index: 5, kind: output, shape index: {2}]   ;;  %s1012_s2 = inlined_call_operand.vmem [shape: f32[1,64], index: 2, kind: input, shape index: {}]   ;;  %s1013_s3 = inlined_call_operand.vmem [shape: bf16[32,64], index: 3, kind: output, shape index: {0}]  }
   0x1   :  { %v738_v0 = vld [vmem:[%s1008_s1 + $0x40] sm:$0xff]   ;;  %v742_v4 = vld [vmem:[%s1008_s1 + $0x48] sm:$0xff]   ;;  %v746_v8 = vld [vmem:[%s1008_s1 + $0x50] sm:$0xff]   ;;  %585 = vst.msk [vmem:[%s1010_s4] sm:$0x1] %vm584_vm1, %v788_v46 }
   0x2   :  { %v739_v1 = vld [vmem:[%s1008_s1] sm:$0xff]   ;;  %663 = vmatprep.subr.bf16.mxu0 %v738_v0  ;;  %v743_v5 = vld [vmem:[%s1008_s1 + $0x8] sm:$0xff]   ;;  %v747_v9 = vld [vmem:[%s1008_s1 + $0x10] sm:$0xff]   ;;  %586 = vst.msk [vmem:[%s1011_s5] sm:$0x1] %vm584_vm1, %v788_v46 }
   0x3   :  { %v740_v2 = vld [vmem:[%s1008_s1 + $0xc0] sm:$0xff]   ;;  %664 = vmatpush3.bf16.msra.mxu0 %v739_v1  ;;  %v744_v6 = vld [vmem:[%s1008_s1 + $0xc8] sm:$0xff]   ;;  %v748_v10 = vld [vmem:[%s1008_s1 + $0xd0] sm:$0xff]  }
   0x4   :  { %v741_v3 = vld [vmem:[%s1008_s1 + $0x80] sm:$0xff]   ;;  %691 = vmatprep.subr.bf16.mxu1 %v740_v2  ;;  %665 = vmatprep.subr.bf16.mxu0 %v742_v4  ;;  %v745_v7 = vld [vmem:[%s1008_s1 + $0x88] sm:$0xff]   ;;  %v749_v11 = vld [vmem:[%s1008_s1 + $0x90] sm:$0xff]  }
   0x5   :  { %692 = vmatpush3.bf16.msra.mxu1 %v741_v3  ;;  %v750_v12 = vld [vmem:[%s1008_s1 + $0x58] sm:$0xff]   ;;  %v754_v16 = vld [vmem:[%s1008_s1 + $0x60] sm:$0xff]   ;;  %v758_v20 = vld [vmem:[%s1008_s1 + $0x68] sm:$0xff]  }
   0x6   :  { %693 = vmatprep.subr.bf16.mxu1 %v744_v6  ;;  %v751_v13 = vld [vmem:[%s1008_s1 + $0x18] sm:$0xff]   ;;  %v755_v17 = vld [vmem:[%s1008_s1 + $0x20] sm:$0xff]   ;;  %v759_v21 = vld [vmem:[%s1008_s1 + $0x28] sm:$0xff]  }
   0x7   :  { %666 = vmatpush3.bf16.msra.mxu0 %v743_v5  ;;  %v752_v14 = vld [vmem:[%s1008_s1 + $0xd8] sm:$0xff]   ;;  %v756_v18 = vld [vmem:[%s1008_s1 + $0xe0] sm:$0xff]   ;;  %v760_v22 = vld [vmem:[%s1008_s1 + $0xe8] sm:$0xff]  }
   0x8   :  { %667 = vmatprep.subr.bf16.mxu0 %v746_v8  ;;  %v753_v15 = vld [vmem:[%s1008_s1 + $0x98] sm:$0xff]   ;;  %v757_v19 = vld [vmem:[%s1008_s1 + $0xa0] sm:$0xff]   ;;  %v761_v23 = vld [vmem:[%s1008_s1 + $0xa8] sm:$0xff]  }
   0x9   :  { %694 = vmatpush3.bf16.msra.mxu1 %v745_v7  ;;  %v762_v24 = vld [vmem:[%s1008_s1 + $0x70] sm:$0xff]   ;;  %v766_v28 = vld [vmem:[%s1008_s1 + $0x78] sm:$0xff]   ;;  %v773_v34 = vld [vmem:[%s1008_s1 + $0x100] sm:$0xff]  }
   0xa   :  { %695 = vmatprep.subr.bf16.mxu1 %v748_v10  ;;  %v763_v25 = vld [vmem:[%s1008_s1 + $0x30] sm:$0xff]   ;;  %v767_v29 = vld [vmem:[%s1008_s1 + $0x38] sm:$0xff]   ;;  %v776_v36 = vld [vmem:[%s1009_s0 + $0xc] ss:$20 sps:$4 sm:$0xff]  }
   0xb   :  { %668 = vmatpush3.bf16.msra.mxu0 %v747_v9  ;;  %v764_v26 = vld [vmem:[%s1008_s1 + $0xf0] sm:$0xff]   ;;  %v768_v30 = vld [vmem:[%s1008_s1 + $0xf8] sm:$0xff]   ;;  %v777_v37 = vld [vmem:[%s1008_s1 + $0x108] sm:$0xff]   ;;  %463 = vmatprep.mubr.bf16.mxu1 %v776_v36 }
   0xc   :  { %669 = vmatprep.subr.bf16.mxu0 %v750_v12  ;;  %v765_v27 = vld [vmem:[%s1008_s1 + $0xb0] sm:$0xff]   ;;  %v771_v32 = vld [vmem:[%s1009_s0 + $0x4] ss:$20 sps:$4 sm:$0xff]   ;;  %v774_v35 = vld [vmem:[%s1009_s0 + $0x8] ss:$20 sps:$4 sm:$0xff]  }
   0xd   :  { %696 = vmatpush3.bf16.msra.mxu1 %v749_v11  ;;  %v769_v31 = vld [vmem:[%s1009_s0] ss:$20 sps:$4 sm:$0xff]   ;;  %v772_v33 = vld [vmem:[%s1008_s1 + $0xb8] sm:$0xff]   ;;  %414 = vmatprep.mubr.bf16.mxu0 %v771_v32  ;;  %v784_v42 = vld [vmem:[%s1009_s0 + $0x30] ss:$20 sps:$4 sm:$0xff]  }
   0xe   :  { %697 = vmatprep.subr.bf16.mxu1 %v752_v14  ;;  %v778_v38 = vld [vmem:[%s1009_s0 + $0x2c] ss:$20 sps:$4 sm:$0xff]   ;;  %v780_v39 = vld [vmem:[%s1009_s0 + $0x28] ss:$20 sps:$4 sm:$0xff]   ;;  %v781_v40 = vld [vmem:[%s1008_s1 + $0x110] sm:$0xff]  }
   0xf   :  { %670 = vmatpush3.bf16.msra.mxu0 %v751_v13  ;;  %v782_v41 = vld [vmem:[%s1009_s0 + $0x34] ss:$20 sps:$4 sm:$0xff]   ;;  %v785_v43 = vld [vmem:[%s1008_s1 + $0x118] sm:$0xff]   ;;  %v786_v44 = vld [vmem:[%s1009_s0 + $0x10] ss:$20 sps:$4 sm:$0xff]  }
  0x10   :  { %671 = vmatprep.subr.bf16.mxu0 %v754_v16  ;;  %v787_v45 = vld [vmem:[%s1009_s0 + $0x38] ss:$20 sps:$4 sm:$0xff]   ;;  %v606_v48 = vld [vmem:[%s1012_s2] ss:$0 sm:$0xff] }
  0x11   :  { %698 = vmatpush3.bf16.msra.mxu1 %v753_v15 }
  0x12   :  { %699 = vmatprep.subr.bf16.mxu1 %v756_v18 }
  0x13   :  { %672 = vmatpush3.bf16.msra.mxu0 %v755_v17 }
  0x14   :  { %673 = vmatprep.subr.bf16.mxu0 %v758_v20 }
  0x15   :  { %700 = vmatpush3.bf16.msra.mxu1 %v757_v19 }
  0x16   :  { %701 = vmatprep.subr.bf16.mxu1 %v760_v22 }
  0x17   :  { %674 = vmatpush3.bf16.msra.mxu0 %v759_v21 }
  0x18   :  { %675 = vmatprep.subr.bf16.mxu0 %v762_v24 }
  0x19   :  { %702 = vmatpush3.bf16.msra.mxu1 %v761_v23 }
  0x1a   :  { %703 = vmatprep.subr.bf16.mxu1 %v764_v26 }
  0x1b   :  { %676 = vmatpush3.bf16.msra.mxu0 %v763_v25 }
  0x1c   :  { %677 = vmatprep.subr.bf16.mxu0 %v766_v28 }
  0x1d   :  { %704 = vmatpush3.bf16.msra.mxu1 %v765_v27 }
  0x1e   :  { %705 = vmatprep.subr.bf16.mxu1 %v768_v30 }
  0x1f   :  { %678 = vmatpush3.bf16.msra.mxu0 %v767_v29 }
  0x20   :  { %725 = vmatprep.subr.bf16.mxu0 %v773_v34 }
  0x21   :  { %706 = vmatpush3.bf16.msra.mxu1 %v772_v33 }
  0x22   :  { %415 = vmatmul.mubr.bf16.vlgmr.msra.gmra.mrb[0].mxu0 %v769_v31 }
  0x23   :  { %726 = vmatpush3.bf16.msra.mxu0 %v773_v34  ;;  %422 = vmatprep.mubr.bf16.mxu0 %v778_v38 }
  0x24   :  { %464 = vmatmul.mubr.bf16.vlgmr.msra.gmra.mrb[0].mxu1 %v774_v35  ;;  %727 = vmatprep.subr.bf16.mxu0 %v777_v37 }
  0x25   :  { %471 = vmatprep.mubr.bf16.mxu1 %v782_v41 }
  0x27   :  { %728 = vmatpush3.bf16.msra.mxu0 %v777_v37 }
  0x28   :  { %729 = vmatprep.subr.bf16.mxu0 %v781_v40 }
  0x2a   :  { %423 = vmatmul.mubr.bf16.gmra.mrb[4].mxu0 %v780_v39 }
  0x2b   :  { %733 = vmatprep.mubr.msk.bf16.mxu0 %vm375_vm0, %v786_v44  ;;  %730 = vmatpush3.bf16.msra.mxu0 %v781_v40 }
  0x2c   :  { %472 = vmatmul.mubr.bf16.gmra.mrb[4].mxu1 %v784_v42  ;;  %731 = vmatprep.subr.bf16.mxu0 %v785_v43 }
  0x2f   :  { %732 = vmatpush3.bf16.msra.mxu0 %v785_v43 }
  0x32   :  { %734 = vmatmul.mubr.msk.bf16.vlgmr.msra.gmra.mrb[8].mxu0 %vm375_vm0, %v787_v45 }
  0xf5   :  { %v679_v47 = vpop.f32.mrb[0].mxu0 }
  0xf6   :  { %v680_v49 = vpop.f32.mrb[1].mxu0 }
  0xf7   :  { %v681_v50 = vadd.f32 %v680_v49, %v679_v47  ;;  %v682_v51 = vpop.f32.mrb[2].mxu0  ;;  %v707_v52 = vpop.f32.mrb[0].mxu1 }
  0xf8   :  { %v683_v53 = vpop.f32.mrb[3].mxu0  ;;  %v708_v56 = vpop.f32.mrb[1].mxu1 }
  0xf9   :  { %v417_v54 = vadd.f32 %v681_v50, %v606_v48  ;;  %v684_v55 = vadd.f32 %v683_v53, %v682_v51  ;;  %v709_v57 = vadd.f32 %v708_v56, %v707_v52  ;;  %v710_v58 = vpop.f32.mrb[2].mxu1 }
  0xfa   :  { %v711_v60 = vpop.f32.mrb[3].mxu1 }
  0xfb   :  { %v420_v59 = vadd.f32 %v684_v55, %v606_v48  ;;  %v712_v61 = vadd.f32 %v711_v60, %v710_v58  ;;  %v466_v62 = vadd.f32 %v709_v57, %v417_v54  ;;  %v587_v55 = vld [vmem:[%s1010_s4] sm:$0x1] }
  0xfc   :  { %v591_v58 = vld [vmem:[%s1011_s5] sm:$0x1] }
  0xfd   :  { %v685_v63 = vpop.f32.mrb[4].mxu0  ;;  %v469_v1 = vadd.f32 %v712_v61, %v420_v59 }
  0xfe   :  { %v686_v0 = vpop.f32.mrb[5].mxu0 }
  0xff   :  { %v687_v2 = vadd.f32 %v686_v0, %v685_v63  ;;  %v688_v3 = vpop.f32.mrb[6].mxu0  ;;  %v713_v4 = vpop.f32.mrb[4].mxu1 }
 0x100   :  { %v689_v5 = vpop.f32.mrb[7].mxu0  ;;  %v714_v8 = vpop.f32.mrb[5].mxu1 }
 0x101   :  { %v425_v6 = vadd.f32 %v687_v2, %v606_v48  ;;  %v690_v7 = vadd.f32 %v689_v5, %v688_v3  ;;  %v715_v9 = vadd.f32 %v714_v8, %v713_v4  ;;  %v716_v10 = vpop.f32.mrb[6].mxu1 }
 0x102   :  { %v717_v12 = vpop.f32.mrb[7].mxu1 }
 0x103   :  { %v428_v11 = vadd.f32 %v690_v7, %v606_v48  ;;  %v718_v13 = vadd.f32 %v717_v12, %v716_v10  ;;  %v474_v14 = vadd.f32 %v715_v9, %v425_v6 }
 0x105   :  { %v735_v15 = vpop.f32.mrb[8].mxu0  ;;  %v477_v16 = vadd.f32 %v718_v13, %v428_v11 }
 0x106   :  { %v523_v17 = vadd.f32 %v735_v15, %v474_v14  ;;  %v514_v18 = vpop.f32.mrb[9].mxu0 }
 0x107   :  { %v515_v19 = vadd.f32 %v514_v18, %v466_v62  ;;  %v736_v20 = vpop.f32.mrb[10].mxu0 }
 0x108   :  { %v661_v21 = vpack.c.bf16 %v523_v17, %v523_v17  ;;  %v526_v22 = vadd.f32 %v736_v20, %v477_v16  ;;  %v517_v23 = vpop.f32.mrb[11].mxu0  ;;  %v565_v27 = vmul.f32 %v523_v17, %v523_v17  ;;  %v553_v34 = vsel %vm375_vm0, %v523_v17, 0.0 }
 0x109   :  { %v659_v24 = vpack.c.bf16 %v515_v19, %v515_v19  ;;  %v563_v25 = vmul.f32 %v515_v19, %v515_v19  ;;  %v518_v26 = vadd.f32 %v517_v23, %v469_v1  ;;  %v550_v29 = vsel %vm375_vm0, %v515_v19, 0.0 }
 0x10a   :  { %548 = vst.msk [vmem:[%s1013_s3 + $0x8] sm:$0xf] %vm545_vm2, %v661_v21  ;;  %v662_v28 = vpack.c.bf16 %v526_v22, %v526_v22  ;;  %v566_v36 = vmul.f32 %v526_v22, %v526_v22  ;;  %v570_v40 = vsel %vm375_vm0, %v565_v27, 0.0  ;;  %v555_v41 = vsel %vm375_vm0, %v526_v22, 0.0 }
 0x10b   :  { %546 = vst.msk [vmem:[%s1013_s3] sm:$0xf] %vm545_vm2, %v659_v24  ;;  %v660_v30 = vpack.c.bf16 %v518_v26, %v518_v26  ;;  %v551_v31 = vsel %vm375_vm0, %v518_v26, 0.0  ;;  %v564_v32 = vmul.f32 %v518_v26, %v518_v26  ;;  %v567_v35 = vsel %vm375_vm0, %v563_v25, 0.0 }
 0x10c   :  { %549 = vst.msk [vmem:[%s1013_s3 + $0xc] sm:$0xf] %vm545_vm2, %v662_v28  ;;  %v552_v33 = vadd.f32 %v551_v31, %v550_v29  ;;  %v572_v44 = vsel %vm375_vm0, %v566_v36, 0.0 }
 0x10d   :  { %547 = vst.msk [vmem:[%s1013_s3 + $0x4] sm:$0xf] %vm545_vm2, %v660_v30  ;;  %v568_v37 = vsel %vm375_vm0, %v564_v32, 0.0 }
 0x10e   :  { %v554_v38 = vadd.f32 %v553_v34, %v552_v33  ;;  %v569_v39 = vadd.f32 %v568_v37, %v567_v35 }
 0x110   :  { %v556_v42 = vadd.f32 %v555_v41, %v554_v38  ;;  %v571_v43 = vadd.f32 %v570_v40, %v569_v39 }
 0x112   :  { %v557_v45 = vrot.slane %v556_v42, 4  ;;  %v573_v46 = vadd.f32 %v572_v44, %v571_v43 }
 0x114   :  { %v558_v47 = vadd.f32 %v557_v45, %v556_v42  ;;  %v574_v48 = vrot.slane %v573_v46, 4 }
 0x116   :  { %v559_v49 = vrot.slane %v558_v47, 2  ;;  %v575_v50 = vadd.f32 %v574_v48, %v573_v46 }
 0x118   :  { %v560_v51 = vadd.f32 %v559_v49, %v558_v47  ;;  %v576_v52 = vrot.slane %v575_v50, 2 }
 0x11a   :  { %v561_v53 = vrot.slane %v560_v51, 1  ;;  %v577_v54 = vadd.f32 %v576_v52, %v575_v50 }
 0x11c   :  { %v562_v56 = vadd.f32 %v561_v53, %v560_v51  ;;  %v578_v57 = vrot.slane %v577_v54, 1 }
 0x11e   :  { %v579_v59 = vadd.f32 %v578_v57, %v577_v54  ;;  %v588_v60 = vadd.f32 %v587_v55, %v562_v56 }
 0x120   :  { %590 = vst.msk [vmem:[%s1010_s4] sm:$0x1] %vm584_vm1, %v588_v60  ;;  %v592_v61 = vadd.f32 %v591_v58, %v579_v59 }
 0x122   :  { %593 = vst.msk [vmem:[%s1011_s5] sm:$0x1] %vm584_vm1, %v592_v61 }

// kernel: discriminator_forward.32
= control target key start
LH: loop header
LB: loop body
LE: loop exit
PB: predicated region body
PF: predicated region fallthrough
CT: control target
= control target key end

     0   :  { %s75_s0 = inlined_call_operand.vmem [shape: bf16[8,128], index: 0, kind: input, shape index: {}]   ;;  %s76_s1 = inlined_call_operand.vmem [shape: f32[1,128], index: 1, kind: input, shape index: {}]   ;;  %s77_s2 = inlined_call_operand.vmem [shape: f32[1,128], index: 2, kind: input, shape index: {}]   ;;  %s78_s3 = inlined_call_operand.vmem [shape: bf16[8,128], index: 3, kind: output, shape index: {}]  }
   0x1   :  { %v14_v0 = vld [vmem:[%s75_s0] sm:$0xf] }
   0x2   :  { %v41_v1 = vld [vmem:[%s76_s1] ss:$0 sm:$0xff]  ;;  %v15_v2 = vunpack.c.l.bf16 %v14_v0 }
   0x3   :  { %v42_v3 = vld [vmem:[%s77_s2] ss:$0 sm:$0xff] }
   0x4   :  { %v23_v4 = vmul.f32 %v41_v1, %v15_v2 }
   0x6   :  { %v31_v5 = vadd.f32 %v42_v3, %v23_v4 }
   0x8   :  { %vm32_vm0 = vcmp.ge.f32.partialorder %v31_v5, 0.0  ;;  %v33_v6 = vmul.f32 0.02, %v31_v5 }
   0xa   :  { %v34_v7 = vsel %vm32_vm0, %v31_v5, %v33_v6 }
   0xb   :  { %v35_v8 = vpack.c.bf16 %v34_v7, %v34_v7 }
   0xd   :  { %36 = vst [vmem:[%s78_s3] sm:$0xf] %v35_v8 }

// kernel: discriminator_forward.31
= control target key start
LH: loop header
LB: loop body
LE: loop exit
PB: predicated region body
PF: predicated region fallthrough
CT: control target
= control target key end

     0   :  { %s1261_s1 = inlined_call_operand.vmem [shape: bf16[1024,128], index: 1, kind: input, shape index: {}]   ;;  %s1262_s0 = inlined_call_operand.vmem [shape: bf16[8,1024], index: 0, kind: input, shape index: {}]   ;;  %s1263_s4 = inlined_call_operand.vmem [shape: f32[1,128], index: 4, kind: output, shape index: {1}]   ;;  %s1264_s5 = inlined_call_operand.vmem [shape: f32[1,128], index: 5, kind: output, shape index: {2}]   ;;  %s1265_s2 = inlined_call_operand.vmem [shape: f32[1,128], index: 2, kind: input, shape index: {}]   ;;  %s1266_s3 = inlined_call_operand.vmem [shape: bf16[8,128], index: 3, kind: output, shape index: {0}]  }
   0x1   :  { %v930_v0 = vld [vmem:[%s1261_s1 + $0x40] sm:$0xff]   ;;  %v934_v4 = vld [vmem:[%s1261_s1 + $0x48] sm:$0xff]   ;;  %v938_v8 = vld [vmem:[%s1261_s1 + $0x50] sm:$0xff]  }
   0x2   :  { %v931_v1 = vld [vmem:[%s1261_s1 + $0xc0] sm:$0xff]   ;;  %841 = vmatprep.subr.bf16.mxu0 %v930_v0  ;;  %v935_v5 = vld [vmem:[%s1261_s1 + $0xc8] sm:$0xff]   ;;  %v939_v9 = vld [vmem:[%s1261_s1 + $0xd0] sm:$0xff]  }
   0x3   :  { %v932_v2 = vld [vmem:[%s1261_s1] sm:$0xff]   ;;  %863 = vmatprep.subr.bf16.mxu1 %v931_v1  ;;  %v936_v6 = vld [vmem:[%s1261_s1 + $0x8] sm:$0xff]   ;;  %v940_v10 = vld [vmem:[%s1261_s1 + $0x10] sm:$0xff]  }
   0x4   :  { %v933_v3 = vld [vmem:[%s1261_s1 + $0x80] sm:$0xff]   ;;  %842 = vmatpush3.bf16.msra.mxu0 %v932_v2  ;;  %v937_v7 = vld [vmem:[%s1261_s1 + $0x88] sm:$0xff]   ;;  %v941_v11 = vld [vmem:[%s1261_s1 + $0x90] sm:$0xff]  }
   0x5   :  { %864 = vmatpush3.bf16.msra.mxu1 %v933_v3  ;;  %843 = vmatprep.subr.bf16.mxu0 %v934_v4  ;;  %v942_v12 = vld [vmem:[%s1261_s1 + $0x58] sm:$0xff]   ;;  %v946_v16 = vld [vmem:[%s1261_s1 + $0x60] sm:$0xff]   ;;  %v950_v20 = vld [vmem:[%s1261_s1 + $0x68] sm:$0xff]  }
   0x6   :  { %865 = vmatprep.subr.bf16.mxu1 %v935_v5  ;;  %v943_v13 = vld [vmem:[%s1261_s1 + $0xd8] sm:$0xff]   ;;  %v947_v17 = vld [vmem:[%s1261_s1 + $0xe0] sm:$0xff]   ;;  %v951_v21 = vld [vmem:[%s1261_s1 + $0xe8] sm:$0xff]  }
   0x7   :  { %v944_v14 = vld [vmem:[%s1261_s1 + $0x18] sm:$0xff]   ;;  %v948_v18 = vld [vmem:[%s1261_s1 + $0x20] sm:$0xff]   ;;  %v952_v22 = vld [vmem:[%s1261_s1 + $0x28] sm:$0xff]  }
   0x8   :  { %844 = vmatpush3.bf16.msra.mxu0 %v936_v6  ;;  %v945_v15 = vld [vmem:[%s1261_s1 + $0x98] sm:$0xff]   ;;  %v949_v19 = vld [vmem:[%s1261_s1 + $0xa0] sm:$0xff]   ;;  %v953_v23 = vld [vmem:[%s1261_s1 + $0xa8] sm:$0xff]  }
   0x9   :  { %866 = vmatpush3.bf16.msra.mxu1 %v937_v7  ;;  %845 = vmatprep.subr.bf16.mxu0 %v938_v8  ;;  %v954_v24 = vld [vmem:[%s1261_s1 + $0x70] sm:$0xff]   ;;  %v958_v28 = vld [vmem:[%s1261_s1 + $0x78] sm:$0xff]   ;;  %v18_v32 = vld [vmem:[%s1262_s0] sm:$0xff] }
   0xa   :  { %867 = vmatprep.subr.bf16.mxu1 %v939_v9  ;;  %v955_v25 = vld [vmem:[%s1261_s1 + $0xf0] sm:$0xff]   ;;  %v959_v29 = vld [vmem:[%s1261_s1 + $0xf8] sm:$0xff]   ;;  %v19_v33 = vld [vmem:[%s1262_s0 + $0x8] sm:$0xff]  ;;  %v769_v34 = vcombine.low %v18_v32, %v18_v32  ;;  %v770_v35 = vcombine.high %v18_v32, %v18_v32 }
   0xb   :  { %v956_v26 = vld [vmem:[%s1261_s1 + $0x30] sm:$0xff]   ;;  %v960_v30 = vld [vmem:[%s1261_s1 + $0x38] sm:$0xff]   ;;  %v771_v36 = vcombine.low %v19_v33, %v19_v33  ;;  %v772_v37 = vcombine.high %v19_v33, %v19_v33  ;;  %v966_v38 = vld [vmem:[%s1261_s1 + $0x140] sm:$0xff]  }
   0xc   :  { %846 = vmatpush3.bf16.msra.mxu0 %v940_v10  ;;  %v957_v27 = vld [vmem:[%s1261_s1 + $0xb0] sm:$0xff]   ;;  %v961_v31 = vld [vmem:[%s1261_s1 + $0xb8] sm:$0xff]   ;;  %v967_v39 = vld [vmem:[%s1261_s1 + $0x1c0] sm:$0xff]   ;;  %601 = vmatprep.mubr.bf16.mxu0 %v770_v35 }
   0xd   :  { %868 = vmatpush3.bf16.msra.mxu1 %v941_v11  ;;  %847 = vmatprep.subr.bf16.mxu0 %v942_v12  ;;  %v968_v40 = vld [vmem:[%s1261_s1 + $0x100] sm:$0xff]   ;;  %v970_v42 = vld [vmem:[%s1261_s1 + $0x148] sm:$0xff]   ;;  %v974_v46 = vld [vmem:[%s1261_s1 + $0x150] sm:$0xff]   ;;  %v1002_v12 = vmov 0.0  }
   0xe   :  { %869 = vmatprep.subr.bf16.mxu1 %v943_v13  ;;  %641 = vmatprep.mubr.bf16.mxu1 %v772_v37  ;;  %v969_v41 = vld [vmem:[%s1261_s1 + $0x180] sm:$0xff]   ;;  %v971_v43 = vld [vmem:[%s1261_s1 + $0x1c8] sm:$0xff]   ;;  %v975_v47 = vld [vmem:[%s1261_s1 + $0x1d0] sm:$0xff]   ;;  %748 = vst [vmem:[%s1263_s4] sm:$0x1] %v1002_v12 }
   0xf   :  { %v972_v44 = vld [vmem:[%s1261_s1 + $0x108] sm:$0xff]   ;;  %v976_v48 = vld [vmem:[%s1261_s1 + $0x110] sm:$0xff]   ;;  %v978_v50 = vld [vmem:[%s1261_s1 + $0x158] sm:$0xff]   ;;  %749 = vst [vmem:[%s1264_s5] sm:$0x1] %v1002_v12 }
  0x10   :  { %848 = vmatpush3.bf16.msra.mxu0 %v944_v14  ;;  %v973_v45 = vld [vmem:[%s1261_s1 + $0x188] sm:$0xff]   ;;  %v977_v49 = vld [vmem:[%s1261_s1 + $0x190] sm:$0xff]   ;;  %v979_v51 = vld [vmem:[%s1261_s1 + $0x1d8] sm:$0xff]  }
  0x11   :  { %870 = vmatpush3.bf16.msra.mxu1 %v945_v15  ;;  %849 = vmatprep.subr.bf16.mxu0 %v946_v16  ;;  %v980_v52 = vld [vmem:[%s1261_s1 + $0x118] sm:$0xff]   ;;  %v982_v54 = vld [vmem:[%s1261_s1 + $0x160] sm:$0xff]   ;;  %v986_v58 = vld [vmem:[%s1261_s1 + $0x168] sm:$0xff]  }
  0x12   :  { %871 = vmatprep.subr.bf16.mxu1 %v947_v17  ;;  %v981_v53 = vld [vmem:[%s1261_s1 + $0x198] sm:$0xff]   ;;  %v983_v55 = vld [vmem:[%s1261_s1 + $0x1e0] sm:$0xff]   ;;  %v987_v59 = vld [vmem:[%s1261_s1 + $0x1e8] sm:$0xff]  }
  0x13   :  { %v984_v56 = vld [vmem:[%s1261_s1 + $0x120] sm:$0xff]   ;;  %v988_v60 = vld [vmem:[%s1261_s1 + $0x128] sm:$0xff]   ;;  %v990_v62 = vld [vmem:[%s1261_s1 + $0x170] sm:$0xff]  }
  0x14   :  { %850 = vmatpush3.bf16.msra.mxu0 %v948_v18  ;;  %v985_v57 = vld [vmem:[%s1261_s1 + $0x1a0] sm:$0xff]   ;;  %v989_v61 = vld [vmem:[%s1261_s1 + $0x1a8] sm:$0xff]   ;;  %v991_v63 = vld [vmem:[%s1261_s1 + $0x1f0] sm:$0xff]  }
  0x15   :  { %872 = vmatpush3.bf16.msra.mxu1 %v949_v19  ;;  %851 = vmatprep.subr.bf16.mxu0 %v950_v20  ;;  %v992_v0 = vld [vmem:[%s1261_s1 + $0x130] sm:$0xff]   ;;  %v994_v2 = vld [vmem:[%s1261_s1 + $0x178] sm:$0xff]   ;;  %v768_v15 = vld [vmem:[%s1265_s2] ss:$0 sm:$0xff] }
  0x16   :  { %873 = vmatprep.subr.bf16.mxu1 %v951_v21  ;;  %v993_v1 = vld [vmem:[%s1261_s1 + $0x1b0] sm:$0xff]   ;;  %v995_v3 = vld [vmem:[%s1261_s1 + $0x1f8] sm:$0xff]  }
  0x17   :  { %v996_v4 = vld [vmem:[%s1261_s1 + $0x138] sm:$0xff]   ;;  %v20_v6 = vld [vmem:[%s1262_s0 + $0x10] sm:$0xff] }
  0x18   :  { %852 = vmatpush3.bf16.msra.mxu0 %v952_v22  ;;  %v997_v5 = vld [vmem:[%s1261_s1 + $0x1b8] sm:$0xff]   ;;  %v773_v7 = vcombine.low %v20_v6, %v20_v6  ;;  %v774_v8 = vcombine.high %v20_v6, %v20_v6 }
  0x19   :  { %874 = vmatpush3.bf16.msra.mxu1 %v953_v23  ;;  %853 = vmatprep.subr.bf16.mxu0 %v954_v24  ;;  %v21_v9 = vld [vmem:[%s1262_s0 + $0x18] sm:$0xff] }
  0x1a   :  { %875 = vmatprep.subr.bf16.mxu1 %v955_v25  ;;  %v775_v10 = vcombine.low %v21_v9, %v21_v9  ;;  %v776_v11 = vcombine.high %v21_v9, %v21_v9 }
  0x1c   :  { %854 = vmatpush3.bf16.msra.mxu0 %v956_v26 }
  0x1d   :  { %876 = vmatpush3.bf16.msra.mxu1 %v957_v27  ;;  %855 = vmatprep.subr.bf16.mxu0 %v958_v28 }
  0x1e   :  { %877 = vmatprep.subr.bf16.mxu1 %v959_v29 }
  0x20   :  { %856 = vmatpush3.bf16.msra.mxu0 %v960_v30 }
  0x21   :  { %878 = vmatpush3.bf16.msra.mxu1 %v961_v31  ;;  %885 = vmatprep.subr.bf16.mxu0 %v966_v38 }
  0x22   :  { %907 = vmatprep.subr.bf16.mxu1 %v967_v39 }
  0x23   :  { %602 = vmatmul.mubr.bf16.vlgmr.msra.gmra.mrb[0].mxu0 %v769_v34 }
  0x24   :  { %642 = vmatmul.mubr.bf16.vlgmr.msra.gmra.mrb[0].mxu1 %v771_v36  ;;  %886 = vmatpush3.bf16.msra.mxu0 %v968_v40 }
  0x25   :  { %908 = vmatpush3.bf16.msra.mxu1 %v969_v41  ;;  %887 = vmatprep.subr.bf16.mxu0 %v970_v42 }
  0x26   :  { %909 = vmatprep.subr.bf16.mxu1 %v971_v43  ;;  %681 = vmatprep.mubr.bf16.mxu0 %v774_v8 }
  0x27   :  { %721 = vmatprep.mubr.bf16.mxu1 %v776_v11 }
  0x28   :  { %888 = vmatpush3.bf16.msra.mxu0 %v972_v44 }
  0x29   :  { %910 = vmatpush3.bf16.msra.mxu1 %v973_v45  ;;  %889 = vmatprep.subr.bf16.mxu0 %v974_v46 }
  0x2a   :  { %911 = vmatprep.subr.bf16.mxu1 %v975_v47 }
  0x2c   :  { %890 = vmatpush3.bf16.msra.mxu0 %v976_v48 }
  0x2d   :  { %912 = vmatpush3.bf16.msra.mxu1 %v977_v49  ;;  %891 = vmatprep.subr.bf16.mxu0 %v978_v50  ;;  %v750_v49 = vld [vmem:[%s1263_s4] sm:$0x1] }
  0x2e   :  { %913 = vmatprep.subr.bf16.mxu1 %v979_v51 }
  0x30   :  { %892 = vmatpush3.bf16.msra.mxu0 %v980_v52  ;;  %v753_v52 = vld [vmem:[%s1264_s5] sm:$0x1] }
  0x31   :  { %914 = vmatpush3.bf16.msra.mxu1 %v981_v53  ;;  %893 = vmatprep.subr.bf16.mxu0 %v982_v54 }
  0x32   :  { %915 = vmatprep.subr.bf16.mxu1 %v983_v55 }
  0x34   :  { %894 = vmatpush3.bf16.msra.mxu0 %v984_v56 }
  0x35   :  { %916 = vmatpush3.bf16.msra.mxu1 %v985_v57  ;;  %895 = vmatprep.subr.bf16.mxu0 %v986_v58 }
  0x36   :  { %917 = vmatprep.subr.bf16.mxu1 %v987_v59 }
  0x38   :  { %896 = vmatpush3.bf16.msra.mxu0 %v988_v60 }
  0x39   :  { %918 = vmatpush3.bf16.msra.mxu1 %v989_v61  ;;  %897 = vmatprep.subr.bf16.mxu0 %v990_v62 }
  0x3a   :  { %919 = vmatprep.subr.bf16.mxu1 %v991_v63 }
  0x3c   :  { %898 = vmatpush3.bf16.msra.mxu0 %v992_v0 }
  0x3d   :  { %920 = vmatpush3.bf16.msra.mxu1 %v993_v1  ;;  %899 = vmatprep.subr.bf16.mxu0 %v994_v2 }
  0x3e   :  { %921 = vmatprep.subr.bf16.mxu1 %v995_v3 }
  0x40   :  { %900 = vmatpush3.bf16.msra.mxu0 %v996_v4 }
  0x41   :  { %922 = vmatpush3.bf16.msra.mxu1 %v997_v5 }
  0x43   :  { %682 = vmatmul.mubr.bf16.vlgmr.msra.gmra.mrb[4].mxu0 %v773_v7 }
  0x44   :  { %722 = vmatmul.mubr.bf16.vlgmr.msra.gmra.mrb[4].mxu1 %v775_v10 }
  0xf6   :  { %v857_v13 = vpop.f32.mrb[0].mxu0 }
  0xf7   :  { %v879_v14 = vpop.f32.mrb[0].mxu1  ;;  %v858_v16 = vpop.f32.mrb[1].mxu0 }
  0xf8   :  { %v880_v17 = vpop.f32.mrb[1].mxu1  ;;  %v859_v18 = vadd.f32 %v858_v16, %v857_v13  ;;  %v860_v20 = vpop.f32.mrb[2].mxu0 }
  0xf9   :  { %v881_v19 = vadd.f32 %v880_v17, %v879_v14  ;;  %v882_v21 = vpop.f32.mrb[2].mxu1  ;;  %v861_v22 = vpop.f32.mrb[3].mxu0 }
  0xfa   :  { %v883_v23 = vpop.f32.mrb[3].mxu1  ;;  %v604_v24 = vadd.f32 %v859_v18, %v768_v15 }
  0xfc   :  { %v644_v25 = vadd.f32 %v881_v19, %v604_v24 }
 0x116   :  { %v901_v26 = vpop.f32.mrb[4].mxu0 }
 0x117   :  { %v923_v27 = vpop.f32.mrb[4].mxu1  ;;  %v902_v28 = vpop.f32.mrb[5].mxu0 }
 0x118   :  { %v924_v29 = vpop.f32.mrb[5].mxu1  ;;  %v903_v30 = vadd.f32 %v902_v28, %v901_v26  ;;  %v904_v32 = vpop.f32.mrb[6].mxu0 }
 0x119   :  { %v925_v31 = vadd.f32 %v924_v29, %v923_v27  ;;  %v926_v33 = vpop.f32.mrb[6].mxu1  ;;  %v905_v34 = vpop.f32.mrb[7].mxu0 }
 0x11a   :  { %v927_v35 = vpop.f32.mrb[7].mxu1  ;;  %v684_v36 = vadd.f32 %v903_v30, %v644_v25 }
 0x11c   :  { %v724_v37 = vadd.f32 %v925_v31, %v684_v36 }
 0x11e   :  { %v729_v38 = vpack.c.bf16 %v724_v37, %v724_v37  ;;  %v731_v39 = vrot.slane %v724_v37, 4  ;;  %v737_v40 = vmul.f32 %v724_v37, %v724_v37 }
 0x120   :  { %730 = vst [vmem:[%s1266_s3] sm:$0xf] %v729_v38  ;;  %v732_v41 = vadd.f32 %v731_v39, %v724_v37  ;;  %v738_v42 = vrot.slane %v737_v40, 4 }
 0x122   :  { %v733_v43 = vrot.slane %v732_v41, 2  ;;  %v739_v44 = vadd.f32 %v738_v42, %v737_v40 }
 0x124   :  { %v734_v45 = vadd.f32 %v733_v43, %v732_v41  ;;  %v740_v46 = vrot.slane %v739_v44, 2 }
 0x126   :  { %v735_v47 = vrot.slane %v734_v45, 1  ;;  %v741_v48 = vadd.f32 %v740_v46, %v739_v44 }
 0x128   :  { %v736_v50 = vadd.f32 %v735_v47, %v734_v45  ;;  %v742_v51 = vrot.slane %v741_v48, 1 }
 0x12a   :  { %v743_v53 = vadd.f32 %v742_v51, %v741_v48  ;;  %v751_v54 = vadd.f32 %v750_v49, %v736_v50 }
 0x12c   :  { %752 = vst [vmem:[%s1263_s4] sm:$0x1] %v751_v54  ;;  %v754_v55 = vadd.f32 %v753_v52, %v743_v53 }
 0x12e   :  { %755 = vst [vmem:[%s1264_s5] sm:$0x1] %v754_v55 }

// kernel: discriminator_forward.36
= control target key start
LH: loop header
LB: loop body
LE: loop exit
PB: predicated region body
PF: predicated region fallthrough
CT: control target
= control target key end

     0   :  { %s89_s0 = inlined_call_operand.vmem [shape: bf16[8,128], index: 0, kind: input, shape index: {}]   ;;  %s90_s1 = inlined_call_operand.vmem [shape: f32[1,128], index: 1, kind: input, shape index: {}]   ;;  %s91_s2 = inlined_call_operand.vmem [shape: f32[1,128], index: 2, kind: input, shape index: {}]   ;;  %s92_s3 = inlined_call_operand.vmem [shape: bf16[8,128], index: 3, kind: input, shape index: {}]   ;;  %s93_s4 = inlined_call_operand.vmem [shape: bf16[8,128], index: 4, kind: output, shape index: {}]  }
   0x1   :  { %v17_v0 = vld [vmem:[%s89_s0] sm:$0xf] }
   0x2   :  { %v47_v1 = vld [vmem:[%s90_s1] ss:$0 sm:$0xff]  ;;  %v18_v2 = vunpack.c.l.bf16 %v17_v0 }
   0x3   :  { %v35_v3 = vld [vmem:[%s92_s3] sm:$0xf] }
   0x4   :  { %v48_v4 = vld [vmem:[%s91_s2] ss:$0 sm:$0xff]  ;;  %v26_v5 = vmul.f32 %v47_v1, %v18_v2  ;;  %v36_v6 = vunpack.c.l.bf16 %v35_v3 }
   0x6   :  { %v34_v7 = vadd.f32 %v48_v4, %v26_v5 }
   0x8   :  { %v37_v8 = vadd.f32 %v36_v6, %v34_v7 }
   0xa   :  { %vm38_vm0 = vcmp.ge.f32.partialorder %v37_v8, 0.0  ;;  %v39_v9 = vmul.f32 0.02, %v37_v8 }
   0xc   :  { %v40_v10 = vsel %vm38_vm0, %v37_v8, %v39_v9 }
   0xd   :  { %v41_v11 = vpack.c.bf16 %v40_v10, %v40_v10 }
   0xf   :  { %42 = vst [vmem:[%s93_s4] sm:$0xf] %v41_v11 }

// kernel: discriminator_forward.33
= control target key start
LH: loop header
LB: loop body
LE: loop exit
PB: predicated region body
PF: predicated region fallthrough
CT: control target
= control target key end

     0   :  { %s2166_s1 = inlined_call_operand.vmem [shape: bf16[1152,256], index: 1, kind: input, shape index: {}]   ;;  %s2167_s0 = inlined_call_operand.vmem [shape: bf16[8,1152], index: 0, kind: input, shape index: {}]   ;;  %s2168_s4 = inlined_call_operand.vmem [shape: f32[1,256], index: 4, kind: output, shape index: {1}]   ;;  %s2169_s5 = inlined_call_operand.vmem [shape: f32[1,256], index: 5, kind: output, shape index: {2}]   ;;  %s2170_s2 = inlined_call_operand.vmem [shape: f32[1,256], index: 2, kind: input, shape index: {}]   ;;  %s2171_s3 = inlined_call_operand.vmem [shape: bf16[8,256], index: 3, kind: output, shape index: {0}]  }
   0x1   :  { %v1413_v0 = vld [vmem:[%s2166_s1 + $0x4] ss:$8 sps:$4 sm:$0xff]   ;;  %v1417_v2 = vld [vmem:[%s2166_s1] ss:$8 sps:$4 sm:$0xff]   ;;  %v1419_v4 = vld [vmem:[%s2166_s1 + $0x14] ss:$8 sps:$4 sm:$0xff]  }
   0x2   :  { %v1415_v1 = vld [vmem:[%s2166_s1 + $0x204] ss:$8 sps:$4 sm:$0xff]   ;;  %931 = vmatprep.subr.bf16.mxu1 %v1413_v0  ;;  %v1418_v3 = vld [vmem:[%s2166_s1 + $0x200] ss:$8 sps:$4 sm:$0xff]   ;;  %v1421_v5 = vld [vmem:[%s2166_s1 + $0x214] ss:$8 sps:$4 sm:$0xff]  }
   0x3   :  { %1013 = vmatprep.subr.bf16.mxu0 %v1415_v1  ;;  %932 = vmatpush1.bf16.msra.mxu1 %v1417_v2  ;;  %v1423_v6 = vld [vmem:[%s2166_s1 + $0x10] ss:$8 sps:$4 sm:$0xff]   ;;  %v1425_v8 = vld [vmem:[%s2166_s1 + $0x24] ss:$8 sps:$4 sm:$0xff]   ;;  %v1429_v10 = vld [vmem:[%s2166_s1 + $0x20] ss:$8 sps:$4 sm:$0xff]  }
   0x4   :  { %1014 = vmatpush1.bf16.msra.mxu0 %v1418_v3  ;;  %933 = vmatprep.subr.bf16.mxu1 %v1419_v4  ;;  %v1424_v7 = vld [vmem:[%s2166_s1 + $0x210] ss:$8 sps:$4 sm:$0xff]   ;;  %v1427_v9 = vld [vmem:[%s2166_s1 + $0x224] ss:$8 sps:$4 sm:$0xff]   ;;  %v1430_v11 = vld [vmem:[%s2166_s1 + $0x220] ss:$8 sps:$4 sm:$0xff]  }
   0x5   :  { %1015 = vmatprep.subr.bf16.mxu0 %v1421_v5  ;;  %v1431_v12 = vld [vmem:[%s2166_s1 + $0x34] ss:$8 sps:$4 sm:$0xff]   ;;  %v1435_v14 = vld [vmem:[%s2166_s1 + $0x30] ss:$8 sps:$4 sm:$0xff]   ;;  %v1437_v16 = vld [vmem:[%s2166_s1 + $0x44] ss:$8 sps:$4 sm:$0xff]  }
   0x6   :  { %v1433_v13 = vld [vmem:[%s2166_s1 + $0x234] ss:$8 sps:$4 sm:$0xff]   ;;  %v1436_v15 = vld [vmem:[%s2166_s1 + $0x230] ss:$8 sps:$4 sm:$0xff]   ;;  %v1439_v17 = vld [vmem:[%s2166_s1 + $0x244] ss:$8 sps:$4 sm:$0xff]  }
   0x7   :  { %934 = vmatpush1.bf16.msra.mxu1 %v1423_v6  ;;  %v1441_v18 = vld [vmem:[%s2166_s1 + $0x40] ss:$8 sps:$4 sm:$0xff]   ;;  %v1443_v20 = vld [vmem:[%s2166_s1 + $0x54] ss:$8 sps:$4 sm:$0xff]   ;;  %v1447_v22 = vld [vmem:[%s2166_s1 + $0x50] ss:$8 sps:$4 sm:$0xff]  }
   0x8   :  { %1016 = vmatpush1.bf16.msra.mxu0 %v1424_v7  ;;  %935 = vmatprep.subr.bf16.mxu1 %v1425_v8  ;;  %v1442_v19 = vld [vmem:[%s2166_s1 + $0x240] ss:$8 sps:$4 sm:$0xff]   ;;  %v1445_v21 = vld [vmem:[%s2166_s1 + $0x254] ss:$8 sps:$4 sm:$0xff]   ;;  %v1448_v23 = vld [vmem:[%s2166_s1 + $0x250] ss:$8 sps:$4 sm:$0xff]  }
   0x9   :  { %1017 = vmatprep.subr.bf16.mxu0 %v1427_v9  ;;  %v1449_v24 = vld [vmem:[%s2166_s1 + $0x64] ss:$8 sps:$4 sm:$0xff]   ;;  %v1453_v26 = vld [vmem:[%s2166_s1 + $0x60] ss:$8 sps:$4 sm:$0xff]   ;;  %v1455_v28 = vld [vmem:[%s2166_s1 + $0x74] ss:$8 sps:$4 sm:$0xff]  }
   0xa   :  { %v1451_v25 = vld [vmem:[%s2166_s1 + $0x264] ss:$8 sps:$4 sm:$0xff]   ;;  %v1454_v27 = vld [vmem:[%s2166_s1 + $0x260] ss:$8 sps:$4 sm:$0xff]   ;;  %v1457_v29 = vld [vmem:[%s2166_s1 + $0x274] ss:$8 sps:$4 sm:$0xff]  }
   0xb   :  { %936 = vmatpush1.bf16.msra.mxu1 %v1429_v10  ;;  %v1459_v30 = vld [vmem:[%s2166_s1 + $0x70] ss:$8 sps:$4 sm:$0xff]   ;;  %v1461_v32 = vld [vmem:[%s2166_s1 + $0x84] ss:$8 sps:$4 sm:$0xff]   ;;  %v1465_v34 = vld [vmem:[%s2166_s1 + $0x80] ss:$8 sps:$4 sm:$0xff]  }
   0xc   :  { %1018 = vmatpush1.bf16.msra.mxu0 %v1430_v11  ;;  %937 = vmatprep.subr.bf16.mxu1 %v1431_v12  ;;  %v1460_v31 = vld [vmem:[%s2166_s1 + $0x270] ss:$8 sps:$4 sm:$0xff]   ;;  %v1463_v33 = vld [vmem:[%s2166_s1 + $0x284] ss:$8 sps:$4 sm:$0xff]   ;;  %v1466_v35 = vld [vmem:[%s2166_s1 + $0x280] ss:$8 sps:$4 sm:$0xff]  }
   0xd   :  { %1019 = vmatprep.subr.bf16.mxu0 %v1433_v13  ;;  %v1467_v36 = vld [vmem:[%s2166_s1 + $0x94] ss:$8 sps:$4 sm:$0xff]   ;;  %v1471_v38 = vld [vmem:[%s2166_s1 + $0x90] ss:$8 sps:$4 sm:$0xff]   ;;  %v1473_v40 = vld [vmem:[%s2166_s1 + $0xa4] ss:$8 sps:$4 sm:$0xff]  }
   0xe   :  { %v1469_v37 = vld [vmem:[%s2166_s1 + $0x294] ss:$8 sps:$4 sm:$0xff]   ;;  %v1472_v39 = vld [vmem:[%s2166_s1 + $0x290] ss:$8 sps:$4 sm:$0xff]   ;;  %v1475_v41 = vld [vmem:[%s2166_s1 + $0x2a4] ss:$8 sps:$4 sm:$0xff]  }
   0xf   :  { %938 = vmatpush1.bf16.msra.mxu1 %v1435_v14  ;;  %v1477_v42 = vld [vmem:[%s2166_s1 + $0xa0] ss:$8 sps:$4 sm:$0xff]   ;;  %v1479_v44 = vld [vmem:[%s2166_s1 + $0xb4] ss:$8 sps:$4 sm:$0xff]   ;;  %v1483_v47 = vld [vmem:[%s2166_s1 + $0xb0] ss:$8 sps:$4 sm:$0xff]  }
  0x10   :  { %1020 = vmatpush1.bf16.msra.mxu0 %v1436_v15  ;;  %939 = vmatprep.subr.bf16.mxu1 %v1437_v16  ;;  %v1478_v43 = vld [vmem:[%s2166_s1 + $0x2a0] ss:$8 sps:$4 sm:$0xff]   ;;  %v1481_v45 = vld [vmem:[%s2166_s1 + $0x2b4] ss:$8 sps:$4 sm:$0xff]   ;;  %v1484_v49 = vld [vmem:[%s2166_s1 + $0x2b0] ss:$8 sps:$4 sm:$0xff]  }
  0x11   :  { %1021 = vmatprep.subr.bf16.mxu0 %v1439_v17  ;;  %v18_v46 = vld [vmem:[%s2167_s0] sm:$0xff]  ;;  %v20_v50 = vld [vmem:[%s2167_s0 + $0x10] sm:$0xff] }
  0x12   :  { %v1240_v48 = vcombine.high %v18_v46, %v18_v46  ;;  %v1485_v51 = vld [vmem:[%s2166_s1 + $0xc4] ss:$8 sps:$4 sm:$0xff]   ;;  %v1244_v53 = vcombine.high %v20_v50, %v20_v50  ;;  %v1489_v54 = vld [vmem:[%s2166_s1 + $0xc0] ss:$8 sps:$4 sm:$0xff]   ;;  %v1491_v56 = vld [vmem:[%s2166_s1 + $0xd4] ss:$8 sps:$4 sm:$0xff]   ;;  %v1239_v6 = vcombine.low %v18_v46, %v18_v46  ;;  %v1243_v7 = vcombine.low %v20_v50, %v20_v50 }
  0x13   :  { %940 = vmatpush1.bf16.msra.mxu1 %v1441_v18  ;;  %v1487_v52 = vld [vmem:[%s2166_s1 + $0x2c4] ss:$8 sps:$4 sm:$0xff]   ;;  %v1490_v55 = vld [vmem:[%s2166_s1 + $0x2c0] ss:$8 sps:$4 sm:$0xff]   ;;  %v1493_v57 = vld [vmem:[%s2166_s1 + $0x2d4] ss:$8 sps:$4 sm:$0xff]  }
  0x14   :  { %1022 = vmatpush1.bf16.msra.mxu0 %v1442_v19  ;;  %941 = vmatprep.subr.bf16.mxu1 %v1443_v20  ;;  %v1495_v58 = vld [vmem:[%s2166_s1 + $0xd0] ss:$8 sps:$4 sm:$0xff]   ;;  %v1497_v60 = vld [vmem:[%s2166_s1 + $0xe4] ss:$8 sps:$4 sm:$0xff]   ;;  %v1501_v62 = vld [vmem:[%s2166_s1 + $0xe0] ss:$8 sps:$4 sm:$0xff]  }
  0x15   :  { %1023 = vmatprep.subr.bf16.mxu0 %v1445_v21  ;;  %963 = vmatprep.mubr.bf16.mxu1 %v1240_v48  ;;  %v1496_v59 = vld [vmem:[%s2166_s1 + $0x2d0] ss:$8 sps:$4 sm:$0xff]   ;;  %v1499_v61 = vld [vmem:[%s2166_s1 + $0x2e4] ss:$8 sps:$4 sm:$0xff]   ;;  %v1502_v63 = vld [vmem:[%s2166_s1 + $0x2e0] ss:$8 sps:$4 sm:$0xff]  }
  0x16   :  { %1045 = vmatprep.mubr.bf16.mxu0 %v1244_v53  ;;  %v1503_v0 = vld [vmem:[%s2166_s1 + $0xf4] ss:$8 sps:$4 sm:$0xff]   ;;  %v1507_v2 = vld [vmem:[%s2166_s1 + $0xf0] ss:$8 sps:$4 sm:$0xff]   ;;  %v1513_v4 = vld [vmem:[%s2166_s1 + $0x104] ss:$8 sps:$4 sm:$0xff]  }
  0x17   :  { %942 = vmatpush1.bf16.msra.mxu1 %v1447_v22  ;;  %v1505_v1 = vld [vmem:[%s2166_s1 + $0x2f4] ss:$8 sps:$4 sm:$0xff]   ;;  %v1508_v3 = vld [vmem:[%s2166_s1 + $0x2f0] ss:$8 sps:$4 sm:$0xff]   ;;  %v1518_v5 = vld [vmem:[%s2166_s1 + $0x304] ss:$8 sps:$4 sm:$0xff]  }
  0x18   :  { %1024 = vmatpush1.bf16.msra.mxu0 %v1448_v23  ;;  %943 = vmatprep.subr.bf16.mxu1 %v1449_v24  ;;  %v1511_v8 = vld [vmem:[%s2166_s1 + $0x100] ss:$8 sps:$4 sm:$0xff]   ;;  %v1521_v10 = vld [vmem:[%s2166_s1 + $0x114] ss:$8 sps:$4 sm:$0xff]   ;;  %v1519_v12 = vld [vmem:[%s2166_s1 + $0x110] ss:$8 sps:$4 sm:$0xff]  }
  0x19   :  { %1025 = vmatprep.subr.bf16.mxu0 %v1451_v25  ;;  %v1516_v9 = vld [vmem:[%s2166_s1 + $0x300] ss:$8 sps:$4 sm:$0xff]   ;;  %v1524_v11 = vld [vmem:[%s2166_s1 + $0x314] ss:$8 sps:$4 sm:$0xff]   ;;  %v1522_v13 = vld [vmem:[%s2166_s1 + $0x310] ss:$8 sps:$4 sm:$0xff]  }
  0x1a   :  { %v1527_v14 = vld [vmem:[%s2166_s1 + $0x124] ss:$8 sps:$4 sm:$0xff]   ;;  %v1525_v16 = vld [vmem:[%s2166_s1 + $0x120] ss:$8 sps:$4 sm:$0xff]   ;;  %v1533_v18 = vld [vmem:[%s2166_s1 + $0x134] ss:$8 sps:$4 sm:$0xff]  }
  0x1b   :  { %944 = vmatpush1.bf16.msra.mxu1 %v1453_v26  ;;  %v1530_v15 = vld [vmem:[%s2166_s1 + $0x324] ss:$8 sps:$4 sm:$0xff]   ;;  %v1528_v17 = vld [vmem:[%s2166_s1 + $0x320] ss:$8 sps:$4 sm:$0xff]   ;;  %v1536_v19 = vld [vmem:[%s2166_s1 + $0x334] ss:$8 sps:$4 sm:$0xff]  }
  0x1c   :  { %1026 = vmatpush1.bf16.msra.mxu0 %v1454_v27  ;;  %945 = vmatprep.subr.bf16.mxu1 %v1455_v28  ;;  %v1531_v20 = vld [vmem:[%s2166_s1 + $0x130] ss:$8 sps:$4 sm:$0xff]   ;;  %v1539_v22 = vld [vmem:[%s2166_s1 + $0x144] ss:$8 sps:$4 sm:$0xff]   ;;  %v1537_v24 = vld [vmem:[%s2166_s1 + $0x140] ss:$8 sps:$4 sm:$0xff]  }
  0x1d   :  { %1027 = vmatprep.subr.bf16.mxu0 %v1457_v29  ;;  %v1534_v21 = vld [vmem:[%s2166_s1 + $0x330] ss:$8 sps:$4 sm:$0xff]   ;;  %v1542_v23 = vld [vmem:[%s2166_s1 + $0x344] ss:$8 sps:$4 sm:$0xff]   ;;  %v1540_v25 = vld [vmem:[%s2166_s1 + $0x340] ss:$8 sps:$4 sm:$0xff]  }
  0x1e   :  { %v1545_v26 = vld [vmem:[%s2166_s1 + $0x154] ss:$8 sps:$4 sm:$0xff]   ;;  %v1543_v28 = vld [vmem:[%s2166_s1 + $0x150] ss:$8 sps:$4 sm:$0xff]   ;;  %v1575_v50 = vld [vmem:[%s2166_s1 + $0x1a4] ss:$8 sps:$4 sm:$0xff]  }
  0x1f   :  { %946 = vmatpush1.bf16.msra.mxu1 %v1459_v30  ;;  %v1548_v27 = vld [vmem:[%s2166_s1 + $0x354] ss:$8 sps:$4 sm:$0xff]   ;;  %v1546_v29 = vld [vmem:[%s2166_s1 + $0x350] ss:$8 sps:$4 sm:$0xff]   ;;  %v1551_v30 = vld [vmem:[%s2166_s1 + $0x164] ss:$8 sps:$4 sm:$0xff]  }
  0x20   :  { %1028 = vmatpush1.bf16.msra.mxu0 %v1460_v31  ;;  %947 = vmatprep.subr.bf16.mxu1 %v1461_v32  ;;  %v1554_v31 = vld [vmem:[%s2166_s1 + $0x364] ss:$8 sps:$4 sm:$0xff]   ;;  %v1569_v46 = vld [vmem:[%s2166_s1 + $0x194] ss:$8 sps:$4 sm:$0xff]   ;;  %v1567_v48 = vld [vmem:[%s2166_s1 + $0x190] ss:$8 sps:$4 sm:$0xff]  }
  0x21   :  { %1029 = vmatprep.subr.bf16.mxu0 %v1463_v33  ;;  %v1950_v32 = vld [vmem:[%s2167_s0 + $0x8] sm:$0xff]  ;;  %v1955_v33 = vld [vmem:[%s2167_s0 + $0x18] sm:$0xff] }
  0x22   :  { %v1576_v53 = vld [vmem:[%s2166_s1 + $0x3a0] ss:$8 sps:$4 sm:$0xff]  }
  0x23   :  { %948 = vmatpush1.bf16.msra.mxu1 %v1465_v34  ;;  %v1549_v34 = vld [vmem:[%s2166_s1 + $0x160] ss:$8 sps:$4 sm:$0xff]  }
  0x24   :  { %1030 = vmatpush1.bf16.msra.mxu0 %v1466_v35  ;;  %949 = vmatprep.subr.bf16.mxu1 %v1467_v36  ;;  %v1552_v35 = vld [vmem:[%s2166_s1 + $0x360] ss:$8 sps:$4 sm:$0xff]   ;;  %v1242_v36 = vcombine.high %v1950_v32, %v1950_v32 }
  0x25   :  { %1031 = vmatprep.subr.bf16.mxu0 %v1469_v37  ;;  %v1246_v37 = vcombine.high %v1955_v33, %v1955_v33 }
  0x27   :  { %950 = vmatpush1.bf16.msra.mxu1 %v1471_v38  ;;  %v1557_v38 = vld [vmem:[%s2166_s1 + $0x174] ss:$8 sps:$4 sm:$0xff]  }
  0x28   :  { %1032 = vmatpush1.bf16.msra.mxu0 %v1472_v39  ;;  %951 = vmatprep.subr.bf16.mxu1 %v1473_v40  ;;  %v1560_v39 = vld [vmem:[%s2166_s1 + $0x374] ss:$8 sps:$4 sm:$0xff]   ;;  %v1555_v40 = vld [vmem:[%s2166_s1 + $0x170] ss:$8 sps:$4 sm:$0xff]  }
  0x29   :  { %1033 = vmatprep.subr.bf16.mxu0 %v1475_v41  ;;  %v1558_v41 = vld [vmem:[%s2166_s1 + $0x370] ss:$8 sps:$4 sm:$0xff]  }
  0x2b   :  { %952 = vmatpush1.bf16.msra.mxu1 %v1477_v42  ;;  %v1563_v42 = vld [vmem:[%s2166_s1 + $0x184] ss:$8 sps:$4 sm:$0xff]  }
  0x2c   :  { %1034 = vmatpush1.bf16.msra.mxu0 %v1478_v43  ;;  %953 = vmatprep.subr.bf16.mxu1 %v1479_v44  ;;  %v1566_v43 = vld [vmem:[%s2166_s1 + $0x384] ss:$8 sps:$4 sm:$0xff]   ;;  %v1561_v44 = vld [vmem:[%s2166_s1 + $0x180] ss:$8 sps:$4 sm:$0xff]  }
  0x2d   :  { %1035 = vmatprep.subr.bf16.mxu0 %v1481_v45  ;;  %v1564_v45 = vld [vmem:[%s2166_s1 + $0x380] ss:$8 sps:$4 sm:$0xff]  }
  0x2f   :  { %954 = vmatpush1.bf16.msra.mxu1 %v1483_v47  ;;  %v1572_v47 = vld [vmem:[%s2166_s1 + $0x394] ss:$8 sps:$4 sm:$0xff]  }
  0x30   :  { %1036 = vmatpush1.bf16.msra.mxu0 %v1484_v49  ;;  %955 = vmatprep.subr.bf16.mxu1 %v1485_v51  ;;  %v1570_v49 = vld [vmem:[%s2166_s1 + $0x390] ss:$8 sps:$4 sm:$0xff]   ;;  %v1578_v51 = vld [vmem:[%s2166_s1 + $0x3a4] ss:$8 sps:$4 sm:$0xff]  }
  0x31   :  { %1037 = vmatprep.subr.bf16.mxu0 %v1487_v52  ;;  %v1573_v52 = vld [vmem:[%s2166_s1 + $0x1a0] ss:$8 sps:$4 sm:$0xff]  }
  0x33   :  { %956 = vmatpush1.bf16.msra.mxu1 %v1489_v54  ;;  %v1581_v54 = vld [vmem:[%s2166_s1 + $0x1b4] ss:$8 sps:$4 sm:$0xff]  }
  0x34   :  { %1038 = vmatpush1.bf16.msra.mxu0 %v1490_v55  ;;  %957 = vmatprep.subr.bf16.mxu1 %v1491_v56  ;;  %v1584_v55 = vld [vmem:[%s2166_s1 + $0x3b4] ss:$8 sps:$4 sm:$0xff]   ;;  %v1579_v56 = vld [vmem:[%s2166_s1 + $0x1b0] ss:$8 sps:$4 sm:$0xff]  }
  0x35   :  { %1039 = vmatprep.subr.bf16.mxu0 %v1493_v57  ;;  %v1582_v57 = vld [vmem:[%s2166_s1 + $0x3b0] ss:$8 sps:$4 sm:$0xff]  }
  0x37   :  { %958 = vmatpush1.bf16.msra.mxu1 %v1495_v58  ;;  %v1587_v58 = vld [vmem:[%s2166_s1 + $0x1c4] ss:$8 sps:$4 sm:$0xff]  }
  0x38   :  { %1040 = vmatpush1.bf16.msra.mxu0 %v1496_v59  ;;  %959 = vmatprep.subr.bf16.mxu1 %v1497_v60  ;;  %v1590_v59 = vld [vmem:[%s2166_s1 + $0x3c4] ss:$8 sps:$4 sm:$0xff]   ;;  %v1585_v60 = vld [vmem:[%s2166_s1 + $0x1c0] ss:$8 sps:$4 sm:$0xff]  }
  0x39   :  { %1041 = vmatprep.subr.bf16.mxu0 %v1499_v61  ;;  %v1588_v61 = vld [vmem:[%s2166_s1 + $0x3c0] ss:$8 sps:$4 sm:$0xff]  }
  0x3b   :  { %960 = vmatpush1.bf16.msra.mxu1 %v1501_v62  ;;  %v1593_v62 = vld [vmem:[%s2166_s1 + $0x1d4] ss:$8 sps:$4 sm:$0xff]  }
  0x3c   :  { %1042 = vmatpush1.bf16.msra.mxu0 %v1502_v63  ;;  %961 = vmatprep.subr.bf16.mxu1 %v1503_v0  ;;  %v1596_v63 = vld [vmem:[%s2166_s1 + $0x3d4] ss:$8 sps:$4 sm:$0xff]   ;;  %v1591_v0 = vld [vmem:[%s2166_s1 + $0x1d0] ss:$8 sps:$4 sm:$0xff]  }
  0x3d   :  { %1043 = vmatprep.subr.bf16.mxu0 %v1505_v1  ;;  %v1594_v1 = vld [vmem:[%s2166_s1 + $0x3d0] ss:$8 sps:$4 sm:$0xff]  }
  0x3f   :  { %962 = vmatpush1.bf16.msra.mxu1 %v1507_v2  ;;  %v1599_v2 = vld [vmem:[%s2166_s1 + $0x1e4] ss:$8 sps:$4 sm:$0xff]  }
  0x40   :  { %1044 = vmatpush1.bf16.msra.mxu0 %v1508_v3  ;;  %972 = vmatprep.subr.bf16.mxu1 %v1513_v4  ;;  %v1602_v3 = vld [vmem:[%s2166_s1 + $0x3e4] ss:$8 sps:$4 sm:$0xff]   ;;  %v1597_v4 = vld [vmem:[%s2166_s1 + $0x1e0] ss:$8 sps:$4 sm:$0xff]  }
  0x41   :  { %1054 = vmatprep.subr.bf16.mxu0 %v1518_v5  ;;  %v1600_v5 = vld [vmem:[%s2166_s1 + $0x3e0] ss:$8 sps:$4 sm:$0xff]  }
  0x42   :  { %964 = vmatmul.mubr.bf16.vlgmr.msra.gmra.mrb[0].mxu1 %v1239_v6  ;;  %v1605_v6 = vld [vmem:[%s2166_s1 + $0x1f4] ss:$8 sps:$4 sm:$0xff]  }
  0x43   :  { %1046 = vmatmul.mubr.bf16.vlgmr.msra.gmra.mrb[0].mxu0 %v1243_v7  ;;  %973 = vmatpush1.bf16.msra.mxu1 %v1511_v8  ;;  %v1608_v7 = vld [vmem:[%s2166_s1 + $0x3f4] ss:$8 sps:$4 sm:$0xff]   ;;  %v1603_v8 = vld [vmem:[%s2166_s1 + $0x1f0] ss:$8 sps:$4 sm:$0xff]  }
  0x44   :  { %1055 = vmatpush1.bf16.msra.mxu0 %v1516_v9  ;;  %974 = vmatprep.subr.bf16.mxu1 %v1521_v10  ;;  %v1606_v9 = vld [vmem:[%s2166_s1 + $0x3f0] ss:$8 sps:$4 sm:$0xff]   ;;  %v1615_v10 = vld [vmem:[%s2166_s1 + $0x404] ss:$8 sps:$4 sm:$0xff]  }
  0x45   :  { %1056 = vmatprep.subr.bf16.mxu0 %v1524_v11  ;;  %1004 = vmatprep.mubr.bf16.mxu1 %v1242_v36  ;;  %v1241_v11 = vcombine.low %v1950_v32, %v1950_v32  ;;  %v1639_v32 = vmov 0.0  }
  0x46   :  { %1086 = vmatprep.mubr.bf16.mxu0 %v1246_v37 }
  0x47   :  { %975 = vmatpush1.bf16.msra.mxu1 %v1519_v12  ;;  %v1245_v12 = vcombine.low %v1955_v33, %v1955_v33 }
  0x48   :  { %1057 = vmatpush1.bf16.msra.mxu0 %v1522_v13  ;;  %976 = vmatprep.subr.bf16.mxu1 %v1527_v14  ;;  %v1613_v13 = vld [vmem:[%s2166_s1 + $0x400] ss:$8 sps:$4 sm:$0xff]   ;;  %v1618_v14 = vld [vmem:[%s2166_s1 + $0x414] ss:$8 sps:$4 sm:$0xff]  }
  0x49   :  { %1058 = vmatprep.subr.bf16.mxu0 %v1530_v15  ;;  %v1616_v15 = vld [vmem:[%s2166_s1 + $0x410] ss:$8 sps:$4 sm:$0xff]  }
  0x4b   :  { %977 = vmatpush1.bf16.msra.mxu1 %v1525_v16  ;;  %v1638_v16 = vmov 0  }
  0x4c   :  { %1059 = vmatpush1.bf16.msra.mxu0 %v1528_v17  ;;  %978 = vmatprep.subr.bf16.mxu1 %v1533_v18  ;;  %v1621_v17 = vld [vmem:[%s2166_s1 + $0x424] ss:$8 sps:$4 sm:$0xff]   ;;  %v1619_v18 = vld [vmem:[%s2166_s1 + $0x420] ss:$8 sps:$4 sm:$0xff]  }
  0x4d   :  { %1060 = vmatprep.subr.bf16.mxu0 %v1536_v19  ;;  %v1624_v19 = vld [vmem:[%s2166_s1 + $0x434] ss:$8 sps:$4 sm:$0xff]  }
  0x4f   :  { %979 = vmatpush1.bf16.msra.mxu1 %v1531_v20  ;;  %v1622_v20 = vld [vmem:[%s2166_s1 + $0x430] ss:$8 sps:$4 sm:$0xff]  }
  0x50   :  { %1061 = vmatpush1.bf16.msra.mxu0 %v1534_v21  ;;  %980 = vmatprep.subr.bf16.mxu1 %v1539_v22  ;;  %v1627_v21 = vld [vmem:[%s2166_s1 + $0x444] ss:$8 sps:$4 sm:$0xff]   ;;  %v1625_v22 = vld [vmem:[%s2166_s1 + $0x440] ss:$8 sps:$4 sm:$0xff]  }
  0x51   :  { %1062 = vmatprep.subr.bf16.mxu0 %v1542_v23  ;;  %v1630_v23 = vld [vmem:[%s2166_s1 + $0x454] ss:$8 sps:$4 sm:$0xff]  }
  0x53   :  { %981 = vmatpush1.bf16.msra.mxu1 %v1537_v24  ;;  %v1628_v24 = vld [vmem:[%s2166_s1 + $0x450] ss:$8 sps:$4 sm:$0xff]  }
  0x54   :  { %1063 = vmatpush1.bf16.msra.mxu0 %v1540_v25  ;;  %982 = vmatprep.subr.bf16.mxu1 %v1545_v26  ;;  %v1633_v25 = vld [vmem:[%s2166_s1 + $0x464] ss:$8 sps:$4 sm:$0xff]   ;;  %v1631_v26 = vld [vmem:[%s2166_s1 + $0x460] ss:$8 sps:$4 sm:$0xff]  }
  0x55   :  { %1064 = vmatprep.subr.bf16.mxu0 %v1548_v27  ;;  %v1636_v27 = vld [vmem:[%s2166_s1 + $0x474] ss:$8 sps:$4 sm:$0xff]  }
  0x57   :  { %983 = vmatpush1.bf16.msra.mxu1 %v1543_v28  ;;  %v1634_v28 = vld [vmem:[%s2166_s1 + $0x470] ss:$8 sps:$4 sm:$0xff]  }
  0x58   :  { %1065 = vmatpush1.bf16.msra.mxu0 %v1546_v29  ;;  %984 = vmatprep.subr.bf16.mxu1 %v1551_v30  ;;  %v1637_v29 = vld [vmem:[%s2167_s0 + $0x20] ss:$0 sps:$4 sm:$0xff]   ;;  %v169_v30 = vlaneseq }
  0x59   :  { %1066 = vmatprep.subr.bf16.mxu0 %v1554_v31 }
  0x5a   :  { %vm2130_vm0 = vcmp.lt.s32.totalorder %v169_v30, 256  ;;  %v170_v37 = vshrl.u32 %v169_v30, 7 }
  0x5b   :  { %985 = vmatpush1.bf16.msra.mxu1 %v1549_v34  ;;  %1179 = vst.msk [vmem:[%s2168_s4] sm:$0x3] %vm2130_vm0, %v1639_v32  ;;  %1180 = vst.msk [vmem:[%s2169_s5] sm:$0x3] %vm2130_vm0, %v1639_v32 }
  0x5c   :  { %1067 = vmatpush1.bf16.msra.mxu0 %v1552_v35  ;;  %986 = vmatprep.subr.bf16.mxu1 %v1557_v38  ;;  %v171_v38 = vsub.s32 0, %v170_v37 }
  0x5d   :  { %1068 = vmatprep.subr.bf16.mxu0 %v1560_v39  ;;  %v167_v39 = vld [vmem:[%s2170_s2] sm:$0x3] }
  0x5f   :  { %987 = vmatpush1.bf16.msra.mxu1 %v1555_v40  ;;  %v175_v40 = vsub.s32 1, %v170_v37 }
  0x60   :  { %1069 = vmatpush1.bf16.msra.mxu0 %v1558_v41  ;;  %988 = vmatprep.subr.bf16.mxu1 %v1563_v42  ;;  %v172_v41 = vrot.slane %v167_v39, %v171_v38 }
  0x61   :  { %1070 = vmatprep.subr.bf16.mxu0 %v1566_v43  ;;  %v176_v42 = vrot.slane %v167_v39, %v175_v40 }
  0x63   :  { %989 = vmatpush1.bf16.msra.mxu1 %v1561_v44 }
  0x64   :  { %1071 = vmatpush1.bf16.msra.mxu0 %v1564_v45  ;;  %990 = vmatprep.subr.bf16.mxu1 %v1569_v46 }
  0x65   :  { %1072 = vmatprep.subr.bf16.mxu0 %v1572_v47 }
  0x67   :  { %991 = vmatpush1.bf16.msra.mxu1 %v1567_v48 }
  0x68   :  { %1073 = vmatpush1.bf16.msra.mxu0 %v1570_v49  ;;  %992 = vmatprep.subr.bf16.mxu1 %v1575_v50 }
  0x69   :  { %1074 = vmatprep.subr.bf16.mxu0 %v1578_v51 }
  0x6b   :  { %993 = vmatpush1.bf16.msra.mxu1 %v1573_v52 }
  0x6c   :  { %1075 = vmatpush1.bf16.msra.mxu0 %v1576_v53  ;;  %994 = vmatprep.subr.bf16.mxu1 %v1581_v54 }
  0x6d   :  { %1076 = vmatprep.subr.bf16.mxu0 %v1584_v55 }
  0x6f   :  { %995 = vmatpush1.bf16.msra.mxu1 %v1579_v56 }
  0x70   :  { %1077 = vmatpush1.bf16.msra.mxu0 %v1582_v57  ;;  %996 = vmatprep.subr.bf16.mxu1 %v1587_v58  ;;  %v1640_v58 = vmov 1966171168  }
  0x71   :  { %1078 = vmatprep.subr.bf16.mxu0 %v1590_v59  ;;  %v1186_v59 = vunpack.c.l.s4 %v1640_v58 }
  0x73   :  { %997 = vmatpush1.bf16.msra.mxu1 %v1585_v60 }
  0x74   :  { %1079 = vmatpush1.bf16.msra.mxu0 %v1588_v61  ;;  %998 = vmatprep.subr.bf16.mxu1 %v1593_v62 }
  0x75   :  { %1080 = vmatprep.subr.bf16.mxu0 %v1596_v63 }
  0x77   :  { %999 = vmatpush1.bf16.msra.mxu1 %v1591_v0 }
  0x78   :  { %1081 = vmatpush1.bf16.msra.mxu0 %v1594_v1  ;;  %1000 = vmatprep.subr.bf16.mxu1 %v1599_v2 }
  0x79   :  { %1082 = vmatprep.subr.bf16.mxu0 %v1602_v3 }
  0x7b   :  { %1001 = vmatpush1.bf16.msra.mxu1 %v1597_v4  ;;  %v1187_v4 = vunpack.c.0.s8 %v1186_v59 }
  0x7c   :  { %1083 = vmatpush1.bf16.msra.mxu0 %v1600_v5  ;;  %1002 = vmatprep.subr.bf16.mxu1 %v1605_v6 }
  0x7d   :  { %1084 = vmatprep.subr.bf16.mxu0 %v1608_v7 }
  0x7f   :  { %1003 = vmatpush1.bf16.msra.mxu1 %v1603_v8 }
  0x80   :  { %1085 = vmatpush1.bf16.msra.mxu0 %v1606_v9 }
  0x81   :  { %1095 = vmatprep.subr.bf16.mxu0 %v1615_v10 }
  0x82   :  { %1005 = vmatmul.mubr.bf16.vlgmr.msra.gmra.mrb[0].mxu1 %v1241_v11 }
  0x83   :  { %1087 = vmatmul.mubr.bf16.vlgmr.msra.gmra.mrb[0].mxu0 %v1245_v12 }
  0x84   :  { %1096 = vmatpush1.bf16.msra.mxu0 %v1613_v13  ;;  %1127 = vmatprep.mubr.bf16.mxu0 %v1638_v16  ;;  %v1190_v13 = vsub.s32 %v1187_v4, %v170_v37 }
  0x85   :  { %1097 = vmatprep.subr.bf16.mxu0 %v1618_v14 }
  0x88   :  { %1098 = vmatpush1.bf16.msra.mxu0 %v1616_v15 }
  0x89   :  { %1099 = vmatprep.subr.bf16.mxu0 %v1621_v17 }
  0x8c   :  { %1100 = vmatpush1.bf16.msra.mxu0 %v1619_v18 }
  0x8d   :  { %1101 = vmatprep.subr.bf16.mxu0 %v1624_v19 }
  0x90   :  { %1102 = vmatpush1.bf16.msra.mxu0 %v1622_v20 }
  0x91   :  { %1103 = vmatprep.subr.bf16.mxu0 %v1627_v21  ;;  %v1181_v21 = vld [vmem:[%s2168_s4] sm:$0x3] }
  0x94   :  { %1104 = vmatpush1.bf16.msra.mxu0 %v1625_v22 }
  0x95   :  { %1105 = vmatprep.subr.bf16.mxu0 %v1630_v23 }
  0x98   :  { %1106 = vmatpush1.bf16.msra.mxu0 %v1628_v24  ;;  %v1206_v24 = vld [vmem:[%s2169_s5] sm:$0x3] }
  0x99   :  { %1107 = vmatprep.subr.bf16.mxu0 %v1633_v25 }
  0x9c   :  { %1108 = vmatpush1.bf16.msra.mxu0 %v1631_v26 }
  0x9d   :  { %1109 = vmatprep.subr.bf16.mxu0 %v1636_v27 }
  0xa0   :  { %1110 = vmatpush1.bf16.msra.mxu0 %v1634_v28 }
  0xa3   :  { %1128 = vmatmul.mubr.bf16.vlgmr.msra.gmra.mrb[0].mxu0 %v1637_v29 }
 0x155   :  { %v1006_v33 = vpop.f32.mrb[0].mxu1 }
 0x156   :  { %v1008_v34 = vpop.f32.mrb[1].mxu1  ;;  %v1394_v43 = vadd.f32 %v1006_v33, %v172_v41 }
 0x157   :  { %v1010_v35 = vpop.f32.mrb[2].mxu1  ;;  %v1396_v44 = vadd.f32 %v1008_v34, %v176_v42 }
 0x158   :  { %v1011_v36 = vpop.f32.mrb[3].mxu1 }
 0x176   :  { %v1129_v45 = vpop.f32.mrb[0].mxu0 }
 0x177   :  { %v1395_v46 = vadd.f32 %v1394_v43, %v1129_v45  ;;  %v1131_v47 = vpop.f32.mrb[1].mxu0 }
 0x178   :  { %v1397_v48 = vadd.f32 %v1396_v44, %v1131_v47  ;;  %v1133_v49 = vpop.f32.mrb[2].mxu0 }
 0x179   :  { %v1145_v50 = vrot.slane %v1395_v46, 4  ;;  %v1157_v51 = vmul.f32 %v1395_v46, %v1395_v46  ;;  %v1134_v52 = vpop.f32.mrb[3].mxu0 }
 0x17a   :  { %v1393_v53 = vpack.c.bf16 %v1397_v48, %v1395_v46  ;;  %v1151_v54 = vrot.slane %v1397_v48, 4  ;;  %v1158_v55 = vmul.f32 %v1397_v48, %v1397_v48 }
 0x17b   :  { %v1146_v56 = vadd.f32 %v1395_v46, %v1145_v50  ;;  %v1159_v57 = vrot.slane %v1157_v51, 4 }
 0x17c   :  { %1144 = vst [vmem:[%s2171_s3] sm:$0xff] %v1393_v53  ;;  %v1152_v60 = vadd.f32 %v1397_v48, %v1151_v54  ;;  %v1165_v61 = vrot.slane %v1158_v55, 4 }
 0x17d   :  { %v1147_v62 = vrot.slane %v1146_v56, 2  ;;  %v1160_v63 = vadd.f32 %v1159_v57, %v1157_v51 }
 0x17e   :  { %v1153_v0 = vrot.slane %v1152_v60, 2  ;;  %v1166_v1 = vadd.f32 %v1165_v61, %v1158_v55 }
 0x17f   :  { %v1148_v2 = vadd.f32 %v1147_v62, %v1146_v56  ;;  %v1161_v3 = vrot.slane %v1160_v63, 2 }
 0x180   :  { %v1154_v5 = vadd.f32 %v1153_v0, %v1152_v60  ;;  %v1167_v6 = vrot.slane %v1166_v1, 2 }
 0x181   :  { %v1149_v7 = vrot.slane %v1148_v2, 1  ;;  %v1162_v8 = vadd.f32 %v1161_v3, %v1160_v63 }
 0x182   :  { %v1155_v9 = vrot.slane %v1154_v5, 1  ;;  %v1168_v10 = vadd.f32 %v1167_v6, %v1166_v1 }
 0x183   :  { %v1150_v11 = vadd.f32 %v1149_v7, %v1148_v2  ;;  %v1163_v12 = vrot.slane %v1162_v8, 1 }
 0x184   :  { %v1156_v14 = vadd.f32 %v1155_v9, %v1154_v5  ;;  %v1169_v15 = vrot.slane %v1168_v10, 1 }
 0x185   :  { %v1164_v16 = vadd.f32 %v1163_v12, %v1162_v8 }
 0x186   :  { %v1170_v17 = vadd.f32 %v1169_v15, %v1168_v10  ;;  %v1184_v18 = vcombine.low %v1150_v11, %v1156_v14 }
 0x188   :  { %v1191_v19 = vrot.slane %v1184_v18, %v1190_v13  ;;  %v1209_v20 = vcombine.low %v1164_v16, %v1170_v17 }
 0x18a   :  { %v1198_v22 = vrot.slane %v1191_v19, %v1190_v13  ;;  %v1216_v23 = vrot.slane %v1209_v20, %v1190_v13 }
 0x18c   :  { %v1200_v25 = vadd.f32 %v1198_v22, %v1181_v21  ;;  %v1223_v26 = vrot.slane %v1216_v23, %v1190_v13 }
 0x18e   :  { %1205 = vst.msk [vmem:[%s2168_s4] sm:$0x3] %vm2130_vm0, %v1200_v25  ;;  %v1225_v27 = vadd.f32 %v1223_v26, %v1206_v24 }
 0x190   :  { %1226 = vst.msk [vmem:[%s2169_s5] sm:$0x3] %vm2130_vm0, %v1225_v27 }

// kernel: discriminator_forward.35
= control target key start
LH: loop header
LB: loop body
LE: loop exit
PB: predicated region body
PF: predicated region fallthrough
CT: control target
= control target key end

     0   :  { %vm1160_vm0 = vmmov 0   ;;  %s1446_s1 = inlined_call_operand.vmem [shape: bf16[1152,128], index: 1, kind: input, shape index: {}]   ;;  %s1447_s0 = inlined_call_operand.vmem [shape: bf16[8,1152], index: 0, kind: input, shape index: {}]   ;;  %s1448_s4 = inlined_call_operand.vmem [shape: f32[1,128], index: 4, kind: output, shape index: {1}]   ;;  %s1449_s5 = inlined_call_operand.vmem [shape: f32[1,128], index: 5, kind: output, shape index: {2}]   ;;  %s1450_s2 = inlined_call_operand.vmem [shape: f32[1,128], index: 2, kind: input, shape index: {}]   ;;  %s1451_s3 = inlined_call_operand.vmem [shape: bf16[8,128], index: 3, kind: output, shape index: {0}]  }
   0x1   :  { %v1078_v0 = vld [vmem:[%s1446_s1 + $0x40] sm:$0xff]   ;;  %v1082_v4 = vld [vmem:[%s1446_s1 + $0x48] sm:$0xff]   ;;  %v1086_v8 = vld [vmem:[%s1446_s1 + $0x50] sm:$0xff]  }
   0x2   :  { %v1079_v1 = vld [vmem:[%s1446_s1] sm:$0xff]   ;;  %959 = vmatprep.subr.bf16.mxu0 %v1078_v0  ;;  %v1083_v5 = vld [vmem:[%s1446_s1 + $0x8] sm:$0xff]   ;;  %v1087_v9 = vld [vmem:[%s1446_s1 + $0x10] sm:$0xff]  }
   0x3   :  { %v1080_v2 = vld [vmem:[%s1446_s1 + $0xc0] sm:$0xff]   ;;  %960 = vmatpush3.bf16.msra.mxu0 %v1079_v1  ;;  %v1084_v6 = vld [vmem:[%s1446_s1 + $0xc8] sm:$0xff]   ;;  %v1088_v10 = vld [vmem:[%s1446_s1 + $0xd0] sm:$0xff]  }
   0x4   :  { %v1081_v3 = vld [vmem:[%s1446_s1 + $0x80] sm:$0xff]   ;;  %981 = vmatprep.subr.bf16.mxu1 %v1080_v2  ;;  %961 = vmatprep.subr.bf16.mxu0 %v1082_v4  ;;  %v1085_v7 = vld [vmem:[%s1446_s1 + $0x88] sm:$0xff]   ;;  %v1089_v11 = vld [vmem:[%s1446_s1 + $0x90] sm:$0xff]  }
   0x5   :  { %982 = vmatpush3.bf16.msra.mxu1 %v1081_v3  ;;  %v1090_v12 = vld [vmem:[%s1446_s1 + $0x58] sm:$0xff]   ;;  %v1094_v16 = vld [vmem:[%s1446_s1 + $0x60] sm:$0xff]   ;;  %v1098_v20 = vld [vmem:[%s1446_s1 + $0x68] sm:$0xff]  }
   0x6   :  { %983 = vmatprep.subr.bf16.mxu1 %v1084_v6  ;;  %v1091_v13 = vld [vmem:[%s1446_s1 + $0x18] sm:$0xff]   ;;  %v1095_v17 = vld [vmem:[%s1446_s1 + $0x20] sm:$0xff]   ;;  %v1099_v21 = vld [vmem:[%s1446_s1 + $0x28] sm:$0xff]  }
   0x7   :  { %962 = vmatpush3.bf16.msra.mxu0 %v1083_v5  ;;  %v1092_v14 = vld [vmem:[%s1446_s1 + $0xd8] sm:$0xff]   ;;  %v1096_v18 = vld [vmem:[%s1446_s1 + $0xe0] sm:$0xff]   ;;  %v1100_v22 = vld [vmem:[%s1446_s1 + $0xe8] sm:$0xff]  }
   0x8   :  { %963 = vmatprep.subr.bf16.mxu0 %v1086_v8  ;;  %v1093_v15 = vld [vmem:[%s1446_s1 + $0x98] sm:$0xff]   ;;  %v1097_v19 = vld [vmem:[%s1446_s1 + $0xa0] sm:$0xff]   ;;  %v1101_v23 = vld [vmem:[%s1446_s1 + $0xa8] sm:$0xff]  }
   0x9   :  { %984 = vmatpush3.bf16.msra.mxu1 %v1085_v7  ;;  %v1102_v24 = vld [vmem:[%s1446_s1 + $0x70] sm:$0xff]   ;;  %v1106_v28 = vld [vmem:[%s1446_s1 + $0x78] sm:$0xff]   ;;  %v18_v31 = vld [vmem:[%s1447_s0] sm:$0xff] }
   0xa   :  { %985 = vmatprep.subr.bf16.mxu1 %v1088_v10  ;;  %v1103_v25 = vld [vmem:[%s1446_s1 + $0x30] sm:$0xff]   ;;  %v1107_v29 = vld [vmem:[%s1446_s1 + $0x38] sm:$0xff]   ;;  %v878_v32 = vcombine.low %v18_v31, %v18_v31  ;;  %v879_v33 = vcombine.high %v18_v31, %v18_v31  ;;  %v1112_v35 = vld [vmem:[%s1446_s1 + $0x140] sm:$0xff]  }
   0xb   :  { %964 = vmatpush3.bf16.msra.mxu0 %v1087_v9  ;;  %v1104_v26 = vld [vmem:[%s1446_s1 + $0xf0] sm:$0xff]   ;;  %v1108_v30 = vld [vmem:[%s1446_s1 + $0xf8] sm:$0xff]   ;;  %v19_v36 = vld [vmem:[%s1447_s0 + $0x8] sm:$0xff]  ;;  %v1159_v9 = vmov 0.0  }
   0xc   :  { %965 = vmatprep.subr.bf16.mxu0 %v1090_v12  ;;  %v1105_v27 = vld [vmem:[%s1446_s1 + $0xb0] sm:$0xff]   ;;  %v1111_v34 = vld [vmem:[%s1446_s1 + $0xb8] sm:$0xff]   ;;  %670 = vmatprep.mubr.bf16.mxu0 %v879_v33  ;;  %v880_v37 = vcombine.low %v19_v36, %v19_v36  ;;  %v881_v38 = vcombine.high %v19_v36, %v19_v36  ;;  %v1115_v39 = vld [vmem:[%s1446_s1 + $0x100] sm:$0xff]   ;;  %857 = vst [vmem:[%s1448_s4] sm:$0x1] %v1159_v9 }
   0xd   :  { %986 = vmatpush3.bf16.msra.mxu1 %v1089_v11  ;;  %v1116_v40 = vld [vmem:[%s1446_s1 + $0x1c0] sm:$0xff]   ;;  %v1118_v42 = vld [vmem:[%s1446_s1 + $0x148] sm:$0xff]   ;;  %v1122_v46 = vld [vmem:[%s1446_s1 + $0x150] sm:$0xff]   ;;  %858 = vst [vmem:[%s1449_s5] sm:$0x1] %v1159_v9 }
   0xe   :  { %987 = vmatprep.subr.bf16.mxu1 %v1092_v14  ;;  %710 = vmatprep.mubr.bf16.mxu1 %v881_v38  ;;  %v1117_v41 = vld [vmem:[%s1446_s1 + $0x180] sm:$0xff]   ;;  %v1119_v43 = vld [vmem:[%s1446_s1 + $0x108] sm:$0xff]   ;;  %v1123_v47 = vld [vmem:[%s1446_s1 + $0x110] sm:$0xff]  }
   0xf   :  { %966 = vmatpush3.bf16.msra.mxu0 %v1091_v13  ;;  %v1120_v44 = vld [vmem:[%s1446_s1 + $0x1c8] sm:$0xff]   ;;  %v1124_v48 = vld [vmem:[%s1446_s1 + $0x1d0] sm:$0xff]   ;;  %v1126_v50 = vld [vmem:[%s1446_s1 + $0x158] sm:$0xff]  }
  0x10   :  { %967 = vmatprep.subr.bf16.mxu0 %v1094_v16  ;;  %v1121_v45 = vld [vmem:[%s1446_s1 + $0x188] sm:$0xff]   ;;  %v1125_v49 = vld [vmem:[%s1446_s1 + $0x190] sm:$0xff]   ;;  %v1127_v51 = vld [vmem:[%s1446_s1 + $0x118] sm:$0xff]  }
  0x11   :  { %988 = vmatpush3.bf16.msra.mxu1 %v1093_v15  ;;  %v1128_v52 = vld [vmem:[%s1446_s1 + $0x1d8] sm:$0xff]   ;;  %v1130_v54 = vld [vmem:[%s1446_s1 + $0x160] sm:$0xff]   ;;  %v1134_v58 = vld [vmem:[%s1446_s1 + $0x168] sm:$0xff]  }
  0x12   :  { %989 = vmatprep.subr.bf16.mxu1 %v1096_v18  ;;  %v1129_v53 = vld [vmem:[%s1446_s1 + $0x198] sm:$0xff]   ;;  %v1131_v55 = vld [vmem:[%s1446_s1 + $0x120] sm:$0xff]   ;;  %v1135_v59 = vld [vmem:[%s1446_s1 + $0x128] sm:$0xff]  }
  0x13   :  { %968 = vmatpush3.bf16.msra.mxu0 %v1095_v17  ;;  %v1132_v56 = vld [vmem:[%s1446_s1 + $0x1e0] sm:$0xff]   ;;  %v1136_v60 = vld [vmem:[%s1446_s1 + $0x1e8] sm:$0xff]   ;;  %v1138_v62 = vld [vmem:[%s1446_s1 + $0x170] sm:$0xff]  }
  0x14   :  { %969 = vmatprep.subr.bf16.mxu0 %v1098_v20  ;;  %v1133_v57 = vld [vmem:[%s1446_s1 + $0x1a0] sm:$0xff]   ;;  %v1137_v61 = vld [vmem:[%s1446_s1 + $0x1a8] sm:$0xff]   ;;  %v1139_v63 = vld [vmem:[%s1446_s1 + $0x130] sm:$0xff]  }
  0x15   :  { %990 = vmatpush3.bf16.msra.mxu1 %v1097_v19  ;;  %v1140_v0 = vld [vmem:[%s1446_s1 + $0x1f0] sm:$0xff]   ;;  %v1142_v2 = vld [vmem:[%s1446_s1 + $0x178] sm:$0xff]   ;;  %v1150_v13 = vld [vmem:[%s1446_s1 + $0x200] sm:$0xff]  }
  0x16   :  { %991 = vmatprep.subr.bf16.mxu1 %v1100_v22  ;;  %v1141_v1 = vld [vmem:[%s1446_s1 + $0x1b0] sm:$0xff]   ;;  %v1143_v3 = vld [vmem:[%s1446_s1 + $0x138] sm:$0xff]   ;;  %v1151_v14 = vld [vmem:[%s1446_s1 + $0x208] sm:$0xff]  }
  0x17   :  { %970 = vmatpush3.bf16.msra.mxu0 %v1099_v21  ;;  %v1144_v4 = vld [vmem:[%s1446_s1 + $0x1f8] sm:$0xff]   ;;  %v20_v5 = vld [vmem:[%s1447_s0 + $0x10] sm:$0xff]  ;;  %v1154_v17 = vld [vmem:[%s1446_s1 + $0x220] sm:$0xff]  }
  0x18   :  { %971 = vmatprep.subr.bf16.mxu0 %v1102_v24  ;;  %v882_v6 = vcombine.low %v20_v5, %v20_v5  ;;  %v883_v7 = vcombine.high %v20_v5, %v20_v5  ;;  %v1147_v8 = vld [vmem:[%s1446_s1 + $0x1b8] sm:$0xff]   ;;  %v1152_v15 = vld [vmem:[%s1446_s1 + $0x210] sm:$0xff]   ;;  %v1155_v18 = vld [vmem:[%s1446_s1 + $0x228] sm:$0xff]  }
  0x19   :  { %992 = vmatpush3.bf16.msra.mxu1 %v1101_v23  ;;  %v21_v10 = vld [vmem:[%s1447_s0 + $0x18] sm:$0xff]  ;;  %v1156_v19 = vld [vmem:[%s1446_s1 + $0x230] sm:$0xff]   ;;  %v1158_v21 = vld [vmem:[%s1447_s0 + $0x20] ss:$0 sps:$4 sm:$0xff]  }
  0x1a   :  { %993 = vmatprep.subr.bf16.mxu1 %v1104_v26  ;;  %v884_v11 = vcombine.low %v21_v10, %v21_v10  ;;  %v885_v12 = vcombine.high %v21_v10, %v21_v10  ;;  %v1153_v16 = vld [vmem:[%s1446_s1 + $0x218] sm:$0xff]   ;;  %v877_v23 = vld [vmem:[%s1450_s2] ss:$0 sm:$0xff] }
  0x1b   :  { %972 = vmatpush3.bf16.msra.mxu0 %v1103_v25  ;;  %v1157_v20 = vld [vmem:[%s1446_s1 + $0x238] sm:$0xff]  }
  0x1c   :  { %973 = vmatprep.subr.bf16.mxu0 %v1106_v28 }
  0x1d   :  { %994 = vmatpush3.bf16.msra.mxu1 %v1105_v27 }
  0x1e   :  { %995 = vmatprep.subr.bf16.mxu1 %v1108_v30 }
  0x1f   :  { %974 = vmatpush3.bf16.msra.mxu0 %v1107_v29 }
  0x20   :  { %1003 = vmatprep.subr.bf16.mxu0 %v1112_v35 }
  0x21   :  { %996 = vmatpush3.bf16.msra.mxu1 %v1111_v34 }
  0x22   :  { %671 = vmatmul.mubr.bf16.vlgmr.msra.gmra.mrb[0].mxu0 %v878_v32  ;;  %1025 = vmatprep.subr.bf16.mxu1 %v1116_v40 }
  0x23   :  { %1004 = vmatpush3.bf16.msra.mxu0 %v1115_v39  ;;  %750 = vmatprep.mubr.bf16.mxu0 %v883_v7 }
  0x24   :  { %711 = vmatmul.mubr.bf16.vlgmr.msra.gmra.mrb[0].mxu1 %v880_v37  ;;  %1005 = vmatprep.subr.bf16.mxu0 %v1118_v42 }
  0x25   :  { %1026 = vmatpush3.bf16.msra.mxu1 %v1117_v41  ;;  %790 = vmatprep.mubr.bf16.mxu1 %v885_v12 }
  0x26   :  { %1027 = vmatprep.subr.bf16.mxu1 %v1120_v44 }
  0x27   :  { %1006 = vmatpush3.bf16.msra.mxu0 %v1119_v43 }
  0x28   :  { %1007 = vmatprep.subr.bf16.mxu0 %v1122_v46 }
  0x29   :  { %1028 = vmatpush3.bf16.msra.mxu1 %v1121_v45 }
  0x2a   :  { %1029 = vmatprep.subr.bf16.mxu1 %v1124_v48 }
  0x2b   :  { %1008 = vmatpush3.bf16.msra.mxu0 %v1123_v47 }
  0x2c   :  { %1009 = vmatprep.subr.bf16.mxu0 %v1126_v50 }
  0x2d   :  { %1030 = vmatpush3.bf16.msra.mxu1 %v1125_v49 }
  0x2e   :  { %1031 = vmatprep.subr.bf16.mxu1 %v1128_v52 }
  0x2f   :  { %1010 = vmatpush3.bf16.msra.mxu0 %v1127_v51 }
  0x30   :  { %1011 = vmatprep.subr.bf16.mxu0 %v1130_v54 }
  0x31   :  { %1032 = vmatpush3.bf16.msra.mxu1 %v1129_v53 }
  0x32   :  { %1033 = vmatprep.subr.bf16.mxu1 %v1132_v56 }
  0x33   :  { %1012 = vmatpush3.bf16.msra.mxu0 %v1131_v55 }
  0x34   :  { %1013 = vmatprep.subr.bf16.mxu0 %v1134_v58 }
  0x35   :  { %1034 = vmatpush3.bf16.msra.mxu1 %v1133_v57 }
  0x36   :  { %1035 = vmatprep.subr.bf16.mxu1 %v1136_v60 }
  0x37   :  { %1014 = vmatpush3.bf16.msra.mxu0 %v1135_v59 }
  0x38   :  { %1015 = vmatprep.subr.bf16.mxu0 %v1138_v62 }
  0x39   :  { %1036 = vmatpush3.bf16.msra.mxu1 %v1137_v61 }
  0x3a   :  { %1037 = vmatprep.subr.bf16.mxu1 %v1140_v0 }
  0x3b   :  { %1016 = vmatpush3.bf16.msra.mxu0 %v1139_v63  ;;  %v859_v63 = vld [vmem:[%s1448_s4] sm:$0x1] }
  0x3c   :  { %1017 = vmatprep.subr.bf16.mxu0 %v1142_v2  ;;  %v862_v2 = vld [vmem:[%s1449_s5] sm:$0x1] }
  0x3d   :  { %1038 = vmatpush3.bf16.msra.mxu1 %v1141_v1 }
  0x3e   :  { %1039 = vmatprep.subr.bf16.mxu1 %v1144_v4 }
  0x3f   :  { %1018 = vmatpush3.bf16.msra.mxu0 %v1143_v3 }
  0x40   :  { %1056 = vmatprep.subr.bf16.mxu0 %v1159_v9 }
  0x41   :  { %1040 = vmatpush3.bf16.msra.mxu1 %v1147_v8 }
  0x42   :  { %751 = vmatmul.mubr.bf16.vlgmr.msra.gmra.mrb[4].mxu0 %v882_v6 }
  0x43   :  { %1057 = vmatpush3.bf16.msra.mxu0 %v1150_v13  ;;  %1072 = vmatprep.mubr.msk.bf16.mxu0 %vm1160_vm0, %v1159_v9 }
  0x44   :  { %791 = vmatmul.mubr.bf16.vlgmr.msra.gmra.mrb[4].mxu1 %v884_v11  ;;  %1058 = vmatprep.subr.bf16.mxu0 %v1159_v9 }
  0x47   :  { %1059 = vmatpush3.bf16.msra.mxu0 %v1151_v14 }
  0x48   :  { %1060 = vmatprep.subr.bf16.mxu0 %v1159_v9 }
  0x4b   :  { %1061 = vmatpush3.bf16.msra.mxu0 %v1152_v15 }
  0x4c   :  { %1062 = vmatprep.subr.bf16.mxu0 %v1159_v9 }
  0x4f   :  { %1063 = vmatpush3.bf16.msra.mxu0 %v1153_v16 }
  0x50   :  { %1064 = vmatprep.subr.bf16.mxu0 %v1159_v9 }
  0x53   :  { %1065 = vmatpush3.bf16.msra.mxu0 %v1154_v17 }
  0x54   :  { %1066 = vmatprep.subr.bf16.mxu0 %v1159_v9 }
  0x57   :  { %1067 = vmatpush3.bf16.msra.mxu0 %v1155_v18 }
  0x58   :  { %1068 = vmatprep.subr.bf16.mxu0 %v1159_v9 }
  0x5b   :  { %1069 = vmatpush3.bf16.msra.mxu0 %v1156_v19 }
  0x5c   :  { %1070 = vmatprep.subr.bf16.mxu0 %v1159_v9 }
  0x5f   :  { %1071 = vmatpush3.bf16.msra.mxu0 %v1157_v20 }
  0x62   :  { %1073 = vmatmul.mubr.bf16.vlgmr.msra.gmra.mrb[8].mxu0 %v1158_v21 }
  0xf5   :  { %v975_v22 = vpop.f32.mrb[0].mxu0 }
  0xf6   :  { %v976_v24 = vpop.f32.mrb[1].mxu0 }
  0xf7   :  { %v977_v25 = vadd.f32 %v976_v24, %v975_v22  ;;  %v978_v26 = vpop.f32.mrb[2].mxu0  ;;  %v997_v27 = vpop.f32.mrb[0].mxu1 }
  0xf8   :  { %v979_v28 = vpop.f32.mrb[3].mxu0  ;;  %v998_v29 = vpop.f32.mrb[1].mxu1 }
  0xf9   :  { %v673_v30 = vadd.f32 %v977_v25, %v877_v23  ;;  %v999_v31 = vadd.f32 %v998_v29, %v997_v27  ;;  %v1000_v32 = vpop.f32.mrb[2].mxu1 }
  0xfa   :  { %v1001_v33 = vpop.f32.mrb[3].mxu1 }
  0xfb   :  { %v713_v34 = vadd.f32 %v999_v31, %v673_v30 }
 0x115   :  { %v1019_v35 = vpop.f32.mrb[4].mxu0 }
 0x116   :  { %v1020_v36 = vpop.f32.mrb[5].mxu0 }
 0x117   :  { %v1021_v37 = vadd.f32 %v1020_v36, %v1019_v35  ;;  %v1022_v38 = vpop.f32.mrb[6].mxu0  ;;  %v1041_v39 = vpop.f32.mrb[4].mxu1 }
 0x118   :  { %v1023_v40 = vpop.f32.mrb[7].mxu0  ;;  %v1042_v41 = vpop.f32.mrb[5].mxu1 }
 0x119   :  { %v753_v42 = vadd.f32 %v1021_v37, %v713_v34  ;;  %v1043_v43 = vadd.f32 %v1042_v41, %v1041_v39  ;;  %v1044_v44 = vpop.f32.mrb[6].mxu1 }
 0x11a   :  { %v1045_v45 = vpop.f32.mrb[7].mxu1 }
 0x11b   :  { %v793_v46 = vadd.f32 %v1043_v43, %v753_v42 }
 0x135   :  { %v832_v47 = vpop.f32.mrb[8].mxu0 }
 0x136   :  { %v833_v48 = vadd.f32 %v832_v47, %v793_v46  ;;  %v1074_v49 = vpop.f32.mrb[9].mxu0 }
 0x137   :  { %v835_v50 = vpop.f32.mrb[10].mxu0 }
 0x138   :  { %v838_v51 = vpack.c.bf16 %v833_v48, %v833_v48  ;;  %v840_v52 = vrot.slane %v833_v48, 4  ;;  %v846_v53 = vmul.f32 %v833_v48, %v833_v48  ;;  %v1075_v54 = vpop.f32.mrb[11].mxu0 }
 0x13a   :  { %839 = vst [vmem:[%s1451_s3] sm:$0xf] %v838_v51  ;;  %v841_v55 = vadd.f32 %v840_v52, %v833_v48  ;;  %v847_v56 = vrot.slane %v846_v53, 4 }
 0x13c   :  { %v842_v57 = vrot.slane %v841_v55, 2  ;;  %v848_v58 = vadd.f32 %v847_v56, %v846_v53 }
 0x13e   :  { %v843_v59 = vadd.f32 %v842_v57, %v841_v55  ;;  %v849_v60 = vrot.slane %v848_v58, 2 }
 0x140   :  { %v844_v61 = vrot.slane %v843_v59, 1  ;;  %v850_v62 = vadd.f32 %v849_v60, %v848_v58 }
 0x142   :  { %v845_v0 = vadd.f32 %v844_v61, %v843_v59  ;;  %v851_v1 = vrot.slane %v850_v62, 1 }
 0x144   :  { %v852_v3 = vadd.f32 %v851_v1, %v850_v62  ;;  %v860_v4 = vadd.f32 %v859_v63, %v845_v0 }
 0x146   :  { %861 = vst [vmem:[%s1448_s4] sm:$0x1] %v860_v4  ;;  %v863_v5 = vadd.f32 %v862_v2, %v852_v3 }
 0x148   :  { %864 = vst [vmem:[%s1449_s5] sm:$0x1] %v863_v5 }

// kernel: discriminator_forward.37
= control target key start
LH: loop header
LB: loop body
LE: loop exit
PB: predicated region body
PF: predicated region fallthrough
CT: control target
= control target key end

     0   :  { %vm1442_vm0 = vcmask 7168   ;;  %s2351_s1 = inlined_call_operand.vmem [shape: bf16[2048,1], index: 1, kind: input, shape index: {}]   ;;  %s2352_s0 = inlined_call_operand.vmem [shape: bf16[8,2048], index: 0, kind: input, shape index: {}]   ;;  %s2353_s2 = inlined_call_operand.<no memory space> [shape: f32[1,1], index: 2, kind: input, shape index: {}]   ;;  %s2354_s3 = inlined_call_operand.vmem [shape: f32[8,1], index: 3, kind: output, shape index: {}]  }
   0x1   :  { %v1769_v0 = vld [vmem:[%s2351_s1 + $0x40] sm:$0xff]   ;;  %v1773_v4 = vld [vmem:[%s2351_s1 + $0x48] sm:$0xff]   ;;  %v1777_v8 = vld [vmem:[%s2351_s1 + $0x50] sm:$0xff]  }
   0x2   :  { %v1770_v1 = vld [vmem:[%s2351_s1 + $0xc0] sm:$0xff]   ;;  %1593 = vmatprep.subr.bf16.mxu0 %v1769_v0  ;;  %v1774_v5 = vld [vmem:[%s2351_s1 + $0xc8] sm:$0xff]   ;;  %v1778_v9 = vld [vmem:[%s2351_s1 + $0xd0] sm:$0xff]  }
   0x3   :  { %v1771_v2 = vld [vmem:[%s2351_s1] sm:$0xff]   ;;  %1615 = vmatprep.subr.bf16.mxu1 %v1770_v1  ;;  %v1775_v6 = vld [vmem:[%s2351_s1 + $0x8] sm:$0xff]   ;;  %v1779_v10 = vld [vmem:[%s2351_s1 + $0x10] sm:$0xff]  }
   0x4   :  { %v1772_v3 = vld [vmem:[%s2351_s1 + $0x80] sm:$0xff]   ;;  %1594 = vmatpush3.bf16.msra.mxu0 %v1771_v2  ;;  %v1776_v7 = vld [vmem:[%s2351_s1 + $0x88] sm:$0xff]   ;;  %v1780_v11 = vld [vmem:[%s2351_s1 + $0x90] sm:$0xff]  }
   0x5   :  { %1616 = vmatpush3.bf16.msra.mxu1 %v1772_v3  ;;  %1595 = vmatprep.subr.bf16.mxu0 %v1773_v4  ;;  %v1781_v12 = vld [vmem:[%s2351_s1 + $0x58] sm:$0xff]   ;;  %v1785_v16 = vld [vmem:[%s2351_s1 + $0x60] sm:$0xff]   ;;  %v1789_v20 = vld [vmem:[%s2351_s1 + $0x68] sm:$0xff]  }
   0x6   :  { %1617 = vmatprep.subr.bf16.mxu1 %v1774_v5  ;;  %v1782_v13 = vld [vmem:[%s2351_s1 + $0xd8] sm:$0xff]   ;;  %v1786_v17 = vld [vmem:[%s2351_s1 + $0xe0] sm:$0xff]   ;;  %v1790_v21 = vld [vmem:[%s2351_s1 + $0xe8] sm:$0xff]  }
   0x7   :  { %v1783_v14 = vld [vmem:[%s2351_s1 + $0x18] sm:$0xff]   ;;  %v1787_v18 = vld [vmem:[%s2351_s1 + $0x20] sm:$0xff]   ;;  %v1791_v22 = vld [vmem:[%s2351_s1 + $0x28] sm:$0xff]  }
   0x8   :  { %1596 = vmatpush3.bf16.msra.mxu0 %v1775_v6  ;;  %v1784_v15 = vld [vmem:[%s2351_s1 + $0x98] sm:$0xff]   ;;  %v1788_v19 = vld [vmem:[%s2351_s1 + $0xa0] sm:$0xff]   ;;  %v1792_v23 = vld [vmem:[%s2351_s1 + $0xa8] sm:$0xff]  }
   0x9   :  { %1618 = vmatpush3.bf16.msra.mxu1 %v1776_v7  ;;  %1597 = vmatprep.subr.bf16.mxu0 %v1777_v8  ;;  %v1793_v24 = vld [vmem:[%s2351_s1 + $0x70] sm:$0xff]   ;;  %v1797_v28 = vld [vmem:[%s2351_s1 + $0x78] sm:$0xff]   ;;  %v17_v32 = vld [vmem:[%s2352_s0] sm:$0xff] }
   0xa   :  { %1619 = vmatprep.subr.bf16.mxu1 %v1778_v9  ;;  %v1794_v25 = vld [vmem:[%s2351_s1 + $0xf0] sm:$0xff]   ;;  %v1798_v29 = vld [vmem:[%s2351_s1 + $0xf8] sm:$0xff]   ;;  %v18_v33 = vld [vmem:[%s2352_s0 + $0x8] sm:$0xff]  ;;  %v1449_v34 = vcombine.low %v17_v32, %v17_v32  ;;  %v1450_v35 = vcombine.high %v17_v32, %v17_v32 }
   0xb   :  { %v1795_v26 = vld [vmem:[%s2351_s1 + $0x30] sm:$0xff]   ;;  %v1799_v30 = vld [vmem:[%s2351_s1 + $0x38] sm:$0xff]   ;;  %v1451_v36 = vcombine.low %v18_v33, %v18_v33  ;;  %v1452_v37 = vcombine.high %v18_v33, %v18_v33  ;;  %v1805_v38 = vld [vmem:[%s2351_s1 + $0x140] sm:$0xff]  }
   0xc   :  { %1598 = vmatpush3.bf16.msra.mxu0 %v1779_v10  ;;  %v1796_v27 = vld [vmem:[%s2351_s1 + $0xb0] sm:$0xff]   ;;  %v1800_v31 = vld [vmem:[%s2351_s1 + $0xb8] sm:$0xff]   ;;  %v1806_v39 = vld [vmem:[%s2351_s1 + $0x1c0] sm:$0xff]   ;;  %1144 = vmatprep.mubr.bf16.mxu0 %v1450_v35 }
   0xd   :  { %1620 = vmatpush3.bf16.msra.mxu1 %v1780_v11  ;;  %1599 = vmatprep.subr.bf16.mxu0 %v1781_v12  ;;  %v1807_v40 = vld [vmem:[%s2351_s1 + $0x100] sm:$0xff]   ;;  %v1809_v42 = vld [vmem:[%s2351_s1 + $0x148] sm:$0xff]   ;;  %v1813_v46 = vld [vmem:[%s2351_s1 + $0x150] sm:$0xff]  }
   0xe   :  { %1621 = vmatprep.subr.bf16.mxu1 %v1782_v13  ;;  %1184 = vmatprep.mubr.bf16.mxu1 %v1452_v37  ;;  %v1808_v41 = vld [vmem:[%s2351_s1 + $0x180] sm:$0xff]   ;;  %v1810_v43 = vld [vmem:[%s2351_s1 + $0x1c8] sm:$0xff]   ;;  %v1814_v47 = vld [vmem:[%s2351_s1 + $0x1d0] sm:$0xff]  }
   0xf   :  { %v1811_v44 = vld [vmem:[%s2351_s1 + $0x108] sm:$0xff]   ;;  %v1815_v48 = vld [vmem:[%s2351_s1 + $0x110] sm:$0xff]   ;;  %v1817_v50 = vld [vmem:[%s2351_s1 + $0x158] sm:$0xff]  }
  0x10   :  { %1600 = vmatpush3.bf16.msra.mxu0 %v1783_v14  ;;  %v1812_v45 = vld [vmem:[%s2351_s1 + $0x188] sm:$0xff]   ;;  %v1816_v49 = vld [vmem:[%s2351_s1 + $0x190] sm:$0xff]   ;;  %v1818_v51 = vld [vmem:[%s2351_s1 + $0x1d8] sm:$0xff]  }
  0x11   :  { %1622 = vmatpush3.bf16.msra.mxu1 %v1784_v15  ;;  %1601 = vmatprep.subr.bf16.mxu0 %v1785_v16  ;;  %v1819_v52 = vld [vmem:[%s2351_s1 + $0x118] sm:$0xff]   ;;  %v1821_v54 = vld [vmem:[%s2351_s1 + $0x160] sm:$0xff]   ;;  %v1825_v58 = vld [vmem:[%s2351_s1 + $0x168] sm:$0xff]  }
  0x12   :  { %1623 = vmatprep.subr.bf16.mxu1 %v1786_v17  ;;  %v1820_v53 = vld [vmem:[%s2351_s1 + $0x198] sm:$0xff]   ;;  %v1822_v55 = vld [vmem:[%s2351_s1 + $0x1e0] sm:$0xff]   ;;  %v1826_v59 = vld [vmem:[%s2351_s1 + $0x1e8] sm:$0xff]  }
  0x13   :  { %v1823_v56 = vld [vmem:[%s2351_s1 + $0x120] sm:$0xff]   ;;  %v1827_v60 = vld [vmem:[%s2351_s1 + $0x128] sm:$0xff]   ;;  %v1829_v62 = vld [vmem:[%s2351_s1 + $0x170] sm:$0xff]  }
  0x14   :  { %1602 = vmatpush3.bf16.msra.mxu0 %v1787_v18  ;;  %v1824_v57 = vld [vmem:[%s2351_s1 + $0x1a0] sm:$0xff]   ;;  %v1828_v61 = vld [vmem:[%s2351_s1 + $0x1a8] sm:$0xff]   ;;  %v1830_v63 = vld [vmem:[%s2351_s1 + $0x1f0] sm:$0xff]  }
  0x15   :  { %1624 = vmatpush3.bf16.msra.mxu1 %v1788_v19  ;;  %1603 = vmatprep.subr.bf16.mxu0 %v1789_v20  ;;  %v1831_v0 = vld [vmem:[%s2351_s1 + $0x130] sm:$0xff]   ;;  %v1833_v2 = vld [vmem:[%s2351_s1 + $0x178] sm:$0xff]   ;;  %v1841_v12 = vld [vmem:[%s2351_s1 + $0x240] sm:$0xff]  }
  0x16   :  { %1625 = vmatprep.subr.bf16.mxu1 %v1790_v21  ;;  %v1832_v1 = vld [vmem:[%s2351_s1 + $0x1b0] sm:$0xff]   ;;  %v1834_v3 = vld [vmem:[%s2351_s1 + $0x1f8] sm:$0xff]   ;;  %v1842_v13 = vld [vmem:[%s2351_s1 + $0x2c0] sm:$0xff]  }
  0x17   :  { %v1835_v4 = vld [vmem:[%s2351_s1 + $0x138] sm:$0xff]   ;;  %v19_v6 = vld [vmem:[%s2352_s0 + $0x10] sm:$0xff]  ;;  %v1843_v14 = vld [vmem:[%s2351_s1 + $0x200] sm:$0xff]  }
  0x18   :  { %1604 = vmatpush3.bf16.msra.mxu0 %v1791_v22  ;;  %v1836_v5 = vld [vmem:[%s2351_s1 + $0x1b8] sm:$0xff]   ;;  %v1453_v7 = vcombine.low %v19_v6, %v19_v6  ;;  %v1454_v8 = vcombine.high %v19_v6, %v19_v6  ;;  %v1844_v15 = vld [vmem:[%s2351_s1 + $0x280] sm:$0xff]   ;;  %v1845_v16 = vld [vmem:[%s2351_s1 + $0x248] sm:$0xff]   ;;  %v8_v6 = vstv %s2353_s2 }
  0x19   :  { %1626 = vmatpush3.bf16.msra.mxu1 %v1792_v23  ;;  %1605 = vmatprep.subr.bf16.mxu0 %v1793_v24  ;;  %v20_v9 = vld [vmem:[%s2352_s0 + $0x18] sm:$0xff]  ;;  %v1846_v17 = vld [vmem:[%s2351_s1 + $0x2c8] sm:$0xff]   ;;  %v1849_v20 = vld [vmem:[%s2351_s1 + $0x250] sm:$0xff]   ;;  %9 = vst [vmem:[#allocation2] sm:$0x1] %v8_v6 }
  0x1a   :  { %1627 = vmatprep.subr.bf16.mxu1 %v1794_v25  ;;  %v1455_v10 = vcombine.low %v20_v9, %v20_v9  ;;  %v1456_v11 = vcombine.high %v20_v9, %v20_v9  ;;  %v1847_v18 = vld [vmem:[%s2351_s1 + $0x208] sm:$0xff]   ;;  %v1850_v21 = vld [vmem:[%s2351_s1 + $0x2d0] sm:$0xff]   ;;  %v1853_v24 = vld [vmem:[%s2351_s1 + $0x258] sm:$0xff]  }
  0x1b   :  { %v1848_v19 = vld [vmem:[%s2351_s1 + $0x288] sm:$0xff]   ;;  %v1851_v22 = vld [vmem:[%s2351_s1 + $0x210] sm:$0xff]   ;;  %v1854_v25 = vld [vmem:[%s2351_s1 + $0x2d8] sm:$0xff]  }
  0x1c   :  { %1606 = vmatpush3.bf16.msra.mxu0 %v1795_v26  ;;  %v1852_v23 = vld [vmem:[%s2351_s1 + $0x290] sm:$0xff]   ;;  %v1855_v26 = vld [vmem:[%s2351_s1 + $0x218] sm:$0xff]   ;;  %v1861_v32 = vld [vmem:[%s2351_s1 + $0x268] sm:$0xff]  }
  0x1d   :  { %1628 = vmatpush3.bf16.msra.mxu1 %v1796_v27  ;;  %1607 = vmatprep.subr.bf16.mxu0 %v1797_v28  ;;  %v1856_v27 = vld [vmem:[%s2351_s1 + $0x298] sm:$0xff]   ;;  %v1857_v28 = vld [vmem:[%s2351_s1 + $0x260] sm:$0xff]   ;;  %v1862_v33 = vld [vmem:[%s2351_s1 + $0x2e8] sm:$0xff]  }
  0x1e   :  { %1629 = vmatprep.subr.bf16.mxu1 %v1798_v29  ;;  %v1858_v29 = vld [vmem:[%s2351_s1 + $0x2e0] sm:$0xff]   ;;  %v1864_v35 = vld [vmem:[%s2351_s1 + $0x2a8] sm:$0xff]   ;;  %v1866_v37 = vld [vmem:[%s2351_s1 + $0x2f0] sm:$0xff]  }
  0x1f   :  { %v1899_v9 = vld [vmem:[%s2351_s1 + $0x328] sm:$0xff]  }
  0x20   :  { %1608 = vmatpush3.bf16.msra.mxu0 %v1799_v30  ;;  %v1859_v30 = vld [vmem:[%s2351_s1 + $0x220] sm:$0xff]  }
  0x21   :  { %1630 = vmatpush3.bf16.msra.mxu1 %v1800_v31  ;;  %1637 = vmatprep.subr.bf16.mxu0 %v1805_v38  ;;  %v1860_v31 = vld [vmem:[%s2351_s1 + $0x2a0] sm:$0xff]   ;;  %v1867_v38 = vld [vmem:[%s2351_s1 + $0x230] sm:$0xff]  }
  0x22   :  { %1659 = vmatprep.subr.bf16.mxu1 %v1806_v39  ;;  %v1868_v39 = vld [vmem:[%s2351_s1 + $0x2b0] sm:$0xff]  }
  0x23   :  { %1145 = vmatmul.mubr.bf16.vlgmr.msra.gmra.mrb[0].mxu0 %v1449_v34  ;;  %v1863_v34 = vld [vmem:[%s2351_s1 + $0x228] sm:$0xff]  }
  0x24   :  { %1185 = vmatmul.mubr.bf16.vlgmr.msra.gmra.mrb[0].mxu1 %v1451_v36  ;;  %1638 = vmatpush3.bf16.msra.mxu0 %v1807_v40  ;;  %v1865_v36 = vld [vmem:[%s2351_s1 + $0x270] sm:$0xff]   ;;  %v1869_v40 = vld [vmem:[%s2351_s1 + $0x278] sm:$0xff]  }
  0x25   :  { %1660 = vmatpush3.bf16.msra.mxu1 %v1808_v41  ;;  %1639 = vmatprep.subr.bf16.mxu0 %v1809_v42  ;;  %v1870_v41 = vld [vmem:[%s2351_s1 + $0x2f8] sm:$0xff]  }
  0x26   :  { %1661 = vmatprep.subr.bf16.mxu1 %v1810_v43  ;;  %1224 = vmatprep.mubr.bf16.mxu0 %v1454_v8  ;;  %v1871_v42 = vld [vmem:[%s2351_s1 + $0x238] sm:$0xff]   ;;  %v1898_v8 = vld [vmem:[%s2351_s1 + $0x3e8] sm:$0xff]  }
  0x27   :  { %1264 = vmatprep.mubr.bf16.mxu1 %v1456_v11  ;;  %v1872_v43 = vld [vmem:[%s2351_s1 + $0x2b8] sm:$0xff]   ;;  %v1901_v11 = vld [vmem:[%s2351_s1 + $0x370] sm:$0xff]  }
  0x28   :  { %1640 = vmatpush3.bf16.msra.mxu0 %v1811_v44  ;;  %v21_v44 = vld [vmem:[%s2352_s0 + $0x20] sm:$0xff] }
  0x29   :  { %1662 = vmatpush3.bf16.msra.mxu1 %v1812_v45  ;;  %1641 = vmatprep.subr.bf16.mxu0 %v1813_v46  ;;  %v22_v45 = vld [vmem:[%s2352_s0 + $0x28] sm:$0xff]  ;;  %v1457_v46 = vcombine.low %v21_v44, %v21_v44 }
  0x2a   :  { %1663 = vmatprep.subr.bf16.mxu1 %v1814_v47  ;;  %v1458_v47 = vcombine.high %v21_v44, %v21_v44 }
  0x2c   :  { %1642 = vmatpush3.bf16.msra.mxu0 %v1815_v48  ;;  %v1459_v48 = vcombine.low %v22_v45, %v22_v45 }
  0x2d   :  { %1664 = vmatpush3.bf16.msra.mxu1 %v1816_v49  ;;  %1643 = vmatprep.subr.bf16.mxu0 %v1817_v50  ;;  %v1460_v49 = vcombine.high %v22_v45, %v22_v45  ;;  %v1877_v50 = vld [vmem:[%s2351_s1 + $0x340] sm:$0xff]  }
  0x2e   :  { %1665 = vmatprep.subr.bf16.mxu1 %v1818_v51  ;;  %v1878_v51 = vld [vmem:[%s2351_s1 + $0x3c0] sm:$0xff]  }
  0x30   :  { %1644 = vmatpush3.bf16.msra.mxu0 %v1819_v52  ;;  %v1879_v52 = vld [vmem:[%s2351_s1 + $0x300] sm:$0xff]  }
  0x31   :  { %1666 = vmatpush3.bf16.msra.mxu1 %v1820_v53  ;;  %1645 = vmatprep.subr.bf16.mxu0 %v1821_v54  ;;  %v1880_v53 = vld [vmem:[%s2351_s1 + $0x380] sm:$0xff]   ;;  %v1881_v54 = vld [vmem:[%s2351_s1 + $0x348] sm:$0xff]  }
  0x32   :  { %1667 = vmatprep.subr.bf16.mxu1 %v1822_v55  ;;  %v1882_v55 = vld [vmem:[%s2351_s1 + $0x3c8] sm:$0xff]  }
  0x34   :  { %1646 = vmatpush3.bf16.msra.mxu0 %v1823_v56  ;;  %v1883_v56 = vld [vmem:[%s2351_s1 + $0x308] sm:$0xff]  }
  0x35   :  { %1668 = vmatpush3.bf16.msra.mxu1 %v1824_v57  ;;  %1647 = vmatprep.subr.bf16.mxu0 %v1825_v58  ;;  %v1884_v57 = vld [vmem:[%s2351_s1 + $0x388] sm:$0xff]   ;;  %v1885_v58 = vld [vmem:[%s2351_s1 + $0x350] sm:$0xff]  }
  0x36   :  { %1669 = vmatprep.subr.bf16.mxu1 %v1826_v59  ;;  %v1886_v59 = vld [vmem:[%s2351_s1 + $0x3d0] sm:$0xff]  }
  0x38   :  { %1648 = vmatpush3.bf16.msra.mxu0 %v1827_v60  ;;  %v1887_v60 = vld [vmem:[%s2351_s1 + $0x310] sm:$0xff]  }
  0x39   :  { %1670 = vmatpush3.bf16.msra.mxu1 %v1828_v61  ;;  %1649 = vmatprep.subr.bf16.mxu0 %v1829_v62  ;;  %v1888_v61 = vld [vmem:[%s2351_s1 + $0x390] sm:$0xff]   ;;  %v1889_v62 = vld [vmem:[%s2351_s1 + $0x358] sm:$0xff]  }
  0x3a   :  { %1671 = vmatprep.subr.bf16.mxu1 %v1830_v63  ;;  %v1890_v63 = vld [vmem:[%s2351_s1 + $0x3d8] sm:$0xff]  }
  0x3c   :  { %1650 = vmatpush3.bf16.msra.mxu0 %v1831_v0  ;;  %v1891_v0 = vld [vmem:[%s2351_s1 + $0x318] sm:$0xff]  }
  0x3d   :  { %1672 = vmatpush3.bf16.msra.mxu1 %v1832_v1  ;;  %1651 = vmatprep.subr.bf16.mxu0 %v1833_v2  ;;  %v1892_v1 = vld [vmem:[%s2351_s1 + $0x398] sm:$0xff]   ;;  %v1893_v2 = vld [vmem:[%s2351_s1 + $0x360] sm:$0xff]  }
  0x3e   :  { %1673 = vmatprep.subr.bf16.mxu1 %v1834_v3  ;;  %v1894_v3 = vld [vmem:[%s2351_s1 + $0x3e0] sm:$0xff]  }
  0x40   :  { %1652 = vmatpush3.bf16.msra.mxu0 %v1835_v4  ;;  %v1895_v4 = vld [vmem:[%s2351_s1 + $0x320] sm:$0xff]  }
  0x41   :  { %1674 = vmatpush3.bf16.msra.mxu1 %v1836_v5  ;;  %1681 = vmatprep.subr.bf16.mxu0 %v1841_v12  ;;  %v1896_v5 = vld [vmem:[%s2351_s1 + $0x3a0] sm:$0xff]   ;;  %v1902_v12 = vld [vmem:[%s2351_s1 + $0x3f0] sm:$0xff]  }
  0x42   :  { %1703 = vmatprep.subr.bf16.mxu1 %v1842_v13  ;;  %v1903_v13 = vld [vmem:[%s2351_s1 + $0x330] sm:$0xff]  }
  0x43   :  { %1225 = vmatmul.mubr.bf16.vlgmr.msra.gmra.mrb[4].mxu0 %v1453_v7  ;;  %v1897_v7 = vld [vmem:[%s2351_s1 + $0x368] sm:$0xff]  }
  0x44   :  { %1265 = vmatmul.mubr.bf16.vlgmr.msra.gmra.mrb[4].mxu1 %v1455_v10  ;;  %1682 = vmatpush3.bf16.msra.mxu0 %v1843_v14  ;;  %v1900_v10 = vld [vmem:[%s2351_s1 + $0x3a8] sm:$0xff]   ;;  %v1904_v14 = vld [vmem:[%s2351_s1 + $0x3b0] sm:$0xff]  }
  0x45   :  { %1704 = vmatpush3.bf16.msra.mxu1 %v1844_v15  ;;  %1683 = vmatprep.subr.bf16.mxu0 %v1845_v16  ;;  %v1905_v15 = vld [vmem:[%s2351_s1 + $0x378] sm:$0xff]  }
  0x46   :  { %1705 = vmatprep.subr.bf16.mxu1 %v1846_v17  ;;  %1304 = vmatprep.mubr.bf16.mxu0 %v1458_v47  ;;  %v1906_v16 = vld [vmem:[%s2351_s1 + $0x3f8] sm:$0xff]  }
  0x47   :  { %1344 = vmatprep.mubr.bf16.mxu1 %v1460_v49  ;;  %v1907_v17 = vld [vmem:[%s2351_s1 + $0x338] sm:$0xff]  }
  0x48   :  { %1684 = vmatpush3.bf16.msra.mxu0 %v1847_v18  ;;  %v1908_v18 = vld [vmem:[%s2351_s1 + $0x3b8] sm:$0xff]  }
  0x49   :  { %1706 = vmatpush3.bf16.msra.mxu1 %v1848_v19  ;;  %1685 = vmatprep.subr.bf16.mxu0 %v1849_v20  ;;  %v23_v19 = vld [vmem:[%s2352_s0 + $0x30] sm:$0xff]  ;;  %v24_v20 = vld [vmem:[%s2352_s0 + $0x38] sm:$0xff] }
  0x4a   :  { %1707 = vmatprep.subr.bf16.mxu1 %v1850_v21  ;;  %v1461_v21 = vcombine.low %v23_v19, %v23_v19 }
  0x4c   :  { %1686 = vmatpush3.bf16.msra.mxu0 %v1851_v22  ;;  %v1462_v22 = vcombine.high %v23_v19, %v23_v19 }
  0x4d   :  { %1708 = vmatpush3.bf16.msra.mxu1 %v1852_v23  ;;  %1687 = vmatprep.subr.bf16.mxu0 %v1853_v24  ;;  %v1463_v23 = vcombine.low %v24_v20, %v24_v20  ;;  %v1464_v24 = vcombine.high %v24_v20, %v24_v20 }
  0x4e   :  { %1709 = vmatprep.subr.bf16.mxu1 %v1854_v25 }
  0x50   :  { %1688 = vmatpush3.bf16.msra.mxu0 %v1855_v26 }
  0x51   :  { %1710 = vmatpush3.bf16.msra.mxu1 %v1856_v27  ;;  %1689 = vmatprep.subr.bf16.mxu0 %v1857_v28  ;;  %v1448_v27 = vld [vmem:[#allocation2] ss:$0 sm:$0xff] }
  0x52   :  { %1711 = vmatprep.subr.bf16.mxu1 %v1858_v29 }
  0x54   :  { %1690 = vmatpush3.bf16.msra.mxu0 %v1859_v30 }
  0x55   :  { %1712 = vmatpush3.bf16.msra.mxu1 %v1860_v31  ;;  %1691 = vmatprep.subr.bf16.mxu0 %v1861_v32 }
  0x56   :  { %1713 = vmatprep.subr.bf16.mxu1 %v1862_v33 }
  0x58   :  { %1692 = vmatpush3.bf16.msra.mxu0 %v1863_v34 }
  0x59   :  { %1714 = vmatpush3.bf16.msra.mxu1 %v1864_v35  ;;  %1693 = vmatprep.subr.bf16.mxu0 %v1865_v36 }
  0x5a   :  { %1715 = vmatprep.subr.bf16.mxu1 %v1866_v37 }
  0x5c   :  { %1694 = vmatpush3.bf16.msra.mxu0 %v1867_v38 }
  0x5d   :  { %1716 = vmatpush3.bf16.msra.mxu1 %v1868_v39  ;;  %1695 = vmatprep.subr.bf16.mxu0 %v1869_v40 }
  0x5e   :  { %1717 = vmatprep.subr.bf16.mxu1 %v1870_v41 }
  0x60   :  { %1696 = vmatpush3.bf16.msra.mxu0 %v1871_v42 }
  0x61   :  { %1718 = vmatpush3.bf16.msra.mxu1 %v1872_v43  ;;  %1725 = vmatprep.subr.bf16.mxu0 %v1877_v50 }
  0x62   :  { %1747 = vmatprep.subr.bf16.mxu1 %v1878_v51 }
  0x63   :  { %1305 = vmatmul.mubr.bf16.vlgmr.msra.gmra.mrb[8].mxu0 %v1457_v46 }
  0x64   :  { %1345 = vmatmul.mubr.bf16.vlgmr.msra.gmra.mrb[8].mxu1 %v1459_v48  ;;  %1726 = vmatpush3.bf16.msra.mxu0 %v1879_v52 }
  0x65   :  { %1748 = vmatpush3.bf16.msra.mxu1 %v1880_v53  ;;  %1727 = vmatprep.subr.bf16.mxu0 %v1881_v54 }
  0x66   :  { %1749 = vmatprep.subr.bf16.mxu1 %v1882_v55  ;;  %1384 = vmatprep.mubr.bf16.mxu0 %v1462_v22 }
  0x67   :  { %1424 = vmatprep.mubr.bf16.mxu1 %v1464_v24 }
  0x68   :  { %1728 = vmatpush3.bf16.msra.mxu0 %v1883_v56 }
  0x69   :  { %1750 = vmatpush3.bf16.msra.mxu1 %v1884_v57  ;;  %1729 = vmatprep.subr.bf16.mxu0 %v1885_v58 }
  0x6a   :  { %1751 = vmatprep.subr.bf16.mxu1 %v1886_v59 }
  0x6c   :  { %1730 = vmatpush3.bf16.msra.mxu0 %v1887_v60 }
  0x6d   :  { %1752 = vmatpush3.bf16.msra.mxu1 %v1888_v61  ;;  %1731 = vmatprep.subr.bf16.mxu0 %v1889_v62 }
  0x6e   :  { %1753 = vmatprep.subr.bf16.mxu1 %v1890_v63 }
  0x70   :  { %1732 = vmatpush3.bf16.msra.mxu0 %v1891_v0 }
  0x71   :  { %1754 = vmatpush3.bf16.msra.mxu1 %v1892_v1  ;;  %1733 = vmatprep.subr.bf16.mxu0 %v1893_v2 }
  0x72   :  { %1755 = vmatprep.subr.bf16.mxu1 %v1894_v3 }
  0x74   :  { %1734 = vmatpush3.bf16.msra.mxu0 %v1895_v4 }
  0x75   :  { %1756 = vmatpush3.bf16.msra.mxu1 %v1896_v5  ;;  %1735 = vmatprep.subr.bf16.mxu0 %v1897_v7 }
  0x76   :  { %1757 = vmatprep.subr.bf16.mxu1 %v1898_v8 }
  0x78   :  { %1736 = vmatpush3.bf16.msra.mxu0 %v1899_v9 }
  0x79   :  { %1758 = vmatpush3.bf16.msra.mxu1 %v1900_v10  ;;  %1737 = vmatprep.subr.bf16.mxu0 %v1901_v11 }
  0x7a   :  { %1759 = vmatprep.subr.bf16.mxu1 %v1902_v12 }
  0x7c   :  { %1738 = vmatpush3.bf16.msra.mxu0 %v1903_v13 }
  0x7d   :  { %1760 = vmatpush3.bf16.msra.mxu1 %v1904_v14  ;;  %1739 = vmatprep.subr.bf16.mxu0 %v1905_v15 }
  0x7e   :  { %1761 = vmatprep.subr.bf16.mxu1 %v1906_v16 }
  0x80   :  { %1740 = vmatpush3.bf16.msra.mxu0 %v1907_v17 }
  0x81   :  { %1762 = vmatpush3.bf16.msra.mxu1 %v1908_v18 }
  0x83   :  { %1385 = vmatmul.mubr.bf16.vlgmr.msra.gmra.mrb[12].mxu0 %v1461_v21 }
  0x84   :  { %1425 = vmatmul.mubr.bf16.vlgmr.msra.gmra.mrb[12].mxu1 %v1463_v23 }
  0xf6   :  { %v1609_v25 = vpop.f32.mrb[0].mxu0 }
  0xf7   :  { %v1631_v26 = vpop.f32.mrb[0].mxu1  ;;  %v1610_v28 = vpop.f32.mrb[1].mxu0 }
  0xf8   :  { %v1632_v29 = vpop.f32.mrb[1].mxu1  ;;  %v1611_v30 = vadd.f32 %v1610_v28, %v1609_v25  ;;  %v1612_v32 = vpop.f32.mrb[2].mxu0 }
  0xf9   :  { %v1633_v31 = vadd.f32 %v1632_v29, %v1631_v26  ;;  %v1634_v33 = vpop.f32.mrb[2].mxu1  ;;  %v1613_v34 = vpop.f32.mrb[3].mxu0 }
  0xfa   :  { %v1635_v35 = vpop.f32.mrb[3].mxu1  ;;  %v1147_v36 = vadd.f32 %v1611_v30, %v1448_v27 }
  0xfc   :  { %v1187_v37 = vadd.f32 %v1633_v31, %v1147_v36 }
 0x116   :  { %v1653_v38 = vpop.f32.mrb[4].mxu0 }
 0x117   :  { %v1675_v39 = vpop.f32.mrb[4].mxu1  ;;  %v1654_v40 = vpop.f32.mrb[5].mxu0 }
 0x118   :  { %v1676_v41 = vpop.f32.mrb[5].mxu1  ;;  %v1655_v42 = vadd.f32 %v1654_v40, %v1653_v38  ;;  %v1656_v44 = vpop.f32.mrb[6].mxu0 }
 0x119   :  { %v1677_v43 = vadd.f32 %v1676_v41, %v1675_v39  ;;  %v1678_v45 = vpop.f32.mrb[6].mxu1  ;;  %v1657_v46 = vpop.f32.mrb[7].mxu0 }
 0x11a   :  { %v1679_v47 = vpop.f32.mrb[7].mxu1  ;;  %v1227_v48 = vadd.f32 %v1655_v42, %v1187_v37 }
 0x11c   :  { %v1267_v49 = vadd.f32 %v1677_v43, %v1227_v48 }
 0x136   :  { %v1697_v50 = vpop.f32.mrb[8].mxu0 }
 0x137   :  { %v1719_v51 = vpop.f32.mrb[8].mxu1  ;;  %v1698_v52 = vpop.f32.mrb[9].mxu0 }
 0x138   :  { %v1699_v53 = vadd.f32 %v1698_v52, %v1697_v50  ;;  %v1720_v54 = vpop.f32.mrb[9].mxu1  ;;  %v1700_v55 = vpop.f32.mrb[10].mxu0 }
 0x139   :  { %v1721_v56 = vadd.f32 %v1720_v54, %v1719_v51  ;;  %v1722_v57 = vpop.f32.mrb[10].mxu1  ;;  %v1701_v58 = vpop.f32.mrb[11].mxu0 }
 0x13a   :  { %v1307_v59 = vadd.f32 %v1699_v53, %v1267_v49  ;;  %v1723_v60 = vpop.f32.mrb[11].mxu1 }
 0x13c   :  { %v1347_v61 = vadd.f32 %v1721_v56, %v1307_v59 }
 0x156   :  { %v1741_v62 = vpop.f32.mrb[12].mxu0 }
 0x157   :  { %v1763_v63 = vpop.f32.mrb[12].mxu1  ;;  %v1742_v0 = vpop.f32.mrb[13].mxu0 }
 0x158   :  { %v1743_v1 = vadd.f32 %v1742_v0, %v1741_v62  ;;  %v1764_v2 = vpop.f32.mrb[13].mxu1  ;;  %v1744_v3 = vpop.f32.mrb[14].mxu0 }
 0x159   :  { %v1765_v4 = vadd.f32 %v1764_v2, %v1763_v63  ;;  %v1766_v5 = vpop.f32.mrb[14].mxu1  ;;  %v1745_v6 = vpop.f32.mrb[15].mxu0 }
 0x15a   :  { %v1387_v7 = vadd.f32 %v1743_v1, %v1347_v61  ;;  %v1767_v8 = vpop.f32.mrb[15].mxu1 }
 0x15c   :  { %v1427_v9 = vadd.f32 %v1765_v4, %v1387_v7 }
 0x15e   :  { %v1432_v10 = vand.u32 2147483647, %v1427_v9  ;;  %vm1436_vm1 = vcmp.ge.f32.partialorder %v1427_v9, 0.0 }
 0x160   :  { %v1433_v11 = vsub.f32 0.0, %v1432_v10 }
 0x162   :  { %v1434_v12 = vmul.f32 1.442695, %v1433_v11 }
 0x164   :  { %1913 = vpow2.f32 %v1434_v12 }
 0x16e   :  { %v1914_v13 = vpop.eup %1913 }
 0x16f   :  { %v1437_v14 = vadd.f32 1.0, %v1914_v13 }
 0x171   :  { %1915 = vrcp.f32 %v1437_v14 }
 0x17b   :  { %v1916_v15 = vpop.eup %1915 }
 0x17c   :  { %v1440_v16 = vmul.f32 %v1916_v15, %v1914_v13 }
 0x17e   :  { %v1441_v17 = vsel %vm1436_vm1, %v1916_v15, %v1440_v16 }
 0x17f   :  { %1443 = vst.msk [vmem:[%s2354_s3] sm:$0xff] %vm1442_vm0, %v1441_v17 }

</bundles_post_ra>
